<compile_context>
chip_gen: v6e
topology: v6e:2x2x1
jax: 0.10.0
libtpu: 0.0.40
codegen_flags: <defaults>
</compile_context>

<pallas_src>
import jax
import jax.numpy as jnp
from jax.experimental import pallas as pl
from jax.experimental.pallas import tpu as pltpu

G_OUTPUT_DIM = 350
BN_EPS = 1e-5
LANE = 128


def _round_up(x, m):
    return (x + m - 1) // m * m


# Padded (lane-aligned) feature dims.
D_IN_P = _round_up(G_OUTPUT_DIM, LANE)        # 384
D_H_P = _round_up(G_OUTPUT_DIM * 2, LANE)     # 768
D_H3_P = _round_up(G_OUTPUT_DIM * 4, LANE)    # 1408
D_OUT_P = _round_up(G_OUTPUT_DIM, LANE)       # 384


def _bn_tanh(h, gamma, beta):
    """PyTorch BatchNorm1d (training mode: batch mean, biased batch var) + tanh."""
    mean = jnp.mean(h, axis=0, keepdims=True)
    var = jnp.maximum(jnp.mean(h * h, axis=0, keepdims=True) - mean * mean, 0.0)
    scale = jax.lax.rsqrt(var + BN_EPS) * gamma
    return jnp.tanh((h - mean) * scale + beta)


def ngram_generator_kernel(x_ref,
                           w_in_ref, b_in_ref,
                           w1_ref, g1_ref, be1_ref,
                           w2_ref, g2_ref, be2_ref,
                           w3_ref, g3_ref, be3_ref,
                           w_out_ref, b_out_ref,
                           out_ref):
    x = x_ref[...]                      # (B, D_IN_P) f32, binary features
    orig_nonzero = x != 0.0             # orig = x.detach().clone()

    # input layer + tanh  (bias kept: no BN after this layer)
    h = jnp.tanh(
        jnp.dot(x.astype(jnp.bfloat16), w_in_ref[...],
                preferred_element_type=jnp.float32) + b_in_ref[...])

    # fc1 -> batch_norm1 -> tanh   (fc bias omitted: cancels under BN mean sub)
    h = jnp.dot(h.astype(jnp.bfloat16), w1_ref[...],
                preferred_element_type=jnp.float32)
    h = _bn_tanh(h, g1_ref[...], be1_ref[...])

    # fc2 -> batch_norm2 -> tanh
    h = jnp.dot(h.astype(jnp.bfloat16), w2_ref[...],
                preferred_element_type=jnp.float32)
    h = _bn_tanh(h, g2_ref[...], be2_ref[...])

    # fc3 -> batch_norm3 -> tanh
    h = jnp.dot(h.astype(jnp.bfloat16), w3_ref[...],
                preferred_element_type=jnp.float32)
    h = _bn_tanh(h, g3_ref[...], be3_ref[...])

    # output layer; sigmoid(h) > 0.5  <=>  h > 0, so skip the sigmoid.
    h = jnp.dot(h.astype(jnp.bfloat16), w_out_ref[...],
                preferred_element_type=jnp.float32) + b_out_ref[...]
    out_ref[...] = jnp.logical_or(orig_nonzero, h > 0.0).astype(out_ref.dtype)


def _pad2(a, rows, cols):
    return jnp.pad(a, ((0, rows - a.shape[0]), (0, cols - a.shape[1])))


def init_params(key, g_output_dim=G_OUTPUT_DIM):
    """Synthetic parameters matching the module's layer shapes.

    Linear weights stored (in_features, out_features), zero-padded to
    lane-aligned dims and cast to bfloat16. fc1/fc2/fc3 biases are not
    materialized (they cancel exactly under training-mode BatchNorm)."""
    d_in = g_output_dim           # 350
    d_h = g_output_dim * 2        # 700
    d_h3 = d_h * 2                # 1400
    d_out = 350

    layer_dims = [(d_in, d_h, D_IN_P, D_H_P),      # self.input
                  (d_h, d_h, D_H_P, D_H_P),        # fc1
                  (d_h, d_h, D_H_P, D_H_P),        # fc2
                  (d_h, d_h3, D_H_P, D_H3_P),      # fc3
                  (d_h3, d_out, D_H3_P, D_OUT_P)]  # output

    keys = jax.random.split(key, 2 * len(layer_dims))
    weights, biases = [], []
    for i, (din, dout, din_p, dout_p) in enumerate(layer_dims):
        w = 0.02 * jax.random.normal(keys[2 * i], (din, dout), dtype=jnp.float32)
        b = 0.01 * jax.random.normal(keys[2 * i + 1], (1, dout), dtype=jnp.float32)
        weights.append(_pad2(w, din_p, dout_p).astype(jnp.bfloat16))
        biases.append(_pad2(b, 1, dout_p))         # biases stay f32 (tiny)

    # BatchNorm affine params at PyTorch init: gamma=1, beta=0 (f32).
    bn_dims = [D_H_P, D_H_P, D_H3_P]
    gammas = [jnp.ones((1, d), jnp.float32) for d in bn_dims]
    betas = [jnp.zeros((1, d), jnp.float32) for d in bn_dims]

    return (weights[0], biases[0],
            weights[1], gammas[0], betas[0],
            weights[2], gammas[1], betas[1],
            weights[3], gammas[2], betas[2],
            weights[4], biases[4])


@jax.jit
def ngram_generator_forward(x, params):
    batch = x.shape[0]
    x_pad = jnp.pad(x, ((0, 0), (0, D_IN_P - x.shape[1])))
    out_pad = pl.pallas_call(
        ngram_generator_kernel,
        out_shape=jax.ShapeDtypeStruct((batch, D_OUT_P), jnp.float32),
        compiler_params=pltpu.CompilerParams(vmem_limit_bytes=32 << 20),
    )(x_pad, *params)
    return out_pad[:, :G_OUTPUT_DIM]


if __name__ == "__main__":
    key = jax.random.PRNGKey(0)
    k_x, k_p = jax.random.split(key)

    # batch >= 2 required: training-mode BatchNorm (PyTorch rejects batch=1).
    batch = 8
    # Binary opcode-ngram feature vector (what the GAN operates on).
    x = jax.random.bernoulli(
        k_x, p=0.3, shape=(batch, G_OUTPUT_DIM)).astype(jnp.float32)

    params = init_params(k_p)

    out = ngram_generator_forward(x, params)
    out = jax.block_until_ready(out)

    assert out.shape == (batch, G_OUTPUT_DIM)
    assert out.dtype == jnp.float32
    # Output must be binary and must keep every 1 from the original input
    # (logical_or semantics), independent of weight precision.
    assert bool(jnp.all((out == 0.0) | (out == 1.0)))
    assert bool(jnp.all(out >= x))
    print("KERNEL_OK")
</pallas_src>

<mosaic_0001>
module attributes {stable_mosaic.version = 11 : i64} {
  func.func @ngram_generator_kernel(%arg0: memref<8x384xf32, #tpu.memory_space<vmem>>, %arg1: memref<384x768xbf16, #tpu.memory_space<vmem>>, %arg2: memref<1x768xf32, #tpu.memory_space<vmem>>, %arg3: memref<768x768xbf16, #tpu.memory_space<vmem>>, %arg4: memref<1x768xf32, #tpu.memory_space<vmem>>, %arg5: memref<1x768xf32, #tpu.memory_space<vmem>>, %arg6: memref<768x768xbf16, #tpu.memory_space<vmem>>, %arg7: memref<1x768xf32, #tpu.memory_space<vmem>>, %arg8: memref<1x768xf32, #tpu.memory_space<vmem>>, %arg9: memref<768x1408xbf16, #tpu.memory_space<vmem>>, %arg10: memref<1x1408xf32, #tpu.memory_space<vmem>>, %arg11: memref<1x1408xf32, #tpu.memory_space<vmem>>, %arg12: memref<1408x384xbf16, #tpu.memory_space<vmem>>, %arg13: memref<1x384xf32, #tpu.memory_space<vmem>>, %arg14: memref<8x384xf32, #tpu.memory_space<vmem>>) attributes {dimension_semantics = [], scalar_prefetch = 0 : i64, scratch_operands = 0 : i64, tpu.core_type = #tpu.core_type<tc>} {
    %c0 = arith.constant 0 : index
    %c0_0 = arith.constant 0 : index
    %0 = vector.load %arg0[%c0, %c0_0] : memref<8x384xf32, #tpu.memory_space<vmem>>, vector<8x384xf32>
    %cst = arith.constant 0.000000e+00 : f32
    %1 = vector.broadcast %cst : f32 to vector<8x384xf32>
    %2 = arith.cmpf one, %0, %1 : vector<8x384xf32>
    %3 = arith.truncf %0 : vector<8x384xf32> to vector<8x384xbf16>
    %c0_1 = arith.constant 0 : index
    %c0_2 = arith.constant 0 : index
    %4 = vector.load %arg1[%c0_1, %c0_2] : memref<384x768xbf16, #tpu.memory_space<vmem>>, vector<384x768xbf16>
    %cst_3 = arith.constant dense<0.000000e+00> : vector<8x768xf32>
    %5 = tpu.matmul %3, %4, %cst_3 {dimension_numbers = #tpu.dot_dimension_numbers<[1], [0], [0], [1], [0, 0, 1, 1], [], []>} : vector<8x384xbf16>, vector<384x768xbf16>, vector<8x768xf32> -> vector<8x768xf32>
    %c0_4 = arith.constant 0 : index
    %c0_5 = arith.constant 0 : index
    %6 = vector.load %arg2[%c0_4, %c0_5] : memref<1x768xf32, #tpu.memory_space<vmem>>, vector<1x768xf32>
    %7 = vector.broadcast %6 : vector<1x768xf32> to vector<8x768xf32>
    %8 = arith.addf %5, %7 : vector<8x768xf32>
    %9 = math.tanh %8 : vector<8x768xf32>
    %10 = arith.truncf %9 : vector<8x768xf32> to vector<8x768xbf16>
    %c0_6 = arith.constant 0 : index
    %c0_7 = arith.constant 0 : index
    %11 = vector.load %arg3[%c0_6, %c0_7] : memref<768x768xbf16, #tpu.memory_space<vmem>>, vector<768x768xbf16>
    %cst_8 = arith.constant dense<0.000000e+00> : vector<8x768xf32>
    %12 = tpu.matmul %10, %11, %cst_8 {dimension_numbers = #tpu.dot_dimension_numbers<[1], [0], [0], [1], [0, 0, 1, 1], [], []>} : vector<8x768xbf16>, vector<768x768xbf16>, vector<8x768xf32> -> vector<8x768xf32>
    %c0_9 = arith.constant 0 : index
    %c0_10 = arith.constant 0 : index
    %13 = vector.load %arg4[%c0_9, %c0_10] : memref<1x768xf32, #tpu.memory_space<vmem>>, vector<1x768xf32>
    %c0_11 = arith.constant 0 : index
    %c0_12 = arith.constant 0 : index
    %14 = vector.load %arg5[%c0_11, %c0_12] : memref<1x768xf32, #tpu.memory_space<vmem>>, vector<1x768xf32>
    %cst_13 = arith.constant dense<0.000000e+00> : vector<768xf32>
    %15 = vector.multi_reduction <add>, %12, %cst_13 [0] : vector<8x768xf32> to vector<768xf32>
    %16 = vector.shape_cast %15 : vector<768xf32> to vector<1x768xf32>
    %cst_14 = arith.constant 8.000000e+00 : f32
    %17 = vector.broadcast %cst_14 : f32 to vector<1x768xf32>
    %18 = arith.divf %16, %17 : vector<1x768xf32>
    %19 = arith.mulf %12, %12 : vector<8x768xf32>
    %cst_15 = arith.constant dense<0.000000e+00> : vector<768xf32>
    %20 = vector.multi_reduction <add>, %19, %cst_15 [0] : vector<8x768xf32> to vector<768xf32>
    %21 = vector.shape_cast %20 : vector<768xf32> to vector<1x768xf32>
    %cst_16 = arith.constant 8.000000e+00 : f32
    %22 = vector.broadcast %cst_16 : f32 to vector<1x768xf32>
    %23 = arith.divf %21, %22 : vector<1x768xf32>
    %24 = arith.mulf %18, %18 : vector<1x768xf32>
    %25 = arith.subf %23, %24 : vector<1x768xf32>
    %cst_17 = arith.constant 0.000000e+00 : f32
    %26 = vector.broadcast %cst_17 : f32 to vector<1x768xf32>
    %27 = arith.maximumf %25, %26 : vector<1x768xf32>
    %cst_18 = arith.constant 9.99999974E-6 : f32
    %28 = vector.broadcast %cst_18 : f32 to vector<1x768xf32>
    %29 = arith.addf %27, %28 : vector<1x768xf32>
    %30 = math.rsqrt %29 : vector<1x768xf32>
    %31 = arith.mulf %30, %13 : vector<1x768xf32>
    %32 = vector.broadcast %18 : vector<1x768xf32> to vector<8x768xf32>
    %33 = arith.subf %12, %32 : vector<8x768xf32>
    %34 = vector.broadcast %31 : vector<1x768xf32> to vector<8x768xf32>
    %35 = arith.mulf %33, %34 : vector<8x768xf32>
    %36 = vector.broadcast %14 : vector<1x768xf32> to vector<8x768xf32>
    %37 = arith.addf %35, %36 : vector<8x768xf32>
    %38 = math.tanh %37 : vector<8x768xf32>
    %39 = arith.truncf %38 : vector<8x768xf32> to vector<8x768xbf16>
    %c0_19 = arith.constant 0 : index
    %c0_20 = arith.constant 0 : index
    %40 = vector.load %arg6[%c0_19, %c0_20] : memref<768x768xbf16, #tpu.memory_space<vmem>>, vector<768x768xbf16>
    %cst_21 = arith.constant dense<0.000000e+00> : vector<8x768xf32>
    %41 = tpu.matmul %39, %40, %cst_21 {dimension_numbers = #tpu.dot_dimension_numbers<[1], [0], [0], [1], [0, 0, 1, 1], [], []>} : vector<8x768xbf16>, vector<768x768xbf16>, vector<8x768xf32> -> vector<8x768xf32>
    %c0_22 = arith.constant 0 : index
    %c0_23 = arith.constant 0 : index
    %42 = vector.load %arg7[%c0_22, %c0_23] : memref<1x768xf32, #tpu.memory_space<vmem>>, vector<1x768xf32>
    %c0_24 = arith.constant 0 : index
    %c0_25 = arith.constant 0 : index
    %43 = vector.load %arg8[%c0_24, %c0_25] : memref<1x768xf32, #tpu.memory_space<vmem>>, vector<1x768xf32>
    %cst_26 = arith.constant dense<0.000000e+00> : vector<768xf32>
    %44 = vector.multi_reduction <add>, %41, %cst_26 [0] : vector<8x768xf32> to vector<768xf32>
    %45 = vector.shape_cast %44 : vector<768xf32> to vector<1x768xf32>
    %cst_27 = arith.constant 8.000000e+00 : f32
    %46 = vector.broadcast %cst_27 : f32 to vector<1x768xf32>
    %47 = arith.divf %45, %46 : vector<1x768xf32>
    %48 = arith.mulf %41, %41 : vector<8x768xf32>
    %cst_28 = arith.constant dense<0.000000e+00> : vector<768xf32>
    %49 = vector.multi_reduction <add>, %48, %cst_28 [0] : vector<8x768xf32> to vector<768xf32>
    %50 = vector.shape_cast %49 : vector<768xf32> to vector<1x768xf32>
    %cst_29 = arith.constant 8.000000e+00 : f32
    %51 = vector.broadcast %cst_29 : f32 to vector<1x768xf32>
    %52 = arith.divf %50, %51 : vector<1x768xf32>
    %53 = arith.mulf %47, %47 : vector<1x768xf32>
    %54 = arith.subf %52, %53 : vector<1x768xf32>
    %cst_30 = arith.constant 0.000000e+00 : f32
    %55 = vector.broadcast %cst_30 : f32 to vector<1x768xf32>
    %56 = arith.maximumf %54, %55 : vector<1x768xf32>
    %cst_31 = arith.constant 9.99999974E-6 : f32
    %57 = vector.broadcast %cst_31 : f32 to vector<1x768xf32>
    %58 = arith.addf %56, %57 : vector<1x768xf32>
    %59 = math.rsqrt %58 : vector<1x768xf32>
    %60 = arith.mulf %59, %42 : vector<1x768xf32>
    %61 = vector.broadcast %47 : vector<1x768xf32> to vector<8x768xf32>
    %62 = arith.subf %41, %61 : vector<8x768xf32>
    %63 = vector.broadcast %60 : vector<1x768xf32> to vector<8x768xf32>
    %64 = arith.mulf %62, %63 : vector<8x768xf32>
    %65 = vector.broadcast %43 : vector<1x768xf32> to vector<8x768xf32>
    %66 = arith.addf %64, %65 : vector<8x768xf32>
    %67 = math.tanh %66 : vector<8x768xf32>
    %68 = arith.truncf %67 : vector<8x768xf32> to vector<8x768xbf16>
    %c0_32 = arith.constant 0 : index
    %c0_33 = arith.constant 0 : index
    %69 = vector.load %arg9[%c0_32, %c0_33] : memref<768x1408xbf16, #tpu.memory_space<vmem>>, vector<768x1408xbf16>
    %cst_34 = arith.constant dense<0.000000e+00> : vector<8x1408xf32>
    %70 = tpu.matmul %68, %69, %cst_34 {dimension_numbers = #tpu.dot_dimension_numbers<[1], [0], [0], [1], [0, 0, 1, 1], [], []>} : vector<8x768xbf16>, vector<768x1408xbf16>, vector<8x1408xf32> -> vector<8x1408xf32>
    %c0_35 = arith.constant 0 : index
    %c0_36 = arith.constant 0 : index
    %71 = vector.load %arg10[%c0_35, %c0_36] : memref<1x1408xf32, #tpu.memory_space<vmem>>, vector<1x1408xf32>
    %c0_37 = arith.constant 0 : index
    %c0_38 = arith.constant 0 : index
    %72 = vector.load %arg11[%c0_37, %c0_38] : memref<1x1408xf32, #tpu.memory_space<vmem>>, vector<1x1408xf32>
    %cst_39 = arith.constant dense<0.000000e+00> : vector<1408xf32>
    %73 = vector.multi_reduction <add>, %70, %cst_39 [0] : vector<8x1408xf32> to vector<1408xf32>
    %74 = vector.shape_cast %73 : vector<1408xf32> to vector<1x1408xf32>
    %cst_40 = arith.constant 8.000000e+00 : f32
    %75 = vector.broadcast %cst_40 : f32 to vector<1x1408xf32>
    %76 = arith.divf %74, %75 : vector<1x1408xf32>
    %77 = arith.mulf %70, %70 : vector<8x1408xf32>
    %cst_41 = arith.constant dense<0.000000e+00> : vector<1408xf32>
    %78 = vector.multi_reduction <add>, %77, %cst_41 [0] : vector<8x1408xf32> to vector<1408xf32>
    %79 = vector.shape_cast %78 : vector<1408xf32> to vector<1x1408xf32>
    %cst_42 = arith.constant 8.000000e+00 : f32
    %80 = vector.broadcast %cst_42 : f32 to vector<1x1408xf32>
    %81 = arith.divf %79, %80 : vector<1x1408xf32>
    %82 = arith.mulf %76, %76 : vector<1x1408xf32>
    %83 = arith.subf %81, %82 : vector<1x1408xf32>
    %cst_43 = arith.constant 0.000000e+00 : f32
    %84 = vector.broadcast %cst_43 : f32 to vector<1x1408xf32>
    %85 = arith.maximumf %83, %84 : vector<1x1408xf32>
    %cst_44 = arith.constant 9.99999974E-6 : f32
    %86 = vector.broadcast %cst_44 : f32 to vector<1x1408xf32>
    %87 = arith.addf %85, %86 : vector<1x1408xf32>
    %88 = math.rsqrt %87 : vector<1x1408xf32>
    %89 = arith.mulf %88, %71 : vector<1x1408xf32>
    %90 = vector.broadcast %76 : vector<1x1408xf32> to vector<8x1408xf32>
    %91 = arith.subf %70, %90 : vector<8x1408xf32>
    %92 = vector.broadcast %89 : vector<1x1408xf32> to vector<8x1408xf32>
    %93 = arith.mulf %91, %92 : vector<8x1408xf32>
    %94 = vector.broadcast %72 : vector<1x1408xf32> to vector<8x1408xf32>
    %95 = arith.addf %93, %94 : vector<8x1408xf32>
    %96 = math.tanh %95 : vector<8x1408xf32>
    %97 = arith.truncf %96 : vector<8x1408xf32> to vector<8x1408xbf16>
    %c0_45 = arith.constant 0 : index
    %c0_46 = arith.constant 0 : index
    %98 = vector.load %arg12[%c0_45, %c0_46] : memref<1408x384xbf16, #tpu.memory_space<vmem>>, vector<1408x384xbf16>
    %cst_47 = arith.constant dense<0.000000e+00> : vector<8x384xf32>
    %99 = tpu.matmul %97, %98, %cst_47 {dimension_numbers = #tpu.dot_dimension_numbers<[1], [0], [0], [1], [0, 0, 1, 1], [], []>} : vector<8x1408xbf16>, vector<1408x384xbf16>, vector<8x384xf32> -> vector<8x384xf32>
    %c0_48 = arith.constant 0 : index
    %c0_49 = arith.constant 0 : index
    %100 = vector.load %arg13[%c0_48, %c0_49] : memref<1x384xf32, #tpu.memory_space<vmem>>, vector<1x384xf32>
    %101 = vector.broadcast %100 : vector<1x384xf32> to vector<8x384xf32>
    %102 = arith.addf %99, %101 : vector<8x384xf32>
    %cst_50 = arith.constant 0.000000e+00 : f32
    %103 = vector.broadcast %cst_50 : f32 to vector<8x384xf32>
    %104 = arith.cmpf ogt, %102, %103 : vector<8x384xf32>
    %105 = arith.ori %2, %104 : vector<8x384xi1>
    %106 = arith.extui %105 : vector<8x384xi1> to vector<8x384xi32>
    %107 = arith.sitofp %106 : vector<8x384xi32> to vector<8x384xf32>
    %c0_51 = arith.constant 0 : index
    %c0_52 = arith.constant 0 : index
    %108 = vector.load %arg14[%c0_51, %c0_52] : memref<8x384xf32, #tpu.memory_space<vmem>>, vector<8x384xf32>
    tpu.vector_store %arg14[%c0_51, %c0_52], %107 {strides = array<i32>} : memref<8x384xf32, #tpu.memory_space<vmem>>, vector<8x384xf32>,
    return
  }
}

</mosaic_0001>

<bundles_post_ra>
// kernel: ngram_generator_forward.1
= control target key start
LH: loop header
LB: loop body
LE: loop exit
PB: predicated region body
PF: predicated region fallthrough
CT: control target
= control target key end

     0   :  { %19 = vsyncpa [#allocation3], 0  ;;  %s18019_s0 = inlined_call_operand.vmem [shape: f32[8,384], index: 0, kind: input, shape index: {}]   ;;  %s18020_s1 = inlined_call_operand.hbm [shape: bf16[384,768], index: 1, kind: input, shape index: {}]   ;;  %s18021_s2 = inlined_call_operand.hbm [shape: f32[1,768], index: 2, kind: input, shape index: {}]   ;;  %s18022_s3 = inlined_call_operand.hbm [shape: bf16[768,768], index: 3, kind: input, shape index: {}]   ;;  %s18023_s4 = inlined_call_operand.hbm [shape: f32[1,768], index: 4, kind: input, shape index: {}]   ;;  %s18024_s5 = inlined_call_operand.hbm [shape: f32[1,768], index: 5, kind: input, shape index: {}]   ;;  %s18025_s6 = inlined_call_operand.hbm [shape: bf16[768,768], index: 6, kind: input, shape index: {}]   ;;  %s18026_s7 = inlined_call_operand.hbm [shape: f32[1,768], index: 7, kind: input, shape index: {}]   ;;  %s18027_s8 = inlined_call_operand.hbm [shape: f32[1,768], index: 8, kind: input, shape index: {}]   ;;  %s18028_s9 = inlined_call_operand.hbm [shape: bf16[768,1408], index: 9, kind: input, shape index: {}]   ;;  %s18029_s10 = inlined_call_operand.hbm [shape: f32[1,1408], index: 10, kind: input, shape index: {}]   ;;  %s18030_s11 = inlined_call_operand.hbm [shape: f32[1,1408], index: 11, kind: input, shape index: {}]   ;;  %s18031_s12 = inlined_call_operand.hbm [shape: bf16[1408,384], index: 12, kind: input, shape index: {}]   ;;  %s18032_s13 = inlined_call_operand.hbm [shape: f32[1,384], index: 13, kind: input, shape index: {}]   ;;  %s18033_s14 = inlined_call_operand.hbm [shape: f32[8,384], index: 14, kind: output, shape index: {}]  }
   0x1   :  { %20 = vsyncpa [#allocation6], 0 }
   0x2   :  { %21 = vsyncpa [#allocation9], 0 }
   0x3   :  { %22 = vsyncpa [#allocation12], 0 }
   0x4   :  { %23 = vsyncpa [#allocation15], 0 }
   0x5   :  { %24 = vsyncpa [#allocation18], 0 }
   0x6   :  { %25 = vsyncpa [#allocation21], 0 }
   0x7   :  { %26 = vsyncpa [#allocation4], 0  ;;  %s17151_s29 = smov [#allocation5]   ;;  %s17152_s15 = smov [#allocation8]  }
   0x8   :  { %s47_s30 = sshll.u32 %s17151_s29, 4  ;;  %s69_s16 = sshll.u32 %s17152_s15, 4  ;;  %s48_s30 = int_to_ptr.vmem [resolvable:$true] %s47_s30  ;;  %s70_s16 = int_to_ptr.vmem [resolvable:$true] %s69_s16 }
   0x9   :  { %s16863_s17 = scalar_lea.vmem %s48_s30, 96  ;;  %p16868_p1 = scmp.lt.s32.totalorder %s48_s30, %s48_s30 }
   0xa   :  { %p16864_p0 = scmp.ne.s32.totalorder %s48_s30, %s16863_s17  ;;  %p16869_p2 = scmp.lt.s32.totalorder %s16863_s17, %s16863_s17 }
   0xc   :  { %p16870_p3 = por %p16869_p2, %p16868_p1 }
   0xe   :  { %p16871_p4 = pnand %p16870_p3, %p16864_p0 }
  0x10   :  { %16874 = shalt.err (!%p16871_p4)
}
  0x11   :  { %50 = dma.hbm_to_vmem [thread:$0]  %s18021_s2, 96, %s48_s30, [#allocation6]  }
  0x12   :  { %s16883_s20 = scalar_lea.vmem %s70_s16, 96  ;;  %p16888_p6 = scmp.lt.s32.totalorder %s70_s16, %s70_s16 }
  0x13   :  { %p16884_p5 = scmp.ne.s32.totalorder %s70_s16, %s16883_s20  ;;  %p16889_p7 = scmp.lt.s32.totalorder %s16883_s20, %s16883_s20 }
  0x15   :  { %p16890_p8 = por %p16889_p7, %p16888_p6 }
  0x17   :  { %p16891_p9 = pnand %p16890_p8, %p16884_p5 }
  0x19   :  { %16894 = shalt.err (!%p16891_p9)
}
  0x1a   :  { %72 = dma.hbm_to_vmem [thread:$0]  %s18023_s4, 96, %s70_s16, [#allocation9]  }
  0x1b   :  { %s17153_s23 = smov [#allocation11]   ;;  %s17154_s25 = smov [#allocation14]  }
  0x1c   :  { %s88_s24 = sshll.u32 %s17153_s23, 4  ;;  %s111_s26 = sshll.u32 %s17154_s25, 4  ;;  %s89_s24 = int_to_ptr.vmem [resolvable:$true] %s88_s24  ;;  %s112_s26 = int_to_ptr.vmem [resolvable:$true] %s111_s26 }
  0x1d   :  { %s16903_s27 = scalar_lea.vmem %s89_s24, 36864  ;;  %p16908_p11 = scmp.lt.s32.totalorder %s89_s24, %s89_s24 }
  0x1e   :  { %p16904_p10 = scmp.ne.s32.totalorder %s89_s24, %s16903_s27  ;;  %p16909_p12 = scmp.lt.s32.totalorder %s16903_s27, %s16903_s27 }
  0x20   :  { %p16910_p13 = por %p16909_p12, %p16908_p11 }
  0x22   :  { %p16911_p0 = pnand %p16910_p13, %p16904_p10 }
  0x24   :  { %16914 = shalt.err (!%p16911_p0)
}
  0x25   :  { %s17155_s2 = smov 384   ;;  %s17156_s28 = smov 24  }
  0x26   :  { %94 = dma.hbm_to_vmem [thread:$0]  %s18025_s6, 36864, %s89_s24, [#allocation12], %s17155_s2, %s17155_s2, %s17156_s28  }
  0x27   :  { %s16923_s30 = scalar_lea.vmem %s112_s26, 96  ;;  %p16928_p2 = scmp.lt.s32.totalorder %s112_s26, %s112_s26 }
  0x28   :  { %p16924_p1 = scmp.ne.s32.totalorder %s112_s26, %s16923_s30  ;;  %p16929_p3 = scmp.lt.s32.totalorder %s16923_s30, %s16923_s30 }
  0x2a   :  { %p16930_p4 = por %p16929_p3, %p16928_p2 }
  0x2c   :  { %p16931_p5 = pnand %p16930_p4, %p16924_p1 }
  0x2e   :  { %16934 = shalt.err (!%p16931_p5)
}
  0x2f   :  { %114 = dma.hbm_to_vmem [thread:$0]  %s18027_s8, 96, %s112_s26, [#allocation15]  }
  0x30   :  { %s17157_s17 = smov [#allocation17]   ;;  %s17158_s19 = smov [#allocation20]  }
  0x31   :  { %s133_s18 = sshll.u32 %s17157_s17, 4  ;;  %s152_s20 = sshll.u32 %s17158_s19, 4  ;;  %s134_s18 = int_to_ptr.vmem [resolvable:$true] %s133_s18  ;;  %s153_s20 = int_to_ptr.vmem [resolvable:$true] %s152_s20 }
  0x32   :  { %s16943_s21 = scalar_lea.vmem %s134_s18, 176  ;;  %s16947_s6 = scalar_lea.vmem %s134_s18, 192 }
  0x33   :  { %p16944_p6 = scmp.ne.s32.totalorder %s134_s18, %s16943_s21  ;;  %p16948_p7 = scmp.lt.s32.totalorder %s134_s18, %s134_s18 }
  0x34   :  { %p16949_p8 = scmp.lt.s32.totalorder %s16947_s6, %s16943_s21 }
  0x36   :  { %p16950_p9 = por %p16949_p8, %p16948_p7 }
  0x38   :  { %p16951_p10 = pnand %p16950_p9, %p16944_p6 }
  0x3a   :  { %16954 = shalt.err (!%p16951_p10)
}
  0x3b   :  { %136 = dma.hbm_to_vmem [thread:$0]  %s18029_s10, 176, %s134_s18, [#allocation18]  }
  0x3c   :  { %s16963_s24 = scalar_lea.vmem %s153_s20, 33792  ;;  %p16968_p12 = scmp.lt.s32.totalorder %s153_s20, %s153_s20 }
  0x3d   :  { %p16964_p11 = scmp.ne.s32.totalorder %s153_s20, %s16963_s24  ;;  %p16969_p13 = scmp.lt.s32.totalorder %s16963_s24, %s16963_s24 }
  0x3f   :  { %p16970_p0 = por %p16969_p13, %p16968_p12 }
  0x41   :  { %p16971_p1 = pnand %p16970_p0, %p16964_p11 }
  0x43   :  { %16974 = shalt.err (!%p16971_p1)
}
  0x44   :  { %s17159_s8 = smov 192   ;;  %s17160_s25 = smov 12  }
  0x45   :  { %158 = dma.hbm_to_vmem [thread:$0]  %s18031_s12, 33792, %s153_s20, [#allocation21], %s17159_s8, %s17159_s8, %s17160_s25  }
  0x46   :  { %s17161_s29 = smov [#allocation2]   ;;  %s17162_s30 = smov [#allocation7]  }
  0x47   :  { %s34_s4 = sshll.u32 %s17161_s29, 4  ;;  %s56_s15 = sshll.u32 %s17162_s30, 4  ;;  %s35_s4 = int_to_ptr.vmem [resolvable:$true] %s34_s4  ;;  %s57_s15 = int_to_ptr.vmem [resolvable:$true] %s56_s15 }
  0x48   :  { %s16983_s10 = scalar_lea.vmem %s35_s4, 18432  ;;  %p16988_p3 = scmp.lt.s32.totalorder %s35_s4, %s35_s4 }
  0x49   :  { %p16984_p2 = scmp.ne.s32.totalorder %s35_s4, %s16983_s10  ;;  %p16989_p4 = scmp.lt.s32.totalorder %s16983_s10, %s16983_s10 }
  0x4b   :  { %p16990_p5 = por %p16989_p4, %p16988_p3 }
  0x4d   :  { %p16991_p6 = pnand %p16990_p5, %p16984_p2 }
  0x4f   :  { %16994 = shalt.err (!%p16991_p6)
}
  0x50   :  { %40 = dma.hbm_to_vmem [thread:$0]  %s18020_s1, 18432, %s35_s4, [#allocation3], %s17155_s2, %s17155_s2, %s17156_s28  }
  0x51   :  { %s17003_s12 = scalar_lea.vmem %s57_s15, 36864  ;;  %p17008_p8 = scmp.lt.s32.totalorder %s57_s15, %s57_s15 }
  0x52   :  { %p17004_p7 = scmp.ne.s32.totalorder %s57_s15, %s17003_s12  ;;  %p17009_p9 = scmp.lt.s32.totalorder %s17003_s12, %s17003_s12 }
  0x54   :  { %p17010_p10 = por %p17009_p9, %p17008_p8 }
  0x56   :  { %p17011_p11 = pnand %p17010_p10, %p17004_p7 }
  0x58   :  { %17014 = shalt.err (!%p17011_p11)
}
  0x59   :  { %62 = dma.hbm_to_vmem [thread:$0]  %s18022_s3, 36864, %s57_s15, [#allocation6], %s17155_s2, %s17155_s2, %s17156_s28  }
  0x5a   :  { %s17163_s20 = smov [#allocation10]   ;;  %s17164_s6 = smov [#allocation13]  }
  0x5b   :  { %s79_s21 = sshll.u32 %s17163_s20, 4  ;;  %s101_s22 = sshll.u32 %s17164_s6, 4  ;;  %s80_s21 = int_to_ptr.vmem [resolvable:$true] %s79_s21  ;;  %s102_s22 = int_to_ptr.vmem [resolvable:$true] %s101_s22 }
  0x5c   :  { %s17023_s1 = scalar_lea.vmem %s80_s21, 96  ;;  %p17028_p13 = scmp.lt.s32.totalorder %s80_s21, %s80_s21 }
  0x5d   :  { %p17024_p12 = scmp.ne.s32.totalorder %s80_s21, %s17023_s1  ;;  %p17029_p0 = scmp.lt.s32.totalorder %s17023_s1, %s17023_s1 }
  0x5f   :  { %p17030_p1 = por %p17029_p0, %p17028_p13 }
  0x61   :  { %p17031_p2 = pnand %p17030_p1, %p17024_p12 }
  0x63   :  { %17034 = shalt.err (!%p17031_p2)
}
  0x64   :  { %82 = dma.hbm_to_vmem [thread:$0]  %s18024_s5, 96, %s80_s21, [#allocation9]  }
  0x65   :  { %s17043_s8 = scalar_lea.vmem %s102_s22, 96  ;;  %p17048_p4 = scmp.lt.s32.totalorder %s102_s22, %s102_s22 }
  0x66   :  { %p17044_p3 = scmp.ne.s32.totalorder %s102_s22, %s17043_s8  ;;  %p17049_p5 = scmp.lt.s32.totalorder %s17043_s8, %s17043_s8 }
  0x68   :  { %p17050_p6 = por %p17049_p5, %p17048_p4 }
  0x6a   :  { %p17051_p7 = pnand %p17050_p6, %p17044_p3 }
  0x6c   :  { %17054 = shalt.err (!%p17051_p7)
}
  0x6d   :  { %104 = dma.hbm_to_vmem [thread:$0]  %s18026_s7, 96, %s102_s22, [#allocation12]  }
  0x6e   :  { %s17165_s28 = smov [#allocation16]  }
  0x6f   :  { %s120_s25 = sshll.u32 %s17165_s28, 4  ;;  %s121_s25 = int_to_ptr.vmem [resolvable:$true] %s120_s25 }
  0x70   :  { %s17063_s26 = scalar_lea.vmem %s121_s25, 67584  ;;  %p17068_p9 = scmp.lt.s32.totalorder %s121_s25, %s121_s25 }
  0x71   :  { %p17064_p8 = scmp.ne.s32.totalorder %s121_s25, %s17063_s26  ;;  %p17069_p10 = scmp.lt.s32.totalorder %s17063_s26, %s17063_s26 }
  0x73   :  { %p17070_p11 = por %p17069_p10, %p17068_p9 }
  0x75   :  { %p17071_p12 = pnand %p17070_p11, %p17064_p8 }
  0x77   :  { %17074 = shalt.err (!%p17071_p12)
}
  0x78   :  { %s17166_s5 = smov 704   ;;  %s17167_s27 = smov 44  }
  0x79   :  { %126 = dma.hbm_to_vmem [thread:$0]  %s18028_s9, 67584, %s121_s25, [#allocation15], %s17166_s5, %s17166_s5, %s17167_s27  }
  0x7a   :  { %s17168_s30 = smov [#allocation19]   ;;  %s17169_s7 = smov [#allocation22]  }
  0x7b   :  { %s143_s15 = sshll.u32 %s17168_s30, 4  ;;  %s165_s10 = sshll.u32 %s17169_s7, 4  ;;  %s144_s15 = int_to_ptr.vmem [resolvable:$true] %s143_s15  ;;  %s166_s10 = int_to_ptr.vmem [resolvable:$true] %s165_s10 }
  0x7c   :  { %s17083_s16 = scalar_lea.vmem %s144_s15, 176  ;;  %s17087_s17 = scalar_lea.vmem %s144_s15, 192 }
  0x7d   :  { %p17084_p13 = scmp.ne.s32.totalorder %s144_s15, %s17083_s16  ;;  %p17088_p0 = scmp.lt.s32.totalorder %s144_s15, %s144_s15 }
  0x7e   :  { %p17089_p1 = scmp.lt.s32.totalorder %s17087_s17, %s17083_s16 }
  0x80   :  { %p17090_p2 = por %p17089_p1, %p17088_p0 }
  0x82   :  { %p17091_p3 = pnand %p17090_p2, %p17084_p13 }
  0x84   :  { %17094 = shalt.err (!%p17091_p3)
}
  0x85   :  { %146 = dma.hbm_to_vmem [thread:$0]  %s18030_s11, 176, %s144_s15, [#allocation18]  }
  0x86   :  { %s17103_s19 = scalar_lea.vmem %s166_s10, 48  ;;  %s17107_s9 = scalar_lea.vmem %s166_s10, 64 }
  0x87   :  { %p17104_p4 = scmp.ne.s32.totalorder %s166_s10, %s17103_s19  ;;  %p17108_p5 = scmp.lt.s32.totalorder %s166_s10, %s166_s10 }
  0x88   :  { %p17109_p6 = scmp.lt.s32.totalorder %s17107_s9, %s17103_s19 }
  0x8a   :  { %p17110_p7 = por %p17109_p6, %p17108_p5 }
  0x8c   :  { %p17111_p8 = pnand %p17110_p7, %p17104_p4 }
  0x8e   :  { %17114 = shalt.err (!%p17111_p8)
}
  0x8f   :  { %168 = dma.hbm_to_vmem [thread:$0]  %s18032_s13, 48, %s166_s10, [#allocation21]  }
  0x90   :  { %17135 = dma.done.wait [#allocation3], 18432  }
  0x91   :  { %17136 = vsyncadd [#allocation3], 4294948864 }
  0x92   :  { %17137 = dma.done.wait [#allocation6], 36960  }
  0x93   :  { %17138 = vsyncadd [#allocation6], 4294930336 }
  0x94   :  { %17139 = dma.done.wait [#allocation9], 192  }
  0x95   :  { %17140 = vsyncadd [#allocation9], 4294967104 }
  0x96   :  { %17141 = dma.done.wait [#allocation12], 36960  }
  0x97   :  { %17142 = vsyncadd [#allocation12], 4294930336 }
  0x98   :  { %17143 = dma.done.wait [#allocation15], 67680  }
  0x99   :  { %17144 = vsyncadd [#allocation15], 4294899616 }
  0x9a   :  { %17145 = dma.done.wait [#allocation18], 352  }
  0x9b   :  { %17146 = vsyncadd [#allocation18], 4294966944 }
  0x9c   :  { %17147 = dma.done.wait [#allocation21], 33840  }
  0x9d   :  { %17148 = vsyncadd [#allocation21], 4294933456  ;;  %v17170_v0 = vmov 0   ;;  %v14544_v1 = vld [vmem:[#allocation2 + $0x154] ss:$24 sps:$4 sm:$0xff]   ;;  %vm17172_vm0 = vmmov 0  }
  0x9e   :  { %1187 = vmatprep.mubr.bf16.mxu1 %v17170_v0  ;;  %v14546_v2 = vld [vmem:[#allocation2 + $0x454] ss:$24 sps:$4 sm:$0xff]   ;;  %1114 = vmatprep.subr.bf16.mxu0 %v14544_v1  ;;  %v14548_v3 = vld [vmem:[#allocation2 + $0x150] ss:$24 sps:$4 sm:$0xff]   ;;  %v14550_v5 = vld [vmem:[#allocation2 + $0x124] ss:$24 sps:$4 sm:$0xff]  }
  0x9f   :  { %v14549_v4 = vld [vmem:[#allocation2 + $0x450] ss:$24 sps:$4 sm:$0xff]   ;;  %1155 = vmatprep.subr.bf16.mxu1 %v14546_v2  ;;  %1115 = vmatpush1.bf16.msra.mxu0 %v14548_v3  ;;  %v14552_v6 = vld [vmem:[#allocation2 + $0x424] ss:$24 sps:$4 sm:$0xff]   ;;  %v14554_v7 = vld [vmem:[#allocation2 + $0x120] ss:$24 sps:$4 sm:$0xff]  }
  0xa0   :  { %1156 = vmatpush1.bf16.msra.mxu1 %v14549_v4  ;;  %1116 = vmatprep.subr.bf16.mxu0 %v14550_v5  ;;  %v14555_v8 = vld [vmem:[#allocation2 + $0x420] ss:$24 sps:$4 sm:$0xff]   ;;  %v14556_v9 = vld [vmem:[#allocation2 + $0xf4] ss:$24 sps:$4 sm:$0xff]   ;;  %v14560_v11 = vld [vmem:[#allocation2 + $0xf0] ss:$24 sps:$4 sm:$0xff]  }
  0xa1   :  { %1157 = vmatprep.subr.bf16.mxu1 %v14552_v6  ;;  %v14558_v10 = vld [vmem:[#allocation2 + $0x3f4] ss:$24 sps:$4 sm:$0xff]   ;;  %v14561_v12 = vld [vmem:[#allocation2 + $0x3f0] ss:$24 sps:$4 sm:$0xff]   ;;  %v14562_v13 = vld [vmem:[#allocation2 + $0xc4] ss:$24 sps:$4 sm:$0xff]  }
  0xa2   :  { %v14564_v14 = vld [vmem:[#allocation2 + $0x3c4] ss:$24 sps:$4 sm:$0xff]   ;;  %v14566_v15 = vld [vmem:[#allocation2 + $0xc0] ss:$24 sps:$4 sm:$0xff]   ;;  %v14568_v17 = vld [vmem:[#allocation2 + $0x94] ss:$24 sps:$4 sm:$0xff]  }
  0xa3   :  { %1117 = vmatpush1.bf16.msra.mxu0 %v14554_v7  ;;  %v14567_v16 = vld [vmem:[#allocation2 + $0x3c0] ss:$24 sps:$4 sm:$0xff]   ;;  %v14570_v18 = vld [vmem:[#allocation2 + $0x394] ss:$24 sps:$4 sm:$0xff]   ;;  %v14572_v19 = vld [vmem:[#allocation2 + $0x90] ss:$24 sps:$4 sm:$0xff]  }
  0xa4   :  { %1158 = vmatpush1.bf16.msra.mxu1 %v14555_v8  ;;  %1118 = vmatprep.subr.bf16.mxu0 %v14556_v9  ;;  %v14573_v20 = vld [vmem:[#allocation2 + $0x390] ss:$24 sps:$4 sm:$0xff]   ;;  %v14574_v21 = vld [vmem:[#allocation2 + $0x64] ss:$24 sps:$4 sm:$0xff]   ;;  %v14578_v23 = vld [vmem:[#allocation2 + $0x60] ss:$24 sps:$4 sm:$0xff]  }
  0xa5   :  { %1159 = vmatprep.subr.bf16.mxu1 %v14558_v10  ;;  %v14576_v22 = vld [vmem:[#allocation2 + $0x364] ss:$24 sps:$4 sm:$0xff]   ;;  %v14579_v24 = vld [vmem:[#allocation2 + $0x360] ss:$24 sps:$4 sm:$0xff]   ;;  %v14580_v25 = vld [vmem:[#allocation2 + $0x34] ss:$24 sps:$4 sm:$0xff]  }
  0xa6   :  { %v14582_v26 = vld [vmem:[#allocation2 + $0x334] ss:$24 sps:$4 sm:$0xff]   ;;  %v14584_v27 = vld [vmem:[#allocation2 + $0x30] ss:$24 sps:$4 sm:$0xff]   ;;  %v14586_v29 = vld [vmem:[#allocation2 + $0x4] ss:$24 sps:$4 sm:$0xff]  }
  0xa7   :  { %1119 = vmatpush1.bf16.msra.mxu0 %v14560_v11  ;;  %v14585_v28 = vld [vmem:[#allocation2 + $0x330] ss:$24 sps:$4 sm:$0xff]   ;;  %v14588_v30 = vld [vmem:[#allocation2 + $0x304] ss:$24 sps:$4 sm:$0xff]   ;;  %v14590_v31 = vld [vmem:[#allocation2] ss:$24 sps:$4 sm:$0xff]  }
  0xa8   :  { %1160 = vmatpush1.bf16.msra.mxu1 %v14561_v12  ;;  %1120 = vmatprep.subr.bf16.mxu0 %v14562_v13  ;;  %v14591_v32 = vld [vmem:[#allocation2 + $0x300] ss:$24 sps:$4 sm:$0xff]   ;;  %v211_v33 = vld [vmem:[%s18019_s0 + $0x10] sm:$0xff]  ;;  %v14598_v39 = vld [vmem:[#allocation2 + $0x2a4] ss:$24 sps:$4 sm:$0xff]   ;;  %s17173_s26 = smov [#allocation23]  }
  0xa9   :  { %1161 = vmatprep.subr.bf16.mxu1 %v14564_v14  ;;  %v14592_v34 = vld [vmem:[#allocation2 + $0x2d4] ss:$24 sps:$4 sm:$0xff]   ;;  %v14594_v36 = vld [vmem:[#allocation2 + $0x158] ss:$24 sps:$4 sm:$0xff]   ;;  %v17301_v38 = vpack.c.bf16 %v211_v33, %v211_v33  ;;  %v14600_v41 = vld [vmem:[#allocation2 + $0x128] ss:$24 sps:$4 sm:$0xff]  }
  0xaa   :  { %v14596_v35 = vld [vmem:[#allocation2 + $0x15c] ss:$24 sps:$4 sm:$0xff]   ;;  %v14597_v37 = vld [vmem:[#allocation2 + $0x2d0] ss:$24 sps:$4 sm:$0xff]   ;;  %v14602_v40 = vld [vmem:[#allocation2 + $0x12c] ss:$24 sps:$4 sm:$0xff]  }
  0xab   :  { %1121 = vmatpush1.bf16.msra.mxu0 %v14566_v15  ;;  %v14603_v42 = vld [vmem:[#allocation2 + $0x2a0] ss:$24 sps:$4 sm:$0xff]   ;;  %v14604_v43 = vld [vmem:[#allocation2 + $0x274] ss:$24 sps:$4 sm:$0xff]   ;;  %v14609_v46 = vld [vmem:[#allocation2 + $0x270] ss:$24 sps:$4 sm:$0xff]  }
  0xac   :  { %1162 = vmatpush1.bf16.msra.mxu1 %v14567_v16  ;;  %1122 = vmatprep.subr.bf16.mxu0 %v14568_v17  ;;  %v14608_v44 = vld [vmem:[#allocation2 + $0xfc] ss:$24 sps:$4 sm:$0xff]   ;;  %v14606_v45 = vld [vmem:[#allocation2 + $0xf8] ss:$24 sps:$4 sm:$0xff]   ;;  %v14614_v48 = vld [vmem:[#allocation2 + $0xcc] ss:$24 sps:$4 sm:$0xff]  }
  0xad   :  { %1163 = vmatprep.subr.bf16.mxu1 %v14570_v18  ;;  %v14610_v47 = vld [vmem:[#allocation2 + $0x244] ss:$24 sps:$4 sm:$0xff]   ;;  %v14612_v49 = vld [vmem:[#allocation2 + $0xc8] ss:$24 sps:$4 sm:$0xff]   ;;  %v14616_v52 = vld [vmem:[#allocation2 + $0x214] ss:$24 sps:$4 sm:$0xff]  }
  0xae   :  { %v210_v50 = vld [vmem:[%s18019_s0 + $0x8] sm:$0xff]  ;;  %v14615_v51 = vld [vmem:[#allocation2 + $0x240] ss:$24 sps:$4 sm:$0xff]   ;;  %v14620_v54 = vld [vmem:[#allocation2 + $0x9c] ss:$24 sps:$4 sm:$0xff]   ;;  %s12786_s5 = sshll.u32 %s17173_s26, 4  ;;  %s12787_s5 = int_to_ptr.vmem [resolvable:$true] %s12786_s5 }
  0xaf   :  { %1123 = vmatpush1.bf16.msra.mxu0 %v14572_v19  ;;  %v17307_v53 = vpack.c.bf16 %v210_v50, %v210_v50  ;;  %v14618_v55 = vld [vmem:[#allocation2 + $0x98] ss:$24 sps:$4 sm:$0xff]   ;;  %v14622_v57 = vld [vmem:[#allocation2 + $0x1e4] ss:$24 sps:$4 sm:$0xff]   ;;  %v14624_v59 = vld [vmem:[#allocation2 + $0x68] ss:$24 sps:$4 sm:$0xff]   ;;  %p17120_p10 = scmp.lt.s32.totalorder %s12787_s5, %s12787_s5 }
  0xb0   :  { %1164 = vmatpush1.bf16.msra.mxu1 %v14573_v20  ;;  %1124 = vmatprep.subr.bf16.mxu0 %v14574_v21  ;;  %v14621_v56 = vld [vmem:[#allocation2 + $0x210] ss:$24 sps:$4 sm:$0xff]   ;;  %v14626_v58 = vld [vmem:[#allocation2 + $0x6c] ss:$24 sps:$4 sm:$0xff]   ;;  %v14627_v60 = vld [vmem:[#allocation2 + $0x1e0] ss:$24 sps:$4 sm:$0xff]  }
  0xb1   :  { %1165 = vmatprep.subr.bf16.mxu1 %v14576_v22  ;;  %1146 = vmatprep.mubr.bf16.mxu0 %v17307_v53  ;;  %v14628_v61 = vld [vmem:[#allocation2 + $0x1b4] ss:$24 sps:$4 sm:$0xff]   ;;  %v14630_v63 = vld [vmem:[#allocation2 + $0x38] ss:$24 sps:$4 sm:$0xff]   ;;  %v14634_v2 = vld [vmem:[#allocation2 + $0x184] ss:$24 sps:$4 sm:$0xff]  }
  0xb2   :  { %v14632_v62 = vld [vmem:[#allocation2 + $0x3c] ss:$24 sps:$4 sm:$0xff]   ;;  %v14633_v1 = vld [vmem:[#allocation2 + $0x1b0] ss:$24 sps:$4 sm:$0xff]   ;;  %v14638_v3 = vld [vmem:[#allocation2 + $0xc] ss:$24 sps:$4 sm:$0xff]  }
  0xb3   :  { %1125 = vmatpush1.bf16.msra.mxu0 %v14578_v23  ;;  %v14636_v4 = vld [vmem:[#allocation2 + $0x8] ss:$24 sps:$4 sm:$0xff]   ;;  %v14642_v7 = vld [vmem:[#allocation2 + $0x2dc] ss:$24 sps:$4 sm:$0xff]   ;;  %v14640_v10 = vld [vmem:[#allocation2 + $0x2d8] ss:$24 sps:$4 sm:$0xff]  }
  0xb4   :  { %1166 = vmatpush1.bf16.msra.mxu1 %v14579_v24  ;;  %1126 = vmatprep.subr.bf16.mxu0 %v14580_v25  ;;  %v14639_v5 = vld [vmem:[#allocation2 + $0x180] ss:$24 sps:$4 sm:$0xff]   ;;  %v14645_v8 = vld [vmem:[#allocation2 + $0x45c] ss:$24 sps:$4 sm:$0xff]   ;;  %v14648_v12 = vld [vmem:[#allocation2 + $0x2ac] ss:$24 sps:$4 sm:$0xff]  }
  0xb5   :  { %1167 = vmatprep.subr.bf16.mxu1 %v14582_v26  ;;  %v209_v6 = vld [vmem:[%s18019_s0] sm:$0xff]  ;;  %v14643_v11 = vld [vmem:[#allocation2 + $0x458] ss:$24 sps:$4 sm:$0xff]   ;;  %v14654_v16 = vld [vmem:[#allocation2 + $0x27c] ss:$24 sps:$4 sm:$0xff]   ;;  %s17115_s27 = scalar_lea.vmem %s12787_s5, 384 }
  0xb6   :  { %v17314_v9 = vpack.c.bf16 %v209_v6, %v209_v6  ;;  %v14651_v13 = vld [vmem:[#allocation2 + $0x42c] ss:$24 sps:$4 sm:$0xff]   ;;  %v14646_v14 = vld [vmem:[#allocation2 + $0x2a8] ss:$24 sps:$4 sm:$0xff]   ;;  %v14657_v17 = vld [vmem:[#allocation2 + $0x3fc] ss:$24 sps:$4 sm:$0xff]   ;;  %p17116_p9 = scmp.ne.s32.totalorder %s12787_s5, %s17115_s27  ;;  %p17121_p11 = scmp.lt.s32.totalorder %s17115_s27, %s17115_s27 }
  0xb7   :  { %1127 = vmatpush1.bf16.msra.mxu0 %v14584_v27  ;;  %v14649_v15 = vld [vmem:[#allocation2 + $0x428] ss:$24 sps:$4 sm:$0xff]   ;;  %v14652_v18 = vld [vmem:[#allocation2 + $0x278] ss:$24 sps:$4 sm:$0xff]   ;;  %v14660_v20 = vld [vmem:[#allocation2 + $0x24c] ss:$24 sps:$4 sm:$0xff]  }
  0xb8   :  { %1168 = vmatpush1.bf16.msra.mxu1 %v14585_v28  ;;  %1128 = vmatprep.subr.bf16.mxu0 %v14586_v29  ;;  %v14655_v19 = vld [vmem:[#allocation2 + $0x3f8] ss:$24 sps:$4 sm:$0xff]   ;;  %v14663_v21 = vld [vmem:[#allocation2 + $0x3cc] ss:$24 sps:$4 sm:$0xff]   ;;  %v14658_v22 = vld [vmem:[#allocation2 + $0x248] ss:$24 sps:$4 sm:$0xff]   ;;  %p17122_p12 = por %p17121_p11, %p17120_p10 }
  0xb9   :  { %1169 = vmatprep.subr.bf16.mxu1 %v14588_v30  ;;  %v14661_v23 = vld [vmem:[#allocation2 + $0x3c8] ss:$24 sps:$4 sm:$0xff]   ;;  %v14666_v24 = vld [vmem:[#allocation2 + $0x21c] ss:$24 sps:$4 sm:$0xff]   ;;  %v14664_v26 = vld [vmem:[#allocation2 + $0x218] ss:$24 sps:$4 sm:$0xff]  }
  0xba   :  { %v14669_v25 = vld [vmem:[#allocation2 + $0x39c] ss:$24 sps:$4 sm:$0xff]   ;;  %v14667_v27 = vld [vmem:[#allocation2 + $0x398] ss:$24 sps:$4 sm:$0xff]   ;;  %v14672_v28 = vld [vmem:[#allocation2 + $0x1ec] ss:$24 sps:$4 sm:$0xff]   ;;  %p17123_p13 = pnand %p17122_p12, %p17116_p9 }
  0xbb   :  { %1129 = vmatpush1.bf16.msra.mxu0 %v14590_v31  ;;  %v14675_v29 = vld [vmem:[#allocation2 + $0x36c] ss:$24 sps:$4 sm:$0xff]   ;;  %v14670_v30 = vld [vmem:[#allocation2 + $0x1e8] ss:$24 sps:$4 sm:$0xff]   ;;  %v14681_v33 = vld [vmem:[#allocation2 + $0x33c] ss:$24 sps:$4 sm:$0xff]  }
  0xbc   :  { %1170 = vmatpush1.bf16.msra.mxu1 %v14591_v32  ;;  %1130 = vmatprep.subr.bf16.mxu0 %v14592_v34  ;;  %v14673_v31 = vld [vmem:[#allocation2 + $0x368] ss:$24 sps:$4 sm:$0xff]   ;;  %v14678_v32 = vld [vmem:[#allocation2 + $0x1bc] ss:$24 sps:$4 sm:$0xff]   ;;  %v14676_v34 = vld [vmem:[#allocation2 + $0x1b8] ss:$24 sps:$4 sm:$0xff]  }
  0xbd   :  { %1196 = vmatprep.subr.bf16.mxu1 %v14596_v35  ;;  %v14679_v35 = vld [vmem:[#allocation2 + $0x338] ss:$24 sps:$4 sm:$0xff]   ;;  %v14726_v50 = vld [vmem:[#allocation2 + $0x404] ss:$24 sps:$4 sm:$0xff]   ;;  %v14711_v6 = vld [vmem:[#allocation2 + $0x14] ss:$24 sps:$4 sm:$0xff]  }
  0xbf   :  { %1188 = vmatmul.mubr.bf16.vlgmr.msra.gmra.mxu1 %v17301_v38  ;;  %1131 = vmatpush2.bf16.msra.mxu0 %v14597_v37  ;;  %v14687_v37 = vld [vmem:[#allocation2 + $0x30c] ss:$24 sps:$4 sm:$0xff]  }
  0xc0   :  { %1197 = vmatpush1.bf16.msra.mxu1 %v14594_v36  ;;  %1132 = vmatprep.subr.bf16.mxu0 %v14598_v39  ;;  %v14684_v36 = vld [vmem:[#allocation2 + $0x18c] ss:$24 sps:$4 sm:$0xff]   ;;  %v14682_v39 = vld [vmem:[#allocation2 + $0x188] ss:$24 sps:$4 sm:$0xff]  }
  0xc1   :  { %1198 = vmatprep.subr.bf16.mxu1 %v14602_v40  ;;  %1228 = vmatprep.mubr.bf16.mxu1 %v17307_v53  ;;  %v14685_v40 = vld [vmem:[#allocation2 + $0x308] ss:$24 sps:$4 sm:$0xff]  }
  0xc3   :  { %1133 = vmatpush2.bf16.msra.mxu0 %v14603_v42  ;;  %v14714_v42 = vld [vmem:[#allocation2 + $0x464] ss:$24 sps:$4 sm:$0xff]  }
  0xc4   :  { %1199 = vmatpush1.bf16.msra.mxu1 %v14600_v41  ;;  %1134 = vmatprep.subr.bf16.mxu0 %v14604_v43  ;;  %v14690_v41 = vld [vmem:[#allocation2 + $0x164] ss:$24 sps:$4 sm:$0xff]   ;;  %v14688_v43 = vld [vmem:[#allocation2 + $0x160] ss:$24 sps:$4 sm:$0xff]  }
  0xc5   :  { %1200 = vmatprep.subr.bf16.mxu1 %v14608_v44  ;;  %v14693_v44 = vld [vmem:[#allocation2 + $0x134] ss:$24 sps:$4 sm:$0xff]  }
  0xc7   :  { %1135 = vmatpush2.bf16.msra.mxu0 %v14609_v46  ;;  %v14720_v46 = vld [vmem:[#allocation2 + $0x434] ss:$24 sps:$4 sm:$0xff]  }
  0xc8   :  { %1201 = vmatpush1.bf16.msra.mxu1 %v14606_v45  ;;  %1136 = vmatprep.subr.bf16.mxu0 %v14610_v47  ;;  %v14712_v45 = vld [vmem:[#allocation2 + $0x460] ss:$24 sps:$4 sm:$0xff]   ;;  %v14691_v47 = vld [vmem:[#allocation2 + $0x130] ss:$24 sps:$4 sm:$0xff]  }
  0xc9   :  { %1202 = vmatprep.subr.bf16.mxu1 %v14614_v48  ;;  %v14696_v48 = vld [vmem:[#allocation2 + $0x104] ss:$24 sps:$4 sm:$0xff]  }
  0xcb   :  { %1137 = vmatpush2.bf16.msra.mxu0 %v14615_v51  ;;  %v14694_v51 = vld [vmem:[#allocation2 + $0x100] ss:$24 sps:$4 sm:$0xff]  }
  0xcc   :  { %1203 = vmatpush1.bf16.msra.mxu1 %v14612_v49  ;;  %1138 = vmatprep.subr.bf16.mxu0 %v14616_v52  ;;  %v14718_v49 = vld [vmem:[#allocation2 + $0x430] ss:$24 sps:$4 sm:$0xff]   ;;  %v14699_v52 = vld [vmem:[#allocation2 + $0xd4] ss:$24 sps:$4 sm:$0xff]  }
  0xcd   :  { %1204 = vmatprep.subr.bf16.mxu1 %v14620_v54  ;;  %v14724_v54 = vld [vmem:[#allocation2 + $0x400] ss:$24 sps:$4 sm:$0xff]  }
  0xcf   :  { %1139 = vmatpush2.bf16.msra.mxu0 %v14621_v56  ;;  %v14697_v56 = vld [vmem:[#allocation2 + $0xd0] ss:$24 sps:$4 sm:$0xff]  }
  0xd0   :  { %1205 = vmatpush1.bf16.msra.mxu1 %v14618_v55  ;;  %1140 = vmatprep.subr.bf16.mxu0 %v14622_v57  ;;  %v14732_v55 = vld [vmem:[#allocation2 + $0x3d4] ss:$24 sps:$4 sm:$0xff]   ;;  %v14702_v57 = vld [vmem:[#allocation2 + $0xa4] ss:$24 sps:$4 sm:$0xff]  }
  0xd1   :  { %1206 = vmatprep.subr.bf16.mxu1 %v14626_v58  ;;  %v14730_v58 = vld [vmem:[#allocation2 + $0x3d0] ss:$24 sps:$4 sm:$0xff]  }
  0xd3   :  { %1141 = vmatpush2.bf16.msra.mxu0 %v14627_v60  ;;  %v14700_v60 = vld [vmem:[#allocation2 + $0xa0] ss:$24 sps:$4 sm:$0xff]  }
  0xd4   :  { %1207 = vmatpush1.bf16.msra.mxu1 %v14624_v59  ;;  %1142 = vmatprep.subr.bf16.mxu0 %v14628_v61  ;;  %v14738_v59 = vld [vmem:[#allocation2 + $0x3a4] ss:$24 sps:$4 sm:$0xff]   ;;  %v14705_v61 = vld [vmem:[#allocation2 + $0x74] ss:$24 sps:$4 sm:$0xff]  }
  0xd5   :  { %1208 = vmatprep.subr.bf16.mxu1 %v14632_v62  ;;  %v14744_v62 = vld [vmem:[#allocation2 + $0x374] ss:$24 sps:$4 sm:$0xff]  }
  0xd7   :  { %1143 = vmatpush2.bf16.msra.mxu0 %v14633_v1  ;;  %v14742_v1 = vld [vmem:[#allocation2 + $0x370] ss:$24 sps:$4 sm:$0xff]  }
  0xd8   :  { %1209 = vmatpush1.bf16.msra.mxu1 %v14630_v63  ;;  %1144 = vmatprep.subr.bf16.mxu0 %v14634_v2  ;;  %v14703_v63 = vld [vmem:[#allocation2 + $0x70] ss:$24 sps:$4 sm:$0xff]   ;;  %v14708_v2 = vld [vmem:[#allocation2 + $0x44] ss:$24 sps:$4 sm:$0xff]  }
  0xd9   :  { %1210 = vmatprep.subr.bf16.mxu1 %v14638_v3  ;;  %v14750_v3 = vld [vmem:[#allocation2 + $0x344] ss:$24 sps:$4 sm:$0xff]  }
  0xdb   :  { %1145 = vmatpush2.bf16.msra.mxu0 %v14639_v5  ;;  %v14748_v5 = vld [vmem:[#allocation2 + $0x340] ss:$24 sps:$4 sm:$0xff]  }
  0xdc   :  { %1211 = vmatpush1.bf16.msra.mxu1 %v14636_v4  ;;  %1237 = vmatprep.subr.bf16.mxu0 %v14645_v8  ;;  %v14706_v4 = vld [vmem:[#allocation2 + $0x40] ss:$24 sps:$4 sm:$0xff]   ;;  %v14709_v8 = vld [vmem:[#allocation2 + $0x10] ss:$24 sps:$4 sm:$0xff]  }
  0xdd   :  { %1212 = vmatprep.subr.bf16.mxu1 %v14642_v7  ;;  %v14756_v7 = vld [vmem:[#allocation2 + $0x314] ss:$24 sps:$4 sm:$0xff]  }
  0xde   :  { %1147 = vmatmul.mubr.bf16.vlgmr.msra.gmra.mxu0 %v17314_v9 }
  0xdf   :  { %1238 = vmatpush1.bf16.msra.mxu0 %v14643_v11  ;;  %1269 = vmatprep.mubr.bf16.mxu0 %v17170_v0  ;;  %v14717_v11 = vld [vmem:[#allocation2 + $0x2e4] ss:$24 sps:$4 sm:$0xff]  }
  0xe0   :  { %1213 = vmatpush2.bf16.msra.mxu1 %v14640_v10  ;;  %1239 = vmatprep.subr.bf16.mxu0 %v14651_v13  ;;  %v14754_v10 = vld [vmem:[#allocation2 + $0x310] ss:$24 sps:$4 sm:$0xff]   ;;  %v14715_v13 = vld [vmem:[#allocation2 + $0x2e0] ss:$24 sps:$4 sm:$0xff]  }
  0xe1   :  { %1214 = vmatprep.subr.bf16.mxu1 %v14648_v12  ;;  %v14762_v12 = vld [vmem:[#allocation7 + $0x154] ss:$24 sps:$4 sm:$0xff]  }
  0xe3   :  { %1240 = vmatpush1.bf16.msra.mxu0 %v14649_v15  ;;  %v14723_v15 = vld [vmem:[#allocation2 + $0x2b4] ss:$24 sps:$4 sm:$0xff]  }
  0xe4   :  { %1215 = vmatpush2.bf16.msra.mxu1 %v14646_v14  ;;  %1241 = vmatprep.subr.bf16.mxu0 %v14657_v17  ;;  %v14760_v14 = vld [vmem:[#allocation7 + $0x150] ss:$24 sps:$4 sm:$0xff]  }
  0xe5   :  { %1216 = vmatprep.subr.bf16.mxu1 %v14654_v16  ;;  %v14765_v16 = vld [vmem:[#allocation7 + $0x124] ss:$24 sps:$4 sm:$0xff]  }
  0xe6   :  { %v14721_v17 = vld [vmem:[#allocation2 + $0x2b0] ss:$24 sps:$4 sm:$0xff]  }
  0xe7   :  { %1242 = vmatpush1.bf16.msra.mxu0 %v14655_v19  ;;  %v14729_v19 = vld [vmem:[#allocation2 + $0x284] ss:$24 sps:$4 sm:$0xff]  }
  0xe8   :  { %1217 = vmatpush2.bf16.msra.mxu1 %v14652_v18  ;;  %1243 = vmatprep.subr.bf16.mxu0 %v14663_v21  ;;  %v14763_v18 = vld [vmem:[#allocation7 + $0x120] ss:$24 sps:$4 sm:$0xff]  }
  0xe9   :  { %1218 = vmatprep.subr.bf16.mxu1 %v14660_v20  ;;  %v14768_v20 = vld [vmem:[#allocation7 + $0xf4] ss:$24 sps:$4 sm:$0xff]  }
  0xea   :  { %v14727_v21 = vld [vmem:[#allocation2 + $0x280] ss:$24 sps:$4 sm:$0xff]  }
  0xeb   :  { %1244 = vmatpush1.bf16.msra.mxu0 %v14661_v23  ;;  %v14735_v23 = vld [vmem:[#allocation2 + $0x254] ss:$24 sps:$4 sm:$0xff]  }
  0xec   :  { %1219 = vmatpush2.bf16.msra.mxu1 %v14658_v22  ;;  %1245 = vmatprep.subr.bf16.mxu0 %v14669_v25  ;;  %v14766_v22 = vld [vmem:[#allocation7 + $0xf0] ss:$24 sps:$4 sm:$0xff]  }
  0xed   :  { %1220 = vmatprep.subr.bf16.mxu1 %v14666_v24  ;;  %v14771_v24 = vld [vmem:[#allocation7 + $0xc4] ss:$24 sps:$4 sm:$0xff]  }
  0xee   :  { %v14733_v25 = vld [vmem:[#allocation2 + $0x250] ss:$24 sps:$4 sm:$0xff]  }
  0xef   :  { %1246 = vmatpush1.bf16.msra.mxu0 %v14667_v27  ;;  %v14774_v27 = vld [vmem:[#allocation7 + $0x94] ss:$24 sps:$4 sm:$0xff]  }
  0xf0   :  { %1221 = vmatpush2.bf16.msra.mxu1 %v14664_v26  ;;  %1247 = vmatprep.subr.bf16.mxu0 %v14675_v29  ;;  %v14769_v26 = vld [vmem:[#allocation7 + $0xc0] ss:$24 sps:$4 sm:$0xff]   ;;  %v14772_v29 = vld [vmem:[#allocation7 + $0x90] ss:$24 sps:$4 sm:$0xff]  }
  0xf1   :  { %1222 = vmatprep.subr.bf16.mxu1 %v14672_v28  ;;  %v14739_v28 = vld [vmem:[#allocation2 + $0x220] ss:$24 sps:$4 sm:$0xff]  }
  0xf3   :  { %1248 = vmatpush1.bf16.msra.mxu0 %v14673_v31  ;;  %v14777_v31 = vld [vmem:[#allocation7 + $0x64] ss:$24 sps:$4 sm:$0xff]  }
  0xf4   :  { %1223 = vmatpush2.bf16.msra.mxu1 %v14670_v30  ;;  %1249 = vmatprep.subr.bf16.mxu0 %v14681_v33  ;;  %v14747_v30 = vld [vmem:[#allocation2 + $0x1f4] ss:$24 sps:$4 sm:$0xff]   ;;  %v14775_v33 = vld [vmem:[#allocation7 + $0x60] ss:$24 sps:$4 sm:$0xff]  }
  0xf5   :  { %1224 = vmatprep.subr.bf16.mxu1 %v14678_v32  ;;  %v14745_v32 = vld [vmem:[#allocation2 + $0x1f0] ss:$24 sps:$4 sm:$0xff]  }
  0xf7   :  { %1250 = vmatpush1.bf16.msra.mxu0 %v14679_v35  ;;  %v14780_v35 = vld [vmem:[#allocation7 + $0x34] ss:$24 sps:$4 sm:$0xff]  }
  0xf8   :  { %1225 = vmatpush2.bf16.msra.mxu1 %v14676_v34  ;;  %1251 = vmatprep.subr.bf16.mxu0 %v14687_v37  ;;  %v14753_v34 = vld [vmem:[#allocation2 + $0x1c4] ss:$24 sps:$4 sm:$0xff]   ;;  %v14759_v37 = vld [vmem:[#allocation2 + $0x194] ss:$24 sps:$4 sm:$0xff]  }
  0xf9   :  { %1226 = vmatprep.subr.bf16.mxu1 %v14684_v36  ;;  %v14751_v36 = vld [vmem:[#allocation2 + $0x1c0] ss:$24 sps:$4 sm:$0xff]  }
  0xfb   :  { %1252 = vmatpush1.bf16.msra.mxu0 %v14685_v40  ;;  %v14783_v40 = vld [vmem:[#allocation7 + $0x4] ss:$24 sps:$4 sm:$0xff]  }
  0xfc   :  { %1227 = vmatpush2.bf16.msra.mxu1 %v14682_v39  ;;  %1278 = vmatprep.subr.bf16.mxu0 %v14690_v41  ;;  %v14778_v39 = vld [vmem:[#allocation7 + $0x30] ss:$24 sps:$4 sm:$0xff]  }
  0xfd   :  { %1319 = vmatprep.subr.bf16.mxu1 %v14714_v42  ;;  %v14757_v41 = vld [vmem:[#allocation2 + $0x190] ss:$24 sps:$4 sm:$0xff]  }
  0xfe   :  { %1270 = vmatmul.mubr.bf16.vlgmr.msra.gmra.mxu0 %v17301_v38  ;;  %v14781_v42 = vld [vmem:[#allocation7] ss:$24 sps:$4 sm:$0xff]  }
  0xff   :  { %1229 = vmatmul.mubr.bf16.vlgmr.msra.gmra.mxu1 %v17314_v9  ;;  %1279 = vmatpush1.bf16.msra.mxu0 %v14688_v43  ;;  %v14786_v43 = vld [vmem:[#allocation7 + $0x454] ss:$24 sps:$4 sm:$0xff]  }
 0x100   :  { %1320 = vmatpush1.bf16.msra.mxu1 %v14712_v45  ;;  %1280 = vmatprep.subr.bf16.mxu0 %v14693_v44  ;;  %v14789_v44 = vld [vmem:[#allocation7 + $0x2d4] ss:$24 sps:$4 sm:$0xff]   ;;  %v14784_v45 = vld [vmem:[#allocation7 + $0x450] ss:$24 sps:$4 sm:$0xff]  }
 0x101   :  { %1321 = vmatprep.subr.bf16.mxu1 %v14720_v46  ;;  %1351 = vmatprep.mubr.bf16.mxu1 %v17170_v0  ;;  %v14787_v46 = vld [vmem:[#allocation7 + $0x2d0] ss:$24 sps:$4 sm:$0xff]  }
 0x102   :  { %1310 = vmatprep.mubr.bf16.mxu0 %v17307_v53  ;;  %v14736_v53 = vld [vmem:[#allocation2 + $0x3a0] ss:$24 sps:$4 sm:$0xff]  }
 0x103   :  { %1281 = vmatpush1.bf16.msra.mxu0 %v14691_v47  ;;  %v14792_v47 = vld [vmem:[#allocation7 + $0x424] ss:$24 sps:$4 sm:$0xff]  }
 0x104   :  { %1322 = vmatpush1.bf16.msra.mxu1 %v14718_v49  ;;  %1282 = vmatprep.subr.bf16.mxu0 %v14696_v48  ;;  %v14795_v48 = vld [vmem:[#allocation7 + $0x2a4] ss:$24 sps:$4 sm:$0xff]   ;;  %v14790_v49 = vld [vmem:[#allocation7 + $0x420] ss:$24 sps:$4 sm:$0xff]  }
 0x105   :  { %1323 = vmatprep.subr.bf16.mxu1 %v14726_v50  ;;  %v14793_v50 = vld [vmem:[#allocation7 + $0x2a0] ss:$24 sps:$4 sm:$0xff]  }
 0x107   :  { %1283 = vmatpush1.bf16.msra.mxu0 %v14694_v51  ;;  %v14798_v51 = vld [vmem:[#allocation7 + $0x3f4] ss:$24 sps:$4 sm:$0xff]  }
 0x108   :  { %1324 = vmatpush1.bf16.msra.mxu1 %v14724_v54  ;;  %1284 = vmatprep.subr.bf16.mxu0 %v14699_v52  ;;  %v14801_v52 = vld [vmem:[#allocation7 + $0x274] ss:$24 sps:$4 sm:$0xff]   ;;  %v14796_v54 = vld [vmem:[#allocation7 + $0x3f0] ss:$24 sps:$4 sm:$0xff]  }
 0x109   :  { %1325 = vmatprep.subr.bf16.mxu1 %v14732_v55  ;;  %v14799_v55 = vld [vmem:[#allocation7 + $0x270] ss:$24 sps:$4 sm:$0xff]  }
 0x10b   :  { %1285 = vmatpush1.bf16.msra.mxu0 %v14697_v56  ;;  %v14804_v56 = vld [vmem:[#allocation7 + $0x3c4] ss:$24 sps:$4 sm:$0xff]  }
 0x10c   :  { %1326 = vmatpush1.bf16.msra.mxu1 %v14730_v58  ;;  %1286 = vmatprep.subr.bf16.mxu0 %v14702_v57  ;;  %v14807_v57 = vld [vmem:[#allocation7 + $0x244] ss:$24 sps:$4 sm:$0xff]   ;;  %v14802_v58 = vld [vmem:[#allocation7 + $0x3c0] ss:$24 sps:$4 sm:$0xff]  }
 0x10d   :  { %1327 = vmatprep.subr.bf16.mxu1 %v14738_v59  ;;  %v14805_v59 = vld [vmem:[#allocation7 + $0x240] ss:$24 sps:$4 sm:$0xff]  }
 0x10f   :  { %1287 = vmatpush1.bf16.msra.mxu0 %v14700_v60  ;;  %v14810_v60 = vld [vmem:[#allocation7 + $0x394] ss:$24 sps:$4 sm:$0xff]  }
 0x110   :  { %1328 = vmatpush1.bf16.msra.mxu1 %v14736_v53  ;;  %1288 = vmatprep.subr.bf16.mxu0 %v14705_v61  ;;  %v14808_v61 = vld [vmem:[#allocation7 + $0x390] ss:$24 sps:$4 sm:$0xff]  }
 0x111   :  { %1329 = vmatprep.subr.bf16.mxu1 %v14744_v62  ;;  %v14811_v53 = vld [vmem:[#allocation7 + $0x210] ss:$24 sps:$4 sm:$0xff]   ;;  %v14816_v62 = vld [vmem:[#allocation7 + $0x364] ss:$24 sps:$4 sm:$0xff]  }
 0x113   :  { %1289 = vmatpush1.bf16.msra.mxu0 %v14703_v63  ;;  %v14819_v63 = vld [vmem:[#allocation7 + $0x1e4] ss:$24 sps:$4 sm:$0xff]  }
 0x114   :  { %1330 = vmatpush1.bf16.msra.mxu1 %v14742_v1  ;;  %1290 = vmatprep.subr.bf16.mxu0 %v14708_v2  ;;  %v14814_v1 = vld [vmem:[#allocation7 + $0x360] ss:$24 sps:$4 sm:$0xff]  }
 0x115   :  { %1331 = vmatprep.subr.bf16.mxu1 %v14750_v3  ;;  %v14817_v2 = vld [vmem:[#allocation7 + $0x1e0] ss:$24 sps:$4 sm:$0xff]   ;;  %v14822_v3 = vld [vmem:[#allocation7 + $0x334] ss:$24 sps:$4 sm:$0xff]  }
 0x117   :  { %1291 = vmatpush1.bf16.msra.mxu0 %v14706_v4  ;;  %v14825_v4 = vld [vmem:[#allocation7 + $0x1b4] ss:$24 sps:$4 sm:$0xff]  }
 0x118   :  { %1332 = vmatpush1.bf16.msra.mxu1 %v14748_v5  ;;  %1292 = vmatprep.subr.bf16.mxu0 %v14711_v6  ;;  %v14820_v5 = vld [vmem:[#allocation7 + $0x330] ss:$24 sps:$4 sm:$0xff]  }
 0x119   :  { %1333 = vmatprep.subr.bf16.mxu1 %v14756_v7  ;;  %v14823_v6 = vld [vmem:[#allocation7 + $0x1b0] ss:$24 sps:$4 sm:$0xff]   ;;  %v14828_v7 = vld [vmem:[#allocation7 + $0x304] ss:$24 sps:$4 sm:$0xff]  }
 0x11b   :  { %1293 = vmatpush1.bf16.msra.mxu0 %v14709_v8  ;;  %v14831_v8 = vld [vmem:[#allocation7 + $0x184] ss:$24 sps:$4 sm:$0xff]  }
 0x11c   :  { %1334 = vmatpush1.bf16.msra.mxu1 %v14754_v10  ;;  %1294 = vmatprep.subr.bf16.mxu0 %v14717_v11  ;;  %v14826_v10 = vld [vmem:[#allocation7 + $0x300] ss:$24 sps:$4 sm:$0xff]  }
 0x11d   :  { %3100 = vmatprep.subr.bf16.mxu1 %v14762_v12  ;;  %v14829_v11 = vld [vmem:[#allocation7 + $0x180] ss:$24 sps:$4 sm:$0xff]   ;;  %v14834_v12 = vld [vmem:[#allocation7 + $0x5d4] ss:$24 sps:$4 sm:$0xff]  }
 0x11f   :  { %1352 = vmatmul.mubr.bf16.vlgmr.msra.gmra.mxu1 %v17301_v38  ;;  %1295 = vmatpush2.bf16.msra.mxu0 %v14715_v13  ;;  %v14741_v38 = vld [vmem:[#allocation2 + $0x224] ss:$24 sps:$4 sm:$0xff]  }
 0x120   :  { %3101 = vmatpush1.bf16.msra.mxu1 %v14760_v14  ;;  %1296 = vmatprep.subr.bf16.mxu0 %v14723_v15  ;;  %v14858_v13 = vld [vmem:[#allocation7 + $0x754] ss:$24 sps:$4 sm:$0xff]   ;;  %v14832_v14 = vld [vmem:[#allocation7 + $0x5d0] ss:$24 sps:$4 sm:$0xff]   ;;  %v14837_v15 = vld [vmem:[#allocation7 + $0x5a4] ss:$24 sps:$4 sm:$0xff]  }
 0x121   :  { %3102 = vmatprep.subr.bf16.mxu1 %v14765_v16  ;;  %v14835_v16 = vld [vmem:[#allocation7 + $0x5a0] ss:$24 sps:$4 sm:$0xff]  }
 0x123   :  { %1297 = vmatpush2.bf16.msra.mxu0 %v14721_v17  ;;  %v14840_v17 = vld [vmem:[#allocation7 + $0x574] ss:$24 sps:$4 sm:$0xff]  }
 0x124   :  { %3103 = vmatpush1.bf16.msra.mxu1 %v14763_v18  ;;  %1298 = vmatprep.subr.bf16.mxu0 %v14729_v19  ;;  %v14838_v18 = vld [vmem:[#allocation7 + $0x570] ss:$24 sps:$4 sm:$0xff]   ;;  %v14843_v19 = vld [vmem:[#allocation7 + $0x544] ss:$24 sps:$4 sm:$0xff]  }
 0x125   :  { %3104 = vmatprep.subr.bf16.mxu1 %v14768_v20  ;;  %v14841_v20 = vld [vmem:[#allocation7 + $0x540] ss:$24 sps:$4 sm:$0xff]  }
 0x127   :  { %1299 = vmatpush2.bf16.msra.mxu0 %v14727_v21  ;;  %v14846_v21 = vld [vmem:[#allocation7 + $0x514] ss:$24 sps:$4 sm:$0xff]  }
 0x128   :  { %3105 = vmatpush1.bf16.msra.mxu1 %v14766_v22  ;;  %1300 = vmatprep.subr.bf16.mxu0 %v14735_v23  ;;  %v14844_v22 = vld [vmem:[#allocation7 + $0x510] ss:$24 sps:$4 sm:$0xff]   ;;  %v14849_v23 = vld [vmem:[#allocation7 + $0x4e4] ss:$24 sps:$4 sm:$0xff]  }
 0x129   :  { %3106 = vmatprep.subr.bf16.mxu1 %v14771_v24  ;;  %v14847_v24 = vld [vmem:[#allocation7 + $0x4e0] ss:$24 sps:$4 sm:$0xff]  }
 0x12b   :  { %1301 = vmatpush2.bf16.msra.mxu0 %v14733_v25  ;;  %v14852_v25 = vld [vmem:[#allocation7 + $0x4b4] ss:$24 sps:$4 sm:$0xff]  }
 0x12c   :  { %3107 = vmatpush1.bf16.msra.mxu1 %v14769_v26  ;;  %1302 = vmatprep.subr.bf16.mxu0 %v14741_v38  ;;  %v14850_v26 = vld [vmem:[#allocation7 + $0x4b0] ss:$24 sps:$4 sm:$0xff]   ;;  %v14855_v38 = vld [vmem:[#allocation7 + $0x484] ss:$24 sps:$4 sm:$0xff]  }
 0x12d   :  { %3108 = vmatprep.subr.bf16.mxu1 %v14774_v27  ;;  %v14853_v27 = vld [vmem:[#allocation7 + $0x480] ss:$24 sps:$4 sm:$0xff]  }
 0x12f   :  { %1303 = vmatpush2.bf16.msra.mxu0 %v14739_v28  ;;  %v14861_v28 = vld [vmem:[#allocation7 + $0x15c] ss:$24 sps:$4 sm:$0xff]  }
 0x130   :  { %3109 = vmatpush1.bf16.msra.mxu1 %v14772_v29  ;;  %1304 = vmatprep.subr.bf16.mxu0 %v14747_v30 }
 0x131   :  { %3110 = vmatprep.subr.bf16.mxu1 %v14777_v31 }
 0x133   :  { %1305 = vmatpush2.bf16.msra.mxu0 %v14745_v32 }
 0x134   :  { %3111 = vmatpush1.bf16.msra.mxu1 %v14775_v33  ;;  %1306 = vmatprep.subr.bf16.mxu0 %v14753_v34  ;;  %v364_v33 = vlaneseq }
 0x135   :  { %3112 = vmatprep.subr.bf16.mxu1 %v14780_v35 }
 0x136   :  { %v17324_v34 = vshrl.u32 %v364_v33, 7  ;;  %v14918_v33 = vld [vmem:[#allocation7 + $0x874] ss:$24 sps:$4 sm:$0xff]  }
 0x137   :  { %1307 = vmatpush2.bf16.msra.mxu0 %v14751_v36  ;;  %v17329_v36 = vld [vmem:[#allocation5] sm:$0x3f] }
 0x138   :  { %3113 = vmatpush1.bf16.msra.mxu1 %v14778_v39  ;;  %1308 = vmatprep.subr.bf16.mxu0 %v14759_v37  ;;  %v17327_v35 = vsub.s32 0, %v17324_v34  ;;  %v17332_v37 = vsub.s32 1, %v17324_v34 }
 0x139   :  { %3114 = vmatprep.subr.bf16.mxu1 %v14783_v40 }
 0x13a   :  { %v367_v39 = vrot.slane %v17329_v36, %v17327_v35  ;;  %v371_v40 = vrot.slane %v17329_v36, %v17332_v37 }
 0x13b   :  { %1309 = vmatpush2.bf16.msra.mxu0 %v14757_v41 }
 0x13c   :  { %3115 = vmatpush1.bf16.msra.mxu1 %v14781_v42  ;;  %3141 = vmatprep.subr.bf16.mxu0 %v14786_v43 }
 0x13d   :  { %3116 = vmatprep.subr.bf16.mxu1 %v14789_v44 }
 0x13e   :  { %1311 = vmatmul.mubr.bf16.vlgmr.msra.gmra.mxu0 %v17314_v9  ;;  %v14813_v9 = vld [vmem:[#allocation7 + $0x214] ss:$24 sps:$4 sm:$0xff]  }
 0x13f   :  { %3142 = vmatpush1.bf16.msra.mxu0 %v14784_v45 }
 0x140   :  { %3117 = vmatpush2.bf16.msra.mxu1 %v14787_v46  ;;  %3143 = vmatprep.subr.bf16.mxu0 %v14792_v47 }
 0x141   :  { %3118 = vmatprep.subr.bf16.mxu1 %v14795_v48 }
 0x143   :  { %3144 = vmatpush1.bf16.msra.mxu0 %v14790_v49 }
 0x144   :  { %3119 = vmatpush2.bf16.msra.mxu1 %v14793_v50  ;;  %3145 = vmatprep.subr.bf16.mxu0 %v14798_v51 }
 0x145   :  { %3120 = vmatprep.subr.bf16.mxu1 %v14801_v52  ;;  %v14856_v52 = vld [vmem:[#allocation7 + $0x750] ss:$24 sps:$4 sm:$0xff]  }
 0x147   :  { %3146 = vmatpush1.bf16.msra.mxu0 %v14796_v54 }
 0x148   :  { %3121 = vmatpush2.bf16.msra.mxu1 %v14799_v55  ;;  %3147 = vmatprep.subr.bf16.mxu0 %v14804_v56  ;;  %v14864_v55 = vld [vmem:[#allocation7 + $0x724] ss:$24 sps:$4 sm:$0xff]   ;;  %v17345_v56 = vsub.s32 2, %v17324_v34 }
 0x149   :  { %3122 = vmatprep.subr.bf16.mxu1 %v14807_v57  ;;  %v14862_v57 = vld [vmem:[#allocation7 + $0x720] ss:$24 sps:$4 sm:$0xff]  }
 0x14b   :  { %3148 = vmatpush1.bf16.msra.mxu0 %v14802_v58  ;;  %v14870_v58 = vld [vmem:[#allocation7 + $0x6f4] ss:$24 sps:$4 sm:$0xff]  }
 0x14c   :  { %3123 = vmatpush2.bf16.msra.mxu1 %v14805_v59  ;;  %3149 = vmatprep.subr.bf16.mxu0 %v14810_v60  ;;  %v17348_v59 = vsub.s32 3, %v17324_v34  ;;  %v375_v60 = vrot.slane %v17329_v36, %v17345_v56 }
 0x14d   :  { %3124 = vmatprep.subr.bf16.mxu1 %v14813_v9  ;;  %v14868_v9 = vld [vmem:[#allocation7 + $0x6f0] ss:$24 sps:$4 sm:$0xff]  }
 0x14f   :  { %3150 = vmatpush1.bf16.msra.mxu0 %v14808_v61  ;;  %v14876_v61 = vld [vmem:[#allocation7 + $0x6c4] ss:$24 sps:$4 sm:$0xff]  }
 0x150   :  { %3125 = vmatpush2.bf16.msra.mxu1 %v14811_v53  ;;  %3151 = vmatprep.subr.bf16.mxu0 %v14816_v62  ;;  %v379_v53 = vrot.slane %v17329_v36, %v17348_v59 }
 0x151   :  { %3126 = vmatprep.subr.bf16.mxu1 %v14819_v63 }
 0x153   :  { %3152 = vmatpush1.bf16.msra.mxu0 %v14814_v1 }
 0x154   :  { %3127 = vmatpush2.bf16.msra.mxu1 %v14817_v2  ;;  %3153 = vmatprep.subr.bf16.mxu0 %v14822_v3  ;;  %v14874_v2 = vld [vmem:[#allocation7 + $0x6c0] ss:$24 sps:$4 sm:$0xff]  }
 0x155   :  { %3128 = vmatprep.subr.bf16.mxu1 %v14825_v4 }
 0x157   :  { %3154 = vmatpush1.bf16.msra.mxu0 %v14820_v5  ;;  %v14882_v5 = vld [vmem:[#allocation7 + $0x694] ss:$24 sps:$4 sm:$0xff]  }
 0x158   :  { %3129 = vmatpush2.bf16.msra.mxu1 %v14823_v6  ;;  %3155 = vmatprep.subr.bf16.mxu0 %v14828_v7 }
 0x159   :  { %3130 = vmatprep.subr.bf16.mxu1 %v14831_v8 }
 0x15b   :  { %3156 = vmatpush1.bf16.msra.mxu0 %v14826_v10 }
 0x15c   :  { %3131 = vmatpush2.bf16.msra.mxu1 %v14829_v11  ;;  %3157 = vmatprep.subr.bf16.mxu0 %v14834_v12  ;;  %v14880_v12 = vld [vmem:[#allocation7 + $0x690] ss:$24 sps:$4 sm:$0xff]  }
 0x15d   :  { %3182 = vmatprep.subr.bf16.mxu1 %v14858_v13 }
 0x15f   :  { %3158 = vmatpush2.bf16.msra.mxu0 %v14832_v14 }
 0x160   :  { %3159 = vmatprep.subr.bf16.mxu0 %v14837_v15  ;;  %v14888_v15 = vld [vmem:[#allocation7 + $0x664] ss:$24 sps:$4 sm:$0xff]  }
 0x163   :  { %3160 = vmatpush2.bf16.msra.mxu0 %v14835_v16  ;;  %v14886_v16 = vld [vmem:[#allocation7 + $0x660] ss:$24 sps:$4 sm:$0xff]  }
 0x164   :  { %3161 = vmatprep.subr.bf16.mxu0 %v14840_v17  ;;  %v14894_v17 = vld [vmem:[#allocation7 + $0x634] ss:$24 sps:$4 sm:$0xff]  }
 0x167   :  { %3162 = vmatpush2.bf16.msra.mxu0 %v14838_v18  ;;  %v14892_v18 = vld [vmem:[#allocation7 + $0x630] ss:$24 sps:$4 sm:$0xff]  }
 0x168   :  { %3163 = vmatprep.subr.bf16.mxu0 %v14843_v19  ;;  %v14900_v19 = vld [vmem:[#allocation7 + $0x604] ss:$24 sps:$4 sm:$0xff]  }
 0x16b   :  { %3164 = vmatpush2.bf16.msra.mxu0 %v14841_v20  ;;  %v14898_v20 = vld [vmem:[#allocation7 + $0x600] ss:$24 sps:$4 sm:$0xff]  }
 0x16c   :  { %3165 = vmatprep.subr.bf16.mxu0 %v14846_v21  ;;  %v14906_v21 = vld [vmem:[#allocation7 + $0x8d4] ss:$24 sps:$4 sm:$0xff]  }
 0x16f   :  { %3166 = vmatpush2.bf16.msra.mxu0 %v14844_v22 }
 0x170   :  { %3167 = vmatprep.subr.bf16.mxu0 %v14849_v23  ;;  %v14859_v23 = vld [vmem:[#allocation7 + $0x158] ss:$24 sps:$4 sm:$0xff]  }
 0x173   :  { %3168 = vmatpush2.bf16.msra.mxu0 %v14847_v24 }
 0x174   :  { %3169 = vmatprep.subr.bf16.mxu0 %v14852_v25  ;;  %v14867_v25 = vld [vmem:[#allocation7 + $0x12c] ss:$24 sps:$4 sm:$0xff]  }
 0x177   :  { %3170 = vmatpush2.bf16.msra.mxu0 %v14850_v26  ;;  %v14904_v26 = vld [vmem:[#allocation7 + $0x8d0] ss:$24 sps:$4 sm:$0xff]  }
 0x178   :  { %3171 = vmatprep.subr.bf16.mxu0 %v14855_v38 }
 0x17b   :  { %3172 = vmatpush2.bf16.msra.mxu0 %v14853_v27 }
 0x17c   :  { %3223 = vmatprep.subr.bf16.mxu0 %v14861_v28  ;;  %v14912_v28 = vld [vmem:[#allocation7 + $0x8a4] ss:$24 sps:$4 sm:$0xff]  }
 0x17f   :  { %v1189_v29 = vpop.f32.mrf.mxu1 }
 0x181   :  { %v1191_v30 = vpop.f32.mrf.mxu1 }
 0x183   :  { %v1193_v31 = vpop.f32.mrf.mxu1 }
 0x184   :  { %v14910_v31 = vld [vmem:[#allocation7 + $0x8a0] ss:$24 sps:$4 sm:$0xff]  }
 0x185   :  { %v1194_v32 = vpop.f32.mrf.mxu1 }
 0x186   :  { %v14871_v32 = vld [vmem:[#allocation7 + $0xf8] ss:$24 sps:$4 sm:$0xff]  }
 0x19e   :  { %v1148_v41 = vpop.f32.mrf.mxu0 }
 0x19f   :  { %v1149_v42 = vadd.f32 %v1148_v41, %v367_v39  ;;  %v14879_v39 = vld [vmem:[#allocation7 + $0xcc] ss:$24 sps:$4 sm:$0xff]   ;;  %v14877_v41 = vld [vmem:[#allocation7 + $0xc8] ss:$24 sps:$4 sm:$0xff]  }
 0x1a0   :  { %v1150_v43 = vpop.f32.mrf.mxu0 }
 0x1a1   :  { %v1190_v44 = vadd.f32 %v1189_v29, %v1149_v42  ;;  %v1151_v45 = vadd.f32 %v1150_v43, %v371_v40  ;;  %v14865_v29 = vld [vmem:[#allocation7 + $0x128] ss:$24 sps:$4 sm:$0xff]   ;;  %v14924_v42 = vld [vmem:[#allocation7 + $0x844] ss:$24 sps:$4 sm:$0xff]  }
 0x1a2   :  { %v1152_v46 = vpop.f32.mrf.mxu0  ;;  %v14916_v40 = vld [vmem:[#allocation7 + $0x870] ss:$24 sps:$4 sm:$0xff]  }
 0x1a3   :  { %v1192_v47 = vadd.f32 %v1191_v30, %v1151_v45  ;;  %16744 = vtanh.f32 %v1190_v44  ;;  %v14873_v30 = vld [vmem:[#allocation7 + $0xfc] ss:$24 sps:$4 sm:$0xff]   ;;  %v14922_v46 = vld [vmem:[#allocation7 + $0x840] ss:$24 sps:$4 sm:$0xff]  }
 0x1a4   :  { %v1153_v48 = vpop.f32.mrf.mxu0  ;;  %v14885_v44 = vld [vmem:[#allocation7 + $0x9c] ss:$24 sps:$4 sm:$0xff]  }
 0x1a5   :  { %16746 = vtanh.f32 %v1192_v47  ;;  %v14883_v47 = vld [vmem:[#allocation7 + $0x98] ss:$24 sps:$4 sm:$0xff]   ;;  %v14930_v48 = vld [vmem:[#allocation7 + $0x814] ss:$24 sps:$4 sm:$0xff]  }
 0x1b0   :  { %v16745_v49 = vpop.eup %16744 }
 0x1b1   :  { %v17340_v54 = vpack.c.bf16 %v16745_v49, %v16745_v49 }
 0x1b2   :  { %v16747_v50 = vpop.eup %16746 }
 0x1b3   :  { %v17338_v51 = vpack.c.bf16 %v16747_v50, %v16747_v50  ;;  %v14891_v50 = vld [vmem:[#allocation7 + $0x6c] ss:$24 sps:$4 sm:$0xff]  }
 0x1b5   :  { %3132 = vmatprep.mubr.bf16.mxu1 %v17338_v51 }
 0x1b6   :  { %3133 = vmatmul.mubr.bf16.vlgmr.msra.gmra.mxu1 %v17340_v54 }
 0x1b7   :  { %3183 = vmatpush1.bf16.msra.mxu1 %v14856_v52 }
 0x1b8   :  { %3184 = vmatprep.subr.bf16.mxu1 %v14864_v55  ;;  %v14928_v55 = vld [vmem:[#allocation7 + $0x810] ss:$24 sps:$4 sm:$0xff]  }
 0x1bb   :  { %3185 = vmatpush1.bf16.msra.mxu1 %v14862_v57  ;;  %v14889_v57 = vld [vmem:[#allocation7 + $0x68] ss:$24 sps:$4 sm:$0xff]  }
 0x1bc   :  { %3186 = vmatprep.subr.bf16.mxu1 %v14870_v58  ;;  %v14936_v58 = vld [vmem:[#allocation7 + $0x7e4] ss:$24 sps:$4 sm:$0xff]  }
 0x1be   :  { %v1271_v63 = vpop.f32.mrf.mxu0 }
 0x1bf   :  { %v1230_v62 = vpop.f32.mrf.mxu1  ;;  %3187 = vmatpush1.bf16.msra.mxu1 %v14868_v9  ;;  %v14934_v9 = vld [vmem:[#allocation7 + $0x7e0] ss:$24 sps:$4 sm:$0xff]  }
 0x1c0   :  { %v1231_v1 = vadd.f32 %v1230_v62, %v375_v60  ;;  %v1273_v4 = vpop.f32.mrf.mxu0  ;;  %3188 = vmatprep.subr.bf16.mxu1 %v14876_v61  ;;  %v14897_v60 = vld [vmem:[#allocation7 + $0x3c] ss:$24 sps:$4 sm:$0xff]   ;;  %v14895_v61 = vld [vmem:[#allocation7 + $0x38] ss:$24 sps:$4 sm:$0xff]   ;;  %v14903_v62 = vld [vmem:[#allocation7 + $0xc] ss:$24 sps:$4 sm:$0xff]  }
 0x1c1   :  { %v1232_v3 = vpop.f32.mrf.mxu1 }
 0x1c2   :  { %v1272_v6 = vadd.f32 %v1271_v63, %v1231_v1  ;;  %v1233_v7 = vadd.f32 %v1232_v3, %v379_v53  ;;  %v1275_v8 = vpop.f32.mrf.mxu0  ;;  %v14942_v53 = vld [vmem:[#allocation7 + $0x7b4] ss:$24 sps:$4 sm:$0xff]   ;;  %v14940_v63 = vld [vmem:[#allocation7 + $0x7b0] ss:$24 sps:$4 sm:$0xff]  }
 0x1c3   :  { %v1234_v10 = vpop.f32.mrf.mxu1  ;;  %3189 = vmatpush1.bf16.msra.mxu1 %v14874_v2  ;;  %v14901_v1 = vld [vmem:[#allocation7 + $0x8] ss:$24 sps:$4 sm:$0xff]   ;;  %v14948_v2 = vld [vmem:[#allocation7 + $0x784] ss:$24 sps:$4 sm:$0xff]  }
 0x1c4   :  { %v1274_v11 = vadd.f32 %v1273_v4, %v1233_v7  ;;  %16748 = vtanh.f32 %v1272_v6  ;;  %v1276_v13 = vpop.f32.mrf.mxu0  ;;  %3190 = vmatprep.subr.bf16.mxu1 %v14882_v5  ;;  %v14909_v3 = vld [vmem:[#allocation7 + $0x2dc] ss:$24 sps:$4 sm:$0xff]   ;;  %v14946_v4 = vld [vmem:[#allocation7 + $0x780] ss:$24 sps:$4 sm:$0xff]   ;;  %v14915_v7 = vld [vmem:[#allocation7 + $0x2ac] ss:$24 sps:$4 sm:$0xff]  }
 0x1c5   :  { %v1235_v14 = vpop.f32.mrf.mxu1  ;;  %v14907_v5 = vld [vmem:[#allocation7 + $0x2d8] ss:$24 sps:$4 sm:$0xff]   ;;  %v14954_v6 = vld [vmem:[#allocation7 + $0x45c] ss:$24 sps:$4 sm:$0xff]   ;;  %v14913_v8 = vld [vmem:[#allocation7 + $0x2a8] ss:$24 sps:$4 sm:$0xff]  }
 0x1c6   :  { %16750 = vtanh.f32 %v1274_v11  ;;  %v17366_v10 = vsub.s32 4, %v17324_v34  ;;  %v14921_v11 = vld [vmem:[#allocation7 + $0x27c] ss:$24 sps:$4 sm:$0xff]   ;;  %v17369_v13 = vsub.s32 5, %v17324_v34 }
 0x1c7   :  { %3191 = vmatpush1.bf16.msra.mxu1 %v14880_v12  ;;  %v14919_v12 = vld [vmem:[#allocation7 + $0x278] ss:$24 sps:$4 sm:$0xff]  }
 0x1c8   :  { %3192 = vmatprep.subr.bf16.mxu1 %v14888_v15  ;;  %v383_v14 = vrot.slane %v17329_v36, %v17366_v10  ;;  %v14927_v15 = vld [vmem:[#allocation7 + $0x24c] ss:$24 sps:$4 sm:$0xff]  }
 0x1cb   :  { %3193 = vmatpush1.bf16.msra.mxu1 %v14886_v16  ;;  %v387_v16 = vrot.slane %v17329_v36, %v17369_v13  ;;  %v14937_v36 = vld [vmem:[#allocation7 + $0x1e8] ss:$24 sps:$4 sm:$0xff]  }
 0x1cc   :  { %3194 = vmatprep.subr.bf16.mxu1 %v14894_v17  ;;  %v14925_v17 = vld [vmem:[#allocation7 + $0x248] ss:$24 sps:$4 sm:$0xff]  }
 0x1cf   :  { %3195 = vmatpush1.bf16.msra.mxu1 %v14892_v18 }
 0x1d0   :  { %3196 = vmatprep.subr.bf16.mxu1 %v14900_v19 }
 0x1d1   :  { %v16749_v22 = vpop.eup %16748 }
 0x1d2   :  { %v17356_v27 = vpack.c.bf16 %v16749_v22, %v16749_v22 }
 0x1d3   :  { %v16751_v24 = vpop.eup %16750  ;;  %3197 = vmatpush1.bf16.msra.mxu1 %v14898_v20 }
 0x1d4   :  { %v17354_v38 = vpack.c.bf16 %v16751_v24, %v16751_v24  ;;  %3198 = vmatprep.subr.bf16.mxu1 %v14906_v21  ;;  %v14933_v21 = vld [vmem:[#allocation7 + $0x21c] ss:$24 sps:$4 sm:$0xff]   ;;  %v14931_v24 = vld [vmem:[#allocation7 + $0x218] ss:$24 sps:$4 sm:$0xff]  }
 0x1d6   :  { %3173 = vmatprep.mubr.bf16.mxu0 %v17354_v38 }
 0x1d7   :  { %3174 = vmatmul.mubr.bf16.vlgmr.msra.gmra.mxu0 %v17356_v27  ;;  %3199 = vmatpush2.bf16.msra.mxu1 %v14904_v26 }
 0x1d8   :  { %3224 = vmatpush1.bf16.msra.mxu0 %v14859_v23  ;;  %3255 = vmatprep.mubr.bf16.mxu0 %v17338_v51 }
 0x1d9   :  { %3225 = vmatprep.subr.bf16.mxu0 %v14867_v25  ;;  %3200 = vmatprep.subr.bf16.mxu1 %v14912_v28 }
 0x1db   :  { %3201 = vmatpush2.bf16.msra.mxu1 %v14910_v31  ;;  %v14943_v31 = vld [vmem:[#allocation7 + $0x1b8] ss:$24 sps:$4 sm:$0xff]  }
 0x1dc   :  { %3226 = vmatpush1.bf16.msra.mxu0 %v14865_v29  ;;  %3202 = vmatprep.subr.bf16.mxu1 %v14918_v33  ;;  %v14939_v29 = vld [vmem:[#allocation7 + $0x1ec] ss:$24 sps:$4 sm:$0xff]   ;;  %v14949_v33 = vld [vmem:[#allocation7 + $0x188] ss:$24 sps:$4 sm:$0xff]  }
 0x1dd   :  { %3227 = vmatprep.subr.bf16.mxu0 %v14873_v30  ;;  %v14945_v30 = vld [vmem:[#allocation7 + $0x1bc] ss:$24 sps:$4 sm:$0xff]  }
 0x1df   :  { %v17361_v43 = vpop.f32.mrf.mxu1  ;;  %3203 = vmatpush2.bf16.msra.mxu1 %v14916_v40 }
 0x1e0   :  { %3228 = vmatpush1.bf16.msra.mxu0 %v14871_v32  ;;  %3204 = vmatprep.subr.bf16.mxu1 %v14924_v42  ;;  %v14951_v32 = vld [vmem:[#allocation7 + $0x18c] ss:$24 sps:$4 sm:$0xff]   ;;  %v14955_v42 = vld [vmem:[#allocation7 + $0x758] ss:$24 sps:$4 sm:$0xff]  }
 0x1e1   :  { %3229 = vmatprep.subr.bf16.mxu0 %v14879_v39  ;;  %v17363_v45 = vpop.f32.mrf.mxu1  ;;  %v14957_v39 = vld [vmem:[#allocation7 + $0x75c] ss:$24 sps:$4 sm:$0xff]  }
 0x1e3   :  { %v1357_v49 = vpop.f32.mrf.mxu1  ;;  %3205 = vmatpush2.bf16.msra.mxu1 %v14922_v46 }
 0x1e4   :  { %3230 = vmatpush1.bf16.msra.mxu0 %v14877_v41  ;;  %3206 = vmatprep.subr.bf16.mxu1 %v14930_v48  ;;  %v14952_v41 = vld [vmem:[#allocation7 + $0x458] ss:$24 sps:$4 sm:$0xff]   ;;  %v14961_v48 = vld [vmem:[#allocation7 + $0x728] ss:$24 sps:$4 sm:$0xff]   ;;  %v14963_v49 = vld [vmem:[#allocation7 + $0x72c] ss:$24 sps:$4 sm:$0xff]  }
 0x1e5   :  { %3231 = vmatprep.subr.bf16.mxu0 %v14885_v44  ;;  %v1358_v52 = vpop.f32.mrf.mxu1 }
 0x1e6   :  { %v14969_v52 = vld [vmem:[#allocation7 + $0x6fc] ss:$24 sps:$4 sm:$0xff]  }
 0x1e7   :  { %3207 = vmatpush2.bf16.msra.mxu1 %v14928_v55  ;;  %v14964_v55 = vld [vmem:[#allocation7 + $0x3f8] ss:$24 sps:$4 sm:$0xff]  }
 0x1e8   :  { %3232 = vmatpush1.bf16.msra.mxu0 %v14883_v47  ;;  %3208 = vmatprep.subr.bf16.mxu1 %v14936_v58  ;;  %v14958_v47 = vld [vmem:[#allocation7 + $0x428] ss:$24 sps:$4 sm:$0xff]   ;;  %v14972_v58 = vld [vmem:[#allocation7 + $0x3cc] ss:$24 sps:$4 sm:$0xff]  }
 0x1e9   :  { %3233 = vmatprep.subr.bf16.mxu0 %v14891_v50  ;;  %v14966_v50 = vld [vmem:[#allocation7 + $0x3fc] ss:$24 sps:$4 sm:$0xff]  }
 0x1eb   :  { %3209 = vmatpush2.bf16.msra.mxu1 %v14934_v9  ;;  %v14970_v9 = vld [vmem:[#allocation7 + $0x3c8] ss:$24 sps:$4 sm:$0xff]  }
 0x1ec   :  { %3234 = vmatpush1.bf16.msra.mxu0 %v14889_v57  ;;  %3210 = vmatprep.subr.bf16.mxu1 %v14942_v53  ;;  %v14967_v57 = vld [vmem:[#allocation7 + $0x6f8] ss:$24 sps:$4 sm:$0xff]   ;;  %v14978_v53 = vld [vmem:[#allocation7 + $0x39c] ss:$24 sps:$4 sm:$0xff]  }
 0x1ed   :  { %3235 = vmatprep.subr.bf16.mxu0 %v14897_v60  ;;  %v14975_v60 = vld [vmem:[#allocation7 + $0x6cc] ss:$24 sps:$4 sm:$0xff]  }
 0x1ef   :  { %3211 = vmatpush2.bf16.msra.mxu1 %v14940_v63  ;;  %v14976_v63 = vld [vmem:[#allocation7 + $0x398] ss:$24 sps:$4 sm:$0xff]  }
 0x1f0   :  { %3236 = vmatpush1.bf16.msra.mxu0 %v14895_v61  ;;  %3212 = vmatprep.subr.bf16.mxu1 %v14948_v2  ;;  %v14973_v61 = vld [vmem:[#allocation7 + $0x6c8] ss:$24 sps:$4 sm:$0xff]   ;;  %v14984_v2 = vld [vmem:[#allocation7 + $0x36c] ss:$24 sps:$4 sm:$0xff]  }
 0x1f1   :  { %3237 = vmatprep.subr.bf16.mxu0 %v14903_v62  ;;  %v14981_v62 = vld [vmem:[#allocation7 + $0x69c] ss:$24 sps:$4 sm:$0xff]  }
 0x1f3   :  { %3213 = vmatpush2.bf16.msra.mxu1 %v14946_v4  ;;  %v14982_v4 = vld [vmem:[#allocation7 + $0x368] ss:$24 sps:$4 sm:$0xff]  }
 0x1f4   :  { %3238 = vmatpush1.bf16.msra.mxu0 %v14901_v1  ;;  %3264 = vmatprep.subr.bf16.mxu1 %v14954_v6  ;;  %v14979_v1 = vld [vmem:[#allocation7 + $0x698] ss:$24 sps:$4 sm:$0xff]   ;;  %v14990_v6 = vld [vmem:[#allocation7 + $0x33c] ss:$24 sps:$4 sm:$0xff]  }
 0x1f5   :  { %3239 = vmatprep.subr.bf16.mxu0 %v14909_v3  ;;  %v14987_v3 = vld [vmem:[#allocation7 + $0x66c] ss:$24 sps:$4 sm:$0xff]  }
 0x1f8   :  { %3240 = vmatpush2.bf16.msra.mxu0 %v14907_v5  ;;  %v14985_v5 = vld [vmem:[#allocation7 + $0x668] ss:$24 sps:$4 sm:$0xff]  }
 0x1f9   :  { %3241 = vmatprep.subr.bf16.mxu0 %v14915_v7  ;;  %v14993_v7 = vld [vmem:[#allocation7 + $0x63c] ss:$24 sps:$4 sm:$0xff]  }
 0x1fc   :  { %3242 = vmatpush2.bf16.msra.mxu0 %v14913_v8  ;;  %v14988_v8 = vld [vmem:[#allocation7 + $0x338] ss:$24 sps:$4 sm:$0xff]  }
 0x1fd   :  { %3243 = vmatprep.subr.bf16.mxu0 %v14921_v11  ;;  %v14991_v11 = vld [vmem:[#allocation7 + $0x638] ss:$24 sps:$4 sm:$0xff]  }
 0x1fe   :  { %v1312_v18 = vpop.f32.mrf.mxu0 }
 0x1ff   :  { %v1313_v19 = vadd.f32 %v1312_v18, %v383_v14  ;;  %v14999_v14 = vld [vmem:[#allocation7 + $0x60c] ss:$24 sps:$4 sm:$0xff]   ;;  %v15005_v18 = vld [vmem:[#allocation7 + $0x8dc] ss:$24 sps:$4 sm:$0xff]  }
 0x200   :  { %3244 = vmatpush2.bf16.msra.mxu0 %v14919_v12  ;;  %v1314_v20 = vpop.f32.mrf.mxu0  ;;  %v14996_v12 = vld [vmem:[#allocation7 + $0x30c] ss:$24 sps:$4 sm:$0xff]  }
 0x201   :  { %3245 = vmatprep.subr.bf16.mxu0 %v14927_v15  ;;  %v1354_v22 = vadd.f32 %v17361_v43, %v1313_v19  ;;  %v1315_v23 = vadd.f32 %v1314_v20, %v387_v16  ;;  %v14994_v15 = vld [vmem:[#allocation7 + $0x308] ss:$24 sps:$4 sm:$0xff]   ;;  %v15000_v19 = vld [vmem:[#allocation7 + $0x5d8] ss:$24 sps:$4 sm:$0xff]  }
 0x202   :  { %v1316_v25 = vpop.f32.mrf.mxu0  ;;  %v14997_v16 = vld [vmem:[#allocation7 + $0x608] ss:$24 sps:$4 sm:$0xff]   ;;  %v15003_v20 = vld [vmem:[#allocation7 + $0x8d8] ss:$24 sps:$4 sm:$0xff]  }
 0x203   :  { %v1356_v26 = vadd.f32 %v17363_v45, %v1315_v23  ;;  %16752 = vtanh.f32 %v1354_v22  ;;  %v14960_v45 = vld [vmem:[#allocation7 + $0x42c] ss:$24 sps:$4 sm:$0xff]   ;;  %v15006_v23 = vld [vmem:[#allocation7 + $0x5a8] ss:$24 sps:$4 sm:$0xff]   ;;  %v15014_v25 = vld [vmem:[#allocation7 + $0x57c] ss:$24 sps:$4 sm:$0xff]  }
 0x204   :  { %3246 = vmatpush2.bf16.msra.mxu0 %v14925_v17  ;;  %v1317_v28 = vpop.f32.mrf.mxu0  ;;  %v15002_v17 = vld [vmem:[#allocation7 + $0x5dc] ss:$24 sps:$4 sm:$0xff]   ;;  %v15011_v22 = vld [vmem:[#allocation7 + $0x8ac] ss:$24 sps:$4 sm:$0xff]  }
 0x205   :  { %3247 = vmatprep.subr.bf16.mxu0 %v14933_v21  ;;  %16754 = vtanh.f32 %v1356_v26  ;;  %v15008_v21 = vld [vmem:[#allocation7 + $0x5ac] ss:$24 sps:$4 sm:$0xff]   ;;  %v15017_v26 = vld [vmem:[#allocation7 + $0x87c] ss:$24 sps:$4 sm:$0xff]   ;;  %v15012_v28 = vld [vmem:[#allocation7 + $0x578] ss:$24 sps:$4 sm:$0xff]  }
 0x208   :  { %3248 = vmatpush2.bf16.msra.mxu0 %v14931_v24  ;;  %v15009_v24 = vld [vmem:[#allocation7 + $0x8a8] ss:$24 sps:$4 sm:$0xff]  }
 0x209   :  { %3249 = vmatprep.subr.bf16.mxu0 %v14939_v29  ;;  %v15015_v29 = vld [vmem:[#allocation7 + $0x878] ss:$24 sps:$4 sm:$0xff]  }
 0x20c   :  { %3250 = vmatpush2.bf16.msra.mxu0 %v14937_v36  ;;  %v15020_v36 = vld [vmem:[#allocation7 + $0x54c] ss:$24 sps:$4 sm:$0xff]  }
 0x20d   :  { %3251 = vmatprep.subr.bf16.mxu0 %v14945_v30  ;;  %v15023_v30 = vld [vmem:[#allocation7 + $0x84c] ss:$24 sps:$4 sm:$0xff]  }
 0x210   :  { %3252 = vmatpush2.bf16.msra.mxu0 %v14943_v31  ;;  %v16753_v40 = vpop.eup %16752  ;;  %v15018_v31 = vld [vmem:[#allocation7 + $0x548] ss:$24 sps:$4 sm:$0xff]  }
 0x211   :  { %3253 = vmatprep.subr.bf16.mxu0 %v14951_v32  ;;  %v17379_v46 = vpack.c.bf16 %v16753_v40, %v16753_v40  ;;  %v15021_v32 = vld [vmem:[#allocation7 + $0x848] ss:$24 sps:$4 sm:$0xff]   ;;  %v15024_v40 = vld [vmem:[#allocation7 + $0x518] ss:$24 sps:$4 sm:$0xff]  }
 0x212   :  { %v16755_v43 = vpop.eup %16754 }
 0x213   :  { %v17377_v44 = vpack.c.bf16 %v16755_v43, %v16755_v43  ;;  %v15035_v43 = vld [vmem:[#allocation7 + $0x7ec] ss:$24 sps:$4 sm:$0xff]  }
 0x214   :  { %3254 = vmatpush2.bf16.msra.mxu0 %v14949_v33  ;;  %v15026_v33 = vld [vmem:[#allocation7 + $0x51c] ss:$24 sps:$4 sm:$0xff]  }
 0x215   :  { %3305 = vmatprep.subr.bf16.mxu0 %v14957_v39  ;;  %3214 = vmatprep.mubr.bf16.mxu1 %v17377_v44  ;;  %v15029_v39 = vld [vmem:[#allocation7 + $0x81c] ss:$24 sps:$4 sm:$0xff]  }
 0x216   :  { %3215 = vmatmul.mubr.bf16.vlgmr.msra.gmra.mxu1 %v17379_v46 }
 0x217   :  { %3256 = vmatmul.mubr.bf16.vlgmr.msra.gmra.mxu0 %v17340_v54  ;;  %3265 = vmatpush1.bf16.msra.mxu1 %v14952_v41  ;;  %v15027_v41 = vld [vmem:[#allocation7 + $0x818] ss:$24 sps:$4 sm:$0xff]  }
 0x218   :  { %3306 = vmatpush1.bf16.msra.mxu0 %v14955_v42  ;;  %3337 = vmatprep.mubr.bf16.mxu0 %v17377_v44  ;;  %v15032_v42 = vld [vmem:[#allocation7 + $0x4ec] ss:$24 sps:$4 sm:$0xff]  }
 0x219   :  { %3296 = vmatprep.mubr.bf16.mxu1 %v17354_v38  ;;  %3266 = vmatprep.subr.bf16.mxu1 %v14960_v45  ;;  %v15030_v45 = vld [vmem:[#allocation7 + $0x4e8] ss:$24 sps:$4 sm:$0xff]  }
 0x21a   :  { %3307 = vmatprep.subr.bf16.mxu0 %v14963_v49  ;;  %v15041_v49 = vld [vmem:[#allocation7 + $0x7bc] ss:$24 sps:$4 sm:$0xff]  }
 0x21b   :  { %3267 = vmatpush1.bf16.msra.mxu1 %v14958_v47  ;;  %v15033_v47 = vld [vmem:[#allocation7 + $0x7e8] ss:$24 sps:$4 sm:$0xff]  }
 0x21c   :  { %3308 = vmatpush1.bf16.msra.mxu0 %v14961_v48  ;;  %3268 = vmatprep.subr.bf16.mxu1 %v14966_v50  ;;  %v15038_v48 = vld [vmem:[#allocation7 + $0x4bc] ss:$24 sps:$4 sm:$0xff]   ;;  %v15036_v50 = vld [vmem:[#allocation7 + $0x4b8] ss:$24 sps:$4 sm:$0xff]  }
 0x21d   :  { %3309 = vmatprep.subr.bf16.mxu0 %v14969_v52  ;;  %v15039_v52 = vld [vmem:[#allocation7 + $0x7b8] ss:$24 sps:$4 sm:$0xff]  }
 0x21f   :  { %3269 = vmatpush1.bf16.msra.mxu1 %v14964_v55  ;;  %v15044_v55 = vld [vmem:[#allocation7 + $0x48c] ss:$24 sps:$4 sm:$0xff]  }
 0x220   :  { %3310 = vmatpush1.bf16.msra.mxu0 %v14967_v57  ;;  %3270 = vmatprep.subr.bf16.mxu1 %v14972_v58  ;;  %v15047_v57 = vld [vmem:[#allocation7 + $0x78c] ss:$24 sps:$4 sm:$0xff]   ;;  %v15042_v58 = vld [vmem:[#allocation7 + $0x488] ss:$24 sps:$4 sm:$0xff]  }
 0x221   :  { %3311 = vmatprep.subr.bf16.mxu0 %v14975_v60  ;;  %v15045_v60 = vld [vmem:[#allocation7 + $0x788] ss:$24 sps:$4 sm:$0xff]  }
 0x223   :  { %3271 = vmatpush1.bf16.msra.mxu1 %v14970_v9  ;;  %v15050_v9 = vld [vmem:[#allocation7 + $0x164] ss:$24 sps:$4 sm:$0xff]  }
 0x224   :  { %3312 = vmatpush1.bf16.msra.mxu0 %v14973_v61  ;;  %3272 = vmatprep.subr.bf16.mxu1 %v14978_v53  ;;  %v15053_v61 = vld [vmem:[#allocation7 + $0x464] ss:$24 sps:$4 sm:$0xff]   ;;  %v15048_v53 = vld [vmem:[#allocation7 + $0x160] ss:$24 sps:$4 sm:$0xff]  }
 0x225   :  { %3313 = vmatprep.subr.bf16.mxu0 %v14981_v62  ;;  %v15051_v62 = vld [vmem:[#allocation7 + $0x460] ss:$24 sps:$4 sm:$0xff]  }
 0x227   :  { %3273 = vmatpush1.bf16.msra.mxu1 %v14976_v63  ;;  %v15056_v63 = vld [vmem:[#allocation7 + $0x134] ss:$24 sps:$4 sm:$0xff]  }
 0x228   :  { %3314 = vmatpush1.bf16.msra.mxu0 %v14979_v1  ;;  %3274 = vmatprep.subr.bf16.mxu1 %v14984_v2  ;;  %v15059_v1 = vld [vmem:[#allocation7 + $0x434] ss:$24 sps:$4 sm:$0xff]   ;;  %v15054_v2 = vld [vmem:[#allocation7 + $0x130] ss:$24 sps:$4 sm:$0xff]  }
 0x229   :  { %3315 = vmatprep.subr.bf16.mxu0 %v14987_v3  ;;  %v15057_v3 = vld [vmem:[#allocation7 + $0x430] ss:$24 sps:$4 sm:$0xff]  }
 0x22b   :  { %3275 = vmatpush1.bf16.msra.mxu1 %v14982_v4  ;;  %v15062_v4 = vld [vmem:[#allocation7 + $0x104] ss:$24 sps:$4 sm:$0xff]  }
 0x22c   :  { %3316 = vmatpush1.bf16.msra.mxu0 %v14985_v5  ;;  %3276 = vmatprep.subr.bf16.mxu1 %v14990_v6  ;;  %v15060_v5 = vld [vmem:[#allocation7 + $0x100] ss:$24 sps:$4 sm:$0xff]   ;;  %v15065_v6 = vld [vmem:[#allocation7 + $0x404] ss:$24 sps:$4 sm:$0xff]  }
 0x22d   :  { %3317 = vmatprep.subr.bf16.mxu0 %v14993_v7  ;;  %v15063_v7 = vld [vmem:[#allocation7 + $0x400] ss:$24 sps:$4 sm:$0xff]  }
 0x22f   :  { %3277 = vmatpush1.bf16.msra.mxu1 %v14988_v8  ;;  %v15068_v8 = vld [vmem:[#allocation7 + $0xd4] ss:$24 sps:$4 sm:$0xff]  }
 0x230   :  { %3318 = vmatpush1.bf16.msra.mxu0 %v14991_v11  ;;  %3278 = vmatprep.subr.bf16.mxu1 %v14996_v12  ;;  %v15066_v11 = vld [vmem:[#allocation7 + $0xd0] ss:$24 sps:$4 sm:$0xff]   ;;  %v15071_v12 = vld [vmem:[#allocation7 + $0x3d4] ss:$24 sps:$4 sm:$0xff]  }
 0x231   :  { %3319 = vmatprep.subr.bf16.mxu0 %v14999_v14  ;;  %v15069_v14 = vld [vmem:[#allocation7 + $0x3d0] ss:$24 sps:$4 sm:$0xff]  }
 0x233   :  { %3279 = vmatpush1.bf16.msra.mxu1 %v14994_v15  ;;  %v15077_v15 = vld [vmem:[#allocation7 + $0x3a4] ss:$24 sps:$4 sm:$0xff]  }
 0x234   :  { %3320 = vmatpush1.bf16.msra.mxu0 %v14997_v16  ;;  %3280 = vmatprep.subr.bf16.mxu1 %v15002_v17  ;;  %v15075_v16 = vld [vmem:[#allocation7 + $0x3a0] ss:$24 sps:$4 sm:$0xff]   ;;  %v15080_v17 = vld [vmem:[#allocation7 + $0x74] ss:$24 sps:$4 sm:$0xff]  }
 0x235   :  { %3321 = vmatprep.subr.bf16.mxu0 %v15005_v18  ;;  %v15078_v18 = vld [vmem:[#allocation7 + $0x70] ss:$24 sps:$4 sm:$0xff]  }
 0x237   :  { %3281 = vmatpush2.bf16.msra.mxu1 %v15000_v19  ;;  %v15083_v19 = vld [vmem:[#allocation7 + $0x374] ss:$24 sps:$4 sm:$0xff]  }
 0x238   :  { %3322 = vmatpush2.bf16.msra.mxu0 %v15003_v20  ;;  %3282 = vmatprep.subr.bf16.mxu1 %v15008_v21  ;;  %v15081_v20 = vld [vmem:[#allocation7 + $0x370] ss:$24 sps:$4 sm:$0xff]   ;;  %v15086_v21 = vld [vmem:[#allocation7 + $0x44] ss:$24 sps:$4 sm:$0xff]  }
 0x239   :  { %3323 = vmatprep.subr.bf16.mxu0 %v15011_v22  ;;  %v15084_v22 = vld [vmem:[#allocation7 + $0x40] ss:$24 sps:$4 sm:$0xff]  }
 0x23b   :  { %3283 = vmatpush2.bf16.msra.mxu1 %v15006_v23  ;;  %v15089_v23 = vld [vmem:[#allocation7 + $0x344] ss:$24 sps:$4 sm:$0xff]  }
 0x23c   :  { %3324 = vmatpush2.bf16.msra.mxu0 %v15009_v24  ;;  %3284 = vmatprep.subr.bf16.mxu1 %v15014_v25  ;;  %v15087_v24 = vld [vmem:[#allocation7 + $0x340] ss:$24 sps:$4 sm:$0xff]   ;;  %v15092_v25 = vld [vmem:[#allocation7 + $0x14] ss:$24 sps:$4 sm:$0xff]  }
 0x23d   :  { %3325 = vmatprep.subr.bf16.mxu0 %v15017_v26  ;;  %v15090_v26 = vld [vmem:[#allocation7 + $0x10] ss:$24 sps:$4 sm:$0xff]  }
 0x23f   :  { %3285 = vmatpush2.bf16.msra.mxu1 %v15012_v28  ;;  %v15095_v28 = vld [vmem:[#allocation7 + $0x314] ss:$24 sps:$4 sm:$0xff]  }
 0x240   :  { %3326 = vmatpush2.bf16.msra.mxu0 %v15015_v29  ;;  %3286 = vmatprep.subr.bf16.mxu1 %v15020_v36  ;;  %v15093_v29 = vld [vmem:[#allocation7 + $0x310] ss:$24 sps:$4 sm:$0xff]   ;;  %v15098_v36 = vld [vmem:[#allocation7 + $0x2e4] ss:$24 sps:$4 sm:$0xff]  }
 0x241   :  { %3327 = vmatprep.subr.bf16.mxu0 %v15023_v30  ;;  %v15096_v30 = vld [vmem:[#allocation7 + $0x2e0] ss:$24 sps:$4 sm:$0xff]  }
 0x243   :  { %3287 = vmatpush2.bf16.msra.mxu1 %v15018_v31  ;;  %v15101_v31 = vld [vmem:[#allocation7 + $0x5e4] ss:$24 sps:$4 sm:$0xff]  }
 0x244   :  { %3328 = vmatpush2.bf16.msra.mxu0 %v15021_v32  ;;  %3288 = vmatprep.subr.bf16.mxu1 %v15026_v33  ;;  %v15099_v32 = vld [vmem:[#allocation7 + $0x5e0] ss:$24 sps:$4 sm:$0xff]   ;;  %v15104_v33 = vld [vmem:[#allocation7 + $0x2b4] ss:$24 sps:$4 sm:$0xff]  }
 0x245   :  { %3329 = vmatprep.subr.bf16.mxu0 %v15029_v39  ;;  %v15102_v39 = vld [vmem:[#allocation7 + $0x2b0] ss:$24 sps:$4 sm:$0xff]  }
 0x247   :  { %3289 = vmatpush2.bf16.msra.mxu1 %v15024_v40  ;;  %v15107_v40 = vld [vmem:[#allocation7 + $0x5b4] ss:$24 sps:$4 sm:$0xff]  }
 0x248   :  { %3330 = vmatpush2.bf16.msra.mxu0 %v15027_v41  ;;  %3290 = vmatprep.subr.bf16.mxu1 %v15032_v42  ;;  %v15105_v42 = vld [vmem:[#allocation7 + $0x5b0] ss:$24 sps:$4 sm:$0xff]  }
 0x249   :  { %3331 = vmatprep.subr.bf16.mxu0 %v15035_v43 }
 0x24b   :  { %3291 = vmatpush2.bf16.msra.mxu1 %v15030_v45  ;;  %v15110_v45 = vld [vmem:[#allocation7 + $0x284] ss:$24 sps:$4 sm:$0xff]  }
 0x24c   :  { %3332 = vmatpush2.bf16.msra.mxu0 %v15033_v47  ;;  %3292 = vmatprep.subr.bf16.mxu1 %v15038_v48  ;;  %v15108_v47 = vld [vmem:[#allocation7 + $0x280] ss:$24 sps:$4 sm:$0xff]   ;;  %v15113_v48 = vld [vmem:[#allocation7 + $0x584] ss:$24 sps:$4 sm:$0xff]  }
 0x24d   :  { %3333 = vmatprep.subr.bf16.mxu0 %v15041_v49 }
 0x24f   :  { %3293 = vmatpush2.bf16.msra.mxu1 %v15036_v50  ;;  %v15111_v50 = vld [vmem:[#allocation7 + $0x580] ss:$24 sps:$4 sm:$0xff]  }
 0x250   :  { %3334 = vmatpush2.bf16.msra.mxu0 %v15039_v52  ;;  %3294 = vmatprep.subr.bf16.mxu1 %v15044_v55  ;;  %v15116_v55 = vld [vmem:[#allocation7 + $0x254] ss:$24 sps:$4 sm:$0xff]  }
 0x251   :  { %3335 = vmatprep.subr.bf16.mxu0 %v15047_v57  ;;  %v15114_v57 = vld [vmem:[#allocation7 + $0x250] ss:$24 sps:$4 sm:$0xff]  }
 0x253   :  { %3295 = vmatpush2.bf16.msra.mxu1 %v15042_v58  ;;  %v15119_v58 = vld [vmem:[#allocation7 + $0x554] ss:$24 sps:$4 sm:$0xff]  }
 0x254   :  { %3336 = vmatpush2.bf16.msra.mxu0 %v15045_v60  ;;  %3346 = vmatprep.subr.bf16.mxu1 %v15050_v9  ;;  %v15117_v60 = vld [vmem:[#allocation7 + $0x550] ss:$24 sps:$4 sm:$0xff]   ;;  %v15122_v9 = vld [vmem:[#allocation7 + $0x224] ss:$24 sps:$4 sm:$0xff]  }
 0x255   :  { %3387 = vmatprep.subr.bf16.mxu0 %v15053_v61  ;;  %v15125_v61 = vld [vmem:[#allocation7 + $0x524] ss:$24 sps:$4 sm:$0xff]  }
 0x256   :  { %3297 = vmatmul.mubr.bf16.vlgmr.msra.gmra.mxu1 %v17356_v27 }
 0x257   :  { %3338 = vmatmul.mubr.bf16.vlgmr.msra.gmra.mxu0 %v17379_v46  ;;  %3347 = vmatpush1.bf16.msra.mxu1 %v15048_v53  ;;  %v15120_v53 = vld [vmem:[#allocation7 + $0x220] ss:$24 sps:$4 sm:$0xff]  }
 0x258   :  { %3378 = vmatprep.mubr.bf16.mxu1 %v17338_v51  ;;  %3388 = vmatpush1.bf16.msra.mxu0 %v15051_v62  ;;  %v15074_v51 = vld [vmem:[#allocation7 + $0xa4] ss:$24 sps:$4 sm:$0xff]   ;;  %v15123_v62 = vld [vmem:[#allocation7 + $0x520] ss:$24 sps:$4 sm:$0xff]  }
 0x259   :  { %3419 = vmatprep.mubr.bf16.mxu0 %v17354_v38  ;;  %3348 = vmatprep.subr.bf16.mxu1 %v15056_v63  ;;  %v15072_v38 = vld [vmem:[#allocation7 + $0xa0] ss:$24 sps:$4 sm:$0xff]   ;;  %v15128_v63 = vld [vmem:[#allocation7 + $0x1f4] ss:$24 sps:$4 sm:$0xff]  }
 0x25a   :  { %3389 = vmatprep.subr.bf16.mxu0 %v15059_v1  ;;  %v15131_v1 = vld [vmem:[#allocation7 + $0x4f4] ss:$24 sps:$4 sm:$0xff]  }
 0x25b   :  { %3349 = vmatpush1.bf16.msra.mxu1 %v15054_v2  ;;  %v15126_v2 = vld [vmem:[#allocation7 + $0x1f0] ss:$24 sps:$4 sm:$0xff]  }
 0x25c   :  { %3390 = vmatpush1.bf16.msra.mxu0 %v15057_v3  ;;  %3350 = vmatprep.subr.bf16.mxu1 %v15062_v4  ;;  %v15129_v3 = vld [vmem:[#allocation7 + $0x4f0] ss:$24 sps:$4 sm:$0xff]   ;;  %v15134_v4 = vld [vmem:[#allocation7 + $0x1c4] ss:$24 sps:$4 sm:$0xff]  }
 0x25d   :  { %3391 = vmatprep.subr.bf16.mxu0 %v15065_v6  ;;  %v15132_v6 = vld [vmem:[#allocation7 + $0x1c0] ss:$24 sps:$4 sm:$0xff]  }
 0x25f   :  { %3351 = vmatpush1.bf16.msra.mxu1 %v15060_v5  ;;  %v15137_v5 = vld [vmem:[#allocation7 + $0x4c4] ss:$24 sps:$4 sm:$0xff]  }
 0x260   :  { %3392 = vmatpush1.bf16.msra.mxu0 %v15063_v7  ;;  %3352 = vmatprep.subr.bf16.mxu1 %v15068_v8  ;;  %v15135_v7 = vld [vmem:[#allocation7 + $0x4c0] ss:$24 sps:$4 sm:$0xff]   ;;  %v15140_v8 = vld [vmem:[#allocation7 + $0x194] ss:$24 sps:$4 sm:$0xff]  }
 0x261   :  { %3393 = vmatprep.subr.bf16.mxu0 %v15071_v12  ;;  %v15138_v12 = vld [vmem:[#allocation7 + $0x190] ss:$24 sps:$4 sm:$0xff]  }
 0x263   :  { %3353 = vmatpush1.bf16.msra.mxu1 %v15066_v11  ;;  %v15143_v11 = vld [vmem:[#allocation7 + $0x494] ss:$24 sps:$4 sm:$0xff]  }
 0x264   :  { %3394 = vmatpush1.bf16.msra.mxu0 %v15069_v14  ;;  %3354 = vmatprep.subr.bf16.mxu1 %v15074_v51  ;;  %v15141_v14 = vld [vmem:[#allocation7 + $0x490] ss:$24 sps:$4 sm:$0xff]   ;;  %v15146_v51 = vld [vmem:[#allocation7 + $0x764] ss:$24 sps:$4 sm:$0xff]  }
 0x265   :  { %3395 = vmatprep.subr.bf16.mxu0 %v15077_v15  ;;  %v15144_v15 = vld [vmem:[#allocation7 + $0x760] ss:$24 sps:$4 sm:$0xff]  }
 0x267   :  { %3355 = vmatpush1.bf16.msra.mxu1 %v15072_v38  ;;  %v15194_v38 = vld [vmem:[#allocation11 + $0x154] ss:$24 sps:$4 sm:$0xff]  }
 0x268   :  { %3396 = vmatpush1.bf16.msra.mxu0 %v15075_v16  ;;  %3356 = vmatprep.subr.bf16.mxu1 %v15080_v17  ;;  %v15149_v16 = vld [vmem:[#allocation7 + $0x734] ss:$24 sps:$4 sm:$0xff]  }
 0x269   :  { %3397 = vmatprep.subr.bf16.mxu0 %v15083_v19  ;;  %v15192_v17 = vld [vmem:[#allocation11 + $0x150] ss:$24 sps:$4 sm:$0xff]   ;;  %v15147_v19 = vld [vmem:[#allocation7 + $0x730] ss:$24 sps:$4 sm:$0xff]  }
 0x26b   :  { %3357 = vmatpush1.bf16.msra.mxu1 %v15078_v18  ;;  %v15197_v18 = vld [vmem:[#allocation11 + $0x124] ss:$24 sps:$4 sm:$0xff]  }
 0x26c   :  { %3398 = vmatpush1.bf16.msra.mxu0 %v15081_v20  ;;  %3358 = vmatprep.subr.bf16.mxu1 %v15086_v21  ;;  %v15152_v21 = vld [vmem:[#allocation7 + $0x704] ss:$24 sps:$4 sm:$0xff]  }
 0x26d   :  { %3399 = vmatprep.subr.bf16.mxu0 %v15089_v23 }
 0x26f   :  { %3359 = vmatpush1.bf16.msra.mxu1 %v15084_v22 }
 0x270   :  { %3400 = vmatpush1.bf16.msra.mxu0 %v15087_v24  ;;  %3360 = vmatprep.subr.bf16.mxu1 %v15092_v25  ;;  %v15195_v24 = vld [vmem:[#allocation11 + $0x120] ss:$24 sps:$4 sm:$0xff]   ;;  %v15150_v25 = vld [vmem:[#allocation7 + $0x700] ss:$24 sps:$4 sm:$0xff]  }
 0x271   :  { %3401 = vmatprep.subr.bf16.mxu0 %v15095_v28 }
 0x273   :  { %3361 = vmatpush1.bf16.msra.mxu1 %v15090_v26  ;;  %v15200_v26 = vld [vmem:[#allocation11 + $0xf4] ss:$24 sps:$4 sm:$0xff]  }
 0x274   :  { %3402 = vmatpush1.bf16.msra.mxu0 %v15093_v29  ;;  %3362 = vmatprep.subr.bf16.mxu1 %v15098_v36  ;;  %v15155_v29 = vld [vmem:[#allocation7 + $0x6d4] ss:$24 sps:$4 sm:$0xff]   ;;  %v15153_v36 = vld [vmem:[#allocation7 + $0x6d0] ss:$24 sps:$4 sm:$0xff]  }
 0x275   :  { %3403 = vmatprep.subr.bf16.mxu0 %v15101_v31  ;;  %v15158_v31 = vld [vmem:[#allocation7 + $0x6a4] ss:$24 sps:$4 sm:$0xff]  }
 0x276   :  { %v17390_v41 = vpop.f32.mrf.mxu1 }
 0x277   :  { %3363 = vmatpush2.bf16.msra.mxu1 %v15096_v30  ;;  %v15203_v30 = vld [vmem:[#allocation11 + $0xc4] ss:$24 sps:$4 sm:$0xff]  }
 0x278   :  { %3404 = vmatpush2.bf16.msra.mxu0 %v15099_v32  ;;  %v17392_v43 = vpop.f32.mrf.mxu1  ;;  %3364 = vmatprep.subr.bf16.mxu1 %v15104_v33  ;;  %v15156_v32 = vld [vmem:[#allocation7 + $0x6a0] ss:$24 sps:$4 sm:$0xff]  }
 0x279   :  { %3405 = vmatprep.subr.bf16.mxu0 %v15107_v40  ;;  %v15206_v33 = vld [vmem:[#allocation11 + $0x94] ss:$24 sps:$4 sm:$0xff]   ;;  %v15204_v40 = vld [vmem:[#allocation11 + $0x90] ss:$24 sps:$4 sm:$0xff]  }
 0x27a   :  { %v3138_v49 = vpop.f32.mrf.mxu1 }
 0x27b   :  { %3365 = vmatpush2.bf16.msra.mxu1 %v15102_v39  ;;  %v15161_v39 = vld [vmem:[#allocation7 + $0x674] ss:$24 sps:$4 sm:$0xff]   ;;  %v15212_v49 = vld [vmem:[#allocation11 + $0x34] ss:$24 sps:$4 sm:$0xff]  }
 0x27c   :  { %3406 = vmatpush2.bf16.msra.mxu0 %v15105_v42  ;;  %v3139_v52 = vpop.f32.mrf.mxu1  ;;  %3366 = vmatprep.subr.bf16.mxu1 %v15110_v45  ;;  %v15209_v42 = vld [vmem:[#allocation11 + $0x64] ss:$24 sps:$4 sm:$0xff]   ;;  %v15164_v45 = vld [vmem:[#allocation7 + $0x644] ss:$24 sps:$4 sm:$0xff]  }
 0x27d   :  { %3407 = vmatprep.subr.bf16.mxu0 %v15113_v48  ;;  %v15162_v48 = vld [vmem:[#allocation7 + $0x640] ss:$24 sps:$4 sm:$0xff]   ;;  %v15210_v52 = vld [vmem:[#allocation11 + $0x30] ss:$24 sps:$4 sm:$0xff]  }
 0x27f   :  { %3367 = vmatpush2.bf16.msra.mxu1 %v15108_v47  ;;  %v15207_v47 = vld [vmem:[#allocation11 + $0x60] ss:$24 sps:$4 sm:$0xff]  }
 0x280   :  { %3408 = vmatpush2.bf16.msra.mxu0 %v15111_v50  ;;  %3368 = vmatprep.subr.bf16.mxu1 %v15116_v55  ;;  %v15167_v50 = vld [vmem:[#allocation7 + $0x614] ss:$24 sps:$4 sm:$0xff]   ;;  %v15165_v55 = vld [vmem:[#allocation7 + $0x610] ss:$24 sps:$4 sm:$0xff]  }
 0x281   :  { %3409 = vmatprep.subr.bf16.mxu0 %v15119_v58  ;;  %v15170_v58 = vld [vmem:[#allocation7 + $0x8e4] ss:$24 sps:$4 sm:$0xff]  }
 0x283   :  { %3369 = vmatpush2.bf16.msra.mxu1 %v15114_v57  ;;  %v15215_v57 = vld [vmem:[#allocation11 + $0x4] ss:$24 sps:$4 sm:$0xff]  }
 0x284   :  { %3410 = vmatpush2.bf16.msra.mxu0 %v15117_v60  ;;  %3370 = vmatprep.subr.bf16.mxu1 %v15122_v9  ;;  %v15213_v60 = vld [vmem:[#allocation11] ss:$24 sps:$4 sm:$0xff]   ;;  %v15168_v9 = vld [vmem:[#allocation7 + $0x8e0] ss:$24 sps:$4 sm:$0xff]  }
 0x285   :  { %3411 = vmatprep.subr.bf16.mxu0 %v15125_v61  ;;  %v15218_v61 = vld [vmem:[#allocation11 + $0x2d4] ss:$24 sps:$4 sm:$0xff]  }
 0x287   :  { %3371 = vmatpush2.bf16.msra.mxu1 %v15120_v53  ;;  %v15173_v53 = vld [vmem:[#allocation7 + $0x8b4] ss:$24 sps:$4 sm:$0xff]  }
 0x288   :  { %3412 = vmatpush2.bf16.msra.mxu0 %v15123_v62  ;;  %3372 = vmatprep.subr.bf16.mxu1 %v15128_v63  ;;  %v15216_v62 = vld [vmem:[#allocation11 + $0x2d0] ss:$24 sps:$4 sm:$0xff]   ;;  %v15171_v63 = vld [vmem:[#allocation7 + $0x8b0] ss:$24 sps:$4 sm:$0xff]  }
 0x289   :  { %3413 = vmatprep.subr.bf16.mxu0 %v15131_v1  ;;  %v15221_v1 = vld [vmem:[#allocation11 + $0x2a4] ss:$24 sps:$4 sm:$0xff]  }
 0x28b   :  { %3373 = vmatpush2.bf16.msra.mxu1 %v15126_v2  ;;  %v15176_v2 = vld [vmem:[#allocation7 + $0x884] ss:$24 sps:$4 sm:$0xff]  }
 0x28c   :  { %3414 = vmatpush2.bf16.msra.mxu0 %v15129_v3  ;;  %3374 = vmatprep.subr.bf16.mxu1 %v15134_v4  ;;  %v15219_v3 = vld [vmem:[#allocation11 + $0x2a0] ss:$24 sps:$4 sm:$0xff]   ;;  %v15174_v4 = vld [vmem:[#allocation7 + $0x880] ss:$24 sps:$4 sm:$0xff]  }
 0x28d   :  { %3415 = vmatprep.subr.bf16.mxu0 %v15137_v5  ;;  %v15224_v5 = vld [vmem:[#allocation11 + $0x274] ss:$24 sps:$4 sm:$0xff]  }
 0x28f   :  { %3375 = vmatpush2.bf16.msra.mxu1 %v15132_v6  ;;  %v15179_v6 = vld [vmem:[#allocation7 + $0x854] ss:$24 sps:$4 sm:$0xff]  }
 0x290   :  { %3416 = vmatpush2.bf16.msra.mxu0 %v15135_v7  ;;  %3376 = vmatprep.subr.bf16.mxu1 %v15140_v8  ;;  %v15222_v7 = vld [vmem:[#allocation11 + $0x270] ss:$24 sps:$4 sm:$0xff]   ;;  %v15177_v8 = vld [vmem:[#allocation7 + $0x850] ss:$24 sps:$4 sm:$0xff]  }
 0x291   :  { %3417 = vmatprep.subr.bf16.mxu0 %v15143_v11  ;;  %v15227_v11 = vld [vmem:[#allocation11 + $0x244] ss:$24 sps:$4 sm:$0xff]  }
 0x293   :  { %3377 = vmatpush2.bf16.msra.mxu1 %v15138_v12  ;;  %v15182_v12 = vld [vmem:[#allocation7 + $0x824] ss:$24 sps:$4 sm:$0xff]  }
 0x294   :  { %3418 = vmatpush2.bf16.msra.mxu0 %v15141_v14  ;;  %3428 = vmatprep.subr.bf16.mxu1 %v15146_v51  ;;  %v15225_v14 = vld [vmem:[#allocation11 + $0x240] ss:$24 sps:$4 sm:$0xff]   ;;  %v15230_v51 = vld [vmem:[#allocation11 + $0x214] ss:$24 sps:$4 sm:$0xff]  }
 0x295   :  { %5442 = vmatprep.subr.bf16.mxu0 %v15194_v38  ;;  %v15180_v38 = vld [vmem:[#allocation7 + $0x820] ss:$24 sps:$4 sm:$0xff]  }
 0x296   :  { %3379 = vmatmul.mubr.bf16.vlgmr.msra.gmra.mxu1 %v17340_v54 }
 0x297   :  { %v3175_v20 = vpop.f32.mrf.mxu0  ;;  %3420 = vmatmul.mubr.bf16.vlgmr.msra.gmra.mxu0 %v17356_v27  ;;  %3429 = vmatpush1.bf16.msra.mxu1 %v15144_v15  ;;  %v15198_v27 = vld [vmem:[#allocation11 + $0xf0] ss:$24 sps:$4 sm:$0xff]  }
 0x298   :  { %v17397_v22 = vadd.f32 %v3175_v20, %v17390_v41  ;;  %3460 = vmatprep.mubr.bf16.mxu1 %v17377_v44  ;;  %3430 = vmatprep.subr.bf16.mxu1 %v15149_v16  ;;  %v15201_v44 = vld [vmem:[#allocation11 + $0xc0] ss:$24 sps:$4 sm:$0xff]   ;;  %v15159_v41 = vld [vmem:[#allocation7 + $0x670] ss:$24 sps:$4 sm:$0xff]  }
 0x299   :  { %v17400_v23 = vpop.f32.mrf.mxu0  ;;  %5443 = vmatpush1.bf16.msra.mxu0 %v15192_v17  ;;  %v15185_v15 = vld [vmem:[#allocation7 + $0x7f4] ss:$24 sps:$4 sm:$0xff]   ;;  %v15183_v16 = vld [vmem:[#allocation7 + $0x7f0] ss:$24 sps:$4 sm:$0xff]  }
 0x29a   :  { %5444 = vmatprep.subr.bf16.mxu0 %v15197_v18  ;;  %v15228_v17 = vld [vmem:[#allocation11 + $0x210] ss:$24 sps:$4 sm:$0xff]   ;;  %v15231_v20 = vld [vmem:[#allocation11 + $0x1e0] ss:$24 sps:$4 sm:$0xff]  }
 0x29b   :  { %v3179_v28 = vpop.f32.mrf.mxu0  ;;  %3431 = vmatpush1.bf16.msra.mxu1 %v15147_v19  ;;  %v15188_v18 = vld [vmem:[#allocation7 + $0x7c4] ss:$24 sps:$4 sm:$0xff]   ;;  %v15233_v19 = vld [vmem:[#allocation11 + $0x1e4] ss:$24 sps:$4 sm:$0xff]  }
 0x29c   :  { %3432 = vmatprep.subr.bf16.mxu1 %v15152_v21  ;;  %v15236_v21 = vld [vmem:[#allocation11 + $0x1b4] ss:$24 sps:$4 sm:$0xff]   ;;  %v15239_v28 = vld [vmem:[#allocation11 + $0x184] ss:$24 sps:$4 sm:$0xff]  }
 0x29d   :  { %v3180_v54 = vpop.f32.mrf.mxu0  ;;  %5445 = vmatpush1.bf16.msra.mxu0 %v15195_v24  ;;  %v15186_v24 = vld [vmem:[#allocation7 + $0x7c0] ss:$24 sps:$4 sm:$0xff]  }
 0x29e   :  { %5446 = vmatprep.subr.bf16.mxu0 %v15200_v26  ;;  %v15234_v26 = vld [vmem:[#allocation11 + $0x1b0] ss:$24 sps:$4 sm:$0xff]   ;;  %v15242_v54 = vld [vmem:[#allocation11 + $0x454] ss:$24 sps:$4 sm:$0xff]  }
 0x29f   :  { %3433 = vmatpush1.bf16.msra.mxu1 %v15150_v25  ;;  %v15191_v25 = vld [vmem:[#allocation7 + $0x794] ss:$24 sps:$4 sm:$0xff]  }
 0x2a0   :  { %3434 = vmatprep.subr.bf16.mxu1 %v15155_v29  ;;  %v15189_v29 = vld [vmem:[#allocation7 + $0x790] ss:$24 sps:$4 sm:$0xff]  }
 0x2a1   :  { %5447 = vmatpush1.bf16.msra.mxu0 %v15198_v27  ;;  %v15237_v27 = vld [vmem:[#allocation11 + $0x180] ss:$24 sps:$4 sm:$0xff]  }
 0x2a2   :  { %5448 = vmatprep.subr.bf16.mxu0 %v15203_v30  ;;  %v15245_v30 = vld [vmem:[#allocation11 + $0x424] ss:$24 sps:$4 sm:$0xff]  }
 0x2a3   :  { %3435 = vmatpush1.bf16.msra.mxu1 %v15153_v36  ;;  %v15240_v36 = vld [vmem:[#allocation11 + $0x450] ss:$24 sps:$4 sm:$0xff]  }
 0x2a4   :  { %3436 = vmatprep.subr.bf16.mxu1 %v15158_v31  ;;  %v15243_v31 = vld [vmem:[#allocation11 + $0x420] ss:$24 sps:$4 sm:$0xff]  }
 0x2a5   :  { %5449 = vmatpush1.bf16.msra.mxu0 %v15201_v44 }
 0x2a6   :  { %5450 = vmatprep.subr.bf16.mxu0 %v15206_v33  ;;  %v3178_v33 = vadd.f32 %v17400_v23, %v17392_v43  ;;  %v15251_v43 = vld [vmem:[#allocation11 + $0x3c4] ss:$24 sps:$4 sm:$0xff]  }
 0x2a7   :  { %3437 = vmatpush1.bf16.msra.mxu1 %v15156_v32 }
 0x2a8   :  { %3438 = vmatprep.subr.bf16.mxu1 %v15161_v39 }
 0x2a9   :  { %5451 = vmatpush1.bf16.msra.mxu0 %v15204_v40 }
 0x2aa   :  { %5452 = vmatprep.subr.bf16.mxu0 %v15209_v42  ;;  %v15248_v42 = vld [vmem:[#allocation11 + $0x3f4] ss:$24 sps:$4 sm:$0xff]  }
 0x2ab   :  { %3439 = vmatpush1.bf16.msra.mxu1 %v15159_v41 }
 0x2ac   :  { %3440 = vmatprep.subr.bf16.mxu1 %v15164_v45 }
 0x2ad   :  { %5453 = vmatpush1.bf16.msra.mxu0 %v15207_v47 }
 0x2ae   :  { %5454 = vmatprep.subr.bf16.mxu0 %v15212_v49 }
 0x2af   :  { %3441 = vmatpush1.bf16.msra.mxu1 %v15162_v48 }
 0x2b0   :  { %3442 = vmatprep.subr.bf16.mxu1 %v15167_v50 }
 0x2b1   :  { %5455 = vmatpush1.bf16.msra.mxu0 %v15210_v52 }
 0x2b2   :  { %5456 = vmatprep.subr.bf16.mxu0 %v15215_v57 }
 0x2b3   :  { %3443 = vmatpush1.bf16.msra.mxu1 %v15165_v55 }
 0x2b4   :  { %3444 = vmatprep.subr.bf16.mxu1 %v15170_v58 }
 0x2b5   :  { %5457 = vmatpush1.bf16.msra.mxu0 %v15213_v60 }
 0x2b6   :  { %5458 = vmatprep.subr.bf16.mxu0 %v15218_v61 }
 0x2b7   :  { %3445 = vmatpush2.bf16.msra.mxu1 %v15168_v9 }
 0x2b8   :  { %3446 = vmatprep.subr.bf16.mxu1 %v15173_v53 }
 0x2b9   :  { %5459 = vmatpush2.bf16.msra.mxu0 %v15216_v62  ;;  %v15249_v62 = vld [vmem:[#allocation11 + $0x3c0] ss:$24 sps:$4 sm:$0xff]  }
 0x2ba   :  { %5460 = vmatprep.subr.bf16.mxu0 %v15221_v1 }
 0x2bb   :  { %3447 = vmatpush2.bf16.msra.mxu1 %v15171_v63 }
 0x2bc   :  { %3448 = vmatprep.subr.bf16.mxu1 %v15176_v2 }
 0x2bd   :  { %5461 = vmatpush2.bf16.msra.mxu0 %v15219_v3 }
 0x2be   :  { %5462 = vmatprep.subr.bf16.mxu0 %v15224_v5 }
 0x2bf   :  { %3449 = vmatpush2.bf16.msra.mxu1 %v15174_v4  ;;  %v15254_v4 = vld [vmem:[#allocation11 + $0x394] ss:$24 sps:$4 sm:$0xff]  }
 0x2c0   :  { %3450 = vmatprep.subr.bf16.mxu1 %v15179_v6 }
 0x2c1   :  { %5463 = vmatpush2.bf16.msra.mxu0 %v15222_v7 }
 0x2c2   :  { %5464 = vmatprep.subr.bf16.mxu0 %v15227_v11  ;;  %v15252_v11 = vld [vmem:[#allocation11 + $0x390] ss:$24 sps:$4 sm:$0xff]  }
 0x2c3   :  { %3451 = vmatpush2.bf16.msra.mxu1 %v15177_v8 }
 0x2c4   :  { %3452 = vmatprep.subr.bf16.mxu1 %v15182_v12 }
 0x2c5   :  { %5465 = vmatpush2.bf16.msra.mxu0 %v15225_v14 }
 0x2c6   :  { %5466 = vmatprep.subr.bf16.mxu0 %v15230_v51 }
 0x2c7   :  { %3453 = vmatpush2.bf16.msra.mxu1 %v15180_v38 }
 0x2c8   :  { %3454 = vmatprep.subr.bf16.mxu1 %v15185_v15  ;;  %v15257_v15 = vld [vmem:[#allocation11 + $0x364] ss:$24 sps:$4 sm:$0xff]  }
 0x2c9   :  { %5467 = vmatpush2.bf16.msra.mxu0 %v15228_v17 }
 0x2ca   :  { %5468 = vmatprep.subr.bf16.mxu0 %v15233_v19 }
 0x2cb   :  { %3455 = vmatpush2.bf16.msra.mxu1 %v15183_v16 }
 0x2cc   :  { %3456 = vmatprep.subr.bf16.mxu1 %v15188_v18 }
 0x2cd   :  { %5469 = vmatpush2.bf16.msra.mxu0 %v15231_v20  ;;  %v15255_v20 = vld [vmem:[#allocation11 + $0x360] ss:$24 sps:$4 sm:$0xff]  }
 0x2ce   :  { %5470 = vmatprep.subr.bf16.mxu0 %v15236_v21 }
 0x2cf   :  { %3457 = vmatpush2.bf16.msra.mxu1 %v15186_v24 }
 0x2d0   :  { %3458 = vmatprep.subr.bf16.mxu1 %v15191_v25 }
 0x2d1   :  { %5471 = vmatpush2.bf16.msra.mxu0 %v15234_v26 }
 0x2d2   :  { %5472 = vmatprep.subr.bf16.mxu0 %v15239_v28  ;;  %v15260_v28 = vld [vmem:[#allocation11 + $0x334] ss:$24 sps:$4 sm:$0xff]  }
 0x2d3   :  { %3459 = vmatpush2.bf16.msra.mxu1 %v15189_v29 }
 0x2d4   :  { %5483 = vmatprep.subr.bf16.mxu1 %v15242_v54 }
 0x2d5   :  { %5473 = vmatpush2.bf16.msra.mxu0 %v15237_v27  ;;  %v15258_v27 = vld [vmem:[#allocation11 + $0x330] ss:$24 sps:$4 sm:$0xff]  }
 0x2d6   :  { %3461 = vmatmul.mubr.bf16.vlgmr.msra.gmra.mxu1 %v17379_v46  ;;  %v3216_v32 = vpop.f32.mrf.mxu1  ;;  %v15246_v46 = vld [vmem:[#allocation11 + $0x3f0] ss:$24 sps:$4 sm:$0xff]  }
 0x2d7   :  { %v17402_v44 = vpop.f32.mrf.mxu0  ;;  %v17408_v39 = vadd.f32 %v3216_v32, %v17397_v22  ;;  %5484 = vmatpush1.bf16.msra.mxu1 %v15240_v36  ;;  %v15263_v32 = vld [vmem:[#allocation11 + $0x304] ss:$24 sps:$4 sm:$0xff]  }
 0x2d8   :  { %v3218_v41 = vpop.f32.mrf.mxu1  ;;  %5485 = vmatprep.subr.bf16.mxu1 %v15245_v30 }
 0x2d9   :  { %v17410_v40 = vpop.f32.mrf.mxu0  ;;  %v3471_v45 = vrot.slane %v17408_v39, 4  ;;  %v3514_v47 = vmul.f32 %v17408_v39, %v17408_v39  ;;  %v17415_v48 = vadd.f32 %v3218_v41, %v3178_v33  ;;  %v15261_v41 = vld [vmem:[#allocation11 + $0x300] ss:$24 sps:$4 sm:$0xff]  }
 0x2da   :  { %v3220_v50 = vpop.f32.mrf.mxu1 }
 0x2db   :  { %v3261_v49 = vpop.f32.mrf.mxu0  ;;  %v3472_v22 = vadd.f32 %v3471_v45, %v17408_v39  ;;  %v3520_v23 = vrot.slane %v3514_v47, 4  ;;  %v3477_v52 = vrot.slane %v17415_v48, 4  ;;  %v3515_v55 = vmul.f32 %v17415_v48, %v17415_v48  ;;  %5486 = vmatpush1.bf16.msra.mxu1 %v15243_v31  ;;  %v15269_v50 = vld [vmem:[#allocation11 + $0x5a4] ss:$24 sps:$4 sm:$0xff]  }
 0x2dc   :  { %v3221_v58 = vpop.f32.mrf.mxu1  ;;  %5487 = vmatprep.subr.bf16.mxu1 %v15248_v42  ;;  %v17422_v49 = vld [vmem:[#allocation8] sm:$0x3f] }
 0x2dd   :  { %v3262_v57 = vpop.f32.mrf.mxu0  ;;  %v3473_v60 = vrot.slane %v3472_v22, 2  ;;  %v3521_v9 = vadd.f32 %v3520_v23, %v3514_v47  ;;  %v3478_v61 = vadd.f32 %v3477_v52, %v17415_v48  ;;  %v3526_v53 = vrot.slane %v3515_v55, 4  ;;  %v15266_v47 = vld [vmem:[#allocation11 + $0x5d4] ss:$24 sps:$4 sm:$0xff]   ;;  %v15270_v52 = vld [vmem:[#allocation11 + $0x570] ss:$24 sps:$4 sm:$0xff]  }
 0x2de   :  { %v3596_v23 = vrot.slane %v17422_v49, %v17327_v35  ;;  %v17426_v57 = vld [vmem:[#allocation10] sm:$0x3f]  ;;  %v3600_v58 = vrot.slane %v17422_v49, %v17332_v37 }
 0x2df   :  { %v3474_v63 = vadd.f32 %v3473_v60, %v3472_v22  ;;  %v3522_v1 = vrot.slane %v3521_v9, 2  ;;  %v3479_v2 = vrot.slane %v3478_v61, 2  ;;  %v3527_v3 = vadd.f32 %v3526_v53, %v3515_v55  ;;  %5488 = vmatpush1.bf16.msra.mxu1 %v15246_v46  ;;  %v15264_v46 = vld [vmem:[#allocation11 + $0x5d0] ss:$24 sps:$4 sm:$0xff]   ;;  %v15272_v22 = vld [vmem:[#allocation11 + $0x574] ss:$24 sps:$4 sm:$0xff]  }
 0x2e0   :  { %5489 = vmatprep.subr.bf16.mxu1 %v15251_v43  ;;  %v15267_v43 = vld [vmem:[#allocation11 + $0x5a0] ss:$24 sps:$4 sm:$0xff]   ;;  %v15275_v60 = vld [vmem:[#allocation11 + $0x544] ss:$24 sps:$4 sm:$0xff]  }
 0x2e1   :  { %v3475_v5 = vrot.slane %v3474_v63, 1  ;;  %v3523_v6 = vadd.f32 %v3522_v1, %v3521_v9  ;;  %v3480_v7 = vadd.f32 %v3479_v2, %v3478_v61  ;;  %v3528_v8 = vrot.slane %v3527_v3, 2  ;;  %v15273_v61 = vld [vmem:[#allocation11 + $0x540] ss:$24 sps:$4 sm:$0xff]  }
 0x2e2   :  { %v3669_v1 = vrot.slane %v17426_v57, %v17327_v35 }
 0x2e3   :  { %v3476_v12 = vadd.f32 %v3475_v5, %v3474_v63  ;;  %v3524_v14 = vrot.slane %v3523_v6, 1  ;;  %v3481_v51 = vrot.slane %v3480_v7, 1  ;;  %v3529_v38 = vadd.f32 %v3528_v8, %v3527_v3  ;;  %5490 = vmatpush1.bf16.msra.mxu1 %v15249_v62  ;;  %v15278_v3 = vld [vmem:[#allocation11 + $0x514] ss:$24 sps:$4 sm:$0xff]   ;;  %v15276_v5 = vld [vmem:[#allocation11 + $0x510] ss:$24 sps:$4 sm:$0xff]  }
 0x2e4   :  { %5491 = vmatprep.subr.bf16.mxu1 %v15254_v4  ;;  %v3673_v8 = vrot.slane %v17426_v57, %v17332_v37 }
 0x2e5   :  { %v3508_v16 = vmul.f32 0.125, %v3476_v12  ;;  %v3525_v17 = vadd.f32 %v3524_v14, %v3523_v6  ;;  %v3482_v18 = vadd.f32 %v3481_v51, %v3480_v7  ;;  %v3530_v19 = vrot.slane %v3529_v38, 1  ;;  %v15281_v12 = vld [vmem:[#allocation11 + $0x4e4] ss:$24 sps:$4 sm:$0xff]   ;;  %v15279_v14 = vld [vmem:[#allocation11 + $0x4e0] ss:$24 sps:$4 sm:$0xff]  }
 0x2e7   :  { %v3556_v21 = vmul.f32 0.125, %v3525_v17  ;;  %v3562_v24 = vmul.f32 %v3508_v16, %v3508_v16  ;;  %v3509_v25 = vmul.f32 0.125, %v3482_v18  ;;  %5492 = vmatpush1.bf16.msra.mxu1 %v15252_v11  ;;  %v3531_v26 = vadd.f32 %v3530_v19, %v3529_v38  ;;  %v15284_v38 = vld [vmem:[#allocation11 + $0x4b4] ss:$24 sps:$4 sm:$0xff]  }
 0x2e8   :  { %5493 = vmatprep.subr.bf16.mxu1 %v15257_v15  ;;  %v3629_v62 = vsub.f32 %v17408_v39, %v3508_v16  ;;  %v15282_v15 = vld [vmem:[#allocation11 + $0x4b0] ss:$24 sps:$4 sm:$0xff]   ;;  %v15285_v16 = vld [vmem:[#allocation11 + $0x480] ss:$24 sps:$4 sm:$0xff]   ;;  %v15290_v17 = vld [vmem:[#allocation11 + $0x15c] ss:$24 sps:$4 sm:$0xff]  }
 0x2e9   :  { %v3568_v29 = vsub.f32 %v3556_v21, %v3562_v24  ;;  %v3563_v54 = vmul.f32 %v3509_v25, %v3509_v25  ;;  %v3557_v36 = vmul.f32 0.125, %v3531_v26  ;;  %v3630_v6 = vsub.f32 %v17415_v48, %v3509_v25  ;;  %v15287_v48 = vld [vmem:[#allocation11 + $0x484] ss:$24 sps:$4 sm:$0xff]  }
 0x2eb   :  { %v3574_v30 = vmax.f32 %v3568_v29, 0.0  ;;  %5494 = vmatpush1.bf16.msra.mxu1 %v15255_v20  ;;  %v3569_v31 = vsub.f32 %v3557_v36, %v3563_v54 }
 0x2ec   :  { %5495 = vmatprep.subr.bf16.mxu1 %v15260_v28  ;;  %v15338_v28 = vld [vmem:[#allocation11 + $0x754] ss:$24 sps:$4 sm:$0xff]  }
 0x2ed   :  { %v3580_v33 = vadd.f32 1e-05, %v3574_v30  ;;  %v3575_v42 = vmax.f32 %v3569_v31, 0.0  ;;  %5524 = vmatprep.subr.bf16.mxu0 %v15338_v28 }
 0x2ef   :  { %16756 = vrsqrt.f32 %v3580_v33  ;;  %5496 = vmatpush1.bf16.msra.mxu1 %v15258_v27  ;;  %v3581_v45 = vadd.f32 1e-05, %v3575_v42  ;;  %v15336_v27 = vld [vmem:[#allocation11 + $0x750] ss:$24 sps:$4 sm:$0xff]   ;;  %v15344_v42 = vld [vmem:[#allocation11 + $0x724] ss:$24 sps:$4 sm:$0xff]  }
 0x2f0   :  { %5497 = vmatprep.subr.bf16.mxu1 %v15263_v32 }
 0x2f1   :  { %16758 = vrsqrt.f32 %v3581_v45 }
 0x2f3   :  { %5498 = vmatpush1.bf16.msra.mxu1 %v15261_v41 }
 0x2f4   :  { %5499 = vmatprep.subr.bf16.mxu1 %v15266_v47 }
 0x2f7   :  { %5500 = vmatpush2.bf16.msra.mxu1 %v15264_v46  ;;  %v15342_v46 = vld [vmem:[#allocation11 + $0x720] ss:$24 sps:$4 sm:$0xff]  }
 0x2f8   :  { %5501 = vmatprep.subr.bf16.mxu1 %v15269_v50 }
 0x2fb   :  { %5502 = vmatpush2.bf16.msra.mxu1 %v15267_v43 }
 0x2fc   :  { %v16757_v55 = vpop.eup %16756  ;;  %5503 = vmatprep.subr.bf16.mxu1 %v15272_v22 }
 0x2fd   :  { %v3623_v9 = vmul.f32 %v16757_v55, %v3596_v23 }
 0x2fe   :  { %v16759_v53 = vpop.eup %16758 }
 0x2ff   :  { %v3638_v63 = vrot.slane %v3623_v9, %v17327_v35  ;;  %5504 = vmatpush2.bf16.msra.mxu1 %v15270_v52  ;;  %v3624_v2 = vmul.f32 %v16759_v53, %v3600_v58  ;;  %v15348_v9 = vld [vmem:[#allocation11 + $0x6f0] ss:$24 sps:$4 sm:$0xff]  }
 0x300   :  { %5505 = vmatprep.subr.bf16.mxu1 %v15275_v60  ;;  %v15350_v60 = vld [vmem:[#allocation11 + $0x6f4] ss:$24 sps:$4 sm:$0xff]  }
 0x301   :  { %v3659_v4 = vmul.f32 %v3638_v63, %v3629_v62  ;;  %v3642_v7 = vrot.slane %v3624_v2, %v17327_v35 }
 0x303   :  { %v3696_v11 = vadd.f32 %v3669_v1, %v3659_v4  ;;  %5506 = vmatpush2.bf16.msra.mxu1 %v15273_v61  ;;  %v3660_v39 = vmul.f32 %v3642_v7, %v3630_v6  ;;  %v15354_v6 = vld [vmem:[#allocation11 + $0x6c0] ss:$24 sps:$4 sm:$0xff]  }
 0x304   :  { %5507 = vmatprep.subr.bf16.mxu1 %v15278_v3 }
 0x305   :  { %v3697_v51 = vadd.f32 %v3673_v8, %v3660_v39  ;;  %16760 = vtanh.f32 %v3696_v11 }
 0x307   :  { %5508 = vmatpush2.bf16.msra.mxu1 %v15276_v5  ;;  %16762 = vtanh.f32 %v3697_v51  ;;  %v15356_v5 = vld [vmem:[#allocation11 + $0x6c4] ss:$24 sps:$4 sm:$0xff]  }
 0x308   :  { %5509 = vmatprep.subr.bf16.mxu1 %v15281_v12 }
 0x30b   :  { %5510 = vmatpush2.bf16.msra.mxu1 %v15279_v14 }
 0x30c   :  { %5511 = vmatprep.subr.bf16.mxu1 %v15284_v38 }
 0x30f   :  { %5512 = vmatpush2.bf16.msra.mxu1 %v15282_v15  ;;  %v15362_v15 = vld [vmem:[#allocation11 + $0x694] ss:$24 sps:$4 sm:$0xff]  }
 0x310   :  { %5513 = vmatprep.subr.bf16.mxu1 %v15287_v48  ;;  %v15360_v48 = vld [vmem:[#allocation11 + $0x690] ss:$24 sps:$4 sm:$0xff]  }
 0x312   :  { %v16761_v18 = vpop.eup %16760 }
 0x313   :  { %5514 = vmatpush2.bf16.msra.mxu1 %v15285_v16  ;;  %v17441_v26 = vpack.c.bf16 %v16761_v18, %v16761_v18 }
 0x314   :  { %5565 = vmatprep.subr.bf16.mxu1 %v15290_v17  ;;  %v16763_v19 = vpop.eup %16762 }
 0x315   :  { %v17438_v24 = vpack.c.bf16 %v16763_v19, %v16763_v19 }
 0x316   :  { %v3298_v20 = vpop.f32.mrf.mxu1 }
 0x317   :  { %v3339_v21 = vpop.f32.mrf.mxu0  ;;  %v3299_v25 = vadd.f32 %v3298_v20, %v17402_v44  ;;  %5474 = vmatprep.mubr.bf16.mxu0 %v17438_v24 }
 0x318   :  { %v3300_v29 = vpop.f32.mrf.mxu1  ;;  %5475 = vmatmul.mubr.bf16.vlgmr.msra.gmra.mxu0 %v17441_v26 }
 0x319   :  { %v3341_v54 = vpop.f32.mrf.mxu0  ;;  %v17444_v36 = vadd.f32 %v3339_v21, %v3299_v25  ;;  %v3301_v30 = vadd.f32 %v3300_v29, %v17410_v40  ;;  %5525 = vmatpush1.bf16.msra.mxu0 %v15336_v27  ;;  %v15368_v25 = vld [vmem:[#allocation11 + $0x664] ss:$24 sps:$4 sm:$0xff]   ;;  %v15366_v29 = vld [vmem:[#allocation11 + $0x660] ss:$24 sps:$4 sm:$0xff]  }
 0x31a   :  { %v3302_v31 = vpop.f32.mrf.mxu1  ;;  %5526 = vmatprep.subr.bf16.mxu0 %v15344_v42  ;;  %v15380_v42 = vld [vmem:[#allocation11 + $0x604] ss:$24 sps:$4 sm:$0xff]  }
 0x31b   :  { %v3343_v32 = vpop.f32.mrf.mxu0  ;;  %v3483_v44 = vrot.slane %v17444_v36, 4  ;;  %v3516_v33 = vmul.f32 %v17444_v36, %v17444_v36  ;;  %v17451_v41 = vadd.f32 %v3341_v54, %v3301_v30  ;;  %v15374_v31 = vld [vmem:[#allocation11 + $0x634] ss:$24 sps:$4 sm:$0xff]  }
 0x31c   :  { %v3303_v45 = vpop.f32.mrf.mxu1 }
 0x31d   :  { %v3344_v47 = vpop.f32.mrf.mxu0  ;;  %v3484_v50 = vadd.f32 %v3483_v44, %v17444_v36  ;;  %v3532_v40 = vrot.slane %v3516_v33, 4  ;;  %v3489_v43 = vrot.slane %v17451_v41, 4  ;;  %v3517_v22 = vmul.f32 %v17451_v41, %v17451_v41  ;;  %5527 = vmatpush1.bf16.msra.mxu0 %v15342_v46  ;;  %v15372_v44 = vld [vmem:[#allocation11 + $0x630] ss:$24 sps:$4 sm:$0xff]   ;;  %v15378_v45 = vld [vmem:[#allocation11 + $0x600] ss:$24 sps:$4 sm:$0xff]  }
 0x31e   :  { %5528 = vmatprep.subr.bf16.mxu0 %v15350_v60  ;;  %v15386_v47 = vld [vmem:[#allocation11 + $0x8d4] ss:$24 sps:$4 sm:$0xff]   ;;  %v15384_v46 = vld [vmem:[#allocation11 + $0x8d0] ss:$24 sps:$4 sm:$0xff]  }
 0x31f   :  { %v3485_v23 = vrot.slane %v3484_v50, 2  ;;  %v3533_v52 = vadd.f32 %v3532_v40, %v3516_v33  ;;  %v3490_v55 = vadd.f32 %v3489_v43, %v17451_v41  ;;  %v3538_v58 = vrot.slane %v3517_v22, 4  ;;  %v15392_v40 = vld [vmem:[#allocation11 + $0x8a4] ss:$24 sps:$4 sm:$0xff]   ;;  %v15390_v43 = vld [vmem:[#allocation11 + $0x8a0] ss:$24 sps:$4 sm:$0xff]  }
 0x321   :  { %v3486_v61 = vadd.f32 %v3485_v23, %v3484_v50  ;;  %v3534_v53 = vrot.slane %v3533_v52, 2  ;;  %v3491_v62 = vrot.slane %v3490_v55, 2  ;;  %v3539_v63 = vadd.f32 %v3538_v58, %v3517_v22  ;;  %5529 = vmatpush1.bf16.msra.mxu0 %v15348_v9  ;;  %v15396_v58 = vld [vmem:[#allocation11 + $0x870] ss:$24 sps:$4 sm:$0xff]  }
 0x322   :  { %5530 = vmatprep.subr.bf16.mxu0 %v15356_v5  ;;  %v3604_v50 = vrot.slane %v17422_v49, %v17345_v56  ;;  %v3608_v23 = vrot.slane %v17422_v49, %v17348_v59 }
 0x323   :  { %v3487_v1 = vrot.slane %v3486_v61, 1  ;;  %v3535_v2 = vadd.f32 %v3534_v53, %v3533_v52  ;;  %v3492_v3 = vadd.f32 %v3491_v62, %v3490_v55  ;;  %v3540_v4 = vrot.slane %v3539_v63, 2  ;;  %v15398_v55 = vld [vmem:[#allocation11 + $0x874] ss:$24 sps:$4 sm:$0xff]  }
 0x324   :  { %v3677_v53 = vrot.slane %v17426_v57, %v17345_v56 }
 0x325   :  { %v3488_v7 = vadd.f32 %v3487_v1, %v3486_v61  ;;  %v3536_v8 = vrot.slane %v3535_v2, 1  ;;  %v3493_v11 = vrot.slane %v3492_v3, 1  ;;  %v3541_v39 = vadd.f32 %v3540_v4, %v3539_v63  ;;  %5531 = vmatpush1.bf16.msra.mxu0 %v15354_v6  ;;  %v15404_v1 = vld [vmem:[#allocation11 + $0x844] ss:$24 sps:$4 sm:$0xff]   ;;  %v15402_v4 = vld [vmem:[#allocation11 + $0x840] ss:$24 sps:$4 sm:$0xff]  }
 0x326   :  { %5532 = vmatprep.subr.bf16.mxu0 %v15362_v15  ;;  %v15410_v6 = vld [vmem:[#allocation11 + $0x814] ss:$24 sps:$4 sm:$0xff]  }
 0x327   :  { %v3510_v12 = vmul.f32 0.125, %v3488_v7  ;;  %v3537_v14 = vadd.f32 %v3536_v8, %v3535_v2  ;;  %v3494_v51 = vadd.f32 %v3493_v11, %v3492_v3  ;;  %v3542_v38 = vrot.slane %v3541_v39, 1  ;;  %v15408_v8 = vld [vmem:[#allocation11 + $0x810] ss:$24 sps:$4 sm:$0xff]   ;;  %v15416_v11 = vld [vmem:[#allocation11 + $0x7e4] ss:$24 sps:$4 sm:$0xff]  }
 0x328   :  { %v3681_v3 = vrot.slane %v17426_v57, %v17348_v59  ;;  %v15428_v57 = vld [vmem:[#allocation11 + $0x784] ss:$24 sps:$4 sm:$0xff]  }
 0x329   :  { %v3558_v16 = vmul.f32 0.125, %v3537_v14  ;;  %v3564_v17 = vmul.f32 %v3510_v12, %v3510_v12  ;;  %v3511_v18 = vmul.f32 0.125, %v3494_v51  ;;  %v3543_v19 = vadd.f32 %v3542_v38, %v3541_v39  ;;  %5533 = vmatpush1.bf16.msra.mxu0 %v15360_v48  ;;  %v15414_v39 = vld [vmem:[#allocation11 + $0x7e0] ss:$24 sps:$4 sm:$0xff]  }
 0x32a   :  { %5534 = vmatprep.subr.bf16.mxu0 %v15368_v25  ;;  %v3631_v9 = vsub.f32 %v17444_v36, %v3510_v12  ;;  %v15420_v12 = vld [vmem:[#allocation11 + $0x7b0] ss:$24 sps:$4 sm:$0xff]   ;;  %v15426_v14 = vld [vmem:[#allocation11 + $0x780] ss:$24 sps:$4 sm:$0xff]  }
 0x32b   :  { %v3570_v20 = vsub.f32 %v3558_v16, %v3564_v17  ;;  %v3565_v21 = vmul.f32 %v3511_v18, %v3511_v18  ;;  %v3559_v28 = vmul.f32 0.125, %v3543_v19  ;;  %v3632_v2 = vsub.f32 %v17451_v41, %v3511_v18  ;;  %v15422_v41 = vld [vmem:[#allocation11 + $0x7b4] ss:$24 sps:$4 sm:$0xff]  }
 0x32c   :  { %v15434_v16 = vld [vmem:[#allocation11 + $0x45c] ss:$24 sps:$4 sm:$0xff]  }
 0x32d   :  { %v3576_v54 = vmax.f32 %v3570_v20, 0.0  ;;  %v3571_v27 = vsub.f32 %v3559_v28, %v3565_v21  ;;  %5535 = vmatpush1.bf16.msra.mxu0 %v15366_v29  ;;  %v15288_v20 = vld [vmem:[#allocation11 + $0x158] ss:$24 sps:$4 sm:$0xff]   ;;  %v15293_v28 = vld [vmem:[#allocation11 + $0x12c] ss:$24 sps:$4 sm:$0xff]  }
 0x32e   :  { %5536 = vmatprep.subr.bf16.mxu0 %v15374_v31 }
 0x32f   :  { %v3582_v30 = vadd.f32 1e-05, %v3576_v54  ;;  %v3577_v32 = vmax.f32 %v3571_v27, 0.0 }
 0x331   :  { %16764 = vrsqrt.f32 %v3582_v30  ;;  %v3583_v33 = vadd.f32 1e-05, %v3577_v32  ;;  %5537 = vmatpush1.bf16.msra.mxu0 %v15372_v44  ;;  %v15291_v30 = vld [vmem:[#allocation11 + $0x128] ss:$24 sps:$4 sm:$0xff]   ;;  %v15296_v32 = vld [vmem:[#allocation11 + $0xfc] ss:$24 sps:$4 sm:$0xff]  }
 0x332   :  { %5538 = vmatprep.subr.bf16.mxu0 %v15380_v42  ;;  %v15294_v44 = vld [vmem:[#allocation11 + $0xf8] ss:$24 sps:$4 sm:$0xff]   ;;  %v15297_v42 = vld [vmem:[#allocation11 + $0xc8] ss:$24 sps:$4 sm:$0xff]  }
 0x333   :  { %16766 = vrsqrt.f32 %v3583_v33  ;;  %v15299_v33 = vld [vmem:[#allocation11 + $0xcc] ss:$24 sps:$4 sm:$0xff]  }
 0x335   :  { %5539 = vmatpush1.bf16.msra.mxu0 %v15378_v45  ;;  %v15302_v45 = vld [vmem:[#allocation11 + $0x9c] ss:$24 sps:$4 sm:$0xff]  }
 0x336   :  { %5540 = vmatprep.subr.bf16.mxu0 %v15386_v47  ;;  %v15300_v47 = vld [vmem:[#allocation11 + $0x98] ss:$24 sps:$4 sm:$0xff]  }
 0x339   :  { %5541 = vmatpush2.bf16.msra.mxu0 %v15384_v46  ;;  %v15305_v46 = vld [vmem:[#allocation11 + $0x6c] ss:$24 sps:$4 sm:$0xff]  }
 0x33a   :  { %5542 = vmatprep.subr.bf16.mxu0 %v15392_v40  ;;  %v15308_v40 = vld [vmem:[#allocation11 + $0x3c] ss:$24 sps:$4 sm:$0xff]  }
 0x33d   :  { %5543 = vmatpush2.bf16.msra.mxu0 %v15390_v43  ;;  %v15306_v43 = vld [vmem:[#allocation11 + $0x38] ss:$24 sps:$4 sm:$0xff]  }
 0x33e   :  { %v16765_v22 = vpop.eup %16764  ;;  %5544 = vmatprep.subr.bf16.mxu0 %v15398_v55  ;;  %v15312_v55 = vld [vmem:[#allocation11 + $0x2d8] ss:$24 sps:$4 sm:$0xff]  }
 0x33f   :  { %v3625_v52 = vmul.f32 %v16765_v22, %v3604_v50  ;;  %v15303_v50 = vld [vmem:[#allocation11 + $0x68] ss:$24 sps:$4 sm:$0xff]   ;;  %v15311_v22 = vld [vmem:[#allocation11 + $0xc] ss:$24 sps:$4 sm:$0xff]  }
 0x340   :  { %v16767_v60 = vpop.eup %16766 }
 0x341   :  { %v3646_v61 = vrot.slane %v3625_v52, %v17327_v35  ;;  %v3626_v62 = vmul.f32 %v16767_v60, %v3608_v23  ;;  %5545 = vmatpush2.bf16.msra.mxu0 %v15396_v58  ;;  %v15309_v23 = vld [vmem:[#allocation11 + $0x8] ss:$24 sps:$4 sm:$0xff]   ;;  %v15314_v52 = vld [vmem:[#allocation11 + $0x2dc] ss:$24 sps:$4 sm:$0xff]   ;;  %v15317_v58 = vld [vmem:[#allocation11 + $0x2ac] ss:$24 sps:$4 sm:$0xff]  }
 0x342   :  { %5546 = vmatprep.subr.bf16.mxu0 %v15404_v1  ;;  %v15315_v60 = vld [vmem:[#allocation11 + $0x2a8] ss:$24 sps:$4 sm:$0xff]   ;;  %v15324_v1 = vld [vmem:[#allocation11 + $0x218] ss:$24 sps:$4 sm:$0xff]  }
 0x343   :  { %v3661_v63 = vmul.f32 %v3646_v61, %v3631_v9  ;;  %v3650_v49 = vrot.slane %v3626_v62, %v17327_v35  ;;  %v15320_v9 = vld [vmem:[#allocation11 + $0x27c] ss:$24 sps:$4 sm:$0xff]   ;;  %v15318_v61 = vld [vmem:[#allocation11 + $0x278] ss:$24 sps:$4 sm:$0xff]   ;;  %v15321_v62 = vld [vmem:[#allocation11 + $0x248] ss:$24 sps:$4 sm:$0xff]  }
 0x345   :  { %v3698_v5 = vadd.f32 %v3677_v53, %v3661_v63  ;;  %v3662_v36 = vmul.f32 %v3650_v49, %v3632_v2  ;;  %5547 = vmatpush2.bf16.msra.mxu0 %v15402_v4  ;;  %v15323_v53 = vld [vmem:[#allocation11 + $0x24c] ss:$24 sps:$4 sm:$0xff]   ;;  %v15326_v63 = vld [vmem:[#allocation11 + $0x21c] ss:$24 sps:$4 sm:$0xff]   ;;  %v15327_v49 = vld [vmem:[#allocation11 + $0x1e8] ss:$24 sps:$4 sm:$0xff]  }
 0x346   :  { %5548 = vmatprep.subr.bf16.mxu0 %v15410_v6  ;;  %v15329_v2 = vld [vmem:[#allocation11 + $0x1ec] ss:$24 sps:$4 sm:$0xff]   ;;  %v15330_v4 = vld [vmem:[#allocation11 + $0x1b8] ss:$24 sps:$4 sm:$0xff]   ;;  %v15341_v6 = vld [vmem:[#allocation11 + $0x75c] ss:$24 sps:$4 sm:$0xff]  }
 0x347   :  { %v3699_v7 = vadd.f32 %v3681_v3, %v3662_v36  ;;  %16768 = vtanh.f32 %v3698_v5  ;;  %v15332_v3 = vld [vmem:[#allocation11 + $0x1bc] ss:$24 sps:$4 sm:$0xff]   ;;  %v15335_v5 = vld [vmem:[#allocation11 + $0x18c] ss:$24 sps:$4 sm:$0xff]   ;;  %v15333_v36 = vld [vmem:[#allocation11 + $0x188] ss:$24 sps:$4 sm:$0xff]  }
 0x349   :  { %16770 = vtanh.f32 %v3699_v7  ;;  %5549 = vmatpush2.bf16.msra.mxu0 %v15408_v8 }
 0x34a   :  { %5550 = vmatprep.subr.bf16.mxu0 %v15416_v11 }
 0x34d   :  { %5551 = vmatpush2.bf16.msra.mxu0 %v15414_v39  ;;  %v15339_v39 = vld [vmem:[#allocation11 + $0x758] ss:$24 sps:$4 sm:$0xff]  }
 0x34e   :  { %5552 = vmatprep.subr.bf16.mxu0 %v15422_v41 }
 0x351   :  { %5553 = vmatpush2.bf16.msra.mxu0 %v15420_v12  ;;  %v15347_v12 = vld [vmem:[#allocation11 + $0x72c] ss:$24 sps:$4 sm:$0xff]  }
 0x352   :  { %5554 = vmatprep.subr.bf16.mxu0 %v15428_v57 }
 0x354   :  { %v16769_v51 = vpop.eup %16768 }
 0x355   :  { %5555 = vmatpush2.bf16.msra.mxu0 %v15426_v14  ;;  %v17478_v25 = vpack.c.bf16 %v16769_v51, %v16769_v51 }
 0x356   :  { %v3380_v38 = vpop.f32.mrf.mxu1  ;;  %v16771_v15 = vpop.eup %16770  ;;  %5606 = vmatprep.subr.bf16.mxu0 %v15434_v16 }
 0x357   :  { %v3421_v48 = vpop.f32.mrf.mxu0  ;;  %v17474_v19 = vpack.c.bf16 %v16771_v15, %v16771_v15 }
 0x358   :  { %v17470_v17 = vadd.f32 %v3421_v48, %v3380_v38  ;;  %v17472_v18 = vpop.f32.mrf.mxu1 }
 0x359   :  { %v17476_v21 = vpop.f32.mrf.mxu0  ;;  %5515 = vmatprep.mubr.bf16.mxu1 %v17474_v19 }
 0x35a   :  { %v3384_v29 = vpop.f32.mrf.mxu1  ;;  %5516 = vmatmul.mubr.bf16.vlgmr.msra.gmra.mxu1 %v17478_v25  ;;  %v3424_v8 = vadd.f32 %v17476_v21, %v17472_v18  ;;  %v15345_v18 = vld [vmem:[#allocation11 + $0x728] ss:$24 sps:$4 sm:$0xff]   ;;  %v15353_v21 = vld [vmem:[#allocation11 + $0x6fc] ss:$24 sps:$4 sm:$0xff]  }
 0x35b   :  { %v3425_v54 = vpop.f32.mrf.mxu0  ;;  %5566 = vmatpush1.bf16.msra.mxu1 %v15288_v20  ;;  %5597 = vmatprep.mubr.bf16.mxu1 %v17438_v24 }
 0x35c   :  { %v3385_v27 = vpop.f32.mrf.mxu1  ;;  %5567 = vmatprep.subr.bf16.mxu1 %v15293_v28 }
 0x35d   :  { %v3426_v31 = vpop.f32.mrf.mxu0 }
 0x35f   :  { %5568 = vmatpush1.bf16.msra.mxu1 %v15291_v30 }
 0x360   :  { %5569 = vmatprep.subr.bf16.mxu1 %v15296_v32 }
 0x363   :  { %5570 = vmatpush1.bf16.msra.mxu1 %v15294_v44 }
 0x364   :  { %5571 = vmatprep.subr.bf16.mxu1 %v15299_v33  ;;  %v15351_v33 = vld [vmem:[#allocation11 + $0x6f8] ss:$24 sps:$4 sm:$0xff]  }
 0x367   :  { %5572 = vmatpush1.bf16.msra.mxu1 %v15297_v42 }
 0x368   :  { %5573 = vmatprep.subr.bf16.mxu1 %v15302_v45 }
 0x36b   :  { %5574 = vmatpush1.bf16.msra.mxu1 %v15300_v47 }
 0x36c   :  { %5575 = vmatprep.subr.bf16.mxu1 %v15305_v46 }
 0x36f   :  { %5576 = vmatpush1.bf16.msra.mxu1 %v15303_v50  ;;  %v15359_v50 = vld [vmem:[#allocation11 + $0x6cc] ss:$24 sps:$4 sm:$0xff]  }
 0x370   :  { %5577 = vmatprep.subr.bf16.mxu1 %v15308_v40 }
 0x373   :  { %5578 = vmatpush1.bf16.msra.mxu1 %v15306_v43 }
 0x374   :  { %5579 = vmatprep.subr.bf16.mxu1 %v15311_v22 }
 0x377   :  { %5580 = vmatpush1.bf16.msra.mxu1 %v15309_v23 }
 0x378   :  { %5581 = vmatprep.subr.bf16.mxu1 %v15314_v52  ;;  %v15357_v52 = vld [vmem:[#allocation11 + $0x6c8] ss:$24 sps:$4 sm:$0xff]  }
 0x37b   :  { %5582 = vmatpush2.bf16.msra.mxu1 %v15312_v55 }
 0x37c   :  { %5583 = vmatprep.subr.bf16.mxu1 %v15317_v58 }
 0x37f   :  { %5584 = vmatpush2.bf16.msra.mxu1 %v15315_v60 }
 0x380   :  { %5585 = vmatprep.subr.bf16.mxu1 %v15320_v9 }
 0x383   :  { %5586 = vmatpush2.bf16.msra.mxu1 %v15318_v61  ;;  %v15365_v61 = vld [vmem:[#allocation11 + $0x69c] ss:$24 sps:$4 sm:$0xff]  }
 0x384   :  { %5587 = vmatprep.subr.bf16.mxu1 %v15323_v53 }
 0x387   :  { %5588 = vmatpush2.bf16.msra.mxu1 %v15321_v62 }
 0x388   :  { %5589 = vmatprep.subr.bf16.mxu1 %v15326_v63 }
 0x38b   :  { %5590 = vmatpush2.bf16.msra.mxu1 %v15324_v1 }
 0x38c   :  { %5591 = vmatprep.subr.bf16.mxu1 %v15329_v2  ;;  %v15363_v2 = vld [vmem:[#allocation11 + $0x698] ss:$24 sps:$4 sm:$0xff]  }
 0x38f   :  { %5592 = vmatpush2.bf16.msra.mxu1 %v15327_v49 }
 0x390   :  { %5593 = vmatprep.subr.bf16.mxu1 %v15332_v3 }
 0x393   :  { %5594 = vmatpush2.bf16.msra.mxu1 %v15330_v4  ;;  %v15371_v4 = vld [vmem:[#allocation11 + $0x66c] ss:$24 sps:$4 sm:$0xff]  }
 0x394   :  { %5595 = vmatprep.subr.bf16.mxu1 %v15335_v5 }
 0x396   :  { %v3462_v7 = vpop.f32.mrf.mxu1 }
 0x397   :  { %v17486_v11 = vadd.f32 %v3462_v7, %v17470_v17  ;;  %5596 = vmatpush2.bf16.msra.mxu1 %v15333_v36  ;;  %v15369_v7 = vld [vmem:[#allocation11 + $0x668] ss:$24 sps:$4 sm:$0xff]  }
 0x398   :  { %v3464_v41 = vpop.f32.mrf.mxu1  ;;  %5647 = vmatprep.subr.bf16.mxu1 %v15341_v6 }
 0x399   :  { %v3495_v57 = vrot.slane %v17486_v11, 4  ;;  %v3518_v14 = vmul.f32 %v17486_v11, %v17486_v11  ;;  %v17491_v51 = vadd.f32 %v3464_v41, %v3424_v8 }
 0x39a   :  { %v3466_v38 = vpop.f32.mrf.mxu1  ;;  %5598 = vmatmul.mubr.bf16.vlgmr.msra.gmra.mxu1 %v17441_v26 }
 0x39b   :  { %v3496_v15 = vadd.f32 %v3495_v57, %v17486_v11  ;;  %v3544_v48 = vrot.slane %v3518_v14, 4  ;;  %v3501_v16 = vrot.slane %v17491_v51, 4  ;;  %v3519_v17 = vmul.f32 %v17491_v51, %v17491_v51  ;;  %5648 = vmatpush1.bf16.msra.mxu1 %v15339_v39  ;;  %v15377_v39 = vld [vmem:[#allocation11 + $0x63c] ss:$24 sps:$4 sm:$0xff]   ;;  %v15375_v57 = vld [vmem:[#allocation11 + $0x638] ss:$24 sps:$4 sm:$0xff]  }
 0x39c   :  { %v3467_v20 = vpop.f32.mrf.mxu1  ;;  %5649 = vmatprep.subr.bf16.mxu1 %v15347_v12  ;;  %v15381_v38 = vld [vmem:[#allocation11 + $0x608] ss:$24 sps:$4 sm:$0xff]  }
 0x39d   :  { %v3497_v28 = vrot.slane %v3496_v15, 2  ;;  %v3545_v29 = vadd.f32 %v3544_v48, %v3518_v14  ;;  %v3502_v54 = vadd.f32 %v3501_v16, %v17491_v51  ;;  %v3550_v27 = vrot.slane %v3519_v17, 4  ;;  %v15383_v14 = vld [vmem:[#allocation11 + $0x60c] ss:$24 sps:$4 sm:$0xff]   ;;  %v15387_v48 = vld [vmem:[#allocation11 + $0x8d8] ss:$24 sps:$4 sm:$0xff]  }
 0x39e   :  { %v16848_v16 = vld [vmem:[#allocation8] sm:$0x3f] }
 0x39f   :  { %v3498_v30 = vadd.f32 %v3497_v28, %v3496_v15  ;;  %v3546_v31 = vrot.slane %v3545_v29, 2  ;;  %v3503_v32 = vrot.slane %v3502_v54, 2  ;;  %v3551_v44 = vadd.f32 %v3550_v27, %v3519_v17  ;;  %5650 = vmatpush1.bf16.msra.mxu1 %v15345_v18  ;;  %v15389_v15 = vld [vmem:[#allocation11 + $0x8dc] ss:$24 sps:$4 sm:$0xff]   ;;  %v15395_v18 = vld [vmem:[#allocation11 + $0x8ac] ss:$24 sps:$4 sm:$0xff]  }
 0x3a0   :  { %5651 = vmatprep.subr.bf16.mxu1 %v15353_v21  ;;  %v3612_v17 = vrot.slane %v16848_v16, %v17366_v10  ;;  %v15393_v21 = vld [vmem:[#allocation11 + $0x8a8] ss:$24 sps:$4 sm:$0xff]   ;;  %v3616_v28 = vrot.slane %v16848_v16, %v17369_v13  ;;  %v15455_v16 = vld [vmem:[#allocation11 + $0x3d4] ss:$24 sps:$4 sm:$0xff]  }
 0x3a1   :  { %v3499_v42 = vrot.slane %v3498_v30, 1  ;;  %v3547_v45 = vadd.f32 %v3546_v31, %v3545_v29  ;;  %v3504_v47 = vadd.f32 %v3503_v32, %v3502_v54  ;;  %v3552_v46 = vrot.slane %v3551_v44, 2  ;;  %v15401_v54 = vld [vmem:[#allocation11 + $0x87c] ss:$24 sps:$4 sm:$0xff]  }
 0x3a2   :  { %v16849_v32 = vld [vmem:[#allocation10] sm:$0x3f] }
 0x3a3   :  { %v3500_v40 = vadd.f32 %v3499_v42, %v3498_v30  ;;  %v3548_v43 = vrot.slane %v3547_v45, 1  ;;  %v3505_v22 = vrot.slane %v3504_v47, 1  ;;  %v3553_v23 = vadd.f32 %v3552_v46, %v3551_v44  ;;  %5652 = vmatpush1.bf16.msra.mxu1 %v15351_v33  ;;  %v15399_v33 = vld [vmem:[#allocation11 + $0x878] ss:$24 sps:$4 sm:$0xff]  }
 0x3a4   :  { %5653 = vmatprep.subr.bf16.mxu1 %v15359_v50  ;;  %v3685_v44 = vrot.slane %v16849_v32, %v17366_v10 }
 0x3a5   :  { %v3512_v55 = vmul.f32 0.125, %v3500_v40  ;;  %v3549_v58 = vadd.f32 %v3548_v43, %v3547_v45  ;;  %v3506_v60 = vadd.f32 %v3505_v22, %v3504_v47  ;;  %v3554_v9 = vrot.slane %v3553_v23, 1  ;;  %v15407_v47 = vld [vmem:[#allocation11 + $0x84c] ss:$24 sps:$4 sm:$0xff]  }
 0x3a6   :  { %v3689_v40 = vrot.slane %v16849_v32, %v17369_v13  ;;  %v15473_v32 = vld [vmem:[#allocation11 + $0x344] ss:$24 sps:$4 sm:$0xff]  }
 0x3a7   :  { %v3560_v53 = vmul.f32 0.125, %v3549_v58  ;;  %v3566_v62 = vmul.f32 %v3512_v55, %v3512_v55  ;;  %v3513_v63 = vmul.f32 0.125, %v3506_v60  ;;  %v3555_v1 = vadd.f32 %v3554_v9, %v3553_v23  ;;  %5654 = vmatpush1.bf16.msra.mxu1 %v15357_v52  ;;  %v15413_v23 = vld [vmem:[#allocation11 + $0x81c] ss:$24 sps:$4 sm:$0xff]   ;;  %v15419_v58 = vld [vmem:[#allocation11 + $0x7ec] ss:$24 sps:$4 sm:$0xff]  }
 0x3a8   :  { %5655 = vmatprep.subr.bf16.mxu1 %v15365_v61  ;;  %v3633_v30 = vsub.f32 %v17486_v11, %v3512_v55  ;;  %v15405_v11 = vld [vmem:[#allocation11 + $0x848] ss:$24 sps:$4 sm:$0xff]   ;;  %v15411_v55 = vld [vmem:[#allocation11 + $0x818] ss:$24 sps:$4 sm:$0xff]   ;;  %v15431_v61 = vld [vmem:[#allocation11 + $0x78c] ss:$24 sps:$4 sm:$0xff]  }
 0x3a9   :  { %v3572_v49 = vsub.f32 %v3560_v53, %v3566_v62  ;;  %v3567_v3 = vmul.f32 %v3513_v63, %v3513_v63  ;;  %v3561_v5 = vmul.f32 0.125, %v3555_v1  ;;  %v3634_v46 = vsub.f32 %v17491_v51, %v3513_v63  ;;  %v15417_v60 = vld [vmem:[#allocation11 + $0x7e8] ss:$24 sps:$4 sm:$0xff]   ;;  %v15425_v51 = vld [vmem:[#allocation11 + $0x7bc] ss:$24 sps:$4 sm:$0xff]  }
 0x3aa   :  { %v15423_v9 = vld [vmem:[#allocation11 + $0x7b8] ss:$24 sps:$4 sm:$0xff]   ;;  %v15429_v62 = vld [vmem:[#allocation11 + $0x788] ss:$24 sps:$4 sm:$0xff]  }
 0x3ab   :  { %v3578_v36 = vmax.f32 %v3572_v49, 0.0  ;;  %v3573_v6 = vsub.f32 %v3561_v5, %v3567_v3  ;;  %5656 = vmatpush1.bf16.msra.mxu1 %v15363_v2  ;;  %v15432_v2 = vld [vmem:[#allocation11 + $0x458] ss:$24 sps:$4 sm:$0xff]   ;;  %v15437_v3 = vld [vmem:[#allocation11 + $0x464] ss:$24 sps:$4 sm:$0xff]  }
 0x3ac   :  { %5657 = vmatprep.subr.bf16.mxu1 %v15371_v4  ;;  %v15435_v4 = vld [vmem:[#allocation11 + $0x460] ss:$24 sps:$4 sm:$0xff]  }
 0x3ad   :  { %v3584_v8 = vadd.f32 1e-05, %v3578_v36  ;;  %v3579_v41 = vmax.f32 %v3573_v6, 0.0  ;;  %v15440_v36 = vld [vmem:[#allocation11 + $0x42c] ss:$24 sps:$4 sm:$0xff]  }
 0x3ae   :  { %v15443_v6 = vld [vmem:[#allocation11 + $0x434] ss:$24 sps:$4 sm:$0xff]  }
 0x3af   :  { %16772 = vrsqrt.f32 %v3584_v8  ;;  %v3585_v12 = vadd.f32 1e-05, %v3579_v41  ;;  %5658 = vmatpush1.bf16.msra.mxu1 %v15369_v7  ;;  %v15438_v7 = vld [vmem:[#allocation11 + $0x428] ss:$24 sps:$4 sm:$0xff]  }
 0x3b0   :  { %5659 = vmatprep.subr.bf16.mxu1 %v15377_v39  ;;  %v15446_v39 = vld [vmem:[#allocation11 + $0x3fc] ss:$24 sps:$4 sm:$0xff]   ;;  %v15441_v41 = vld [vmem:[#allocation11 + $0x430] ss:$24 sps:$4 sm:$0xff]  }
 0x3b1   :  { %16774 = vrsqrt.f32 %v3585_v12 }
 0x3b3   :  { %5660 = vmatpush1.bf16.msra.mxu1 %v15375_v57  ;;  %v15449_v57 = vld [vmem:[#allocation11 + $0x404] ss:$24 sps:$4 sm:$0xff]  }
 0x3b4   :  { %5661 = vmatprep.subr.bf16.mxu1 %v15383_v14  ;;  %v15444_v14 = vld [vmem:[#allocation11 + $0x3f8] ss:$24 sps:$4 sm:$0xff]  }
 0x3b7   :  { %5662 = vmatpush1.bf16.msra.mxu1 %v15381_v38 }
 0x3b8   :  { %5663 = vmatprep.subr.bf16.mxu1 %v15389_v15  ;;  %v15452_v15 = vld [vmem:[#allocation11 + $0x3cc] ss:$24 sps:$4 sm:$0xff]  }
 0x3bb   :  { %5664 = vmatpush2.bf16.msra.mxu1 %v15387_v48  ;;  %v15447_v48 = vld [vmem:[#allocation11 + $0x400] ss:$24 sps:$4 sm:$0xff]  }
 0x3bc   :  { %v16773_v20 = vpop.eup %16772  ;;  %5665 = vmatprep.subr.bf16.mxu1 %v15395_v18  ;;  %v15458_v18 = vld [vmem:[#allocation11 + $0x39c] ss:$24 sps:$4 sm:$0xff]  }
 0x3bd   :  { %v3627_v29 = vmul.f32 %v16773_v20, %v3612_v17  ;;  %v15450_v17 = vld [vmem:[#allocation11 + $0x3c8] ss:$24 sps:$4 sm:$0xff]   ;;  %v15461_v20 = vld [vmem:[#allocation11 + $0x3a4] ss:$24 sps:$4 sm:$0xff]  }
 0x3be   :  { %v16775_v27 = vpop.eup %16774 }
 0x3bf   :  { %v3654_v31 = vrot.slane %v3627_v29, %v17327_v35  ;;  %5666 = vmatpush2.bf16.msra.mxu1 %v15393_v21  ;;  %v3628_v42 = vmul.f32 %v16775_v27, %v3616_v28  ;;  %v15456_v21 = vld [vmem:[#allocation11 + $0x398] ss:$24 sps:$4 sm:$0xff]   ;;  %v15464_v28 = vld [vmem:[#allocation11 + $0x36c] ss:$24 sps:$4 sm:$0xff]   ;;  %v15462_v27 = vld [vmem:[#allocation11 + $0x368] ss:$24 sps:$4 sm:$0xff]  }
 0x3c0   :  { %5667 = vmatprep.subr.bf16.mxu1 %v15401_v54  ;;  %v15459_v29 = vld [vmem:[#allocation11 + $0x3a0] ss:$24 sps:$4 sm:$0xff]   ;;  %v15467_v54 = vld [vmem:[#allocation11 + $0x374] ss:$24 sps:$4 sm:$0xff]  }
 0x3c1   :  { %v3663_v45 = vmul.f32 %v3654_v31, %v3633_v30  ;;  %v3658_v50 = vrot.slane %v3628_v42, %v17327_v35  ;;  %v15470_v30 = vld [vmem:[#allocation11 + $0x33c] ss:$24 sps:$4 sm:$0xff]   ;;  %v15465_v31 = vld [vmem:[#allocation11 + $0x370] ss:$24 sps:$4 sm:$0xff]   ;;  %v15471_v42 = vld [vmem:[#allocation11 + $0x340] ss:$24 sps:$4 sm:$0xff]  }
 0x3c3   :  { %v3700_v43 = vadd.f32 %v3685_v44, %v3663_v45  ;;  %5668 = vmatpush2.bf16.msra.mxu1 %v15399_v33  ;;  %v3664_v22 = vmul.f32 %v3658_v50, %v3634_v46  ;;  %v15468_v44 = vld [vmem:[#allocation11 + $0x338] ss:$24 sps:$4 sm:$0xff]   ;;  %v15476_v33 = vld [vmem:[#allocation11 + $0x30c] ss:$24 sps:$4 sm:$0xff]   ;;  %v15482_v46 = vld [vmem:[#allocation11 + $0x5dc] ss:$24 sps:$4 sm:$0xff]  }
 0x3c4   :  { %5669 = vmatprep.subr.bf16.mxu1 %v15407_v47  ;;  %v15479_v45 = vld [vmem:[#allocation11 + $0x314] ss:$24 sps:$4 sm:$0xff]   ;;  %v15474_v47 = vld [vmem:[#allocation11 + $0x308] ss:$24 sps:$4 sm:$0xff]  }
 0x3c5   :  { %v3701_v52 = vadd.f32 %v3689_v40, %v3664_v22  ;;  %16776 = vtanh.f32 %v3700_v43  ;;  %v15477_v50 = vld [vmem:[#allocation11 + $0x310] ss:$24 sps:$4 sm:$0xff]   ;;  %v15485_v40 = vld [vmem:[#allocation11 + $0x5e4] ss:$24 sps:$4 sm:$0xff]   ;;  %v15483_v22 = vld [vmem:[#allocation11 + $0x5e0] ss:$24 sps:$4 sm:$0xff]  }
 0x3c6   :  { %v15480_v43 = vld [vmem:[#allocation11 + $0x5d8] ss:$24 sps:$4 sm:$0xff]  }
 0x3c7   :  { %5670 = vmatpush2.bf16.msra.mxu1 %v15405_v11  ;;  %16778 = vtanh.f32 %v3701_v52  ;;  %v15488_v11 = vld [vmem:[#allocation11 + $0x5ac] ss:$24 sps:$4 sm:$0xff]   ;;  %v15486_v52 = vld [vmem:[#allocation11 + $0x5a8] ss:$24 sps:$4 sm:$0xff]  }
 0x3c8   :  { %5671 = vmatprep.subr.bf16.mxu1 %v15413_v23  ;;  %v15491_v23 = vld [vmem:[#allocation11 + $0x5b4] ss:$24 sps:$4 sm:$0xff]  }
 0x3cb   :  { %5672 = vmatpush2.bf16.msra.mxu1 %v15411_v55  ;;  %v15494_v55 = vld [vmem:[#allocation11 + $0x57c] ss:$24 sps:$4 sm:$0xff]  }
 0x3cc   :  { %5673 = vmatprep.subr.bf16.mxu1 %v15419_v58  ;;  %v15489_v58 = vld [vmem:[#allocation11 + $0x5b0] ss:$24 sps:$4 sm:$0xff]  }
 0x3cf   :  { %5674 = vmatpush2.bf16.msra.mxu1 %v15417_v60  ;;  %v15497_v60 = vld [vmem:[#allocation11 + $0x584] ss:$24 sps:$4 sm:$0xff]  }
 0x3d0   :  { %5675 = vmatprep.subr.bf16.mxu1 %v15425_v51  ;;  %v15492_v51 = vld [vmem:[#allocation11 + $0x578] ss:$24 sps:$4 sm:$0xff]  }
 0x3d2   :  { %v16777_v53 = vpop.eup %16776 }
 0x3d3   :  { %5676 = vmatpush2.bf16.msra.mxu1 %v15423_v9  ;;  %v17509_v49 = vpack.c.bf16 %v16777_v53, %v16777_v53  ;;  %v15500_v9 = vld [vmem:[#allocation11 + $0x54c] ss:$24 sps:$4 sm:$0xff]  }
 0x3d4   :  { %v16779_v63 = vpop.eup %16778  ;;  %5677 = vmatprep.subr.bf16.mxu1 %v15431_v61  ;;  %v15495_v61 = vld [vmem:[#allocation11 + $0x580] ss:$24 sps:$4 sm:$0xff]   ;;  %v15503_v53 = vld [vmem:[#allocation11 + $0x554] ss:$24 sps:$4 sm:$0xff]  }
 0x3d5   :  { %v17507_v1 = vpack.c.bf16 %v16779_v63, %v16779_v63  ;;  %v15506_v63 = vld [vmem:[#allocation11 + $0x51c] ss:$24 sps:$4 sm:$0xff]  }
 0x3d7   :  { %5678 = vmatpush2.bf16.msra.mxu1 %v15429_v62  ;;  %5556 = vmatprep.mubr.bf16.mxu0 %v17507_v1  ;;  %v15498_v62 = vld [vmem:[#allocation11 + $0x548] ss:$24 sps:$4 sm:$0xff]  }
 0x3d8   :  { %5679 = vmatprep.mubr.bf16.mxu1 %v17507_v1  ;;  %5557 = vmatmul.mubr.bf16.vlgmr.msra.gmra.mxu0 %v17509_v49  ;;  %v17514_v5 = vpop.f32.mrf.mxu0 }
 0x3d9   :  { %5607 = vmatpush1.bf16.msra.mxu0 %v15432_v2  ;;  %5638 = vmatprep.mubr.bf16.mxu0 %v17474_v19  ;;  %v15501_v2 = vld [vmem:[#allocation11 + $0x550] ss:$24 sps:$4 sm:$0xff]  }
 0x3da   :  { %5680 = vmatmul.mubr.bf16.vlgmr.msra.gmra.mxu1 %v17509_v49  ;;  %5729 = vmatprep.subr.bf16.mxu1 %v15437_v3  ;;  %v17518_v8 = vpop.f32.mrf.mxu0  ;;  %v15509_v3 = vld [vmem:[#allocation11 + $0x524] ss:$24 sps:$4 sm:$0xff]  }
 0x3db   :  { %5730 = vmatpush1.bf16.msra.mxu1 %v15435_v4  ;;  %5761 = vmatprep.mubr.bf16.mxu1 %v17474_v19  ;;  %v15453_v19 = vld [vmem:[#allocation11 + $0x3d0] ss:$24 sps:$4 sm:$0xff]  }
 0x3dc   :  { %5608 = vmatprep.subr.bf16.mxu0 %v15440_v36  ;;  %v5480_v12 = vpop.f32.mrf.mxu0  ;;  %5731 = vmatprep.subr.bf16.mxu1 %v15443_v6  ;;  %v15504_v4 = vld [vmem:[#allocation11 + $0x518] ss:$24 sps:$4 sm:$0xff]   ;;  %v15512_v36 = vld [vmem:[#allocation11 + $0x4ec] ss:$24 sps:$4 sm:$0xff]  }
 0x3dd   :  { %5609 = vmatpush1.bf16.msra.mxu0 %v15438_v7  ;;  %v15507_v6 = vld [vmem:[#allocation11 + $0x520] ss:$24 sps:$4 sm:$0xff]   ;;  %v15515_v7 = vld [vmem:[#allocation11 + $0x4f4] ss:$24 sps:$4 sm:$0xff]   ;;  %v15513_v12 = vld [vmem:[#allocation11 + $0x4f0] ss:$24 sps:$4 sm:$0xff]  }
 0x3de   :  { %v5481_v38 = vpop.f32.mrf.mxu0  ;;  %5610 = vmatprep.subr.bf16.mxu0 %v15446_v39  ;;  %v15510_v39 = vld [vmem:[#allocation11 + $0x4e8] ss:$24 sps:$4 sm:$0xff]  }
 0x3df   :  { %5732 = vmatpush1.bf16.msra.mxu1 %v15441_v41  ;;  %v15518_v41 = vld [vmem:[#allocation11 + $0x4bc] ss:$24 sps:$4 sm:$0xff]   ;;  %v15524_v38 = vld [vmem:[#allocation11 + $0x48c] ss:$24 sps:$4 sm:$0xff]  }
 0x3e0   :  { %5733 = vmatprep.subr.bf16.mxu1 %v15449_v57  ;;  %v15521_v57 = vld [vmem:[#allocation11 + $0x4c4] ss:$24 sps:$4 sm:$0xff]  }
 0x3e1   :  { %5611 = vmatpush1.bf16.msra.mxu0 %v15444_v14  ;;  %v15516_v14 = vld [vmem:[#allocation11 + $0x4b8] ss:$24 sps:$4 sm:$0xff]  }
 0x3e2   :  { %5612 = vmatprep.subr.bf16.mxu0 %v15452_v15  ;;  %v15519_v15 = vld [vmem:[#allocation11 + $0x4c0] ss:$24 sps:$4 sm:$0xff]  }
 0x3e3   :  { %5734 = vmatpush1.bf16.msra.mxu1 %v15447_v48  ;;  %v15527_v48 = vld [vmem:[#allocation11 + $0x494] ss:$24 sps:$4 sm:$0xff]  }
 0x3e4   :  { %5735 = vmatprep.subr.bf16.mxu1 %v15455_v16  ;;  %v15522_v16 = vld [vmem:[#allocation11 + $0x488] ss:$24 sps:$4 sm:$0xff]  }
 0x3e5   :  { %5613 = vmatpush1.bf16.msra.mxu0 %v15450_v17  ;;  %v15530_v17 = vld [vmem:[#allocation11 + $0x164] ss:$24 sps:$4 sm:$0xff]  }
 0x3e6   :  { %5614 = vmatprep.subr.bf16.mxu0 %v15458_v18  ;;  %v15525_v18 = vld [vmem:[#allocation11 + $0x490] ss:$24 sps:$4 sm:$0xff]  }
 0x3e7   :  { %5736 = vmatpush1.bf16.msra.mxu1 %v15453_v19  ;;  %v15528_v19 = vld [vmem:[#allocation11 + $0x160] ss:$24 sps:$4 sm:$0xff]  }
 0x3e8   :  { %5737 = vmatprep.subr.bf16.mxu1 %v15461_v20  ;;  %v15533_v20 = vld [vmem:[#allocation11 + $0x134] ss:$24 sps:$4 sm:$0xff]  }
 0x3e9   :  { %5615 = vmatpush1.bf16.msra.mxu0 %v15456_v21  ;;  %v15531_v21 = vld [vmem:[#allocation11 + $0x130] ss:$24 sps:$4 sm:$0xff]  }
 0x3ea   :  { %5616 = vmatprep.subr.bf16.mxu0 %v15464_v28  ;;  %v15626_v28 = vld [vmem:[#allocation16 + $0x26c] ss:$44 sps:$4 sm:$0xff]  }
 0x3eb   :  { %5738 = vmatpush1.bf16.msra.mxu1 %v15459_v29 }
 0x3ec   :  { %5739 = vmatprep.subr.bf16.mxu1 %v15467_v54  ;;  %v15536_v54 = vld [vmem:[#allocation11 + $0x104] ss:$24 sps:$4 sm:$0xff]  }
 0x3ed   :  { %5617 = vmatpush1.bf16.msra.mxu0 %v15462_v27  ;;  %v15624_v27 = vld [vmem:[#allocation16 + $0x268] ss:$44 sps:$4 sm:$0xff]  }
 0x3ee   :  { %5618 = vmatprep.subr.bf16.mxu0 %v15470_v30 }
 0x3ef   :  { %5740 = vmatpush1.bf16.msra.mxu1 %v15465_v31  ;;  %v15534_v31 = vld [vmem:[#allocation11 + $0x100] ss:$24 sps:$4 sm:$0xff]  }
 0x3f0   :  { %5741 = vmatprep.subr.bf16.mxu1 %v15473_v32  ;;  %v15629_v32 = vld [vmem:[#allocation16 + $0x214] ss:$44 sps:$4 sm:$0xff]  }
 0x3f1   :  { %5619 = vmatpush1.bf16.msra.mxu0 %v15468_v44 }
 0x3f2   :  { %5620 = vmatprep.subr.bf16.mxu0 %v15476_v33  ;;  %v15539_v33 = vld [vmem:[#allocation11 + $0xd4] ss:$24 sps:$4 sm:$0xff]  }
 0x3f3   :  { %5742 = vmatpush1.bf16.msra.mxu1 %v15471_v42 }
 0x3f4   :  { %5743 = vmatprep.subr.bf16.mxu1 %v15479_v45  ;;  %v15632_v45 = vld [vmem:[#allocation16 + $0x1bc] ss:$44 sps:$4 sm:$0xff]  }
 0x3f5   :  { %5621 = vmatpush1.bf16.msra.mxu0 %v15474_v47  ;;  %v15542_v47 = vld [vmem:[#allocation11 + $0xa4] ss:$24 sps:$4 sm:$0xff]  }
 0x3f6   :  { %5622 = vmatprep.subr.bf16.mxu0 %v15482_v46  ;;  %v15630_v46 = vld [vmem:[#allocation16 + $0x1b8] ss:$44 sps:$4 sm:$0xff]  }
 0x3f7   :  { %5744 = vmatpush1.bf16.msra.mxu1 %v15477_v50  ;;  %v15540_v50 = vld [vmem:[#allocation11 + $0xa0] ss:$24 sps:$4 sm:$0xff]  }
 0x3f8   :  { %5745 = vmatprep.subr.bf16.mxu1 %v15485_v40  ;;  %v15635_v40 = vld [vmem:[#allocation16 + $0x164] ss:$44 sps:$4 sm:$0xff]  }
 0x3f9   :  { %5623 = vmatpush2.bf16.msra.mxu0 %v15480_v43  ;;  %v15545_v43 = vld [vmem:[#allocation11 + $0x74] ss:$24 sps:$4 sm:$0xff]  }
 0x3fa   :  { %5624 = vmatprep.subr.bf16.mxu0 %v15488_v11  ;;  %v15633_v11 = vld [vmem:[#allocation16 + $0x160] ss:$44 sps:$4 sm:$0xff]  }
 0x3fb   :  { %5746 = vmatpush2.bf16.msra.mxu1 %v15483_v22  ;;  %v15543_v22 = vld [vmem:[#allocation11 + $0x70] ss:$24 sps:$4 sm:$0xff]  }
 0x3fc   :  { %5747 = vmatprep.subr.bf16.mxu1 %v15491_v23  ;;  %v15638_v23 = vld [vmem:[#allocation16 + $0x10c] ss:$44 sps:$4 sm:$0xff]  }
 0x3fd   :  { %5625 = vmatpush2.bf16.msra.mxu0 %v15486_v52  ;;  %v15548_v52 = vld [vmem:[#allocation11 + $0x44] ss:$24 sps:$4 sm:$0xff]  }
 0x3fe   :  { %5626 = vmatprep.subr.bf16.mxu0 %v15494_v55  ;;  %v15636_v55 = vld [vmem:[#allocation16 + $0x108] ss:$44 sps:$4 sm:$0xff]  }
 0x3ff   :  { %5748 = vmatpush2.bf16.msra.mxu1 %v15489_v58  ;;  %v15546_v58 = vld [vmem:[#allocation11 + $0x40] ss:$24 sps:$4 sm:$0xff]  }
 0x400   :  { %5749 = vmatprep.subr.bf16.mxu1 %v15497_v60  ;;  %v15641_v60 = vld [vmem:[#allocation16 + $0xb4] ss:$44 sps:$4 sm:$0xff]  }
 0x401   :  { %5627 = vmatpush2.bf16.msra.mxu0 %v15492_v51  ;;  %v15551_v51 = vld [vmem:[#allocation11 + $0x14] ss:$24 sps:$4 sm:$0xff]  }
 0x402   :  { %5628 = vmatprep.subr.bf16.mxu0 %v15500_v9  ;;  %v15639_v9 = vld [vmem:[#allocation16 + $0xb0] ss:$44 sps:$4 sm:$0xff]  }
 0x403   :  { %5750 = vmatpush2.bf16.msra.mxu1 %v15495_v61  ;;  %v15549_v61 = vld [vmem:[#allocation11 + $0x10] ss:$24 sps:$4 sm:$0xff]  }
 0x404   :  { %5751 = vmatprep.subr.bf16.mxu1 %v15503_v53  ;;  %v15644_v53 = vld [vmem:[#allocation16 + $0x5c] ss:$44 sps:$4 sm:$0xff]  }
 0x405   :  { %5629 = vmatpush2.bf16.msra.mxu0 %v15498_v62  ;;  %v15554_v62 = vld [vmem:[#allocation11 + $0x2e4] ss:$24 sps:$4 sm:$0xff]  }
 0x406   :  { %5630 = vmatprep.subr.bf16.mxu0 %v15506_v63  ;;  %v15642_v63 = vld [vmem:[#allocation16 + $0x58] ss:$44 sps:$4 sm:$0xff]  }
 0x407   :  { %5752 = vmatpush2.bf16.msra.mxu1 %v15501_v2  ;;  %v15552_v2 = vld [vmem:[#allocation11 + $0x2e0] ss:$24 sps:$4 sm:$0xff]  }
 0x408   :  { %5753 = vmatprep.subr.bf16.mxu1 %v15509_v3  ;;  %v15647_v3 = vld [vmem:[#allocation16 + $0x4] ss:$44 sps:$4 sm:$0xff]  }
 0x409   :  { %5631 = vmatpush2.bf16.msra.mxu0 %v15504_v4  ;;  %v15557_v4 = vld [vmem:[#allocation11 + $0x2b4] ss:$24 sps:$4 sm:$0xff]  }
 0x40a   :  { %5632 = vmatprep.subr.bf16.mxu0 %v15512_v36  ;;  %v15645_v36 = vld [vmem:[#allocation16] ss:$44 sps:$4 sm:$0xff]  }
 0x40b   :  { %5754 = vmatpush2.bf16.msra.mxu1 %v15507_v6  ;;  %v15555_v6 = vld [vmem:[#allocation11 + $0x2b0] ss:$24 sps:$4 sm:$0xff]  }
 0x40c   :  { %5755 = vmatprep.subr.bf16.mxu1 %v15515_v7  ;;  %v15650_v7 = vld [vmem:[#allocation16 + $0x52c] ss:$44 sps:$4 sm:$0xff]  }
 0x40d   :  { %5633 = vmatpush2.bf16.msra.mxu0 %v15510_v39  ;;  %v15560_v39 = vld [vmem:[#allocation11 + $0x284] ss:$24 sps:$4 sm:$0xff]  }
 0x40e   :  { %5634 = vmatprep.subr.bf16.mxu0 %v15518_v41  ;;  %v15648_v41 = vld [vmem:[#allocation16 + $0x528] ss:$44 sps:$4 sm:$0xff]  }
 0x40f   :  { %5756 = vmatpush2.bf16.msra.mxu1 %v15513_v12  ;;  %v15558_v12 = vld [vmem:[#allocation11 + $0x280] ss:$24 sps:$4 sm:$0xff]  }
 0x410   :  { %5757 = vmatprep.subr.bf16.mxu1 %v15521_v57  ;;  %v15653_v57 = vld [vmem:[#allocation16 + $0x4d4] ss:$44 sps:$4 sm:$0xff]  }
 0x411   :  { %5635 = vmatpush2.bf16.msra.mxu0 %v15516_v14  ;;  %v15563_v14 = vld [vmem:[#allocation11 + $0x254] ss:$24 sps:$4 sm:$0xff]  }
 0x412   :  { %5636 = vmatprep.subr.bf16.mxu0 %v15524_v38  ;;  %v15651_v38 = vld [vmem:[#allocation16 + $0x4d0] ss:$44 sps:$4 sm:$0xff]  }
 0x413   :  { %5758 = vmatpush2.bf16.msra.mxu1 %v15519_v15  ;;  %v15561_v15 = vld [vmem:[#allocation11 + $0x250] ss:$24 sps:$4 sm:$0xff]  }
 0x414   :  { %5759 = vmatprep.subr.bf16.mxu1 %v15527_v48  ;;  %v15656_v48 = vld [vmem:[#allocation16 + $0x47c] ss:$44 sps:$4 sm:$0xff]  }
 0x415   :  { %5637 = vmatpush2.bf16.msra.mxu0 %v15522_v16  ;;  %v15566_v16 = vld [vmem:[#allocation11 + $0x224] ss:$24 sps:$4 sm:$0xff]  }
 0x416   :  { %5688 = vmatprep.subr.bf16.mxu0 %v15530_v17  ;;  %v15654_v17 = vld [vmem:[#allocation16 + $0x478] ss:$44 sps:$4 sm:$0xff]  }
 0x417   :  { %5760 = vmatpush2.bf16.msra.mxu1 %v15525_v18  ;;  %v15564_v18 = vld [vmem:[#allocation11 + $0x220] ss:$24 sps:$4 sm:$0xff]  }
 0x418   :  { %5639 = vmatmul.mubr.bf16.vlgmr.msra.gmra.mxu0 %v17478_v25  ;;  %9319 = vmatprep.subr.bf16.mxu1 %v15626_v28  ;;  %v15567_v28 = vld [vmem:[#allocation11 + $0x1f0] ss:$24 sps:$4 sm:$0xff]  }
 0x419   :  { %5689 = vmatpush1.bf16.msra.mxu0 %v15528_v19  ;;  %5720 = vmatprep.mubr.bf16.mxu0 %v17438_v24  ;;  %v15627_v24 = vld [vmem:[#allocation16 + $0x210] ss:$44 sps:$4 sm:$0xff]  }
 0x41a   :  { %5762 = vmatmul.mubr.bf16.vlgmr.msra.gmra.mxu1 %v17478_v25  ;;  %v17524_v29 = vpop.f32.mrf.mxu1  ;;  %5690 = vmatprep.subr.bf16.mxu0 %v15533_v20  ;;  %v15537_v25 = vld [vmem:[#allocation11 + $0xd0] ss:$24 sps:$4 sm:$0xff]   ;;  %v15569_v20 = vld [vmem:[#allocation11 + $0x1f4] ss:$24 sps:$4 sm:$0xff]  }
 0x41b   :  { %9320 = vmatpush1.bf16.msra.mxu1 %v15624_v27  ;;  %v15659_v19 = vld [vmem:[#allocation16 + $0x424] ss:$44 sps:$4 sm:$0xff]  }
 0x41c   :  { %v17526_v30 = vpop.f32.mrf.mxu1  ;;  %9321 = vmatprep.subr.bf16.mxu1 %v15629_v32  ;;  %v15572_v27 = vld [vmem:[#allocation11 + $0x1c4] ss:$24 sps:$4 sm:$0xff]   ;;  %v15570_v32 = vld [vmem:[#allocation11 + $0x1c0] ss:$24 sps:$4 sm:$0xff]  }
 0x41d   :  { %5691 = vmatpush1.bf16.msra.mxu0 %v15531_v21  ;;  %v15657_v21 = vld [vmem:[#allocation16 + $0x420] ss:$44 sps:$4 sm:$0xff]  }
 0x41e   :  { %v5521_v44 = vpop.f32.mrf.mxu1  ;;  %5692 = vmatprep.subr.bf16.mxu0 %v15536_v54  ;;  %v15662_v54 = vld [vmem:[#allocation16 + $0x3cc] ss:$44 sps:$4 sm:$0xff]  }
 0x41f   :  { %9322 = vmatpush1.bf16.msra.mxu1 %v15627_v24  ;;  %v15665_v44 = vld [vmem:[#allocation16 + $0x374] ss:$44 sps:$4 sm:$0xff]   ;;  %v15663_v24 = vld [vmem:[#allocation16 + $0x370] ss:$44 sps:$4 sm:$0xff]  }
 0x420   :  { %v5522_v42 = vpop.f32.mrf.mxu1  ;;  %9323 = vmatprep.subr.bf16.mxu1 %v15632_v45  ;;  %v15578_v45 = vld [vmem:[#allocation11 + $0x764] ss:$24 sps:$4 sm:$0xff]  }
 0x421   :  { %5693 = vmatpush1.bf16.msra.mxu0 %v15534_v31  ;;  %v15660_v31 = vld [vmem:[#allocation16 + $0x3c8] ss:$44 sps:$4 sm:$0xff]   ;;  %v15573_v42 = vld [vmem:[#allocation11 + $0x190] ss:$24 sps:$4 sm:$0xff]  }
 0x422   :  { %5694 = vmatprep.subr.bf16.mxu0 %v15539_v33  ;;  %v15575_v33 = vld [vmem:[#allocation11 + $0x194] ss:$24 sps:$4 sm:$0xff]  }
 0x423   :  { %9324 = vmatpush1.bf16.msra.mxu1 %v15630_v46  ;;  %v15576_v46 = vld [vmem:[#allocation11 + $0x760] ss:$24 sps:$4 sm:$0xff]  }
 0x424   :  { %9325 = vmatprep.subr.bf16.mxu1 %v15635_v40  ;;  %v15581_v40 = vld [vmem:[#allocation11 + $0x734] ss:$24 sps:$4 sm:$0xff]  }
 0x425   :  { %5695 = vmatpush1.bf16.msra.mxu0 %v15537_v25  ;;  %v15668_v25 = vld [vmem:[#allocation16 + $0x31c] ss:$44 sps:$4 sm:$0xff]  }
 0x426   :  { %5696 = vmatprep.subr.bf16.mxu0 %v15542_v47  ;;  %v15666_v47 = vld [vmem:[#allocation16 + $0x318] ss:$44 sps:$4 sm:$0xff]  }
 0x427   :  { %9326 = vmatpush1.bf16.msra.mxu1 %v15633_v11  ;;  %v15579_v11 = vld [vmem:[#allocation11 + $0x730] ss:$24 sps:$4 sm:$0xff]  }
 0x428   :  { %9327 = vmatprep.subr.bf16.mxu1 %v15638_v23  ;;  %v15584_v23 = vld [vmem:[#allocation11 + $0x704] ss:$24 sps:$4 sm:$0xff]  }
 0x429   :  { %5697 = vmatpush1.bf16.msra.mxu0 %v15540_v50  ;;  %v15671_v50 = vld [vmem:[#allocation16 + $0x2c4] ss:$44 sps:$4 sm:$0xff]  }
 0x42a   :  { %5698 = vmatprep.subr.bf16.mxu0 %v15545_v43  ;;  %v15669_v43 = vld [vmem:[#allocation16 + $0x2c0] ss:$44 sps:$4 sm:$0xff]  }
 0x42b   :  { %9328 = vmatpush1.bf16.msra.mxu1 %v15636_v55  ;;  %v15582_v55 = vld [vmem:[#allocation11 + $0x700] ss:$24 sps:$4 sm:$0xff]  }
 0x42c   :  { %9329 = vmatprep.subr.bf16.mxu1 %v15641_v60  ;;  %v15587_v60 = vld [vmem:[#allocation11 + $0x6d4] ss:$24 sps:$4 sm:$0xff]  }
 0x42d   :  { %5699 = vmatpush1.bf16.msra.mxu0 %v15543_v22 }
 0x42e   :  { %5700 = vmatprep.subr.bf16.mxu0 %v15548_v52 }
 0x42f   :  { %9330 = vmatpush1.bf16.msra.mxu1 %v15639_v9  ;;  %v15585_v9 = vld [vmem:[#allocation11 + $0x6d0] ss:$24 sps:$4 sm:$0xff]  }
 0x430   :  { %9331 = vmatprep.subr.bf16.mxu1 %v15644_v53  ;;  %v15591_v53 = vld [vmem:[#allocation11 + $0x670] ss:$24 sps:$4 sm:$0xff]  }
 0x431   :  { %5701 = vmatpush1.bf16.msra.mxu0 %v15546_v58 }
 0x432   :  { %5702 = vmatprep.subr.bf16.mxu0 %v15551_v51 }
 0x433   :  { %9332 = vmatpush1.bf16.msra.mxu1 %v15642_v63  ;;  %v15594_v63 = vld [vmem:[#allocation11 + $0x640] ss:$24 sps:$4 sm:$0xff]  }
 0x434   :  { %9333 = vmatprep.subr.bf16.mxu1 %v15647_v3  ;;  %v15597_v3 = vld [vmem:[#allocation11 + $0x610] ss:$24 sps:$4 sm:$0xff]  }
 0x435   :  { %5703 = vmatpush1.bf16.msra.mxu0 %v15549_v61  ;;  %v15588_v61 = vld [vmem:[#allocation11 + $0x6a0] ss:$24 sps:$4 sm:$0xff]  }
 0x436   :  { %5704 = vmatprep.subr.bf16.mxu0 %v15554_v62  ;;  %v15596_v62 = vld [vmem:[#allocation11 + $0x644] ss:$24 sps:$4 sm:$0xff]  }
 0x437   :  { %9334 = vmatpush1.bf16.msra.mxu1 %v15645_v36  ;;  %v15600_v36 = vld [vmem:[#allocation11 + $0x8e0] ss:$24 sps:$4 sm:$0xff]  }
 0x438   :  { %9335 = vmatprep.subr.bf16.mxu1 %v15650_v7  ;;  %v15603_v7 = vld [vmem:[#allocation11 + $0x8b0] ss:$24 sps:$4 sm:$0xff]  }
 0x439   :  { %5705 = vmatpush2.bf16.msra.mxu0 %v15552_v2  ;;  %v15599_v2 = vld [vmem:[#allocation11 + $0x614] ss:$24 sps:$4 sm:$0xff]  }
 0x43a   :  { %5706 = vmatprep.subr.bf16.mxu0 %v15557_v4  ;;  %v15602_v4 = vld [vmem:[#allocation11 + $0x8e4] ss:$24 sps:$4 sm:$0xff]  }
 0x43b   :  { %9336 = vmatpush2.bf16.msra.mxu1 %v15648_v41  ;;  %v15606_v41 = vld [vmem:[#allocation11 + $0x880] ss:$24 sps:$4 sm:$0xff]  }
 0x43c   :  { %9337 = vmatprep.subr.bf16.mxu1 %v15653_v57  ;;  %v15609_v57 = vld [vmem:[#allocation11 + $0x850] ss:$24 sps:$4 sm:$0xff]  }
 0x43d   :  { %5707 = vmatpush2.bf16.msra.mxu0 %v15555_v6  ;;  %v15605_v6 = vld [vmem:[#allocation11 + $0x8b4] ss:$24 sps:$4 sm:$0xff]  }
 0x43e   :  { %5708 = vmatprep.subr.bf16.mxu0 %v15560_v39  ;;  %v15608_v39 = vld [vmem:[#allocation11 + $0x884] ss:$24 sps:$4 sm:$0xff]  }
 0x43f   :  { %9338 = vmatpush2.bf16.msra.mxu1 %v15651_v38  ;;  %v15612_v38 = vld [vmem:[#allocation11 + $0x820] ss:$24 sps:$4 sm:$0xff]  }
 0x440   :  { %9339 = vmatprep.subr.bf16.mxu1 %v15656_v48  ;;  %v15615_v48 = vld [vmem:[#allocation11 + $0x7f0] ss:$24 sps:$4 sm:$0xff]  }
 0x441   :  { %5709 = vmatpush2.bf16.msra.mxu0 %v15558_v12  ;;  %v15611_v12 = vld [vmem:[#allocation11 + $0x854] ss:$24 sps:$4 sm:$0xff]  }
 0x442   :  { %5710 = vmatprep.subr.bf16.mxu0 %v15563_v14  ;;  %v15614_v14 = vld [vmem:[#allocation11 + $0x824] ss:$24 sps:$4 sm:$0xff]  }
 0x443   :  { %9340 = vmatpush2.bf16.msra.mxu1 %v15654_v17  ;;  %v15618_v17 = vld [vmem:[#allocation11 + $0x7c0] ss:$24 sps:$4 sm:$0xff]  }
 0x444   :  { %9341 = vmatprep.subr.bf16.mxu1 %v15659_v19  ;;  %v15621_v19 = vld [vmem:[#allocation11 + $0x790] ss:$24 sps:$4 sm:$0xff]  }
 0x445   :  { %5711 = vmatpush2.bf16.msra.mxu0 %v15561_v15  ;;  %v15617_v15 = vld [vmem:[#allocation11 + $0x7f4] ss:$24 sps:$4 sm:$0xff]  }
 0x446   :  { %5712 = vmatprep.subr.bf16.mxu0 %v15566_v16  ;;  %v15620_v16 = vld [vmem:[#allocation11 + $0x7c4] ss:$24 sps:$4 sm:$0xff]  }
 0x447   :  { %9342 = vmatpush2.bf16.msra.mxu1 %v15657_v21  ;;  %v15672_v21 = vld [vmem:[#allocation16 + $0x7e8] ss:$44 sps:$4 sm:$0xff]  }
 0x448   :  { %9343 = vmatprep.subr.bf16.mxu1 %v15662_v54  ;;  %v5518_v54 = vadd.f32 %v17524_v29, %v17514_v5 }
 0x449   :  { %5713 = vmatpush2.bf16.msra.mxu0 %v15564_v18  ;;  %v15623_v18 = vld [vmem:[#allocation11 + $0x794] ss:$24 sps:$4 sm:$0xff]  }
 0x44a   :  { %5714 = vmatprep.subr.bf16.mxu0 %v15569_v20  ;;  %v15674_v20 = vld [vmem:[#allocation16 + $0x7ec] ss:$44 sps:$4 sm:$0xff]  }
 0x44b   :  { %9344 = vmatpush2.bf16.msra.mxu1 %v15660_v31  ;;  %v5520_v31 = vadd.f32 %v17526_v30, %v17518_v8 }
 0x44c   :  { %9345 = vmatprep.subr.bf16.mxu1 %v15665_v44  ;;  %v15675_v44 = vld [vmem:[#allocation16 + $0x790] ss:$44 sps:$4 sm:$0xff]  }
 0x44d   :  { %5715 = vmatpush2.bf16.msra.mxu0 %v15567_v28  ;;  %v15677_v28 = vld [vmem:[#allocation16 + $0x794] ss:$44 sps:$4 sm:$0xff]  }
 0x44e   :  { %5716 = vmatprep.subr.bf16.mxu0 %v15572_v27 }
 0x44f   :  { %9346 = vmatpush2.bf16.msra.mxu1 %v15663_v24 }
 0x450   :  { %9347 = vmatprep.subr.bf16.mxu1 %v15668_v25 }
 0x451   :  { %5717 = vmatpush2.bf16.msra.mxu0 %v15570_v32 }
 0x452   :  { %5718 = vmatprep.subr.bf16.mxu0 %v15575_v33 }
 0x453   :  { %9348 = vmatpush2.bf16.msra.mxu1 %v15666_v47 }
 0x454   :  { %9349 = vmatprep.subr.bf16.mxu1 %v15671_v50  ;;  %v15678_v50 = vld [vmem:[#allocation16 + $0x738] ss:$44 sps:$4 sm:$0xff]  }
 0x455   :  { %5719 = vmatpush2.bf16.msra.mxu0 %v15573_v42  ;;  %v15680_v42 = vld [vmem:[#allocation16 + $0x73c] ss:$44 sps:$4 sm:$0xff]  }
 0x456   :  { %5770 = vmatprep.subr.bf16.mxu0 %v15578_v45 }
 0x457   :  { %9350 = vmatpush2.bf16.msra.mxu1 %v15669_v43 }
 0x458   :  { %5721 = vmatmul.mubr.bf16.vlgmr.msra.gmra.mxu0 %v17441_v26  ;;  %v15590_v26 = vld [vmem:[#allocation11 + $0x6a4] ss:$24 sps:$4 sm:$0xff]  }
 0x459   :  { %5771 = vmatpush1.bf16.msra.mxu0 %v15576_v46  ;;  %5802 = vmatprep.mubr.bf16.mxu0 %v17507_v1  ;;  %v15593_v1 = vld [vmem:[#allocation11 + $0x674] ss:$24 sps:$4 sm:$0xff]  }
 0x45a   :  { %v17530_v22 = vpop.f32.mrf.mxu1  ;;  %5772 = vmatprep.subr.bf16.mxu0 %v15581_v40 }
 0x45c   :  { %v17532_v52 = vpop.f32.mrf.mxu1 }
 0x45d   :  { %5773 = vmatpush1.bf16.msra.mxu0 %v15579_v11  ;;  %v15683_v11 = vld [vmem:[#allocation16 + $0x6e4] ss:$44 sps:$4 sm:$0xff]  }
 0x45e   :  { %v5603_v58 = vpop.f32.mrf.mxu1  ;;  %5774 = vmatprep.subr.bf16.mxu0 %v15584_v23 }
 0x460   :  { %v5604_v51 = vpop.f32.mrf.mxu1 }
 0x461   :  { %5775 = vmatpush1.bf16.msra.mxu0 %v15582_v55 }
 0x462   :  { %5776 = vmatprep.subr.bf16.mxu0 %v15587_v60 }
 0x465   :  { %5777 = vmatpush1.bf16.msra.mxu0 %v15585_v9 }
 0x466   :  { %5778 = vmatprep.subr.bf16.mxu0 %v15590_v26 }
 0x469   :  { %5779 = vmatpush1.bf16.msra.mxu0 %v15588_v61 }
 0x46a   :  { %5780 = vmatprep.subr.bf16.mxu0 %v15593_v1 }
 0x46d   :  { %5781 = vmatpush1.bf16.msra.mxu0 %v15591_v53  ;;  %v15681_v53 = vld [vmem:[#allocation16 + $0x6e0] ss:$44 sps:$4 sm:$0xff]  }
 0x46e   :  { %5782 = vmatprep.subr.bf16.mxu0 %v15596_v62  ;;  %v15686_v62 = vld [vmem:[#allocation16 + $0x68c] ss:$44 sps:$4 sm:$0xff]  }
 0x471   :  { %5783 = vmatpush1.bf16.msra.mxu0 %v15594_v63 }
 0x472   :  { %5784 = vmatprep.subr.bf16.mxu0 %v15599_v2 }
 0x475   :  { %5785 = vmatpush1.bf16.msra.mxu0 %v15597_v3 }
 0x476   :  { %5786 = vmatprep.subr.bf16.mxu0 %v15602_v4 }
 0x479   :  { %5787 = vmatpush2.bf16.msra.mxu0 %v15600_v36 }
 0x47a   :  { %5788 = vmatprep.subr.bf16.mxu0 %v15605_v6 }
 0x47d   :  { %5789 = vmatpush2.bf16.msra.mxu0 %v15603_v7 }
 0x47e   :  { %5790 = vmatprep.subr.bf16.mxu0 %v15608_v39 }
 0x481   :  { %5791 = vmatpush2.bf16.msra.mxu0 %v15606_v41  ;;  %v15684_v41 = vld [vmem:[#allocation16 + $0x688] ss:$44 sps:$4 sm:$0xff]  }
 0x482   :  { %5792 = vmatprep.subr.bf16.mxu0 %v15611_v12  ;;  %v15689_v12 = vld [vmem:[#allocation16 + $0x634] ss:$44 sps:$4 sm:$0xff]  }
 0x485   :  { %5793 = vmatpush2.bf16.msra.mxu0 %v15609_v57 }
 0x486   :  { %5794 = vmatprep.subr.bf16.mxu0 %v15614_v14 }
 0x489   :  { %5795 = vmatpush2.bf16.msra.mxu0 %v15612_v38 }
 0x48a   :  { %5796 = vmatprep.subr.bf16.mxu0 %v15617_v15 }
 0x48d   :  { %5797 = vmatpush2.bf16.msra.mxu0 %v15615_v48 }
 0x48e   :  { %5798 = vmatprep.subr.bf16.mxu0 %v15620_v16 }
 0x491   :  { %5799 = vmatpush2.bf16.msra.mxu0 %v15618_v17 }
 0x492   :  { %5800 = vmatprep.subr.bf16.mxu0 %v15623_v18  ;;  %v15687_v18 = vld [vmem:[#allocation16 + $0x630] ss:$44 sps:$4 sm:$0xff]  }
 0x495   :  { %5801 = vmatpush2.bf16.msra.mxu0 %v15621_v19 }
 0x496   :  { %9360 = vmatprep.subr.bf16.mxu0 %v15674_v20  ;;  %v15692_v20 = vld [vmem:[#allocation16 + $0x5dc] ss:$44 sps:$4 sm:$0xff]  }
 0x498   :  { %5803 = vmatmul.mubr.bf16.vlgmr.msra.gmra.mxu0 %v17509_v49  ;;  %v5558_v27 = vpop.f32.mrf.mxu0 }
 0x499   :  { %v17539_v32 = vadd.f32 %v5558_v27, %v5518_v54  ;;  %9361 = vmatpush1.bf16.msra.mxu0 %v15672_v21 }
 0x49a   :  { %v17541_v33 = vpop.f32.mrf.mxu1  ;;  %v5560_v24 = vpop.f32.mrf.mxu0  ;;  %9362 = vmatprep.subr.bf16.mxu0 %v15677_v28 }
 0x49b   :  { %v5813_v25 = vrot.slane %v17539_v32, 4  ;;  %v5855_v5 = vmul.f32 %v17539_v32, %v17539_v32  ;;  %v17546_v29 = vadd.f32 %v5560_v24, %v5520_v31  ;;  %v15690_v31 = vld [vmem:[#allocation16 + $0x5d8] ss:$44 sps:$4 sm:$0xff]  }
 0x49c   :  { %v17548_v49 = vpop.f32.mrf.mxu1  ;;  %v5562_v45 = vpop.f32.mrf.mxu0  ;;  %v15695_v24 = vld [vmem:[#allocation16 + $0x584] ss:$44 sps:$4 sm:$0xff]  }
 0x49d   :  { %v5814_v8 = vadd.f32 %v5813_v25, %v17539_v32  ;;  %v5861_v30 = vrot.slane %v5855_v5, 4  ;;  %v5819_v47 = vrot.slane %v17546_v29, 4  ;;  %v5856_v46 = vmul.f32 %v17546_v29, %v17546_v29  ;;  %9363 = vmatpush1.bf16.msra.mxu0 %v15675_v44 }
 0x49e   :  { %v5685_v40 = vpop.f32.mrf.mxu1  ;;  %v5563_v43 = vpop.f32.mrf.mxu0  ;;  %9364 = vmatprep.subr.bf16.mxu0 %v15680_v42 }
 0x49f   :  { %v5815_v23 = vrot.slane %v5814_v8, 2  ;;  %v5862_v55 = vadd.f32 %v5861_v30, %v5855_v5  ;;  %v5820_v58 = vadd.f32 %v5819_v47, %v17546_v29  ;;  %v5867_v60 = vrot.slane %v5856_v46, 4  ;;  %v15693_v5 = vld [vmem:[#allocation16 + $0x580] ss:$44 sps:$4 sm:$0xff]   ;;  %v15696_v30 = vld [vmem:[#allocation16 + $0xaa8] ss:$44 sps:$4 sm:$0xff]  }
 0x4a0   :  { %v5686_v51 = vpop.f32.mrf.mxu1  ;;  %v15701_v47 = vld [vmem:[#allocation16 + $0xa54] ss:$44 sps:$4 sm:$0xff]   ;;  %v15704_v40 = vld [vmem:[#allocation16 + $0x9fc] ss:$44 sps:$4 sm:$0xff]  }
 0x4a1   :  { %v5816_v9 = vadd.f32 %v5815_v23, %v5814_v8  ;;  %v5863_v26 = vrot.slane %v5862_v55, 2  ;;  %v5821_v61 = vrot.slane %v5820_v58, 2  ;;  %v5868_v1 = vadd.f32 %v5867_v60, %v5856_v46  ;;  %9365 = vmatpush1.bf16.msra.mxu0 %v15678_v50  ;;  %v15698_v8 = vld [vmem:[#allocation16 + $0xaac] ss:$44 sps:$4 sm:$0xff]   ;;  %v15699_v50 = vld [vmem:[#allocation16 + $0xa50] ss:$44 sps:$4 sm:$0xff]  }
 0x4a2   :  { %9366 = vmatprep.subr.bf16.mxu0 %v15683_v11  ;;  %v17555_v46 = vld [vmem:[#allocation13] sm:$0x3f]  ;;  %v15707_v60 = vld [vmem:[#allocation16 + $0x9a4] ss:$44 sps:$4 sm:$0xff]  }
 0x4a3   :  { %v5817_v63 = vrot.slane %v5816_v9, 1  ;;  %v5864_v2 = vadd.f32 %v5863_v26, %v5862_v55  ;;  %v5822_v3 = vadd.f32 %v5821_v61, %v5820_v58  ;;  %v5869_v4 = vrot.slane %v5868_v1, 2  ;;  %v15702_v11 = vld [vmem:[#allocation16 + $0x9f8] ss:$44 sps:$4 sm:$0xff]  }
 0x4a4   :  { %v5937_v43 = vrot.slane %v17555_v46, %v17327_v35  ;;  %v17559_v55 = vld [vmem:[#allocation14] sm:$0x3f]  ;;  %v5941_v58 = vrot.slane %v17555_v46, %v17332_v37 }
 0x4a5   :  { %v5818_v36 = vadd.f32 %v5817_v63, %v5816_v9  ;;  %v5865_v6 = vrot.slane %v5864_v2, 1  ;;  %v5823_v7 = vrot.slane %v5822_v3, 1  ;;  %v5870_v39 = vadd.f32 %v5869_v4, %v5868_v1  ;;  %9367 = vmatpush1.bf16.msra.mxu0 %v15681_v53  ;;  %v15705_v53 = vld [vmem:[#allocation16 + $0x9a0] ss:$44 sps:$4 sm:$0xff]  }
 0x4a6   :  { %9368 = vmatprep.subr.bf16.mxu0 %v15686_v62  ;;  %v6010_v1 = vrot.slane %v17559_v55, %v17327_v35  ;;  %v15710_v63 = vld [vmem:[#allocation16 + $0x94c] ss:$44 sps:$4 sm:$0xff]  }
 0x4a7   :  { %v5849_v57 = vmul.f32 0.125, %v5818_v36  ;;  %v5866_v14 = vadd.f32 %v5865_v6, %v5864_v2  ;;  %v5824_v38 = vadd.f32 %v5823_v7, %v5822_v3  ;;  %v5871_v15 = vrot.slane %v5870_v39, 1 }
 0x4a8   :  { %v6014_v36 = vrot.slane %v17559_v55, %v17332_v37 }
 0x4a9   :  { %v5897_v48 = vmul.f32 0.125, %v5866_v14  ;;  %v5903_v16 = vmul.f32 %v5849_v57, %v5849_v57  ;;  %v5850_v17 = vmul.f32 0.125, %v5824_v38  ;;  %9369 = vmatpush1.bf16.msra.mxu0 %v15684_v41  ;;  %v5872_v19 = vadd.f32 %v5871_v15, %v5870_v39  ;;  %v15713_v39 = vld [vmem:[#allocation16 + $0x8f4] ss:$44 sps:$4 sm:$0xff]   ;;  %v15719_v14 = vld [vmem:[#allocation16 + $0x844] ss:$44 sps:$4 sm:$0xff]  }
 0x4aa   :  { %9370 = vmatprep.subr.bf16.mxu0 %v15689_v12  ;;  %v5970_v26 = vsub.f32 %v17539_v32, %v5849_v57  ;;  %v15708_v32 = vld [vmem:[#allocation16 + $0x948] ss:$44 sps:$4 sm:$0xff]   ;;  %v15711_v12 = vld [vmem:[#allocation16 + $0x8f0] ss:$44 sps:$4 sm:$0xff]   ;;  %v15717_v38 = vld [vmem:[#allocation16 + $0x840] ss:$44 sps:$4 sm:$0xff]  }
 0x4ab   :  { %v5909_v21 = vsub.f32 %v5897_v48, %v5903_v16  ;;  %v5904_v28 = vmul.f32 %v5850_v17, %v5850_v17  ;;  %v5898_v54 = vmul.f32 0.125, %v5872_v19  ;;  %v5971_v3 = vsub.f32 %v17546_v29, %v5850_v17  ;;  %v15716_v57 = vld [vmem:[#allocation16 + $0x89c] ss:$44 sps:$4 sm:$0xff]   ;;  %v15714_v29 = vld [vmem:[#allocation16 + $0x898] ss:$44 sps:$4 sm:$0xff]  }
 0x4ac   :  { %v15722_v15 = vld [vmem:[#allocation16 + $0x274] ss:$44 sps:$4 sm:$0xff]  }
 0x4ad   :  { %v5915_v27 = vmax.f32 %v5909_v21, 0.0  ;;  %9371 = vmatpush1.bf16.msra.mxu0 %v15687_v18  ;;  %v5910_v44 = vsub.f32 %v5898_v54, %v5904_v28  ;;  %v15770_v21 = vld [vmem:[#allocation16 + $0xd6c] ss:$44 sps:$4 sm:$0xff]  }
 0x4ae   :  { %9372 = vmatprep.subr.bf16.mxu0 %v15692_v20  ;;  %9401 = vmatprep.subr.bf16.mxu1 %v15770_v21  ;;  %v15800_v21 = vld [vmem:[#allocation16 + $0xbb4] ss:$44 sps:$4 sm:$0xff]  }
 0x4af   :  { %v5921_v42 = vadd.f32 1e-05, %v5915_v27  ;;  %v5916_v25 = vmax.f32 %v5910_v44, 0.0  ;;  %v15768_v27 = vld [vmem:[#allocation16 + $0xd68] ss:$44 sps:$4 sm:$0xff]  }
 0x4b1   :  { %16780 = vrsqrt.f32 %v5921_v42  ;;  %9373 = vmatpush1.bf16.msra.mxu0 %v15690_v31  ;;  %v5922_v45 = vadd.f32 1e-05, %v5916_v25 }
 0x4b2   :  { %9374 = vmatprep.subr.bf16.mxu0 %v15695_v24 }
 0x4b3   :  { %16782 = vrsqrt.f32 %v5922_v45  ;;  %v15776_v45 = vld [vmem:[#allocation16 + $0xd14] ss:$44 sps:$4 sm:$0xff]  }
 0x4b5   :  { %9375 = vmatpush1.bf16.msra.mxu0 %v15693_v5 }
 0x4b6   :  { %9376 = vmatprep.subr.bf16.mxu0 %v15698_v8 }
 0x4b9   :  { %9377 = vmatpush2.bf16.msra.mxu0 %v15696_v30  ;;  %v15774_v30 = vld [vmem:[#allocation16 + $0xd10] ss:$44 sps:$4 sm:$0xff]  }
 0x4ba   :  { %9378 = vmatprep.subr.bf16.mxu0 %v15701_v47 }
 0x4bd   :  { %9379 = vmatpush2.bf16.msra.mxu0 %v15699_v50 }
 0x4be   :  { %v16781_v23 = vpop.eup %16780  ;;  %9380 = vmatprep.subr.bf16.mxu0 %v15704_v40 }
 0x4bf   :  { %v5964_v51 = vmul.f32 %v16781_v23, %v5937_v43 }
 0x4c0   :  { %v16783_v9 = vpop.eup %16782 }
 0x4c1   :  { %v5979_v61 = vrot.slane %v5964_v51, %v17327_v35  ;;  %9381 = vmatpush2.bf16.msra.mxu0 %v15702_v11  ;;  %v5965_v62 = vmul.f32 %v16783_v9, %v5941_v58  ;;  %v15780_v51 = vld [vmem:[#allocation16 + $0xcb8] ss:$44 sps:$4 sm:$0xff]  }
 0x4c2   :  { %9382 = vmatprep.subr.bf16.mxu0 %v15707_v60  ;;  %v15782_v60 = vld [vmem:[#allocation16 + $0xcbc] ss:$44 sps:$4 sm:$0xff]  }
 0x4c3   :  { %v6000_v2 = vmul.f32 %v5979_v61, %v5970_v26  ;;  %v5983_v4 = vrot.slane %v5965_v62, %v17327_v35 }
 0x4c5   :  { %v6037_v6 = vadd.f32 %v6010_v1, %v6000_v2  ;;  %9383 = vmatpush2.bf16.msra.mxu0 %v15705_v53  ;;  %v6001_v7 = vmul.f32 %v5983_v4, %v5971_v3  ;;  %v15788_v3 = vld [vmem:[#allocation16 + $0xc64] ss:$44 sps:$4 sm:$0xff]   ;;  %v15786_v4 = vld [vmem:[#allocation16 + $0xc60] ss:$44 sps:$4 sm:$0xff]  }
 0x4c6   :  { %9384 = vmatprep.subr.bf16.mxu0 %v15710_v63 }
 0x4c7   :  { %v6038_v41 = vadd.f32 %v6014_v36, %v6001_v7  ;;  %16784 = vtanh.f32 %v6037_v6 }
 0x4c9   :  { %9385 = vmatpush2.bf16.msra.mxu0 %v15708_v32  ;;  %16786 = vtanh.f32 %v6038_v41 }
 0x4ca   :  { %9386 = vmatprep.subr.bf16.mxu0 %v15713_v39 }
 0x4cd   :  { %9387 = vmatpush2.bf16.msra.mxu0 %v15711_v12 }
 0x4ce   :  { %9388 = vmatprep.subr.bf16.mxu0 %v15716_v57 }
 0x4d1   :  { %9389 = vmatpush2.bf16.msra.mxu0 %v15714_v29  ;;  %v15794_v29 = vld [vmem:[#allocation16 + $0xc0c] ss:$44 sps:$4 sm:$0xff]  }
 0x4d2   :  { %9390 = vmatprep.subr.bf16.mxu0 %v15719_v14  ;;  %v15792_v14 = vld [vmem:[#allocation16 + $0xc08] ss:$44 sps:$4 sm:$0xff]  }
 0x4d4   :  { %v16785_v48 = vpop.eup %16784 }
 0x4d5   :  { %9391 = vmatpush2.bf16.msra.mxu0 %v15717_v38  ;;  %v17573_v19 = vpack.c.bf16 %v16785_v48, %v16785_v48 }
 0x4d6   :  { %9442 = vmatprep.subr.bf16.mxu0 %v15722_v15  ;;  %v16787_v16 = vpop.eup %16786 }
 0x4d7   :  { %v17571_v17 = vpack.c.bf16 %v16787_v16, %v16787_v16 }
 0x4d8   :  { %v5640_v18 = vpop.f32.mrf.mxu0 }
 0x4d9   :  { %v5641_v20 = vadd.f32 %v5640_v18, %v17530_v22  ;;  %9351 = vmatprep.mubr.bf16.mxu1 %v17571_v17 }
 0x4da   :  { %v5642_v28 = vpop.f32.mrf.mxu0  ;;  %v17576_v54 = vpop.f32.mrf.mxu1  ;;  %9352 = vmatmul.mubr.bf16.vlgmr.msra.gmra.mxu1 %v17573_v19 }
 0x4db   :  { %v17580_v31 = vadd.f32 %v17541_v33, %v5641_v20  ;;  %v5643_v44 = vadd.f32 %v5642_v28, %v17532_v52  ;;  %9402 = vmatpush1.bf16.msra.mxu1 %v15768_v27  ;;  %v15798_v27 = vld [vmem:[#allocation16 + $0xbb0] ss:$44 sps:$4 sm:$0xff]  }
 0x4dc   :  { %v5644_v24 = vpop.f32.mrf.mxu0  ;;  %v17584_v42 = vpop.f32.mrf.mxu1  ;;  %9403 = vmatprep.subr.bf16.mxu1 %v15776_v45 }
 0x4dd   :  { %v5825_v22 = vrot.slane %v17580_v31, 4  ;;  %v5857_v25 = vmul.f32 %v17580_v31, %v17580_v31  ;;  %v17590_v5 = vadd.f32 %v17548_v49, %v5643_v44 }
 0x4de   :  { %v5645_v33 = vpop.f32.mrf.mxu0  ;;  %v5767_v8 = vpop.f32.mrf.mxu1 }
 0x4df   :  { %v5826_v52 = vadd.f32 %v5825_v22, %v17580_v31  ;;  %v5873_v47 = vrot.slane %v5857_v25, 4  ;;  %v5831_v50 = vrot.slane %v17590_v5, 4  ;;  %v5858_v40 = vmul.f32 %v17590_v5, %v17590_v5  ;;  %9404 = vmatpush1.bf16.msra.mxu1 %v15774_v30  ;;  %v15804_v33 = vld [vmem:[#allocation16 + $0xb58] ss:$44 sps:$4 sm:$0xff]  }
 0x4e0   :  { %v5768_v43 = vpop.f32.mrf.mxu1  ;;  %9405 = vmatprep.subr.bf16.mxu1 %v15782_v60  ;;  %v15812_v30 = vld [vmem:[#allocation16 + $0xb04] ss:$44 sps:$4 sm:$0xff]   ;;  %v15830_v60 = vld [vmem:[#allocation16 + $0xf7c] ss:$44 sps:$4 sm:$0xff]  }
 0x4e1   :  { %v5827_v11 = vrot.slane %v5826_v52, 2  ;;  %v5874_v23 = vadd.f32 %v5873_v47, %v5857_v25  ;;  %v5832_v49 = vadd.f32 %v5831_v50, %v17590_v5  ;;  %v5879_v58 = vrot.slane %v5858_v40, 4  ;;  %v15806_v25 = vld [vmem:[#allocation16 + $0xb5c] ss:$44 sps:$4 sm:$0xff]   ;;  %v15818_v47 = vld [vmem:[#allocation16 + $0x102c] ss:$44 sps:$4 sm:$0xff]  }
 0x4e2   :  { %v15816_v50 = vld [vmem:[#allocation16 + $0x1028] ss:$44 sps:$4 sm:$0xff]  }
 0x4e3   :  { %v5828_v9 = vadd.f32 %v5827_v11, %v5826_v52  ;;  %v5875_v26 = vrot.slane %v5874_v23, 2  ;;  %v5833_v61 = vrot.slane %v5832_v49, 2  ;;  %v5880_v1 = vadd.f32 %v5879_v58, %v5858_v40  ;;  %9406 = vmatpush1.bf16.msra.mxu1 %v15780_v51  ;;  %v15810_v52 = vld [vmem:[#allocation16 + $0xb00] ss:$44 sps:$4 sm:$0xff]   ;;  %v15822_v11 = vld [vmem:[#allocation16 + $0xfd0] ss:$44 sps:$4 sm:$0xff]  }
 0x4e4   :  { %9407 = vmatprep.subr.bf16.mxu1 %v15788_v3  ;;  %v5945_v40 = vrot.slane %v17555_v46, %v17345_v56  ;;  %v15824_v43 = vld [vmem:[#allocation16 + $0xfd4] ss:$44 sps:$4 sm:$0xff]   ;;  %v15828_v51 = vld [vmem:[#allocation16 + $0xf78] ss:$44 sps:$4 sm:$0xff]  }
 0x4e5   :  { %v5829_v53 = vrot.slane %v5828_v9, 1  ;;  %v5876_v62 = vadd.f32 %v5875_v26, %v5874_v23  ;;  %v5834_v63 = vadd.f32 %v5833_v61, %v5832_v49  ;;  %v5881_v2 = vrot.slane %v5880_v1, 2 }
 0x4e6   :  { %v5949_v49 = vrot.slane %v17555_v46, %v17348_v59 }
 0x4e7   :  { %v5830_v36 = vadd.f32 %v5829_v53, %v5828_v9  ;;  %v5877_v6 = vrot.slane %v5876_v62, 1  ;;  %v5835_v32 = vrot.slane %v5834_v63, 1  ;;  %v5882_v7 = vadd.f32 %v5881_v2, %v5880_v1  ;;  %9408 = vmatpush1.bf16.msra.mxu1 %v15786_v4 }
 0x4e8   :  { %9409 = vmatprep.subr.bf16.mxu1 %v15794_v29  ;;  %v6018_v1 = vrot.slane %v17559_v55, %v17345_v56  ;;  %v6022_v4 = vrot.slane %v17559_v55, %v17348_v59  ;;  %v15860_v29 = vld [vmem:[#allocation16 + $0xdc4] ss:$44 sps:$4 sm:$0xff]  }
 0x4e9   :  { %v5851_v39 = vmul.f32 0.125, %v5830_v36  ;;  %v5878_v41 = vadd.f32 %v5877_v6, %v5876_v62  ;;  %v5836_v12 = vadd.f32 %v5835_v32, %v5834_v63  ;;  %v5883_v57 = vrot.slane %v5882_v7, 1  ;;  %v15836_v63 = vld [vmem:[#allocation16 + $0xf24] ss:$44 sps:$4 sm:$0xff]   ;;  %v15834_v36 = vld [vmem:[#allocation16 + $0xf20] ss:$44 sps:$4 sm:$0xff]  }
 0x4ea   :  { %v15842_v32 = vld [vmem:[#allocation16 + $0xecc] ss:$44 sps:$4 sm:$0xff]  }
 0x4eb   :  { %v5899_v38 = vmul.f32 0.125, %v5878_v41  ;;  %v5905_v15 = vmul.f32 %v5851_v39, %v5851_v39  ;;  %v5852_v48 = vmul.f32 0.125, %v5836_v12  ;;  %v5884_v16 = vadd.f32 %v5883_v57, %v5882_v7  ;;  %9410 = vmatpush1.bf16.msra.mxu1 %v15792_v14  ;;  %v15848_v41 = vld [vmem:[#allocation16 + $0xe74] ss:$44 sps:$4 sm:$0xff]   ;;  %v15846_v12 = vld [vmem:[#allocation16 + $0xe70] ss:$44 sps:$4 sm:$0xff]  }
 0x4ec   :  { %9411 = vmatprep.subr.bf16.mxu1 %v15800_v21  ;;  %v5972_v26 = vsub.f32 %v17580_v31, %v5851_v39  ;;  %v15840_v39 = vld [vmem:[#allocation16 + $0xec8] ss:$44 sps:$4 sm:$0xff]   ;;  %v15852_v57 = vld [vmem:[#allocation16 + $0xe18] ss:$44 sps:$4 sm:$0xff]   ;;  %v15858_v14 = vld [vmem:[#allocation16 + $0xdc0] ss:$44 sps:$4 sm:$0xff]  }
 0x4ed   :  { %v5911_v18 = vsub.f32 %v5899_v38, %v5905_v15  ;;  %v5906_v20 = vmul.f32 %v5852_v48, %v5852_v48  ;;  %v5900_v28 = vmul.f32 0.125, %v5884_v16  ;;  %v5973_v2 = vsub.f32 %v17590_v5, %v5852_v48  ;;  %v15854_v5 = vld [vmem:[#allocation16 + $0xe1c] ss:$44 sps:$4 sm:$0xff]  }
 0x4ef   :  { %v5917_v44 = vmax.f32 %v5911_v18, 0.0  ;;  %v5912_v24 = vsub.f32 %v5900_v28, %v5906_v20  ;;  %9412 = vmatpush1.bf16.msra.mxu1 %v15798_v27  ;;  %v15866_v18 = vld [vmem:[#allocation16 + $0x7f4] ss:$44 sps:$4 sm:$0xff]   ;;  %v15720_v28 = vld [vmem:[#allocation16 + $0x270] ss:$44 sps:$4 sm:$0xff]  }
 0x4f0   :  { %9413 = vmatprep.subr.bf16.mxu1 %v15806_v25  ;;  %v15728_v25 = vld [vmem:[#allocation16 + $0x1c4] ss:$44 sps:$4 sm:$0xff]  }
 0x4f1   :  { %v5923_v22 = vadd.f32 1e-05, %v5917_v44  ;;  %v5918_v45 = vmax.f32 %v5912_v24, 0.0  ;;  %v15725_v44 = vld [vmem:[#allocation16 + $0x21c] ss:$44 sps:$4 sm:$0xff]  }
 0x4f3   :  { %16788 = vrsqrt.f32 %v5923_v22  ;;  %v5924_v8 = vadd.f32 1e-05, %v5918_v45  ;;  %9414 = vmatpush1.bf16.msra.mxu1 %v15804_v33  ;;  %v15723_v22 = vld [vmem:[#allocation16 + $0x218] ss:$44 sps:$4 sm:$0xff]   ;;  %v15726_v45 = vld [vmem:[#allocation16 + $0x1c0] ss:$44 sps:$4 sm:$0xff]  }
 0x4f4   :  { %9415 = vmatprep.subr.bf16.mxu1 %v15812_v30  ;;  %v15731_v33 = vld [vmem:[#allocation16 + $0x16c] ss:$44 sps:$4 sm:$0xff]   ;;  %v15734_v30 = vld [vmem:[#allocation16 + $0x114] ss:$44 sps:$4 sm:$0xff]  }
 0x4f5   :  { %16790 = vrsqrt.f32 %v5924_v8  ;;  %v15729_v8 = vld [vmem:[#allocation16 + $0x168] ss:$44 sps:$4 sm:$0xff]  }
 0x4f7   :  { %9416 = vmatpush1.bf16.msra.mxu1 %v15810_v52  ;;  %v15732_v52 = vld [vmem:[#allocation16 + $0x110] ss:$44 sps:$4 sm:$0xff]  }
 0x4f8   :  { %9417 = vmatprep.subr.bf16.mxu1 %v15818_v47  ;;  %v15737_v47 = vld [vmem:[#allocation16 + $0xbc] ss:$44 sps:$4 sm:$0xff]  }
 0x4fb   :  { %9418 = vmatpush2.bf16.msra.mxu1 %v15816_v50  ;;  %v15735_v50 = vld [vmem:[#allocation16 + $0xb8] ss:$44 sps:$4 sm:$0xff]  }
 0x4fc   :  { %9419 = vmatprep.subr.bf16.mxu1 %v15824_v43  ;;  %v15738_v43 = vld [vmem:[#allocation16 + $0x60] ss:$44 sps:$4 sm:$0xff]  }
 0x4ff   :  { %9420 = vmatpush2.bf16.msra.mxu1 %v15822_v11  ;;  %v15743_v11 = vld [vmem:[#allocation16 + $0xc] ss:$44 sps:$4 sm:$0xff]  }
 0x500   :  { %v16789_v23 = vpop.eup %16788  ;;  %9421 = vmatprep.subr.bf16.mxu1 %v15830_v60  ;;  %v15749_v60 = vld [vmem:[#allocation16 + $0x4dc] ss:$44 sps:$4 sm:$0xff]  }
 0x501   :  { %v5966_v58 = vmul.f32 %v16789_v23, %v5945_v40  ;;  %v15740_v40 = vld [vmem:[#allocation16 + $0x64] ss:$44 sps:$4 sm:$0xff]   ;;  %v15741_v23 = vld [vmem:[#allocation16 + $0x8] ss:$44 sps:$4 sm:$0xff]  }
 0x502   :  { %v16791_v9 = vpop.eup %16790 }
 0x503   :  { %v5987_v61 = vrot.slane %v5966_v58, %v17327_v35  ;;  %v5967_v53 = vmul.f32 %v16791_v9, %v5949_v49  ;;  %9422 = vmatpush2.bf16.msra.mxu1 %v15828_v51  ;;  %v15746_v49 = vld [vmem:[#allocation16 + $0x534] ss:$44 sps:$4 sm:$0xff]   ;;  %v15744_v58 = vld [vmem:[#allocation16 + $0x530] ss:$44 sps:$4 sm:$0xff]   ;;  %v15747_v51 = vld [vmem:[#allocation16 + $0x4d8] ss:$44 sps:$4 sm:$0xff]  }
 0x504   :  { %9423 = vmatprep.subr.bf16.mxu1 %v15836_v63  ;;  %v15752_v9 = vld [vmem:[#allocation16 + $0x484] ss:$44 sps:$4 sm:$0xff]   ;;  %v15761_v63 = vld [vmem:[#allocation16 + $0x37c] ss:$44 sps:$4 sm:$0xff]  }
 0x505   :  { %v6002_v62 = vmul.f32 %v5987_v61, %v5972_v26  ;;  %v5991_v3 = vrot.slane %v5967_v53, %v17327_v35  ;;  %v15750_v26 = vld [vmem:[#allocation16 + $0x480] ss:$44 sps:$4 sm:$0xff]  }
 0x506   :  { %v15755_v61 = vld [vmem:[#allocation16 + $0x42c] ss:$44 sps:$4 sm:$0xff]   ;;  %v15758_v53 = vld [vmem:[#allocation16 + $0x3d4] ss:$44 sps:$4 sm:$0xff]  }
 0x507   :  { %v6039_v6 = vadd.f32 %v6018_v1, %v6002_v62  ;;  %v6003_v31 = vmul.f32 %v5991_v3, %v5973_v2  ;;  %9424 = vmatpush2.bf16.msra.mxu1 %v15834_v36  ;;  %v15753_v1 = vld [vmem:[#allocation16 + $0x428] ss:$44 sps:$4 sm:$0xff]   ;;  %v15756_v62 = vld [vmem:[#allocation16 + $0x3d0] ss:$44 sps:$4 sm:$0xff]   ;;  %v15759_v2 = vld [vmem:[#allocation16 + $0x378] ss:$44 sps:$4 sm:$0xff]  }
 0x508   :  { %9425 = vmatprep.subr.bf16.mxu1 %v15842_v32  ;;  %v15764_v3 = vld [vmem:[#allocation16 + $0x324] ss:$44 sps:$4 sm:$0xff]   ;;  %v15767_v36 = vld [vmem:[#allocation16 + $0x2cc] ss:$44 sps:$4 sm:$0xff]  }
 0x509   :  { %v6040_v7 = vadd.f32 %v6022_v4, %v6003_v31  ;;  %16792 = vtanh.f32 %v6039_v6  ;;  %v15762_v4 = vld [vmem:[#allocation16 + $0x320] ss:$44 sps:$4 sm:$0xff]   ;;  %v15765_v6 = vld [vmem:[#allocation16 + $0x2c8] ss:$44 sps:$4 sm:$0xff]  }
 0x50a   :  { %v15773_v31 = vld [vmem:[#allocation16 + $0xd74] ss:$44 sps:$4 sm:$0xff]  }
 0x50b   :  { %16794 = vtanh.f32 %v6040_v7  ;;  %9426 = vmatpush2.bf16.msra.mxu1 %v15840_v39 }
 0x50c   :  { %9427 = vmatprep.subr.bf16.mxu1 %v15848_v41 }
 0x50f   :  { %9428 = vmatpush2.bf16.msra.mxu1 %v15846_v12  ;;  %v15771_v12 = vld [vmem:[#allocation16 + $0xd70] ss:$44 sps:$4 sm:$0xff]  }
 0x510   :  { %9429 = vmatprep.subr.bf16.mxu1 %v15854_v5 }
 0x513   :  { %9430 = vmatpush2.bf16.msra.mxu1 %v15852_v57 }
 0x514   :  { %9431 = vmatprep.subr.bf16.mxu1 %v15860_v29 }
 0x516   :  { %v16793_v38 = vpop.eup %16792 }
 0x517   :  { %9432 = vmatpush2.bf16.msra.mxu1 %v15858_v14  ;;  %v17616_v27 = vpack.c.bf16 %v16793_v38, %v16793_v38  ;;  %v15779_v14 = vld [vmem:[#allocation16 + $0xd1c] ss:$44 sps:$4 sm:$0xff]  }
 0x518   :  { %v5722_v15 = vpop.f32.mrf.mxu0  ;;  %v16795_v48 = vpop.eup %16794  ;;  %9483 = vmatprep.subr.bf16.mxu1 %v15866_v18 }
 0x519   :  { %v17610_v16 = vadd.f32 %v17576_v54, %v5722_v15  ;;  %v17614_v21 = vpack.c.bf16 %v16795_v48, %v16795_v48 }
 0x51a   :  { %v17612_v20 = vpop.f32.mrf.mxu0 }
 0x51b   :  { %9392 = vmatprep.mubr.bf16.mxu0 %v17614_v21  ;;  %v5766_v7 = vadd.f32 %v17584_v42, %v17612_v20  ;;  %v15777_v20 = vld [vmem:[#allocation16 + $0xd18] ss:$44 sps:$4 sm:$0xff]  }
 0x51c   :  { %v5726_v24 = vpop.f32.mrf.mxu0  ;;  %9393 = vmatmul.mubr.bf16.vlgmr.msra.gmra.mxu0 %v17616_v27 }
 0x51d   :  { %9443 = vmatpush1.bf16.msra.mxu0 %v15720_v28  ;;  %9474 = vmatprep.mubr.bf16.mxu0 %v17571_v17 }
 0x51e   :  { %v5727_v54 = vpop.f32.mrf.mxu0  ;;  %9444 = vmatprep.subr.bf16.mxu0 %v15725_v44 }
 0x521   :  { %9445 = vmatpush1.bf16.msra.mxu0 %v15723_v22  ;;  %v15785_v22 = vld [vmem:[#allocation16 + $0xcc4] ss:$44 sps:$4 sm:$0xff]  }
 0x522   :  { %9446 = vmatprep.subr.bf16.mxu0 %v15728_v25 }
 0x525   :  { %9447 = vmatpush1.bf16.msra.mxu0 %v15726_v45 }
 0x526   :  { %9448 = vmatprep.subr.bf16.mxu0 %v15731_v33 }
 0x529   :  { %9449 = vmatpush1.bf16.msra.mxu0 %v15729_v8 }
 0x52a   :  { %9450 = vmatprep.subr.bf16.mxu0 %v15734_v30  ;;  %v15783_v30 = vld [vmem:[#allocation16 + $0xcc0] ss:$44 sps:$4 sm:$0xff]  }
 0x52d   :  { %9451 = vmatpush1.bf16.msra.mxu0 %v15732_v52 }
 0x52e   :  { %9452 = vmatprep.subr.bf16.mxu0 %v15737_v47 }
 0x531   :  { %9453 = vmatpush1.bf16.msra.mxu0 %v15735_v50 }
 0x532   :  { %9454 = vmatprep.subr.bf16.mxu0 %v15740_v40 }
 0x535   :  { %9455 = vmatpush1.bf16.msra.mxu0 %v15738_v43  ;;  %v15791_v43 = vld [vmem:[#allocation16 + $0xc6c] ss:$44 sps:$4 sm:$0xff]  }
 0x536   :  { %9456 = vmatprep.subr.bf16.mxu0 %v15743_v11 }
 0x539   :  { %9457 = vmatpush1.bf16.msra.mxu0 %v15741_v23 }
 0x53a   :  { %9458 = vmatprep.subr.bf16.mxu0 %v15746_v49 }
 0x53d   :  { %9459 = vmatpush2.bf16.msra.mxu0 %v15744_v58 }
 0x53e   :  { %9460 = vmatprep.subr.bf16.mxu0 %v15749_v60  ;;  %v15789_v60 = vld [vmem:[#allocation16 + $0xc68] ss:$44 sps:$4 sm:$0xff]  }
 0x541   :  { %9461 = vmatpush2.bf16.msra.mxu0 %v15747_v51 }
 0x542   :  { %9462 = vmatprep.subr.bf16.mxu0 %v15752_v9 }
 0x545   :  { %9463 = vmatpush2.bf16.msra.mxu0 %v15750_v26 }
 0x546   :  { %9464 = vmatprep.subr.bf16.mxu0 %v15755_v61 }
 0x549   :  { %9465 = vmatpush2.bf16.msra.mxu0 %v15753_v1  ;;  %v15797_v1 = vld [vmem:[#allocation16 + $0xc14] ss:$44 sps:$4 sm:$0xff]  }
 0x54a   :  { %9466 = vmatprep.subr.bf16.mxu0 %v15758_v53 }
 0x54d   :  { %9467 = vmatpush2.bf16.msra.mxu0 %v15756_v62 }
 0x54e   :  { %9468 = vmatprep.subr.bf16.mxu0 %v15761_v63 }
 0x551   :  { %9469 = vmatpush2.bf16.msra.mxu0 %v15759_v2 }
 0x552   :  { %9470 = vmatprep.subr.bf16.mxu0 %v15764_v3  ;;  %v15795_v3 = vld [vmem:[#allocation16 + $0xc10] ss:$44 sps:$4 sm:$0xff]  }
 0x555   :  { %9471 = vmatpush2.bf16.msra.mxu0 %v15762_v4 }
 0x556   :  { %9472 = vmatprep.subr.bf16.mxu0 %v15767_v36 }
 0x558   :  { %v5804_v32 = vpop.f32.mrf.mxu0 }
 0x559   :  { %v17624_v39 = vadd.f32 %v5804_v32, %v17610_v16  ;;  %9473 = vmatpush2.bf16.msra.mxu0 %v15765_v6  ;;  %v15803_v6 = vld [vmem:[#allocation16 + $0xbbc] ss:$44 sps:$4 sm:$0xff]  }
 0x55a   :  { %v5806_v41 = vpop.f32.mrf.mxu0  ;;  %9524 = vmatprep.subr.bf16.mxu0 %v15773_v31 }
 0x55b   :  { %v5837_v5 = vrot.slane %v17624_v39, 4  ;;  %v5859_v57 = vmul.f32 %v17624_v39, %v17624_v39  ;;  %v17629_v29 = vadd.f32 %v5806_v41, %v5766_v7  ;;  %v15801_v41 = vld [vmem:[#allocation16 + $0xbb8] ss:$44 sps:$4 sm:$0xff]  }
 0x55c   :  { %v5808_v38 = vpop.f32.mrf.mxu0  ;;  %9475 = vmatmul.mubr.bf16.vlgmr.msra.gmra.mxu0 %v17573_v19 }
 0x55d   :  { %v5838_v15 = vadd.f32 %v5837_v5, %v17624_v39  ;;  %v5885_v48 = vrot.slane %v5859_v57, 4  ;;  %v5843_v42 = vrot.slane %v17629_v29, 4  ;;  %v5860_v16 = vmul.f32 %v17629_v29, %v17629_v29  ;;  %9525 = vmatpush1.bf16.msra.mxu0 %v15771_v12  ;;  %v15809_v5 = vld [vmem:[#allocation16 + $0xb64] ss:$44 sps:$4 sm:$0xff]   ;;  %v15807_v38 = vld [vmem:[#allocation16 + $0xb60] ss:$44 sps:$4 sm:$0xff]  }
 0x55e   :  { %v5809_v18 = vpop.f32.mrf.mxu0  ;;  %9526 = vmatprep.subr.bf16.mxu0 %v15779_v14 }
 0x55f   :  { %v5839_v28 = vrot.slane %v5838_v15, 2  ;;  %v5886_v44 = vadd.f32 %v5885_v48, %v5859_v57  ;;  %v5844_v24 = vadd.f32 %v5843_v42, %v17629_v29  ;;  %v5891_v54 = vrot.slane %v5860_v16, 4  ;;  %v15813_v48 = vld [vmem:[#allocation16 + $0xb08] ss:$44 sps:$4 sm:$0xff]  }
 0x560   :  { %v15821_v42 = vld [vmem:[#allocation16 + $0x1034] ss:$44 sps:$4 sm:$0xff]   ;;  %v5953_v18 = vrot.slane %v17555_v46, %v17366_v10 }
 0x561   :  { %v5840_v25 = vadd.f32 %v5839_v28, %v5838_v15  ;;  %v5887_v45 = vrot.slane %v5886_v44, 2  ;;  %v5845_v33 = vrot.slane %v5844_v24, 2  ;;  %v5892_v8 = vadd.f32 %v5891_v54, %v5860_v16  ;;  %9527 = vmatpush1.bf16.msra.mxu0 %v15777_v20  ;;  %v15815_v15 = vld [vmem:[#allocation16 + $0xb0c] ss:$44 sps:$4 sm:$0xff]   ;;  %v15819_v16 = vld [vmem:[#allocation16 + $0x1030] ss:$44 sps:$4 sm:$0xff]  }
 0x562   :  { %9528 = vmatprep.subr.bf16.mxu0 %v15785_v22  ;;  %v15827_v20 = vld [vmem:[#allocation16 + $0xfdc] ss:$44 sps:$4 sm:$0xff]   ;;  %v15833_v22 = vld [vmem:[#allocation16 + $0xf84] ss:$44 sps:$4 sm:$0xff]  }
 0x563   :  { %v5841_v52 = vrot.slane %v5840_v25, 1  ;;  %v5888_v47 = vadd.f32 %v5887_v45, %v5886_v44  ;;  %v5846_v50 = vadd.f32 %v5845_v33, %v5844_v24  ;;  %v5893_v40 = vrot.slane %v5892_v8, 2  ;;  %v15825_v24 = vld [vmem:[#allocation16 + $0xfd8] ss:$44 sps:$4 sm:$0xff]  }
 0x564   :  { %v5957_v44 = vrot.slane %v17555_v46, %v17369_v13 }
 0x565   :  { %v5842_v11 = vadd.f32 %v5841_v52, %v5840_v25  ;;  %v5889_v23 = vrot.slane %v5888_v47, 1  ;;  %v5847_v49 = vrot.slane %v5846_v50, 1  ;;  %v5894_v58 = vadd.f32 %v5893_v40, %v5892_v8  ;;  %9529 = vmatpush1.bf16.msra.mxu0 %v15783_v30  ;;  %v15831_v52 = vld [vmem:[#allocation16 + $0xf80] ss:$44 sps:$4 sm:$0xff]  }
 0x566   :  { %9530 = vmatprep.subr.bf16.mxu0 %v15791_v43  ;;  %v6026_v8 = vrot.slane %v17559_v55, %v17366_v10  ;;  %v6030_v43 = vrot.slane %v17559_v55, %v17369_v13  ;;  %v15863_v55 = vld [vmem:[#allocation16 + $0xdcc] ss:$44 sps:$4 sm:$0xff]  }
 0x567   :  { %v5853_v51 = vmul.f32 0.125, %v5842_v11  ;;  %v5890_v9 = vadd.f32 %v5889_v23, %v5888_v47  ;;  %v5848_v26 = vadd.f32 %v5847_v49, %v5846_v50  ;;  %v5895_v61 = vrot.slane %v5894_v58, 1  ;;  %v15839_v50 = vld [vmem:[#allocation16 + $0xf2c] ss:$44 sps:$4 sm:$0xff]   ;;  %v15837_v23 = vld [vmem:[#allocation16 + $0xf28] ss:$44 sps:$4 sm:$0xff]  }
 0x568   :  { %v15845_v49 = vld [vmem:[#allocation16 + $0xed4] ss:$44 sps:$4 sm:$0xff]  }
 0x569   :  { %v5901_v53 = vmul.f32 0.125, %v5890_v9  ;;  %v5907_v62 = vmul.f32 %v5853_v51, %v5853_v51  ;;  %v5854_v63 = vmul.f32 0.125, %v5848_v26  ;;  %v5896_v2 = vadd.f32 %v5895_v61, %v5894_v58  ;;  %9531 = vmatpush1.bf16.msra.mxu0 %v15789_v60  ;;  %v15843_v60 = vld [vmem:[#allocation16 + $0xed0] ss:$44 sps:$4 sm:$0xff]   ;;  %v15855_v26 = vld [vmem:[#allocation16 + $0xe20] ss:$44 sps:$4 sm:$0xff]  }
 0x56a   :  { %9532 = vmatprep.subr.bf16.mxu0 %v15797_v1  ;;  %v5974_v45 = vsub.f32 %v17624_v39, %v5853_v51  ;;  %v15851_v51 = vld [vmem:[#allocation16 + $0xe7c] ss:$44 sps:$4 sm:$0xff]   ;;  %v15857_v9 = vld [vmem:[#allocation16 + $0xe24] ss:$44 sps:$4 sm:$0xff]  }
 0x56b   :  { %v5913_v4 = vsub.f32 %v5901_v53, %v5907_v62  ;;  %v5908_v36 = vmul.f32 %v5854_v63, %v5854_v63  ;;  %v5902_v31 = vmul.f32 0.125, %v5896_v2  ;;  %v5975_v46 = vsub.f32 %v17629_v29, %v5854_v63  ;;  %v15849_v29 = vld [vmem:[#allocation16 + $0xe78] ss:$44 sps:$4 sm:$0xff]   ;;  %v15861_v1 = vld [vmem:[#allocation16 + $0xdc8] ss:$44 sps:$4 sm:$0xff]  }
 0x56c   :  { %v15864_v63 = vld [vmem:[#allocation16 + $0x7f0] ss:$44 sps:$4 sm:$0xff]  }
 0x56d   :  { %v5919_v32 = vmax.f32 %v5913_v4, 0.0  ;;  %v5914_v7 = vsub.f32 %v5902_v31, %v5908_v36  ;;  %9533 = vmatpush1.bf16.msra.mxu0 %v15795_v3  ;;  %v15869_v3 = vld [vmem:[#allocation16 + $0x7fc] ss:$44 sps:$4 sm:$0xff]   ;;  %v15867_v4 = vld [vmem:[#allocation16 + $0x7f8] ss:$44 sps:$4 sm:$0xff]  }
 0x56e   :  { %9534 = vmatprep.subr.bf16.mxu0 %v15803_v6  ;;  %v15872_v6 = vld [vmem:[#allocation16 + $0x79c] ss:$44 sps:$4 sm:$0xff]   ;;  %v15875_v31 = vld [vmem:[#allocation16 + $0x7a4] ss:$44 sps:$4 sm:$0xff]  }
 0x56f   :  { %v5925_v12 = vadd.f32 1e-05, %v5919_v32  ;;  %v5920_v57 = vmax.f32 %v5914_v7, 0.0  ;;  %v15870_v32 = vld [vmem:[#allocation16 + $0x798] ss:$44 sps:$4 sm:$0xff]  }
 0x571   :  { %16796 = vrsqrt.f32 %v5925_v12  ;;  %v5926_v14 = vadd.f32 1e-05, %v5920_v57  ;;  %9535 = vmatpush1.bf16.msra.mxu0 %v15801_v41  ;;  %v15878_v41 = vld [vmem:[#allocation16 + $0x744] ss:$44 sps:$4 sm:$0xff]   ;;  %v15873_v12 = vld [vmem:[#allocation16 + $0x7a0] ss:$44 sps:$4 sm:$0xff]  }
 0x572   :  { %9536 = vmatprep.subr.bf16.mxu0 %v15809_v5  ;;  %v15881_v57 = vld [vmem:[#allocation16 + $0x74c] ss:$44 sps:$4 sm:$0xff]  }
 0x573   :  { %16798 = vrsqrt.f32 %v5926_v14  ;;  %v15876_v14 = vld [vmem:[#allocation16 + $0x740] ss:$44 sps:$4 sm:$0xff]  }
 0x575   :  { %9537 = vmatpush1.bf16.msra.mxu0 %v15807_v38 }
 0x576   :  { %9538 = vmatprep.subr.bf16.mxu0 %v15815_v15  ;;  %v15884_v15 = vld [vmem:[#allocation16 + $0x6ec] ss:$44 sps:$4 sm:$0xff]  }
 0x579   :  { %9539 = vmatpush1.bf16.msra.mxu0 %v15813_v48  ;;  %v15879_v48 = vld [vmem:[#allocation16 + $0x748] ss:$44 sps:$4 sm:$0xff]  }
 0x57a   :  { %9540 = vmatprep.subr.bf16.mxu0 %v15821_v42  ;;  %v15887_v42 = vld [vmem:[#allocation16 + $0x6f4] ss:$44 sps:$4 sm:$0xff]  }
 0x57d   :  { %9541 = vmatpush2.bf16.msra.mxu0 %v15819_v16  ;;  %v15882_v16 = vld [vmem:[#allocation16 + $0x6e8] ss:$44 sps:$4 sm:$0xff]  }
 0x57e   :  { %v16797_v28 = vpop.eup %16796  ;;  %9542 = vmatprep.subr.bf16.mxu0 %v15827_v20  ;;  %v15885_v20 = vld [vmem:[#allocation16 + $0x6f0] ss:$44 sps:$4 sm:$0xff]  }
 0x57f   :  { %v5968_v54 = vmul.f32 %v16797_v28, %v5953_v18  ;;  %v15890_v18 = vld [vmem:[#allocation16 + $0x694] ss:$44 sps:$4 sm:$0xff]   ;;  %v15893_v28 = vld [vmem:[#allocation16 + $0x69c] ss:$44 sps:$4 sm:$0xff]  }
 0x580   :  { %v16799_v25 = vpop.eup %16798 }
 0x581   :  { %v5995_v33 = vrot.slane %v5968_v54, %v17327_v35  ;;  %v5969_v30 = vmul.f32 %v16799_v25, %v5957_v44  ;;  %9543 = vmatpush2.bf16.msra.mxu0 %v15825_v24  ;;  %v15888_v44 = vld [vmem:[#allocation16 + $0x690] ss:$44 sps:$4 sm:$0xff]   ;;  %v15891_v54 = vld [vmem:[#allocation16 + $0x698] ss:$44 sps:$4 sm:$0xff]  }
 0x582   :  { %9544 = vmatprep.subr.bf16.mxu0 %v15833_v22  ;;  %v15896_v24 = vld [vmem:[#allocation16 + $0x63c] ss:$44 sps:$4 sm:$0xff]   ;;  %v15899_v22 = vld [vmem:[#allocation16 + $0x644] ss:$44 sps:$4 sm:$0xff]  }
 0x583   :  { %v6004_v47 = vmul.f32 %v5995_v33, %v5974_v45  ;;  %v5999_v40 = vrot.slane %v5969_v30, %v17327_v35  ;;  %v15894_v25 = vld [vmem:[#allocation16 + $0x638] ss:$44 sps:$4 sm:$0xff]   ;;  %v15897_v33 = vld [vmem:[#allocation16 + $0x640] ss:$44 sps:$4 sm:$0xff]  }
 0x584   :  { %v15902_v45 = vld [vmem:[#allocation16 + $0x5e4] ss:$44 sps:$4 sm:$0xff]   ;;  %v15900_v30 = vld [vmem:[#allocation16 + $0x5e0] ss:$44 sps:$4 sm:$0xff]  }
 0x585   :  { %v6041_v11 = vadd.f32 %v6026_v8, %v6004_v47  ;;  %v6005_v39 = vmul.f32 %v5999_v40, %v5975_v46  ;;  %9545 = vmatpush2.bf16.msra.mxu0 %v15831_v52  ;;  %v15905_v8 = vld [vmem:[#allocation16 + $0x5ec] ss:$44 sps:$4 sm:$0xff]   ;;  %v15903_v47 = vld [vmem:[#allocation16 + $0x5e8] ss:$44 sps:$4 sm:$0xff]  }
 0x586   :  { %9546 = vmatprep.subr.bf16.mxu0 %v15839_v50  ;;  %v15908_v52 = vld [vmem:[#allocation16 + $0x58c] ss:$44 sps:$4 sm:$0xff]   ;;  %v15911_v50 = vld [vmem:[#allocation16 + $0x594] ss:$44 sps:$4 sm:$0xff]  }
 0x587   :  { %v6042_v58 = vadd.f32 %v6030_v43, %v6005_v39  ;;  %16800 = vtanh.f32 %v6041_v11  ;;  %v15906_v46 = vld [vmem:[#allocation16 + $0x588] ss:$44 sps:$4 sm:$0xff]   ;;  %v15909_v43 = vld [vmem:[#allocation16 + $0x590] ss:$44 sps:$4 sm:$0xff]  }
 0x588   :  { %v15914_v40 = vld [vmem:[#allocation16 + $0xab4] ss:$44 sps:$4 sm:$0xff]   ;;  %v15917_v11 = vld [vmem:[#allocation16 + $0xabc] ss:$44 sps:$4 sm:$0xff]  }
 0x589   :  { %16802 = vtanh.f32 %v6042_v58  ;;  %9547 = vmatpush2.bf16.msra.mxu0 %v15837_v23  ;;  %v15912_v39 = vld [vmem:[#allocation16 + $0xab0] ss:$44 sps:$4 sm:$0xff]  }
 0x58a   :  { %9548 = vmatprep.subr.bf16.mxu0 %v15845_v49  ;;  %v15920_v23 = vld [vmem:[#allocation16 + $0xa5c] ss:$44 sps:$4 sm:$0xff]   ;;  %v15915_v49 = vld [vmem:[#allocation16 + $0xab8] ss:$44 sps:$4 sm:$0xff]  }
 0x58b   :  { %v15923_v58 = vld [vmem:[#allocation16 + $0xa64] ss:$44 sps:$4 sm:$0xff]  }
 0x58d   :  { %9549 = vmatpush2.bf16.msra.mxu0 %v15843_v60  ;;  %v15918_v60 = vld [vmem:[#allocation16 + $0xa58] ss:$44 sps:$4 sm:$0xff]  }
 0x58e   :  { %9550 = vmatprep.subr.bf16.mxu0 %v15851_v51  ;;  %v15926_v51 = vld [vmem:[#allocation16 + $0xa04] ss:$44 sps:$4 sm:$0xff]  }
 0x591   :  { %9551 = vmatpush2.bf16.msra.mxu0 %v15849_v29  ;;  %v15921_v29 = vld [vmem:[#allocation16 + $0xa60] ss:$44 sps:$4 sm:$0xff]  }
 0x592   :  { %9552 = vmatprep.subr.bf16.mxu0 %v15857_v9  ;;  %v15929_v9 = vld [vmem:[#allocation16 + $0xa0c] ss:$44 sps:$4 sm:$0xff]  }
 0x594   :  { %v16801_v61 = vpop.eup %16800 }
 0x595   :  { %9553 = vmatpush2.bf16.msra.mxu0 %v15855_v26  ;;  %v17651_v2 = vpack.c.bf16 %v16801_v61, %v16801_v61  ;;  %v15924_v26 = vld [vmem:[#allocation16 + $0xa00] ss:$44 sps:$4 sm:$0xff]   ;;  %v15927_v61 = vld [vmem:[#allocation16 + $0xa08] ss:$44 sps:$4 sm:$0xff]  }
 0x596   :  { %v16803_v53 = vpop.eup %16802  ;;  %9554 = vmatprep.subr.bf16.mxu0 %v15863_v55  ;;  %v15932_v55 = vld [vmem:[#allocation16 + $0x9ac] ss:$44 sps:$4 sm:$0xff]  }
 0x597   :  { %v17649_v62 = vpack.c.bf16 %v16803_v53, %v16803_v53  ;;  %v15930_v53 = vld [vmem:[#allocation16 + $0x9a8] ss:$44 sps:$4 sm:$0xff]  }
 0x599   :  { %9555 = vmatpush2.bf16.msra.mxu0 %v15861_v1  ;;  %9433 = vmatprep.mubr.bf16.mxu1 %v17649_v62  ;;  %v15935_v1 = vld [vmem:[#allocation16 + $0x9b4] ss:$44 sps:$4 sm:$0xff]  }
 0x59a   :  { %9556 = vmatprep.mubr.bf16.mxu0 %v17649_v62  ;;  %9434 = vmatmul.mubr.bf16.vlgmr.msra.gmra.mxu1 %v17651_v2  ;;  %v17656_v36 = vpop.f32.mrf.mxu1 }
 0x59b   :  { %9484 = vmatpush1.bf16.msra.mxu1 %v15864_v63  ;;  %9515 = vmatprep.mubr.bf16.mxu1 %v17614_v21  ;;  %v15938_v63 = vld [vmem:[#allocation16 + $0x954] ss:$44 sps:$4 sm:$0xff]  }
 0x59c   :  { %9557 = vmatmul.mubr.bf16.vlgmr.msra.gmra.mxu0 %v17651_v2  ;;  %9606 = vmatprep.subr.bf16.mxu0 %v15869_v3  ;;  %v17660_v7 = vpop.f32.mrf.mxu1  ;;  %v15933_v3 = vld [vmem:[#allocation16 + $0x9b0] ss:$44 sps:$4 sm:$0xff]  }
 0x59d   :  { %9607 = vmatpush1.bf16.msra.mxu0 %v15867_v4  ;;  %9638 = vmatprep.mubr.bf16.mxu0 %v17614_v21  ;;  %v15941_v4 = vld [vmem:[#allocation16 + $0x95c] ss:$44 sps:$4 sm:$0xff]  }
 0x59e   :  { %9485 = vmatprep.subr.bf16.mxu1 %v15872_v6  ;;  %v9357_v5 = vpop.f32.mrf.mxu1  ;;  %9608 = vmatprep.subr.bf16.mxu0 %v15875_v31  ;;  %v15936_v6 = vld [vmem:[#allocation16 + $0x950] ss:$44 sps:$4 sm:$0xff]  }
 0x59f   :  { %9486 = vmatpush1.bf16.msra.mxu1 %v15870_v32  ;;  %v15944_v31 = vld [vmem:[#allocation16 + $0x8fc] ss:$44 sps:$4 sm:$0xff]   ;;  %v15939_v32 = vld [vmem:[#allocation16 + $0x958] ss:$44 sps:$4 sm:$0xff]  }
 0x5a0   :  { %v9358_v38 = vpop.f32.mrf.mxu1  ;;  %9487 = vmatprep.subr.bf16.mxu1 %v15878_v41  ;;  %v15947_v41 = vld [vmem:[#allocation16 + $0x904] ss:$44 sps:$4 sm:$0xff]  }
 0x5a1   :  { %9609 = vmatpush1.bf16.msra.mxu0 %v15873_v12  ;;  %v15942_v12 = vld [vmem:[#allocation16 + $0x8f8] ss:$44 sps:$4 sm:$0xff]   ;;  %v15948_v38 = vld [vmem:[#allocation16 + $0x8a0] ss:$44 sps:$4 sm:$0xff]  }
 0x5a2   :  { %9610 = vmatprep.subr.bf16.mxu0 %v15881_v57  ;;  %v15950_v5 = vld [vmem:[#allocation16 + $0x8a4] ss:$44 sps:$4 sm:$0xff]   ;;  %v15945_v57 = vld [vmem:[#allocation16 + $0x900] ss:$44 sps:$4 sm:$0xff]  }
 0x5a3   :  { %9488 = vmatpush1.bf16.msra.mxu1 %v15876_v14  ;;  %v15953_v14 = vld [vmem:[#allocation16 + $0x8ac] ss:$44 sps:$4 sm:$0xff]  }
 0x5a4   :  { %9489 = vmatprep.subr.bf16.mxu1 %v15884_v15  ;;  %v15956_v15 = vld [vmem:[#allocation16 + $0x84c] ss:$44 sps:$4 sm:$0xff]  }
 0x5a5   :  { %9611 = vmatpush1.bf16.msra.mxu0 %v15879_v48  ;;  %v15951_v48 = vld [vmem:[#allocation16 + $0x8a8] ss:$44 sps:$4 sm:$0xff]  }
 0x5a6   :  { %9612 = vmatprep.subr.bf16.mxu0 %v15887_v42  ;;  %v15959_v42 = vld [vmem:[#allocation16 + $0x854] ss:$44 sps:$4 sm:$0xff]  }
 0x5a7   :  { %9490 = vmatpush1.bf16.msra.mxu1 %v15882_v16  ;;  %v15954_v16 = vld [vmem:[#allocation16 + $0x848] ss:$44 sps:$4 sm:$0xff]  }
 0x5a8   :  { %9491 = vmatprep.subr.bf16.mxu1 %v15890_v18  ;;  %v15962_v18 = vld [vmem:[#allocation16 + $0x27c] ss:$44 sps:$4 sm:$0xff]  }
 0x5a9   :  { %9613 = vmatpush1.bf16.msra.mxu0 %v15885_v20  ;;  %v15957_v20 = vld [vmem:[#allocation16 + $0x850] ss:$44 sps:$4 sm:$0xff]  }
 0x5aa   :  { %9614 = vmatprep.subr.bf16.mxu0 %v15893_v28  ;;  %v15965_v28 = vld [vmem:[#allocation16 + $0x284] ss:$44 sps:$4 sm:$0xff]  }
 0x5ab   :  { %9492 = vmatpush1.bf16.msra.mxu1 %v15888_v44  ;;  %v15960_v44 = vld [vmem:[#allocation16 + $0x278] ss:$44 sps:$4 sm:$0xff]  }
 0x5ac   :  { %9493 = vmatprep.subr.bf16.mxu1 %v15896_v24  ;;  %v15968_v24 = vld [vmem:[#allocation16 + $0x224] ss:$44 sps:$4 sm:$0xff]  }
 0x5ad   :  { %9615 = vmatpush1.bf16.msra.mxu0 %v15891_v54  ;;  %v15963_v54 = vld [vmem:[#allocation16 + $0x280] ss:$44 sps:$4 sm:$0xff]  }
 0x5ae   :  { %9616 = vmatprep.subr.bf16.mxu0 %v15899_v22  ;;  %v15971_v22 = vld [vmem:[#allocation16 + $0x22c] ss:$44 sps:$4 sm:$0xff]  }
 0x5af   :  { %9494 = vmatpush1.bf16.msra.mxu1 %v15894_v25  ;;  %v15966_v25 = vld [vmem:[#allocation16 + $0x220] ss:$44 sps:$4 sm:$0xff]  }
 0x5b0   :  { %9495 = vmatprep.subr.bf16.mxu1 %v15902_v45 }
 0x5b1   :  { %9617 = vmatpush1.bf16.msra.mxu0 %v15897_v33  ;;  %v15974_v33 = vld [vmem:[#allocation16 + $0x1cc] ss:$44 sps:$4 sm:$0xff]  }
 0x5b2   :  { %9618 = vmatprep.subr.bf16.mxu0 %v15905_v8  ;;  %v15969_v8 = vld [vmem:[#allocation16 + $0x228] ss:$44 sps:$4 sm:$0xff]  }
 0x5b3   :  { %9496 = vmatpush1.bf16.msra.mxu1 %v15900_v30 }
 0x5b4   :  { %9497 = vmatprep.subr.bf16.mxu1 %v15908_v52  ;;  %v15977_v52 = vld [vmem:[#allocation16 + $0x1d4] ss:$44 sps:$4 sm:$0xff]  }
 0x5b5   :  { %9619 = vmatpush1.bf16.msra.mxu0 %v15903_v47  ;;  %v15972_v47 = vld [vmem:[#allocation16 + $0x1c8] ss:$44 sps:$4 sm:$0xff]  }
 0x5b6   :  { %9620 = vmatprep.subr.bf16.mxu0 %v15911_v50 }
 0x5b7   :  { %9498 = vmatpush1.bf16.msra.mxu1 %v15906_v46  ;;  %v15980_v46 = vld [vmem:[#allocation16 + $0x174] ss:$44 sps:$4 sm:$0xff]  }
 0x5b8   :  { %9499 = vmatprep.subr.bf16.mxu1 %v15914_v40  ;;  %v15975_v40 = vld [vmem:[#allocation16 + $0x1d0] ss:$44 sps:$4 sm:$0xff]  }
 0x5b9   :  { %9621 = vmatpush1.bf16.msra.mxu0 %v15909_v43 }
 0x5ba   :  { %9622 = vmatprep.subr.bf16.mxu0 %v15917_v11  ;;  %v15983_v11 = vld [vmem:[#allocation16 + $0x17c] ss:$44 sps:$4 sm:$0xff]  }
 0x5bb   :  { %9500 = vmatpush2.bf16.msra.mxu1 %v15912_v39  ;;  %v15978_v39 = vld [vmem:[#allocation16 + $0x170] ss:$44 sps:$4 sm:$0xff]  }
 0x5bc   :  { %9501 = vmatprep.subr.bf16.mxu1 %v15920_v23  ;;  %v15986_v23 = vld [vmem:[#allocation16 + $0x11c] ss:$44 sps:$4 sm:$0xff]  }
 0x5bd   :  { %9623 = vmatpush2.bf16.msra.mxu0 %v15915_v49  ;;  %v15981_v49 = vld [vmem:[#allocation16 + $0x178] ss:$44 sps:$4 sm:$0xff]  }
 0x5be   :  { %9624 = vmatprep.subr.bf16.mxu0 %v15923_v58  ;;  %v15989_v58 = vld [vmem:[#allocation16 + $0x124] ss:$44 sps:$4 sm:$0xff]  }
 0x5bf   :  { %9502 = vmatpush2.bf16.msra.mxu1 %v15918_v60  ;;  %v15984_v60 = vld [vmem:[#allocation16 + $0x118] ss:$44 sps:$4 sm:$0xff]  }
 0x5c0   :  { %9503 = vmatprep.subr.bf16.mxu1 %v15926_v51  ;;  %v15992_v51 = vld [vmem:[#allocation16 + $0xc4] ss:$44 sps:$4 sm:$0xff]  }
 0x5c1   :  { %9625 = vmatpush2.bf16.msra.mxu0 %v15921_v29  ;;  %v15987_v29 = vld [vmem:[#allocation16 + $0x120] ss:$44 sps:$4 sm:$0xff]  }
 0x5c2   :  { %9626 = vmatprep.subr.bf16.mxu0 %v15929_v9  ;;  %v15995_v9 = vld [vmem:[#allocation16 + $0xcc] ss:$44 sps:$4 sm:$0xff]  }
 0x5c3   :  { %9504 = vmatpush2.bf16.msra.mxu1 %v15924_v26  ;;  %v15990_v26 = vld [vmem:[#allocation16 + $0xc0] ss:$44 sps:$4 sm:$0xff]  }
 0x5c4   :  { %9505 = vmatprep.subr.bf16.mxu1 %v15932_v55  ;;  %v15998_v55 = vld [vmem:[#allocation16 + $0x6c] ss:$44 sps:$4 sm:$0xff]  }
 0x5c5   :  { %9627 = vmatpush2.bf16.msra.mxu0 %v15927_v61  ;;  %v15993_v61 = vld [vmem:[#allocation16 + $0xc8] ss:$44 sps:$4 sm:$0xff]  }
 0x5c6   :  { %9628 = vmatprep.subr.bf16.mxu0 %v15935_v1  ;;  %v16001_v1 = vld [vmem:[#allocation16 + $0x74] ss:$44 sps:$4 sm:$0xff]  }
 0x5c7   :  { %9506 = vmatpush2.bf16.msra.mxu1 %v15930_v53  ;;  %v15996_v53 = vld [vmem:[#allocation16 + $0x68] ss:$44 sps:$4 sm:$0xff]  }
 0x5c8   :  { %9507 = vmatprep.subr.bf16.mxu1 %v15938_v63  ;;  %v16004_v63 = vld [vmem:[#allocation16 + $0x14] ss:$44 sps:$4 sm:$0xff]  }
 0x5c9   :  { %9629 = vmatpush2.bf16.msra.mxu0 %v15933_v3  ;;  %v15999_v3 = vld [vmem:[#allocation16 + $0x70] ss:$44 sps:$4 sm:$0xff]  }
 0x5ca   :  { %9630 = vmatprep.subr.bf16.mxu0 %v15941_v4  ;;  %v16007_v4 = vld [vmem:[#allocation16 + $0x1c] ss:$44 sps:$4 sm:$0xff]  }
 0x5cb   :  { %9508 = vmatpush2.bf16.msra.mxu1 %v15936_v6  ;;  %v16002_v6 = vld [vmem:[#allocation16 + $0x10] ss:$44 sps:$4 sm:$0xff]  }
 0x5cc   :  { %9509 = vmatprep.subr.bf16.mxu1 %v15944_v31  ;;  %v16010_v31 = vld [vmem:[#allocation16 + $0x53c] ss:$44 sps:$4 sm:$0xff]  }
 0x5cd   :  { %9631 = vmatpush2.bf16.msra.mxu0 %v15939_v32  ;;  %v16005_v32 = vld [vmem:[#allocation16 + $0x18] ss:$44 sps:$4 sm:$0xff]  }
 0x5ce   :  { %9632 = vmatprep.subr.bf16.mxu0 %v15947_v41  ;;  %v16013_v41 = vld [vmem:[#allocation16 + $0x544] ss:$44 sps:$4 sm:$0xff]  }
 0x5cf   :  { %9510 = vmatpush2.bf16.msra.mxu1 %v15942_v12  ;;  %v16008_v12 = vld [vmem:[#allocation16 + $0x538] ss:$44 sps:$4 sm:$0xff]  }
 0x5d0   :  { %9511 = vmatprep.subr.bf16.mxu1 %v15950_v5  ;;  %v16016_v5 = vld [vmem:[#allocation16 + $0x4e4] ss:$44 sps:$4 sm:$0xff]  }
 0x5d1   :  { %9633 = vmatpush2.bf16.msra.mxu0 %v15945_v57  ;;  %v16011_v57 = vld [vmem:[#allocation16 + $0x540] ss:$44 sps:$4 sm:$0xff]  }
 0x5d2   :  { %9634 = vmatprep.subr.bf16.mxu0 %v15953_v14  ;;  %v16019_v14 = vld [vmem:[#allocation16 + $0x4ec] ss:$44 sps:$4 sm:$0xff]  }
 0x5d3   :  { %9512 = vmatpush2.bf16.msra.mxu1 %v15948_v38  ;;  %v16014_v38 = vld [vmem:[#allocation16 + $0x4e0] ss:$44 sps:$4 sm:$0xff]  }
 0x5d4   :  { %9513 = vmatprep.subr.bf16.mxu1 %v15956_v15  ;;  %v16022_v15 = vld [vmem:[#allocation16 + $0x48c] ss:$44 sps:$4 sm:$0xff]  }
 0x5d5   :  { %9635 = vmatpush2.bf16.msra.mxu0 %v15951_v48  ;;  %v16017_v48 = vld [vmem:[#allocation16 + $0x4e8] ss:$44 sps:$4 sm:$0xff]  }
 0x5d6   :  { %9636 = vmatprep.subr.bf16.mxu0 %v15959_v42  ;;  %v16025_v42 = vld [vmem:[#allocation16 + $0x494] ss:$44 sps:$4 sm:$0xff]  }
 0x5d7   :  { %9514 = vmatpush2.bf16.msra.mxu1 %v15954_v16  ;;  %v16020_v16 = vld [vmem:[#allocation16 + $0x488] ss:$44 sps:$4 sm:$0xff]  }
 0x5d8   :  { %9565 = vmatprep.subr.bf16.mxu1 %v15962_v18  ;;  %v16028_v18 = vld [vmem:[#allocation16 + $0x434] ss:$44 sps:$4 sm:$0xff]  }
 0x5d9   :  { %9637 = vmatpush2.bf16.msra.mxu0 %v15957_v20  ;;  %v16023_v20 = vld [vmem:[#allocation16 + $0x490] ss:$44 sps:$4 sm:$0xff]  }
 0x5da   :  { %9516 = vmatmul.mubr.bf16.vlgmr.msra.gmra.mxu1 %v17616_v27  ;;  %9688 = vmatprep.subr.bf16.mxu0 %v15965_v28  ;;  %v16031_v28 = vld [vmem:[#allocation16 + $0x43c] ss:$44 sps:$4 sm:$0xff]  }
 0x5db   :  { %9566 = vmatpush1.bf16.msra.mxu1 %v15960_v44  ;;  %9597 = vmatprep.mubr.bf16.mxu1 %v17571_v17  ;;  %v16026_v44 = vld [vmem:[#allocation16 + $0x430] ss:$44 sps:$4 sm:$0xff]  }
 0x5dc   :  { %9639 = vmatmul.mubr.bf16.vlgmr.msra.gmra.mxu0 %v17616_v27  ;;  %v17666_v45 = vpop.f32.mrf.mxu0  ;;  %9567 = vmatprep.subr.bf16.mxu1 %v15968_v24  ;;  %v16034_v24 = vld [vmem:[#allocation16 + $0x3dc] ss:$44 sps:$4 sm:$0xff]  }
 0x5dd   :  { %9689 = vmatpush1.bf16.msra.mxu0 %v15963_v54  ;;  %9720 = vmatprep.mubr.bf16.mxu0 %v17571_v17  ;;  %v16029_v54 = vld [vmem:[#allocation16 + $0x438] ss:$44 sps:$4 sm:$0xff]  }
 0x5de   :  { %v17669_v30 = vpop.f32.mrf.mxu0  ;;  %9690 = vmatprep.subr.bf16.mxu0 %v15971_v22  ;;  %v16037_v22 = vld [vmem:[#allocation16 + $0x3e4] ss:$44 sps:$4 sm:$0xff]  }
 0x5df   :  { %9568 = vmatpush1.bf16.msra.mxu1 %v15966_v25  ;;  %v16032_v25 = vld [vmem:[#allocation16 + $0x3d8] ss:$44 sps:$4 sm:$0xff]  }
 0x5e0   :  { %v9398_v50 = vpop.f32.mrf.mxu0  ;;  %9569 = vmatprep.subr.bf16.mxu1 %v15974_v33  ;;  %v16040_v33 = vld [vmem:[#allocation16 + $0x384] ss:$44 sps:$4 sm:$0xff]  }
 0x5e1   :  { %9691 = vmatpush1.bf16.msra.mxu0 %v15969_v8  ;;  %v16035_v8 = vld [vmem:[#allocation16 + $0x3e0] ss:$44 sps:$4 sm:$0xff]  }
 0x5e2   :  { %v9399_v43 = vpop.f32.mrf.mxu0  ;;  %9692 = vmatprep.subr.bf16.mxu0 %v15977_v52  ;;  %v16043_v52 = vld [vmem:[#allocation16 + $0x38c] ss:$44 sps:$4 sm:$0xff]  }
 0x5e3   :  { %9570 = vmatpush1.bf16.msra.mxu1 %v15972_v47  ;;  %v16038_v47 = vld [vmem:[#allocation16 + $0x380] ss:$44 sps:$4 sm:$0xff]   ;;  %v16044_v43 = vld [vmem:[#allocation16 + $0x328] ss:$44 sps:$4 sm:$0xff]  }
 0x5e4   :  { %9571 = vmatprep.subr.bf16.mxu1 %v15980_v46  ;;  %v16046_v50 = vld [vmem:[#allocation16 + $0x32c] ss:$44 sps:$4 sm:$0xff]   ;;  %v16041_v46 = vld [vmem:[#allocation16 + $0x388] ss:$44 sps:$4 sm:$0xff]  }
 0x5e5   :  { %9693 = vmatpush1.bf16.msra.mxu0 %v15975_v40  ;;  %v16049_v40 = vld [vmem:[#allocation16 + $0x334] ss:$44 sps:$4 sm:$0xff]  }
 0x5e6   :  { %9694 = vmatprep.subr.bf16.mxu0 %v15983_v11  ;;  %v16052_v11 = vld [vmem:[#allocation16 + $0x2d4] ss:$44 sps:$4 sm:$0xff]  }
 0x5e7   :  { %9572 = vmatpush1.bf16.msra.mxu1 %v15978_v39  ;;  %v16047_v39 = vld [vmem:[#allocation16 + $0x330] ss:$44 sps:$4 sm:$0xff]  }
 0x5e8   :  { %9573 = vmatprep.subr.bf16.mxu1 %v15986_v23  ;;  %v16055_v23 = vld [vmem:[#allocation16 + $0x2dc] ss:$44 sps:$4 sm:$0xff]  }
 0x5e9   :  { %9695 = vmatpush1.bf16.msra.mxu0 %v15981_v49  ;;  %v16050_v49 = vld [vmem:[#allocation16 + $0x2d0] ss:$44 sps:$4 sm:$0xff]  }
 0x5ea   :  { %9696 = vmatprep.subr.bf16.mxu0 %v15989_v58  ;;  %v16058_v58 = vld [vmem:[#allocation16 + $0xd7c] ss:$44 sps:$4 sm:$0xff]  }
 0x5eb   :  { %9574 = vmatpush1.bf16.msra.mxu1 %v15984_v60  ;;  %v16053_v60 = vld [vmem:[#allocation16 + $0x2d8] ss:$44 sps:$4 sm:$0xff]  }
 0x5ec   :  { %9575 = vmatprep.subr.bf16.mxu1 %v15992_v51  ;;  %v16061_v51 = vld [vmem:[#allocation16 + $0xd84] ss:$44 sps:$4 sm:$0xff]  }
 0x5ed   :  { %9697 = vmatpush1.bf16.msra.mxu0 %v15987_v29  ;;  %v16056_v29 = vld [vmem:[#allocation16 + $0xd78] ss:$44 sps:$4 sm:$0xff]  }
 0x5ee   :  { %9698 = vmatprep.subr.bf16.mxu0 %v15995_v9  ;;  %v16064_v9 = vld [vmem:[#allocation16 + $0xd24] ss:$44 sps:$4 sm:$0xff]  }
 0x5ef   :  { %9576 = vmatpush1.bf16.msra.mxu1 %v15990_v26  ;;  %v16059_v26 = vld [vmem:[#allocation16 + $0xd80] ss:$44 sps:$4 sm:$0xff]  }
 0x5f0   :  { %9577 = vmatprep.subr.bf16.mxu1 %v15998_v55  ;;  %v16067_v55 = vld [vmem:[#allocation16 + $0xd2c] ss:$44 sps:$4 sm:$0xff]  }
 0x5f1   :  { %9699 = vmatpush1.bf16.msra.mxu0 %v15993_v61  ;;  %v16062_v61 = vld [vmem:[#allocation16 + $0xd20] ss:$44 sps:$4 sm:$0xff]  }
 0x5f2   :  { %9700 = vmatprep.subr.bf16.mxu0 %v16001_v1 }
 0x5f3   :  { %9578 = vmatpush1.bf16.msra.mxu1 %v15996_v53  ;;  %v16070_v53 = vld [vmem:[#allocation16 + $0xccc] ss:$44 sps:$4 sm:$0xff]  }
 0x5f4   :  { %9579 = vmatprep.subr.bf16.mxu1 %v16004_v63  ;;  %v16065_v63 = vld [vmem:[#allocation16 + $0xd28] ss:$44 sps:$4 sm:$0xff]  }
 0x5f5   :  { %9701 = vmatpush1.bf16.msra.mxu0 %v15999_v3 }
 0x5f6   :  { %9702 = vmatprep.subr.bf16.mxu0 %v16007_v4  ;;  %v16073_v4 = vld [vmem:[#allocation16 + $0xcd4] ss:$44 sps:$4 sm:$0xff]  }
 0x5f7   :  { %9580 = vmatpush1.bf16.msra.mxu1 %v16002_v6  ;;  %v16068_v6 = vld [vmem:[#allocation16 + $0xcc8] ss:$44 sps:$4 sm:$0xff]  }
 0x5f8   :  { %9581 = vmatprep.subr.bf16.mxu1 %v16010_v31 }
 0x5f9   :  { %9703 = vmatpush1.bf16.msra.mxu0 %v16005_v32  ;;  %v16076_v32 = vld [vmem:[#allocation16 + $0xc74] ss:$44 sps:$4 sm:$0xff]  }
 0x5fa   :  { %9704 = vmatprep.subr.bf16.mxu0 %v16013_v41  ;;  %v16071_v41 = vld [vmem:[#allocation16 + $0xcd0] ss:$44 sps:$4 sm:$0xff]  }
 0x5fb   :  { %9582 = vmatpush2.bf16.msra.mxu1 %v16008_v12 }
 0x5fc   :  { %9583 = vmatprep.subr.bf16.mxu1 %v16016_v5  ;;  %v16079_v5 = vld [vmem:[#allocation16 + $0xc7c] ss:$44 sps:$4 sm:$0xff]  }
 0x5fd   :  { %9705 = vmatpush2.bf16.msra.mxu0 %v16011_v57  ;;  %v16074_v57 = vld [vmem:[#allocation16 + $0xc70] ss:$44 sps:$4 sm:$0xff]  }
 0x5fe   :  { %9706 = vmatprep.subr.bf16.mxu0 %v16019_v14  ;;  %v16082_v14 = vld [vmem:[#allocation16 + $0xc1c] ss:$44 sps:$4 sm:$0xff]  }
 0x5ff   :  { %9584 = vmatpush2.bf16.msra.mxu1 %v16014_v38  ;;  %v16077_v38 = vld [vmem:[#allocation16 + $0xc78] ss:$44 sps:$4 sm:$0xff]  }
 0x600   :  { %9585 = vmatprep.subr.bf16.mxu1 %v16022_v15  ;;  %v16085_v15 = vld [vmem:[#allocation16 + $0xc24] ss:$44 sps:$4 sm:$0xff]  }
 0x601   :  { %9707 = vmatpush2.bf16.msra.mxu0 %v16017_v48  ;;  %v16080_v48 = vld [vmem:[#allocation16 + $0xc18] ss:$44 sps:$4 sm:$0xff]  }
 0x602   :  { %9708 = vmatprep.subr.bf16.mxu0 %v16025_v42  ;;  %v16088_v42 = vld [vmem:[#allocation16 + $0xbc4] ss:$44 sps:$4 sm:$0xff]  }
 0x603   :  { %9586 = vmatpush2.bf16.msra.mxu1 %v16020_v16  ;;  %v16083_v16 = vld [vmem:[#allocation16 + $0xc20] ss:$44 sps:$4 sm:$0xff]  }
 0x604   :  { %9587 = vmatprep.subr.bf16.mxu1 %v16028_v18  ;;  %v16091_v18 = vld [vmem:[#allocation16 + $0xbcc] ss:$44 sps:$4 sm:$0xff]  }
 0x605   :  { %9709 = vmatpush2.bf16.msra.mxu0 %v16023_v20  ;;  %v16086_v20 = vld [vmem:[#allocation16 + $0xbc0] ss:$44 sps:$4 sm:$0xff]  }
 0x606   :  { %9710 = vmatprep.subr.bf16.mxu0 %v16031_v28  ;;  %v16094_v28 = vld [vmem:[#allocation16 + $0xb6c] ss:$44 sps:$4 sm:$0xff]  }
 0x607   :  { %9588 = vmatpush2.bf16.msra.mxu1 %v16026_v44  ;;  %v16089_v44 = vld [vmem:[#allocation16 + $0xbc8] ss:$44 sps:$4 sm:$0xff]  }
 0x608   :  { %9589 = vmatprep.subr.bf16.mxu1 %v16034_v24  ;;  %v16097_v24 = vld [vmem:[#allocation16 + $0xb74] ss:$44 sps:$4 sm:$0xff]  }
 0x609   :  { %9711 = vmatpush2.bf16.msra.mxu0 %v16029_v54  ;;  %v16092_v54 = vld [vmem:[#allocation16 + $0xb68] ss:$44 sps:$4 sm:$0xff]  }
 0x60a   :  { %9712 = vmatprep.subr.bf16.mxu0 %v16037_v22  ;;  %v16100_v22 = vld [vmem:[#allocation16 + $0xb14] ss:$44 sps:$4 sm:$0xff]  }
 0x60b   :  { %9590 = vmatpush2.bf16.msra.mxu1 %v16032_v25  ;;  %v16095_v25 = vld [vmem:[#allocation16 + $0xb70] ss:$44 sps:$4 sm:$0xff]  }
 0x60c   :  { %9591 = vmatprep.subr.bf16.mxu1 %v16040_v33  ;;  %v16103_v33 = vld [vmem:[#allocation16 + $0xb1c] ss:$44 sps:$4 sm:$0xff]  }
 0x60d   :  { %9713 = vmatpush2.bf16.msra.mxu0 %v16035_v8  ;;  %v16098_v8 = vld [vmem:[#allocation16 + $0xb10] ss:$44 sps:$4 sm:$0xff]  }
 0x60e   :  { %9714 = vmatprep.subr.bf16.mxu0 %v16043_v52  ;;  %v16106_v52 = vld [vmem:[#allocation16 + $0x103c] ss:$44 sps:$4 sm:$0xff]  }
 0x60f   :  { %9592 = vmatpush2.bf16.msra.mxu1 %v16038_v47  ;;  %v16101_v47 = vld [vmem:[#allocation16 + $0xb18] ss:$44 sps:$4 sm:$0xff]  }
 0x610   :  { %9593 = vmatprep.subr.bf16.mxu1 %v16046_v50  ;;  %v16109_v50 = vld [vmem:[#allocation16 + $0x1044] ss:$44 sps:$4 sm:$0xff]  }
 0x611   :  { %9715 = vmatpush2.bf16.msra.mxu0 %v16041_v46  ;;  %v16104_v46 = vld [vmem:[#allocation16 + $0x1038] ss:$44 sps:$4 sm:$0xff]  }
 0x612   :  { %9716 = vmatprep.subr.bf16.mxu0 %v16049_v40  ;;  %v16112_v40 = vld [vmem:[#allocation16 + $0xfe4] ss:$44 sps:$4 sm:$0xff]  }
 0x613   :  { %9594 = vmatpush2.bf16.msra.mxu1 %v16044_v43  ;;  %v16107_v43 = vld [vmem:[#allocation16 + $0x1040] ss:$44 sps:$4 sm:$0xff]  }
 0x614   :  { %9595 = vmatprep.subr.bf16.mxu1 %v16052_v11  ;;  %v16115_v11 = vld [vmem:[#allocation16 + $0xfec] ss:$44 sps:$4 sm:$0xff]  }
 0x615   :  { %9717 = vmatpush2.bf16.msra.mxu0 %v16047_v39  ;;  %v16110_v39 = vld [vmem:[#allocation16 + $0xfe0] ss:$44 sps:$4 sm:$0xff]  }
 0x616   :  { %9718 = vmatprep.subr.bf16.mxu0 %v16055_v23  ;;  %v16118_v23 = vld [vmem:[#allocation16 + $0xf8c] ss:$44 sps:$4 sm:$0xff]  }
 0x617   :  { %9596 = vmatpush2.bf16.msra.mxu1 %v16050_v49  ;;  %v16113_v49 = vld [vmem:[#allocation16 + $0xfe8] ss:$44 sps:$4 sm:$0xff]  }
 0x618   :  { %9647 = vmatprep.subr.bf16.mxu1 %v16058_v58  ;;  %v16121_v58 = vld [vmem:[#allocation16 + $0xf94] ss:$44 sps:$4 sm:$0xff]  }
 0x619   :  { %9719 = vmatpush2.bf16.msra.mxu0 %v16053_v60  ;;  %v16116_v60 = vld [vmem:[#allocation16 + $0xf88] ss:$44 sps:$4 sm:$0xff]  }
 0x61a   :  { %9598 = vmatmul.mubr.bf16.vlgmr.msra.gmra.mxu1 %v17573_v19  ;;  %9770 = vmatprep.subr.bf16.mxu0 %v16061_v51  ;;  %v16124_v51 = vld [vmem:[#allocation16 + $0xf34] ss:$44 sps:$4 sm:$0xff]  }
 0x61b   :  { %9648 = vmatpush1.bf16.msra.mxu1 %v16056_v29  ;;  %9679 = vmatprep.mubr.bf16.mxu1 %v17649_v62  ;;  %v16119_v29 = vld [vmem:[#allocation16 + $0xf90] ss:$44 sps:$4 sm:$0xff]  }
 0x61c   :  { %v17673_v1 = vpop.f32.mrf.mxu0  ;;  %9721 = vmatmul.mubr.bf16.vlgmr.msra.gmra.mxu0 %v17573_v19  ;;  %9649 = vmatprep.subr.bf16.mxu1 %v16064_v9  ;;  %v16127_v9 = vld [vmem:[#allocation16 + $0xf3c] ss:$44 sps:$4 sm:$0xff]  }
 0x61d   :  { %9771 = vmatpush1.bf16.msra.mxu0 %v16059_v26  ;;  %9802 = vmatprep.mubr.bf16.mxu0 %v17649_v62  ;;  %v16122_v26 = vld [vmem:[#allocation16 + $0xf30] ss:$44 sps:$4 sm:$0xff]  }
 0x61e   :  { %v17677_v3 = vpop.f32.mrf.mxu0  ;;  %9772 = vmatprep.subr.bf16.mxu0 %v16067_v55  ;;  %v16130_v55 = vld [vmem:[#allocation16 + $0xedc] ss:$44 sps:$4 sm:$0xff]  }
 0x61f   :  { %9650 = vmatpush1.bf16.msra.mxu1 %v16062_v61  ;;  %v16125_v61 = vld [vmem:[#allocation16 + $0xf38] ss:$44 sps:$4 sm:$0xff]  }
 0x620   :  { %v9480_v31 = vpop.f32.mrf.mxu0  ;;  %9651 = vmatprep.subr.bf16.mxu1 %v16070_v53  ;;  %v16133_v53 = vld [vmem:[#allocation16 + $0xee4] ss:$44 sps:$4 sm:$0xff]  }
 0x621   :  { %9773 = vmatpush1.bf16.msra.mxu0 %v16065_v63  ;;  %v16128_v63 = vld [vmem:[#allocation16 + $0xed8] ss:$44 sps:$4 sm:$0xff]  }
 0x622   :  { %v9481_v12 = vpop.f32.mrf.mxu0  ;;  %9774 = vmatprep.subr.bf16.mxu0 %v16073_v4  ;;  %v16136_v4 = vld [vmem:[#allocation16 + $0xe84] ss:$44 sps:$4 sm:$0xff]   ;;  %v16139_v31 = vld [vmem:[#allocation16 + $0xe8c] ss:$44 sps:$4 sm:$0xff]  }
 0x623   :  { %9652 = vmatpush1.bf16.msra.mxu1 %v16068_v6  ;;  %v16131_v6 = vld [vmem:[#allocation16 + $0xee0] ss:$44 sps:$4 sm:$0xff]   ;;  %v16137_v12 = vld [vmem:[#allocation16 + $0xe88] ss:$44 sps:$4 sm:$0xff]  }
 0x624   :  { %9653 = vmatprep.subr.bf16.mxu1 %v16076_v32  ;;  %v16134_v32 = vld [vmem:[#allocation16 + $0xe80] ss:$44 sps:$4 sm:$0xff]  }
 0x625   :  { %9775 = vmatpush1.bf16.msra.mxu0 %v16071_v41  ;;  %v16142_v41 = vld [vmem:[#allocation16 + $0xe2c] ss:$44 sps:$4 sm:$0xff]  }
 0x626   :  { %9776 = vmatprep.subr.bf16.mxu0 %v16079_v5  ;;  %v16145_v5 = vld [vmem:[#allocation16 + $0xe34] ss:$44 sps:$4 sm:$0xff]  }
 0x627   :  { %9654 = vmatpush1.bf16.msra.mxu1 %v16074_v57  ;;  %v16140_v57 = vld [vmem:[#allocation16 + $0xe28] ss:$44 sps:$4 sm:$0xff]  }
 0x628   :  { %9655 = vmatprep.subr.bf16.mxu1 %v16082_v14  ;;  %v16148_v14 = vld [vmem:[#allocation16 + $0xdd4] ss:$44 sps:$4 sm:$0xff]  }
 0x629   :  { %9777 = vmatpush1.bf16.msra.mxu0 %v16077_v38  ;;  %v16143_v38 = vld [vmem:[#allocation16 + $0xe30] ss:$44 sps:$4 sm:$0xff]  }
 0x62a   :  { %9778 = vmatprep.subr.bf16.mxu0 %v16085_v15  ;;  %v16151_v15 = vld [vmem:[#allocation16 + $0xddc] ss:$44 sps:$4 sm:$0xff]  }
 0x62b   :  { %9656 = vmatpush1.bf16.msra.mxu1 %v16080_v48  ;;  %v16146_v48 = vld [vmem:[#allocation16 + $0xdd0] ss:$44 sps:$4 sm:$0xff]  }
 0x62c   :  { %9657 = vmatprep.subr.bf16.mxu1 %v16088_v42  ;;  %v16154_v42 = vld [vmem:[#allocation16 + $0x804] ss:$44 sps:$4 sm:$0xff]  }
 0x62d   :  { %9779 = vmatpush1.bf16.msra.mxu0 %v16083_v16  ;;  %v16149_v16 = vld [vmem:[#allocation16 + $0xdd8] ss:$44 sps:$4 sm:$0xff]  }
 0x62e   :  { %9780 = vmatprep.subr.bf16.mxu0 %v16091_v18  ;;  %v16157_v18 = vld [vmem:[#allocation16 + $0x80c] ss:$44 sps:$4 sm:$0xff]  }
 0x62f   :  { %9658 = vmatpush1.bf16.msra.mxu1 %v16086_v20  ;;  %v16152_v20 = vld [vmem:[#allocation16 + $0x800] ss:$44 sps:$4 sm:$0xff]  }
 0x630   :  { %9659 = vmatprep.subr.bf16.mxu1 %v16094_v28  ;;  %v16160_v28 = vld [vmem:[#allocation16 + $0x7ac] ss:$44 sps:$4 sm:$0xff]  }
 0x631   :  { %9781 = vmatpush1.bf16.msra.mxu0 %v16089_v44  ;;  %v9395_v44 = vadd.f32 %v17666_v45, %v17656_v36  ;;  %v16166_v45 = vld [vmem:[#allocation16 + $0x754] ss:$44 sps:$4 sm:$0xff]  }
 0x632   :  { %9782 = vmatprep.subr.bf16.mxu0 %v16097_v24  ;;  %v16155_v24 = vld [vmem:[#allocation16 + $0x808] ss:$44 sps:$4 sm:$0xff]  }
 0x633   :  { %9660 = vmatpush1.bf16.msra.mxu1 %v16092_v54 }
 0x634   :  { %9661 = vmatprep.subr.bf16.mxu1 %v16100_v22  ;;  %v16163_v22 = vld [vmem:[#allocation16 + $0x7b4] ss:$44 sps:$4 sm:$0xff]  }
 0x635   :  { %9783 = vmatpush1.bf16.msra.mxu0 %v16095_v25  ;;  %v9397_v25 = vadd.f32 %v17669_v30, %v17660_v7 }
 0x636   :  { %9784 = vmatprep.subr.bf16.mxu0 %v16103_v33 }
 0x637   :  { %9662 = vmatpush1.bf16.msra.mxu1 %v16098_v8  ;;  %v16158_v8 = vld [vmem:[#allocation16 + $0x7a8] ss:$44 sps:$4 sm:$0xff]  }
 0x638   :  { %9663 = vmatprep.subr.bf16.mxu1 %v16106_v52 }
 0x639   :  { %9785 = vmatpush1.bf16.msra.mxu0 %v16101_v47 }
 0x63a   :  { %9786 = vmatprep.subr.bf16.mxu0 %v16109_v50  ;;  %v16161_v50 = vld [vmem:[#allocation16 + $0x7b0] ss:$44 sps:$4 sm:$0xff]  }
 0x63b   :  { %9664 = vmatpush2.bf16.msra.mxu1 %v16104_v46  ;;  %v16169_v46 = vld [vmem:[#allocation16 + $0x75c] ss:$44 sps:$4 sm:$0xff]  }
 0x63c   :  { %9665 = vmatprep.subr.bf16.mxu1 %v16112_v40  ;;  %v16164_v40 = vld [vmem:[#allocation16 + $0x750] ss:$44 sps:$4 sm:$0xff]  }
 0x63d   :  { %9787 = vmatpush2.bf16.msra.mxu0 %v16107_v43 }
 0x63e   :  { %9788 = vmatprep.subr.bf16.mxu0 %v16115_v11 }
 0x63f   :  { %9666 = vmatpush2.bf16.msra.mxu1 %v16110_v39  ;;  %v16172_v39 = vld [vmem:[#allocation16 + $0x6fc] ss:$44 sps:$4 sm:$0xff]  }
 0x640   :  { %9667 = vmatprep.subr.bf16.mxu1 %v16118_v23  ;;  %v16167_v23 = vld [vmem:[#allocation16 + $0x758] ss:$44 sps:$4 sm:$0xff]  }
 0x641   :  { %9789 = vmatpush2.bf16.msra.mxu0 %v16113_v49 }
 0x642   :  { %9790 = vmatprep.subr.bf16.mxu0 %v16121_v58  ;;  %v16175_v58 = vld [vmem:[#allocation16 + $0x704] ss:$44 sps:$4 sm:$0xff]  }
 0x643   :  { %9668 = vmatpush2.bf16.msra.mxu1 %v16116_v60  ;;  %v16170_v60 = vld [vmem:[#allocation16 + $0x6f8] ss:$44 sps:$4 sm:$0xff]  }
 0x644   :  { %9669 = vmatprep.subr.bf16.mxu1 %v16124_v51  ;;  %v16178_v51 = vld [vmem:[#allocation16 + $0x6a4] ss:$44 sps:$4 sm:$0xff]  }
 0x645   :  { %9791 = vmatpush2.bf16.msra.mxu0 %v16119_v29  ;;  %v16173_v29 = vld [vmem:[#allocation16 + $0x700] ss:$44 sps:$4 sm:$0xff]  }
 0x646   :  { %9792 = vmatprep.subr.bf16.mxu0 %v16127_v9  ;;  %v16181_v9 = vld [vmem:[#allocation16 + $0x6ac] ss:$44 sps:$4 sm:$0xff]  }
 0x647   :  { %9670 = vmatpush2.bf16.msra.mxu1 %v16122_v26  ;;  %v16176_v26 = vld [vmem:[#allocation16 + $0x6a0] ss:$44 sps:$4 sm:$0xff]  }
 0x648   :  { %9671 = vmatprep.subr.bf16.mxu1 %v16130_v55  ;;  %v16184_v55 = vld [vmem:[#allocation16 + $0x64c] ss:$44 sps:$4 sm:$0xff]  }
 0x649   :  { %9793 = vmatpush2.bf16.msra.mxu0 %v16125_v61  ;;  %v16179_v61 = vld [vmem:[#allocation16 + $0x6a8] ss:$44 sps:$4 sm:$0xff]  }
 0x64a   :  { %9794 = vmatprep.subr.bf16.mxu0 %v16133_v53  ;;  %v16187_v53 = vld [vmem:[#allocation16 + $0x654] ss:$44 sps:$4 sm:$0xff]  }
 0x64b   :  { %9672 = vmatpush2.bf16.msra.mxu1 %v16128_v63  ;;  %v16182_v63 = vld [vmem:[#allocation16 + $0x648] ss:$44 sps:$4 sm:$0xff]  }
 0x64c   :  { %9673 = vmatprep.subr.bf16.mxu1 %v16136_v4  ;;  %v16190_v4 = vld [vmem:[#allocation16 + $0x5f4] ss:$44 sps:$4 sm:$0xff]  }
 0x64d   :  { %9795 = vmatpush2.bf16.msra.mxu0 %v16131_v6  ;;  %v16185_v6 = vld [vmem:[#allocation16 + $0x650] ss:$44 sps:$4 sm:$0xff]  }
 0x64e   :  { %9796 = vmatprep.subr.bf16.mxu0 %v16139_v31  ;;  %v16193_v31 = vld [vmem:[#allocation16 + $0x5fc] ss:$44 sps:$4 sm:$0xff]  }
 0x64f   :  { %9674 = vmatpush2.bf16.msra.mxu1 %v16134_v32  ;;  %v16188_v32 = vld [vmem:[#allocation16 + $0x5f0] ss:$44 sps:$4 sm:$0xff]  }
 0x650   :  { %9675 = vmatprep.subr.bf16.mxu1 %v16142_v41  ;;  %v16196_v41 = vld [vmem:[#allocation16 + $0x59c] ss:$44 sps:$4 sm:$0xff]  }
 0x651   :  { %9797 = vmatpush2.bf16.msra.mxu0 %v16137_v12  ;;  %v16191_v12 = vld [vmem:[#allocation16 + $0x5f8] ss:$44 sps:$4 sm:$0xff]  }
 0x652   :  { %9798 = vmatprep.subr.bf16.mxu0 %v16145_v5  ;;  %v16199_v5 = vld [vmem:[#allocation16 + $0x5a4] ss:$44 sps:$4 sm:$0xff]  }
 0x653   :  { %9676 = vmatpush2.bf16.msra.mxu1 %v16140_v57  ;;  %v16194_v57 = vld [vmem:[#allocation16 + $0x598] ss:$44 sps:$4 sm:$0xff]  }
 0x654   :  { %9677 = vmatprep.subr.bf16.mxu1 %v16148_v14  ;;  %v16202_v14 = vld [vmem:[#allocation16 + $0xac4] ss:$44 sps:$4 sm:$0xff]  }
 0x655   :  { %9799 = vmatpush2.bf16.msra.mxu0 %v16143_v38  ;;  %v16197_v38 = vld [vmem:[#allocation16 + $0x5a0] ss:$44 sps:$4 sm:$0xff]  }
 0x656   :  { %9800 = vmatprep.subr.bf16.mxu0 %v16151_v15  ;;  %v16205_v15 = vld [vmem:[#allocation16 + $0xacc] ss:$44 sps:$4 sm:$0xff]  }
 0x657   :  { %9678 = vmatpush2.bf16.msra.mxu1 %v16146_v48  ;;  %v16200_v48 = vld [vmem:[#allocation16 + $0xac0] ss:$44 sps:$4 sm:$0xff]  }
 0x658   :  { %9729 = vmatprep.subr.bf16.mxu1 %v16154_v42  ;;  %v16208_v42 = vld [vmem:[#allocation16 + $0xa6c] ss:$44 sps:$4 sm:$0xff]  }
 0x659   :  { %9801 = vmatpush2.bf16.msra.mxu0 %v16149_v16  ;;  %v16203_v16 = vld [vmem:[#allocation16 + $0xac8] ss:$44 sps:$4 sm:$0xff]  }
 0x65a   :  { %9680 = vmatmul.mubr.bf16.vlgmr.msra.gmra.mxu1 %v17651_v2  ;;  %v9435_v54 = vpop.f32.mrf.mxu1  ;;  %9852 = vmatprep.subr.bf16.mxu0 %v16157_v18  ;;  %v16211_v18 = vld [vmem:[#allocation16 + $0xa74] ss:$44 sps:$4 sm:$0xff]  }
 0x65b   :  { %v17684_v33 = vadd.f32 %v9435_v54, %v9395_v44  ;;  %9730 = vmatpush1.bf16.msra.mxu1 %v16152_v20  ;;  %9761 = vmatprep.mubr.bf16.mxu1 %v17614_v21  ;;  %v16206_v20 = vld [vmem:[#allocation16 + $0xa68] ss:$44 sps:$4 sm:$0xff]   ;;  %v16209_v44 = vld [vmem:[#allocation16 + $0xa70] ss:$44 sps:$4 sm:$0xff]  }
 0x65c   :  { %v17687_v52 = vpop.f32.mrf.mxu0  ;;  %9803 = vmatmul.mubr.bf16.vlgmr.msra.gmra.mxu0 %v17651_v2  ;;  %v9437_v36 = vpop.f32.mrf.mxu1  ;;  %9731 = vmatprep.subr.bf16.mxu1 %v16160_v28  ;;  %v16214_v28 = vld [vmem:[#allocation16 + $0xa14] ss:$44 sps:$4 sm:$0xff]  }
 0x65d   :  { %v17690_v47 = vadd.f32 %v9437_v36, %v9397_v25  ;;  %9853 = vmatpush1.bf16.msra.mxu0 %v16155_v24  ;;  %9884 = vmatprep.mubr.bf16.mxu0 %v17614_v21  ;;  %v16217_v24 = vld [vmem:[#allocation16 + $0xa1c] ss:$44 sps:$4 sm:$0xff]   ;;  %v16215_v36 = vld [vmem:[#allocation16 + $0xa18] ss:$44 sps:$4 sm:$0xff]  }
 0x65e   :  { %v17693_v7 = vpop.f32.mrf.mxu0  ;;  %v9439_v30 = vpop.f32.mrf.mxu1  ;;  %9854 = vmatprep.subr.bf16.mxu0 %v16163_v22  ;;  %v16212_v25 = vld [vmem:[#allocation16 + $0xa10] ss:$44 sps:$4 sm:$0xff]  }
 0x65f   :  { %9732 = vmatpush1.bf16.msra.mxu1 %v16158_v8  ;;  %v10064_v54 = vrot.slane %v17690_v47, 4  ;;  %v10136_v22 = vmul.f32 %v17690_v47, %v17690_v47  ;;  %v16220_v8 = vld [vmem:[#allocation16 + $0x9bc] ss:$44 sps:$4 sm:$0xff]  }
 0x660   :  { %v9562_v43 = vpop.f32.mrf.mxu0  ;;  %v9440_v11 = vpop.f32.mrf.mxu1  ;;  %9733 = vmatprep.subr.bf16.mxu1 %v16166_v45  ;;  %v16223_v45 = vld [vmem:[#allocation16 + $0x9c4] ss:$44 sps:$4 sm:$0xff]  }
 0x661   :  { %9855 = vmatpush1.bf16.msra.mxu0 %v16161_v50  ;;  %v10065_v50 = vadd.f32 %v10064_v54, %v17690_v47  ;;  %v10152_v30 = vrot.slane %v10136_v22, 4  ;;  %v16221_v43 = vld [vmem:[#allocation16 + $0x9c0] ss:$44 sps:$4 sm:$0xff]  }
 0x662   :  { %v9563_v49 = vpop.f32.mrf.mxu0  ;;  %9856 = vmatprep.subr.bf16.mxu0 %v16169_v46  ;;  %v16218_v46 = vld [vmem:[#allocation16 + $0x9b8] ss:$44 sps:$4 sm:$0xff]  }
 0x663   :  { %9734 = vmatpush1.bf16.msra.mxu1 %v16164_v40  ;;  %v16226_v40 = vld [vmem:[#allocation16 + $0x964] ss:$44 sps:$4 sm:$0xff]   ;;  %v16229_v11 = vld [vmem:[#allocation16 + $0x96c] ss:$44 sps:$4 sm:$0xff]  }
 0x664   :  { %9735 = vmatprep.subr.bf16.mxu1 %v16172_v39  ;;  %v10066_v39 = vrot.slane %v10065_v50, 2  ;;  %v16224_v49 = vld [vmem:[#allocation16 + $0x960] ss:$44 sps:$4 sm:$0xff]  }
 0x665   :  { %9857 = vmatpush1.bf16.msra.mxu0 %v16167_v23  ;;  %v10153_v23 = vadd.f32 %v10152_v30, %v10136_v22 }
 0x666   :  { %9858 = vmatprep.subr.bf16.mxu0 %v16175_v58  ;;  %v16232_v58 = vld [vmem:[#allocation16 + $0x90c] ss:$44 sps:$4 sm:$0xff]  }
 0x667   :  { %9736 = vmatpush1.bf16.msra.mxu1 %v16170_v60  ;;  %v16227_v60 = vld [vmem:[#allocation16 + $0x968] ss:$44 sps:$4 sm:$0xff]  }
 0x668   :  { %9737 = vmatprep.subr.bf16.mxu1 %v16178_v51  ;;  %v16235_v51 = vld [vmem:[#allocation16 + $0x914] ss:$44 sps:$4 sm:$0xff]  }
 0x669   :  { %9859 = vmatpush1.bf16.msra.mxu0 %v16173_v29  ;;  %v10067_v29 = vadd.f32 %v10066_v39, %v10065_v50 }
 0x66a   :  { %9860 = vmatprep.subr.bf16.mxu0 %v16181_v9  ;;  %v10154_v9 = vrot.slane %v10153_v23, 2 }
 0x66b   :  { %9738 = vmatpush1.bf16.msra.mxu1 %v16176_v26  ;;  %v16230_v26 = vld [vmem:[#allocation16 + $0x908] ss:$44 sps:$4 sm:$0xff]  }
 0x66c   :  { %9739 = vmatprep.subr.bf16.mxu1 %v16184_v55  ;;  %v16238_v55 = vld [vmem:[#allocation16 + $0x8b4] ss:$44 sps:$4 sm:$0xff]  }
 0x66d   :  { %9861 = vmatpush1.bf16.msra.mxu0 %v16179_v61  ;;  %v16233_v61 = vld [vmem:[#allocation16 + $0x910] ss:$44 sps:$4 sm:$0xff]  }
 0x66e   :  { %9862 = vmatprep.subr.bf16.mxu0 %v16187_v53  ;;  %v16241_v53 = vld [vmem:[#allocation16 + $0x8bc] ss:$44 sps:$4 sm:$0xff]  }
 0x66f   :  { %9740 = vmatpush1.bf16.msra.mxu1 %v16182_v63  ;;  %v10068_v63 = vrot.slane %v10067_v29, 1 }
 0x670   :  { %9741 = vmatprep.subr.bf16.mxu1 %v16190_v4  ;;  %v10155_v4 = vadd.f32 %v10154_v9, %v10153_v23  ;;  %v16258_v23 = vld [vmem:[#allocation16 + $0x1d8] ss:$44 sps:$4 sm:$0xff]  }
 0x671   :  { %9863 = vmatpush1.bf16.msra.mxu0 %v16185_v6  ;;  %v16236_v6 = vld [vmem:[#allocation16 + $0x8b0] ss:$44 sps:$4 sm:$0xff]   ;;  %v16270_v9 = vld [vmem:[#allocation16 + $0x12c] ss:$44 sps:$4 sm:$0xff]  }
 0x672   :  { %9864 = vmatprep.subr.bf16.mxu0 %v16193_v31  ;;  %v16244_v31 = vld [vmem:[#allocation16 + $0x85c] ss:$44 sps:$4 sm:$0xff]  }
 0x673   :  { %9742 = vmatpush1.bf16.msra.mxu1 %v16188_v32  ;;  %v16239_v32 = vld [vmem:[#allocation16 + $0x8b8] ss:$44 sps:$4 sm:$0xff]  }
 0x674   :  { %9743 = vmatprep.subr.bf16.mxu1 %v16196_v41  ;;  %v16247_v41 = vld [vmem:[#allocation16 + $0x864] ss:$44 sps:$4 sm:$0xff]  }
 0x675   :  { %9865 = vmatpush1.bf16.msra.mxu0 %v16191_v12  ;;  %v10069_v12 = vadd.f32 %v10068_v63, %v10067_v29  ;;  %v16263_v29 = vld [vmem:[#allocation16 + $0x180] ss:$44 sps:$4 sm:$0xff]   ;;  %v16272_v63 = vld [vmem:[#allocation16 + $0x130] ss:$44 sps:$4 sm:$0xff]  }
 0x676   :  { %9866 = vmatprep.subr.bf16.mxu0 %v16199_v5  ;;  %v10156_v5 = vrot.slane %v10155_v4, 1 }
 0x677   :  { %9744 = vmatpush1.bf16.msra.mxu1 %v16194_v57  ;;  %v16242_v57 = vld [vmem:[#allocation16 + $0x858] ss:$44 sps:$4 sm:$0xff]  }
 0x678   :  { %9745 = vmatprep.subr.bf16.mxu1 %v16202_v14  ;;  %v16250_v14 = vld [vmem:[#allocation16 + $0x28c] ss:$44 sps:$4 sm:$0xff]  }
 0x679   :  { %9867 = vmatpush1.bf16.msra.mxu0 %v16197_v38  ;;  %v16245_v38 = vld [vmem:[#allocation16 + $0x860] ss:$44 sps:$4 sm:$0xff]  }
 0x67a   :  { %9868 = vmatprep.subr.bf16.mxu0 %v16205_v15  ;;  %v16251_v15 = vld [vmem:[#allocation16 + $0x550] ss:$44 sps:$4 sm:$0xff]  }
 0x67b   :  { %9746 = vmatpush2.bf16.msra.mxu1 %v16200_v48  ;;  %v17699_v48 = vmul.f32 0.125, %v10069_v12  ;;  %v16278_v12 = vld [vmem:[#allocation16 + $0x78] ss:$44 sps:$4 sm:$0xff]  }
 0x67c   :  { %9747 = vmatprep.subr.bf16.mxu1 %v16208_v42  ;;  %v10157_v42 = vadd.f32 %v10156_v5, %v10155_v4  ;;  %v16276_v4 = vld [vmem:[#allocation16 + $0x398] ss:$44 sps:$4 sm:$0xff]  }
 0x67d   :  { %9869 = vmatpush2.bf16.msra.mxu0 %v16203_v16  ;;  %v16248_v16 = vld [vmem:[#allocation16 + $0x288] ss:$44 sps:$4 sm:$0xff]   ;;  %v10224_v54 = vmul.f32 %v17699_v48, %v17699_v48  ;;  %v16285_v5 = vld [vmem:[#allocation16 + $0x24] ss:$44 sps:$4 sm:$0xff]  }
 0x67e   :  { %9870 = vmatprep.subr.bf16.mxu0 %v16211_v18  ;;  %v16255_v18 = vld [vmem:[#allocation16 + $0x234] ss:$44 sps:$4 sm:$0xff]  }
 0x67f   :  { %9748 = vmatpush2.bf16.msra.mxu1 %v16206_v20  ;;  %v16252_v20 = vld [vmem:[#allocation16 + $0x290] ss:$44 sps:$4 sm:$0xff]  }
 0x680   :  { %9749 = vmatprep.subr.bf16.mxu1 %v16214_v28 }
 0x681   :  { %9871 = vmatpush2.bf16.msra.mxu0 %v16209_v44  ;;  %v16256_v44 = vld [vmem:[#allocation16 + $0x4f8] ss:$44 sps:$4 sm:$0xff]  }
 0x682   :  { %9872 = vmatprep.subr.bf16.mxu0 %v16217_v24  ;;  %v10213_v24 = vmul.f32 0.125, %v10157_v42  ;;  %v16287_v42 = vld [vmem:[#allocation16 + $0x28] ss:$44 sps:$4 sm:$0xff]  }
 0x683   :  { %9750 = vmatpush2.bf16.msra.mxu1 %v16212_v25  ;;  %v16253_v25 = vld [vmem:[#allocation16 + $0x230] ss:$44 sps:$4 sm:$0xff]  }
 0x684   :  { %9751 = vmatprep.subr.bf16.mxu1 %v16220_v8 }
 0x685   :  { %9873 = vmatpush2.bf16.msra.mxu0 %v16215_v36 }
 0x686   :  { %9874 = vmatprep.subr.bf16.mxu0 %v16223_v45  ;;  %v16260_v45 = vld [vmem:[#allocation16 + $0x1dc] ss:$44 sps:$4 sm:$0xff]  }
 0x687   :  { %9752 = vmatpush2.bf16.msra.mxu1 %v16218_v46 }
 0x688   :  { %9753 = vmatprep.subr.bf16.mxu1 %v16226_v40 }
 0x689   :  { %9875 = vmatpush2.bf16.msra.mxu0 %v16221_v43  ;;  %v16261_v43 = vld [vmem:[#allocation16 + $0x4a0] ss:$44 sps:$4 sm:$0xff]  }
 0x68a   :  { %9876 = vmatprep.subr.bf16.mxu0 %v16229_v11  ;;  %v10235_v11 = vsub.f32 %v10213_v24, %v10224_v54  ;;  %v16295_v24 = vld [vmem:[#allocation16 + $0x4f4] ss:$44 sps:$4 sm:$0xff]   ;;  %v16292_v54 = vld [vmem:[#allocation16 + $0x810] ss:$44 sps:$4 sm:$0xff]  }
 0x68b   :  { %9754 = vmatpush2.bf16.msra.mxu1 %v16224_v49 }
 0x68c   :  { %9755 = vmatprep.subr.bf16.mxu1 %v16232_v58  ;;  %v16265_v58 = vld [vmem:[#allocation16 + $0x184] ss:$44 sps:$4 sm:$0xff]  }
 0x68d   :  { %9877 = vmatpush2.bf16.msra.mxu0 %v16227_v60 }
 0x68e   :  { %9878 = vmatprep.subr.bf16.mxu0 %v16235_v51  ;;  %v10246_v51 = vmax.f32 %v10235_v11, 0.0  ;;  %v16298_v11 = vld [vmem:[#allocation16 + $0x498] ss:$44 sps:$4 sm:$0xff]  }
 0x68f   :  { %9756 = vmatpush2.bf16.msra.mxu1 %v16230_v26  ;;  %v16267_v26 = vld [vmem:[#allocation16 + $0x188] ss:$44 sps:$4 sm:$0xff]  }
 0x690   :  { %9757 = vmatprep.subr.bf16.mxu1 %v16238_v55  ;;  %v10257_v55 = vadd.f32 1e-05, %v10246_v51  ;;  %v16303_v51 = vld [vmem:[#allocation16 + $0x440] ss:$44 sps:$4 sm:$0xff]  }
 0x691   :  { %9879 = vmatpush2.bf16.msra.mxu0 %v16233_v61  ;;  %v16268_v61 = vld [vmem:[#allocation16 + $0x128] ss:$44 sps:$4 sm:$0xff]  }
 0x692   :  { %9880 = vmatprep.subr.bf16.mxu0 %v16241_v53  ;;  %v16275_v53 = vld [vmem:[#allocation16 + $0xd4] ss:$44 sps:$4 sm:$0xff]   ;;  %16804 = vrsqrt.f32 %v10257_v55  ;;  %v16311_v55 = vld [vmem:[#allocation16 + $0x970] ss:$44 sps:$4 sm:$0xff]  }
 0x693   :  { %9758 = vmatpush2.bf16.msra.mxu1 %v16236_v6  ;;  %v16273_v6 = vld [vmem:[#allocation16 + $0xd0] ss:$44 sps:$4 sm:$0xff]  }
 0x694   :  { %9759 = vmatprep.subr.bf16.mxu1 %v16244_v31  ;;  %v16280_v31 = vld [vmem:[#allocation16 + $0x7c] ss:$44 sps:$4 sm:$0xff]  }
 0x695   :  { %9881 = vmatpush2.bf16.msra.mxu0 %v16239_v32  ;;  %v16277_v32 = vld [vmem:[#allocation16 + $0xd8] ss:$44 sps:$4 sm:$0xff]  }
 0x696   :  { %9882 = vmatprep.subr.bf16.mxu0 %v16247_v41  ;;  %v16281_v41 = vld [vmem:[#allocation16 + $0x340] ss:$44 sps:$4 sm:$0xff]  }
 0x697   :  { %9760 = vmatpush2.bf16.msra.mxu1 %v16242_v57  ;;  %v16282_v57 = vld [vmem:[#allocation16 + $0x80] ss:$44 sps:$4 sm:$0xff]  }
 0x698   :  { %9811 = vmatprep.subr.bf16.mxu1 %v16250_v14  ;;  %v16286_v14 = vld [vmem:[#allocation16 + $0x2e8] ss:$44 sps:$4 sm:$0xff]  }
 0x699   :  { %9883 = vmatpush2.bf16.msra.mxu0 %v16245_v38  ;;  %v16283_v38 = vld [vmem:[#allocation16 + $0x20] ss:$44 sps:$4 sm:$0xff]  }
 0x69a   :  { %v9517_v28 = vpop.f32.mrf.mxu1  ;;  %9762 = vmatmul.mubr.bf16.vlgmr.msra.gmra.mxu1 %v17616_v27  ;;  %14316 = vmatprep.subr.bf16.mxu0 %v16251_v15  ;;  %v16290_v15 = vld [vmem:[#allocation16 + $0x54c] ss:$44 sps:$4 sm:$0xff]  }
 0x69b   :  { %v9518_v22 = vadd.f32 %v9517_v28, %v17673_v1  ;;  %9812 = vmatpush1.bf16.msra.mxu1 %v16248_v16  ;;  %9843 = vmatprep.mubr.bf16.mxu1 %v17571_v17  ;;  %v16257_v1 = vld [vmem:[#allocation16 + $0x238] ss:$44 sps:$4 sm:$0xff]  }
 0x69c   :  { %v9519_v8 = vpop.f32.mrf.mxu1  ;;  %v17706_v36 = vpop.f32.mrf.mxu0  ;;  %9885 = vmatmul.mubr.bf16.vlgmr.msra.gmra.mxu0 %v17616_v27  ;;  %9813 = vmatprep.subr.bf16.mxu1 %v16255_v18  ;;  %v17719_v16 = vld [vmem:[#allocation17] sm:$0xff]  ;;  %v16291_v18 = vld [vmem:[#allocation16 + $0xad0] ss:$44 sps:$4 sm:$0xff]  }
 0x69d   :  { %v17710_v50 = vadd.f32 %v17687_v52, %v9518_v22  ;;  %v9520_v30 = vadd.f32 %v9519_v8, %v17677_v3  ;;  %14317 = vmatpush3.bf16.msra.mxu0 %v16252_v20  ;;  %9966 = vmatprep.mubr.bf16.mxu0 %v17571_v17  ;;  %v16262_v3 = vld [vmem:[#allocation16 + $0x1e0] ss:$44 sps:$4 sm:$0xff]   ;;  %v16266_v17 = vld [vmem:[#allocation16 + $0x448] ss:$44 sps:$4 sm:$0xff]   ;;  %v10287_v28 = vrot.slane %v17719_v16, %v17332_v37  ;;  %v16296_v22 = vld [vmem:[#allocation16 + $0xa78] ss:$44 sps:$4 sm:$0xff]  }
 0x69e   :  { %v9521_v46 = vpop.f32.mrf.mxu1  ;;  %v17714_v40 = vpop.f32.mrf.mxu0  ;;  %14318 = vmatprep.subr.bf16.mxu0 %v16256_v44  ;;  %v16288_v20 = vld [vmem:[#allocation16 + $0x548] ss:$44 sps:$4 sm:$0xff]  }
 0x69f   :  { %v17717_v39 = vadd.f32 %v17693_v7, %v9520_v30  ;;  %9814 = vmatpush1.bf16.msra.mxu1 %v16253_v25  ;;  %v16271_v7 = vld [vmem:[#allocation16 + $0x3f0] ss:$44 sps:$4 sm:$0xff]   ;;  %v16805_v44 = vpop.eup %16804  ;;  %v16297_v30 = vld [vmem:[#allocation16 + $0x7b8] ss:$44 sps:$4 sm:$0xff]   ;;  %v10135_v46 = vmul.f32 %v17684_v33, %v17684_v33 }
 0x6a0   :  { %v9522_v49 = vpop.f32.mrf.mxu1  ;;  %v9644_v52 = vpop.f32.mrf.mxu0  ;;  %9815 = vmatprep.subr.bf16.mxu1 %v16260_v45  ;;  %v16293_v25 = vld [vmem:[#allocation16 + $0x4f0] ss:$44 sps:$4 sm:$0xff]   ;;  %v10336_v8 = vmul.f32 %v16805_v44, %v10287_v28  ;;  %v16326_v44 = vld [vmem:[#allocation16 + $0x868] ss:$44 sps:$4 sm:$0xff]  }
 0x6a1   :  { %14319 = vmatpush3.bf16.msra.mxu0 %v16257_v1  ;;  %v16300_v45 = vld [vmem:[#allocation16 + $0x49c] ss:$44 sps:$4 sm:$0xff]   ;;  %v10058_v1 = vrot.slane %v17684_v33, 4  ;;  %v16305_v49 = vld [vmem:[#allocation16 + $0x444] ss:$44 sps:$4 sm:$0xff]   ;;  %v10347_v52 = vsub.f32 %v17690_v47, %v17699_v48 }
 0x6a2   :  { %v9645_v60 = vpop.f32.mrf.mxu0  ;;  %14320 = vmatprep.subr.bf16.mxu0 %v16261_v43  ;;  %v16301_v43 = vld [vmem:[#allocation16 + $0xa20] ss:$44 sps:$4 sm:$0xff]  }
 0x6a3   :  { %9816 = vmatpush1.bf16.msra.mxu1 %v16258_v23  ;;  %v10364_v23 = vrot.slane %v10336_v8, %v17327_v35  ;;  %v16306_v60 = vld [vmem:[#allocation16 + $0x9c8] ss:$44 sps:$4 sm:$0xff]  }
 0x6a4   :  { %9817 = vmatprep.subr.bf16.mxu1 %v16265_v58  ;;  %v16302_v58 = vld [vmem:[#allocation16 + $0x760] ss:$44 sps:$4 sm:$0xff]  }
 0x6a5   :  { %14321 = vmatpush3.bf16.msra.mxu0 %v16262_v3  ;;  %v10146_v3 = vrot.slane %v10135_v46, 4 }
 0x6a6   :  { %14322 = vmatprep.subr.bf16.mxu0 %v16266_v17  ;;  %v17732_v17 = vld [vmem:[#allocation19] sm:$0xff] }
 0x6a7   :  { %9818 = vmatpush1.bf16.msra.mxu1 %v16263_v29  ;;  %v10402_v29 = vmul.f32 %v10364_v23, %v10347_v52  ;;  %v10147_v48 = vadd.f32 %v10146_v3, %v10135_v46  ;;  %v16336_v46 = vld [vmem:[#allocation16 + $0xd34] ss:$44 sps:$4 sm:$0xff]   ;;  %v16339_v52 = vld [vmem:[#allocation20 + $0x94] ss:$12 sps:$4 sm:$0xff]   ;;  %v16334_v3 = vld [vmem:[#allocation16 + $0xd30] ss:$44 sps:$4 sm:$0xff]  }
 0x6a8   :  { %9819 = vmatprep.subr.bf16.mxu1 %v16270_v9  ;;  %v10421_v9 = vrot.slane %v17732_v17, %v17332_v37 }
 0x6a9   :  { %14323 = vmatpush3.bf16.msra.mxu0 %v16267_v26  ;;  %v16310_v26 = vld [vmem:[#allocation16 + $0x3ec] ss:$44 sps:$4 sm:$0xff]  }
 0x6aa   :  { %14324 = vmatprep.subr.bf16.mxu0 %v16271_v7  ;;  %v16307_v7 = vld [vmem:[#allocation16 + $0x708] ss:$44 sps:$4 sm:$0xff]  }
 0x6ab   :  { %9820 = vmatpush1.bf16.msra.mxu1 %v16268_v61  ;;  %v16308_v61 = vld [vmem:[#allocation16 + $0x3e8] ss:$44 sps:$4 sm:$0xff]  }
 0x6ac   :  { %9821 = vmatprep.subr.bf16.mxu1 %v16275_v53  ;;  %v10470_v53 = vadd.f32 %v10421_v9, %v10402_v29 }
 0x6ad   :  { %14325 = vmatpush3.bf16.msra.mxu0 %v16272_v63  ;;  %v16315_v63 = vld [vmem:[#allocation16 + $0x394] ss:$44 sps:$4 sm:$0xff]  }
 0x6ae   :  { %14326 = vmatprep.subr.bf16.mxu0 %v16276_v4  ;;  %v16312_v4 = vld [vmem:[#allocation16 + $0x6b0] ss:$44 sps:$4 sm:$0xff]   ;;  %16806 = vtanh.f32 %v10470_v53 }
 0x6af   :  { %9822 = vmatpush1.bf16.msra.mxu1 %v16273_v6 }
 0x6b0   :  { %9823 = vmatprep.subr.bf16.mxu1 %v16280_v31  ;;  %v10148_v31 = vrot.slane %v10147_v48, 2 }
 0x6b1   :  { %14327 = vmatpush3.bf16.msra.mxu0 %v16277_v32  ;;  %v16316_v32 = vld [vmem:[#allocation16 + $0x918] ss:$44 sps:$4 sm:$0xff]  }
 0x6b2   :  { %14328 = vmatprep.subr.bf16.mxu0 %v16281_v41  ;;  %v16313_v41 = vld [vmem:[#allocation16 + $0x390] ss:$44 sps:$4 sm:$0xff]  }
 0x6b3   :  { %9824 = vmatpush1.bf16.msra.mxu1 %v16278_v12  ;;  %v16320_v12 = vld [vmem:[#allocation16 + $0x33c] ss:$44 sps:$4 sm:$0xff]  }
 0x6b4   :  { %9825 = vmatprep.subr.bf16.mxu1 %v16285_v5  ;;  %v16317_v5 = vld [vmem:[#allocation16 + $0x658] ss:$44 sps:$4 sm:$0xff]  }
 0x6b5   :  { %14329 = vmatpush3.bf16.msra.mxu0 %v16282_v57 }
 0x6b6   :  { %14330 = vmatprep.subr.bf16.mxu0 %v16286_v14  ;;  %v10149_v14 = vadd.f32 %v10148_v31, %v10147_v48  ;;  %v16345_v48 = vld [vmem:[#allocation20 + $0x7c] ss:$12 sps:$4 sm:$0xff]  }
 0x6b7   :  { %9826 = vmatpush1.bf16.msra.mxu1 %v16283_v38  ;;  %v16321_v38 = vld [vmem:[#allocation16 + $0x8c0] ss:$44 sps:$4 sm:$0xff]  }
 0x6b8   :  { %9827 = vmatprep.subr.bf16.mxu1 %v16290_v15  ;;  %v16318_v15 = vld [vmem:[#allocation16 + $0x338] ss:$44 sps:$4 sm:$0xff]   ;;  %v10150_v28 = vrot.slane %v10149_v14, 1 }
 0x6b9   :  { %14331 = vmatpush3.bf16.msra.mxu0 %v16287_v42  ;;  %v16325_v42 = vld [vmem:[#allocation16 + $0x2e4] ss:$44 sps:$4 sm:$0xff]  }
 0x6ba   :  { %14338 = vmatprep.subr.bf16.mxu0 %v16291_v18  ;;  %v16322_v18 = vld [vmem:[#allocation16 + $0x600] ss:$44 sps:$4 sm:$0xff]   ;;  %v10151_v8 = vadd.f32 %v10150_v28, %v10149_v14 }
 0x6bb   :  { %9828 = vmatpush2.bf16.msra.mxu1 %v16288_v20  ;;  %v16354_v14 = vld [vmem:[#allocation16 + $0xc2c] ss:$44 sps:$4 sm:$0xff]  }
 0x6bc   :  { %9967 = vmatmul.mubr.bf16.vlgmr.msra.gmra.mxu0 %v17573_v19  ;;  %9829 = vmatprep.subr.bf16.mxu1 %v16295_v24  ;;  %v16323_v24 = vld [vmem:[#allocation16 + $0x2e0] ss:$44 sps:$4 sm:$0xff]  }
 0x6bd   :  { %14339 = vmatpush3.bf16.msra.mxu0 %v16292_v54  ;;  %10006 = vmatprep.mubr.bf16.mxu0 %v17614_v21  ;;  %v10059_v21 = vadd.f32 %v10058_v1, %v17684_v33  ;;  %v16330_v54 = vld [vmem:[#allocation16 + $0xd8c] ss:$44 sps:$4 sm:$0xff]   ;;  %v16807_v1 = vpop.eup %16806 }
 0x6be   :  { %14340 = vmatprep.subr.bf16.mxu0 %v16296_v22  ;;  %v16327_v22 = vld [vmem:[#allocation16 + $0x5a8] ss:$44 sps:$4 sm:$0xff]  }
 0x6bf   :  { %9830 = vmatpush2.bf16.msra.mxu1 %v16293_v25  ;;  %v10060_v47 = vrot.slane %v10059_v21, 2 }
 0x6c0   :  { %9831 = vmatprep.subr.bf16.mxu1 %v16300_v45  ;;  %v16333_v45 = vld [vmem:[#allocation20 + $0xac] ss:$12 sps:$4 sm:$0xff]  }
 0x6c1   :  { %14341 = vmatpush3.bf16.msra.mxu0 %v16297_v30  ;;  %v10061_v6 = vadd.f32 %v10060_v47, %v10059_v21  ;;  %v16328_v30 = vld [vmem:[#allocation16 + $0xd88] ss:$44 sps:$4 sm:$0xff]   ;;  %v17745_v21 = vpack.c.bf16 %v16807_v1, %v16807_v1 }
 0x6c2   :  { %14342 = vmatprep.subr.bf16.mxu0 %v16301_v43  ;;  %v16331_v43 = vld [vmem:[#allocation20 + $0xa8] ss:$12 sps:$4 sm:$0xff]   ;;  %v16361_v1 = vld [vmem:[#allocation20 + $0x30] ss:$12 sps:$4 sm:$0xff]  }
 0x6c3   :  { %9832 = vmatpush2.bf16.msra.mxu1 %v16298_v11  ;;  %v10062_v57 = vrot.slane %v10061_v6, 1  ;;  %v10212_v11 = vmul.f32 0.125, %v10151_v8 }
 0x6c4   :  { %9833 = vmatprep.subr.bf16.mxu1 %v16305_v49 }
 0x6c5   :  { %14343 = vmatpush3.bf16.msra.mxu0 %v16302_v58  ;;  %v10063_v20 = vadd.f32 %v10062_v57, %v10061_v6  ;;  %v16343_v6 = vld [vmem:[#allocation20 + $0x78] ss:$12 sps:$4 sm:$0xff]  }
 0x6c6   :  { %14344 = vmatprep.subr.bf16.mxu0 %v16306_v60  ;;  %v10076_v60 = vrot.slane %v17717_v39, 4 }
 0x6c7   :  { %9834 = vmatpush2.bf16.msra.mxu1 %v16303_v51  ;;  %v17736_v25 = vmul.f32 0.125, %v10063_v20  ;;  %v10138_v51 = vmul.f32 %v17717_v39, %v17717_v39 }
 0x6c8   :  { %9835 = vmatprep.subr.bf16.mxu1 %v16310_v26 }
 0x6c9   :  { %14345 = vmatpush3.bf16.msra.mxu0 %v16307_v7  ;;  %v10223_v23 = vmul.f32 %v17736_v25, %v17736_v25  ;;  %v10164_v53 = vrot.slane %v10138_v51, 4 }
 0x6ca   :  { %14346 = vmatprep.subr.bf16.mxu0 %v16311_v55  ;;  %v16340_v55 = vld [vmem:[#allocation16 + $0xcd8] ss:$44 sps:$4 sm:$0xff]  }
 0x6cb   :  { %9836 = vmatpush2.bf16.msra.mxu1 %v16308_v61  ;;  %v10234_v26 = vsub.f32 %v10212_v11, %v10223_v23  ;;  %v10077_v61 = vadd.f32 %v10076_v60, %v17717_v39  ;;  %v10165_v57 = vadd.f32 %v10164_v53, %v10138_v51  ;;  %v16370_v60 = vld [vmem:[#allocation16 + $0xb20] ss:$44 sps:$4 sm:$0xff]  }
 0x6cc   :  { %9837 = vmatprep.subr.bf16.mxu1 %v16315_v63 }
 0x6cd   :  { %14347 = vmatpush3.bf16.msra.mxu0 %v16312_v4  ;;  %v10245_v31 = vmax.f32 %v10234_v26, 0.0  ;;  %v10166_v28 = vrot.slane %v10165_v57, 2  ;;  %v16373_v26 = vld [vmem:[#allocation20] ss:$12 sps:$4 sm:$0xff]  }
 0x6ce   :  { %14348 = vmatprep.subr.bf16.mxu0 %v16316_v32 }
 0x6cf   :  { %9838 = vmatpush2.bf16.msra.mxu1 %v16313_v41  ;;  %v16351_v41 = vld [vmem:[#allocation20 + $0x64] ss:$12 sps:$4 sm:$0xff]  }
 0x6d0   :  { %9839 = vmatprep.subr.bf16.mxu1 %v16320_v12  ;;  %v16346_v12 = vld [vmem:[#allocation16 + $0xc80] ss:$44 sps:$4 sm:$0xff]  }
 0x6d1   :  { %14349 = vmatpush3.bf16.msra.mxu0 %v16317_v5  ;;  %v10078_v5 = vrot.slane %v10077_v61, 2 }
 0x6d2   :  { %14350 = vmatprep.subr.bf16.mxu0 %v16321_v38  ;;  %v16349_v38 = vld [vmem:[#allocation20 + $0x60] ss:$12 sps:$4 sm:$0xff]  }
 0x6d3   :  { %9840 = vmatpush2.bf16.msra.mxu1 %v16318_v15  ;;  %v10256_v15 = vadd.f32 1e-05, %v10245_v31  ;;  %v10079_v20 = vadd.f32 %v10078_v5, %v10077_v61  ;;  %v16376_v61 = vld [vmem:[#allocation16 + $0x1048] ss:$44 sps:$4 sm:$0xff]   ;;  %v16387_v31 = vld [vmem:[#allocation20 + $0x154] ss:$12 sps:$4 sm:$0xff]  }
 0x6d4   :  { %9841 = vmatprep.subr.bf16.mxu1 %v16325_v42  ;;  %v16357_v42 = vld [vmem:[#allocation20 + $0x4c] ss:$12 sps:$4 sm:$0xff]   ;;  %v16385_v5 = vld [vmem:[#allocation20 + $0x150] ss:$12 sps:$4 sm:$0xff]  }
 0x6d5   :  { %14351 = vmatpush3.bf16.msra.mxu0 %v16322_v18  ;;  %v16352_v18 = vld [vmem:[#allocation16 + $0xc28] ss:$44 sps:$4 sm:$0xff]   ;;  %16808 = vrsqrt.f32 %v10256_v15  ;;  %v10080_v8 = vrot.slane %v10079_v20, 1  ;;  %v10346_v15 = vsub.f32 %v17684_v33, %v17736_v25  ;;  %v16405_v33 = vld [vmem:[#allocation20 + $0x10c] ss:$12 sps:$4 sm:$0xff]  }
 0x6d6   :  { %14352 = vmatprep.subr.bf16.mxu0 %v16326_v44  ;;  %v16360_v44 = vld [vmem:[#allocation16 + $0xbd4] ss:$44 sps:$4 sm:$0xff]  }
 0x6d7   :  { %9842 = vmatpush2.bf16.msra.mxu1 %v16323_v24  ;;  %v16355_v24 = vld [vmem:[#allocation20 + $0x48] ss:$12 sps:$4 sm:$0xff]   ;;  %v10081_v11 = vadd.f32 %v10080_v8, %v10079_v20  ;;  %v16391_v20 = vld [vmem:[#allocation20 + $0x138] ss:$12 sps:$4 sm:$0xff]  }
 0x6d8   :  { %9893 = vmatprep.subr.bf16.mxu1 %v16330_v54  ;;  %v16363_v54 = vld [vmem:[#allocation20 + $0x34] ss:$12 sps:$4 sm:$0xff]  }
 0x6d9   :  { %14353 = vmatpush3.bf16.msra.mxu0 %v16327_v22  ;;  %v16358_v22 = vld [vmem:[#allocation16 + $0xbd0] ss:$44 sps:$4 sm:$0xff]   ;;  %v17759_v51 = vmul.f32 0.125, %v10081_v11  ;;  %v16402_v8 = vld [vmem:[#allocation16 + $0xeec] ss:$44 sps:$4 sm:$0xff]  }
 0x6da   :  { %v9599_v49 = vpop.f32.mrf.mxu1  ;;  %9844 = vmatmul.mubr.bf16.vlgmr.msra.gmra.mxu1 %v17573_v19  ;;  %12279 = vmatprep.subr.bf16.mxu0 %v16333_v45  ;;  %v16342_v19 = vld [vmem:[#allocation16 + $0xcdc] ss:$44 sps:$4 sm:$0xff]   ;;  %v10167_v45 = vadd.f32 %v10166_v28, %v10165_v57 }
 0x6db   :  { %v17742_v58 = vadd.f32 %v17706_v36, %v9599_v49  ;;  %9894 = vmatpush1.bf16.msra.mxu1 %v16328_v30  ;;  %9925 = vmatprep.mubr.bf16.mxu1 %v17649_v62  ;;  %v16337_v36 = vld [vmem:[#allocation20 + $0x90] ss:$12 sps:$4 sm:$0xff]   ;;  %v16372_v49 = vld [vmem:[#allocation16 + $0xb24] ss:$44 sps:$4 sm:$0xff]  }
 0x6dc   :  { %v17750_v29 = vpop.f32.mrf.mxu1  ;;  %v17752_v9 = vpop.f32.mrf.mxu0  ;;  %10007 = vmatmul.mubr.bf16.vlgmr.msra.gmra.mxu0 %v17616_v27  ;;  %9895 = vmatprep.subr.bf16.mxu1 %v16336_v46  ;;  %v16348_v27 = vld [vmem:[#allocation16 + $0xc84] ss:$44 sps:$4 sm:$0xff]   ;;  %v16366_v30 = vld [vmem:[#allocation16 + $0xb7c] ss:$44 sps:$4 sm:$0xff]   ;;  %v16369_v46 = vld [vmem:[#allocation20 + $0x1c] ss:$12 sps:$4 sm:$0xff]  }
 0x6dd   :  { %12280 = vmatpush1.bf16.msra.mxu0 %v16331_v43  ;;  %12311 = vmatprep.mubr.bf16.mxu0 %v17745_v21  ;;  %v16364_v43 = vld [vmem:[#allocation16 + $0xb78] ss:$44 sps:$4 sm:$0xff]   ;;  %v10168_v23 = vrot.slane %v10167_v45, 1  ;;  %v16406_v11 = vld [vmem:[#allocation16 + $0xe90] ss:$44 sps:$4 sm:$0xff]  }
 0x6de   :  { %v9603_v7 = vpop.f32.mrf.mxu1  ;;  %v17756_v47 = vpop.f32.mrf.mxu0  ;;  %12281 = vmatprep.subr.bf16.mxu0 %v16339_v52  ;;  %v16367_v52 = vld [vmem:[#allocation20 + $0x18] ss:$12 sps:$4 sm:$0xff]  }
 0x6df   :  { %9896 = vmatpush1.bf16.msra.mxu1 %v16334_v3  ;;  %v16375_v3 = vld [vmem:[#allocation20 + $0x4] ss:$12 sps:$4 sm:$0xff]   ;;  %v10283_v7 = vrot.slane %v17719_v16, %v17327_v35 }
 0x6e0   :  { %v9604_v63 = vpop.f32.mrf.mxu1  ;;  %v9726_v4 = vpop.f32.mrf.mxu0  ;;  %9897 = vmatprep.subr.bf16.mxu1 %v16342_v19  ;;  %v10169_v19 = vadd.f32 %v10168_v23, %v10167_v45  ;;  %v16397_v45 = vld [vmem:[#allocation20 + $0x120] ss:$12 sps:$4 sm:$0xff]   ;;  %v16414_v23 = vld [vmem:[#allocation16 + $0xe3c] ss:$44 sps:$4 sm:$0xff]  }
 0x6e1   :  { %12282 = vmatpush1.bf16.msra.mxu0 %v16337_v36  ;;  %v16378_v36 = vld [vmem:[#allocation16 + $0x104c] ss:$44 sps:$4 sm:$0xff]   ;;  %v10226_v63 = vmul.f32 %v17759_v51, %v17759_v51  ;;  %v16384_v4 = vld [vmem:[#allocation16 + $0xff4] ss:$44 sps:$4 sm:$0xff]  }
 0x6e2   :  { %v9727_v32 = vpop.f32.mrf.mxu0  ;;  %12283 = vmatprep.subr.bf16.mxu0 %v16345_v48  ;;  %v16381_v48 = vld [vmem:[#allocation20 + $0x16c] ss:$12 sps:$4 sm:$0xff]   ;;  %v10215_v53 = vmul.f32 0.125, %v10169_v19 }
 0x6e3   :  { %9898 = vmatpush1.bf16.msra.mxu1 %v16340_v55  ;;  %v16809_v55 = vpop.eup %16808  ;;  %v16382_v32 = vld [vmem:[#allocation16 + $0xff0] ss:$44 sps:$4 sm:$0xff]  }
 0x6e4   :  { %9899 = vmatprep.subr.bf16.mxu1 %v16348_v27  ;;  %v16379_v27 = vld [vmem:[#allocation20 + $0x168] ss:$12 sps:$4 sm:$0xff]   ;;  %v16415_v19 = vld [vmem:[#allocation20 + $0xd8] ss:$12 sps:$4 sm:$0xff]  }
 0x6e5   :  { %12284 = vmatpush1.bf16.msra.mxu0 %v16343_v6  ;;  %v10335_v6 = vmul.f32 %v16809_v55, %v10283_v7  ;;  %v16424_v7 = vld [vmem:[#allocation16 + $0x1050] ss:$44 sps:$4 sm:$0xff]  }
 0x6e6   :  { %12285 = vmatprep.subr.bf16.mxu0 %v16351_v41  ;;  %v10237_v41 = vsub.f32 %v10215_v53, %v10226_v63  ;;  %v16428_v53 = vld [vmem:[#allocation20 + $0x3ac] ss:$12 sps:$4 sm:$0xff]  }
 0x6e7   :  { %9900 = vmatpush1.bf16.msra.mxu1 %v16346_v12  ;;  %v16390_v12 = vld [vmem:[#allocation16 + $0xf9c] ss:$44 sps:$4 sm:$0xff]   ;;  %v10360_v57 = vrot.slane %v10335_v6, %v17327_v35 }
 0x6e8   :  { %9901 = vmatprep.subr.bf16.mxu1 %v16354_v14  ;;  %v16393_v14 = vld [vmem:[#allocation20 + $0x13c] ss:$12 sps:$4 sm:$0xff]  }
 0x6e9   :  { %12286 = vmatpush1.bf16.msra.mxu0 %v16349_v38  ;;  %v16388_v38 = vld [vmem:[#allocation16 + $0xf98] ss:$44 sps:$4 sm:$0xff]   ;;  %v10401_v28 = vmul.f32 %v10360_v57, %v10346_v15  ;;  %v10137_v15 = vmul.f32 %v17710_v50, %v17710_v50 }
 0x6ea   :  { %12287 = vmatprep.subr.bf16.mxu0 %v16357_v42  ;;  %v10248_v42 = vmax.f32 %v10237_v41, 0.0 }
 0x6eb   :  { %9902 = vmatpush1.bf16.msra.mxu1 %v16352_v18  ;;  %v16396_v18 = vld [vmem:[#allocation16 + $0xf44] ss:$44 sps:$4 sm:$0xff]  }
 0x6ec   :  { %9903 = vmatprep.subr.bf16.mxu1 %v16360_v44  ;;  %v16399_v44 = vld [vmem:[#allocation20 + $0x124] ss:$12 sps:$4 sm:$0xff]  }
 0x6ed   :  { %12288 = vmatpush1.bf16.msra.mxu0 %v16355_v24  ;;  %v10417_v24 = vrot.slane %v17732_v17, %v17327_v35 }
 0x6ee   :  { %12289 = vmatprep.subr.bf16.mxu0 %v16363_v54  ;;  %v16394_v54 = vld [vmem:[#allocation16 + $0xf40] ss:$44 sps:$4 sm:$0xff]  }
 0x6ef   :  { %9904 = vmatpush1.bf16.msra.mxu1 %v16358_v22  ;;  %v10259_v22 = vadd.f32 1e-05, %v10248_v42  ;;  %v10469_v25 = vadd.f32 %v10417_v24, %v10401_v28  ;;  %v16431_v28 = vld [vmem:[#allocation20 + $0x390] ss:$12 sps:$4 sm:$0xff]  }
 0x6f0   :  { %9905 = vmatprep.subr.bf16.mxu1 %v16366_v30  ;;  %v16400_v30 = vld [vmem:[#allocation16 + $0xee8] ss:$44 sps:$4 sm:$0xff]  }
 0x6f1   :  { %12290 = vmatpush1.bf16.msra.mxu0 %v16361_v1  ;;  %16810 = vrsqrt.f32 %v10259_v22  ;;  %v16408_v1 = vld [vmem:[#allocation16 + $0xe94] ss:$44 sps:$4 sm:$0xff]  }
 0x6f2   :  { %12291 = vmatprep.subr.bf16.mxu0 %v16369_v46  ;;  %v16403_v46 = vld [vmem:[#allocation20 + $0x108] ss:$12 sps:$4 sm:$0xff]   ;;  %16812 = vtanh.f32 %v10469_v25 }
 0x6f3   :  { %9906 = vmatpush1.bf16.msra.mxu1 %v16364_v43  ;;  %v16411_v43 = vld [vmem:[#allocation20 + $0xf4] ss:$12 sps:$4 sm:$0xff]   ;;  %v16438_v22 = vld [vmem:[#allocation20 + $0x37c] ss:$12 sps:$4 sm:$0xff]  }
 0x6f4   :  { %9907 = vmatprep.subr.bf16.mxu1 %v16372_v49  ;;  %v16409_v49 = vld [vmem:[#allocation20 + $0xf0] ss:$12 sps:$4 sm:$0xff]  }
 0x6f5   :  { %12292 = vmatpush1.bf16.msra.mxu0 %v16367_v52  ;;  %v16417_v52 = vld [vmem:[#allocation20 + $0xdc] ss:$12 sps:$4 sm:$0xff]  }
 0x6f6   :  { %12293 = vmatprep.subr.bf16.mxu0 %v16375_v3  ;;  %v16412_v3 = vld [vmem:[#allocation16 + $0xe38] ss:$44 sps:$4 sm:$0xff]  }
 0x6f7   :  { %9908 = vmatpush1.bf16.msra.mxu1 %v16370_v60  ;;  %v16420_v60 = vld [vmem:[#allocation16 + $0xde4] ss:$44 sps:$4 sm:$0xff]  }
 0x6f8   :  { %9909 = vmatprep.subr.bf16.mxu1 %v16378_v36  ;;  %v16423_v36 = vld [vmem:[#allocation20 + $0xc4] ss:$12 sps:$4 sm:$0xff]  }
 0x6f9   :  { %12294 = vmatpush1.bf16.msra.mxu0 %v16373_v26  ;;  %v16418_v26 = vld [vmem:[#allocation16 + $0xde0] ss:$44 sps:$4 sm:$0xff]  }
 0x6fa   :  { %12295 = vmatprep.subr.bf16.mxu0 %v16381_v48  ;;  %v10295_v48 = vrot.slane %v17719_v16, %v17348_v59 }
 0x6fb   :  { %9910 = vmatpush2.bf16.msra.mxu1 %v16376_v61  ;;  %v16421_v61 = vld [vmem:[#allocation20 + $0xc0] ss:$12 sps:$4 sm:$0xff]  }
 0x6fc   :  { %9911 = vmatprep.subr.bf16.mxu1 %v16384_v4  ;;  %v16425_v4 = vld [vmem:[#allocation16 + $0xd90] ss:$44 sps:$4 sm:$0xff]  }
 0x6fd   :  { %12296 = vmatpush2.bf16.msra.mxu0 %v16379_v27  ;;  %v16429_v27 = vld [vmem:[#allocation16 + $0xff8] ss:$44 sps:$4 sm:$0xff]  }
 0x6fe   :  { %12297 = vmatprep.subr.bf16.mxu0 %v16387_v31  ;;  %v16811_v55 = vpop.eup %16810  ;;  %v16426_v31 = vld [vmem:[#allocation20 + $0x3a8] ss:$12 sps:$4 sm:$0xff]  }
 0x6ff   :  { %9912 = vmatpush2.bf16.msra.mxu1 %v16382_v32  ;;  %v16813_v63 = vpop.eup %16812  ;;  %v10338_v6 = vmul.f32 %v16811_v55, %v10295_v48 }
 0x700   :  { %9913 = vmatprep.subr.bf16.mxu1 %v16390_v12  ;;  %v17773_v41 = vpack.c.bf16 %v16813_v63, %v16813_v63  ;;  %v16433_v12 = vld [vmem:[#allocation20 + $0x394] ss:$12 sps:$4 sm:$0xff]  }
 0x701   :  { %12298 = vmatpush2.bf16.msra.mxu0 %v16385_v5  ;;  %v9643_v5 = vadd.f32 %v17714_v40, %v17750_v29  ;;  %v10372_v40 = vrot.slane %v10338_v6, %v17327_v35 }
 0x702   :  { %12299 = vmatprep.subr.bf16.mxu0 %v16393_v14  ;;  %v16430_v14 = vld [vmem:[#allocation16 + $0xd38] ss:$44 sps:$4 sm:$0xff]  }
 0x703   :  { %9914 = vmatpush2.bf16.msra.mxu1 %v16388_v38  ;;  %v10070_v38 = vrot.slane %v17710_v50, 4 }
 0x704   :  { %9915 = vmatprep.subr.bf16.mxu1 %v16396_v18 }
 0x705   :  { %12300 = vmatpush2.bf16.msra.mxu0 %v16391_v20  ;;  %v16434_v20 = vld [vmem:[#allocation16 + $0xfa0] ss:$44 sps:$4 sm:$0xff]  }
 0x706   :  { %12301 = vmatprep.subr.bf16.mxu0 %v16399_v44  ;;  %v10349_v44 = vsub.f32 %v17717_v39, %v17759_v51  ;;  %v16439_v51 = vld [vmem:[#allocation16 + $0xf48] ss:$44 sps:$4 sm:$0xff]  }
 0x707   :  { %9916 = vmatpush2.bf16.msra.mxu1 %v16394_v54 }
 0x708   :  { %9917 = vmatprep.subr.bf16.mxu1 %v16402_v8 }
 0x709   :  { %12302 = vmatpush2.bf16.msra.mxu0 %v16397_v45 }
 0x70a   :  { %12303 = vmatprep.subr.bf16.mxu0 %v16405_v33 }
 0x70b   :  { %9918 = vmatpush2.bf16.msra.mxu1 %v16400_v30  ;;  %v16435_v30 = vld [vmem:[#allocation16 + $0xce0] ss:$44 sps:$4 sm:$0xff]  }
 0x70c   :  { %9919 = vmatprep.subr.bf16.mxu1 %v16408_v1  ;;  %v10071_v1 = vadd.f32 %v10070_v38, %v17710_v50 }
 0x70d   :  { %12304 = vmatpush2.bf16.msra.mxu0 %v16403_v46  ;;  %v10158_v46 = vrot.slane %v10137_v15, 4 }
 0x70e   :  { %12305 = vmatprep.subr.bf16.mxu0 %v16411_v43  ;;  %v10072_v63 = vrot.slane %v10071_v1, 2 }
 0x70f   :  { %9920 = vmatpush2.bf16.msra.mxu1 %v16406_v11  ;;  %v10404_v11 = vmul.f32 %v10372_v40, %v10349_v44 }
 0x710   :  { %9921 = vmatprep.subr.bf16.mxu1 %v16414_v23  ;;  %v10429_v23 = vrot.slane %v17732_v17, %v17348_v59  ;;  %v16444_v59 = vld [vmem:[#allocation16 + $0xef0] ss:$44 sps:$4 sm:$0xff]  }
 0x711   :  { %12306 = vmatpush2.bf16.msra.mxu0 %v16409_v49 }
 0x712   :  { %12307 = vmatprep.subr.bf16.mxu0 %v16417_v52 }
 0x713   :  { %9922 = vmatpush2.bf16.msra.mxu1 %v16412_v3 }
 0x714   :  { %9923 = vmatprep.subr.bf16.mxu1 %v16420_v60 }
 0x715   :  { %12308 = vmatpush2.bf16.msra.mxu0 %v16415_v19  ;;  %v16436_v19 = vld [vmem:[#allocation20 + $0x378] ss:$12 sps:$4 sm:$0xff]  }
 0x716   :  { %12309 = vmatprep.subr.bf16.mxu0 %v16423_v36 }
 0x717   :  { %9924 = vmatpush2.bf16.msra.mxu1 %v16418_v26  ;;  %v16443_v26 = vld [vmem:[#allocation20 + $0x364] ss:$12 sps:$4 sm:$0xff]  }
 0x718   :  { %14360 = vmatprep.subr.bf16.mxu1 %v16424_v7 }
 0x719   :  { %12310 = vmatpush2.bf16.msra.mxu0 %v16421_v61 }
 0x71a   :  { %v9681_v32 = vpop.f32.mrf.mxu1  ;;  %9926 = vmatmul.mubr.bf16.vlgmr.msra.gmra.mxu1 %v17651_v2  ;;  %12361 = vmatprep.subr.bf16.mxu0 %v16428_v53  ;;  %v16440_v53 = vld [vmem:[#allocation16 + $0xc88] ss:$44 sps:$4 sm:$0xff]  }
 0x71b   :  { %v17778_v57 = vadd.f32 %v9681_v32, %v17742_v58  ;;  %14361 = vmatpush3.bf16.msra.mxu1 %v16425_v4  ;;  %10046 = vmatprep.mubr.bf16.mxu1 %v17649_v62  ;;  %v10159_v4 = vadd.f32 %v10158_v46, %v10137_v15  ;;  %v16449_v15 = vld [vmem:[#allocation16 + $0xe98] ss:$44 sps:$4 sm:$0xff]  }
 0x71c   :  { %v9683_v42 = vpop.f32.mrf.mxu1  ;;  %v17784_v18 = vpop.f32.mrf.mxu0  ;;  %12312 = vmatmul.mubr.bf16.vlgmr.msra.gmra.mxu0 %v17773_v41  ;;  %14362 = vmatprep.subr.bf16.mxu1 %v16429_v27  ;;  %v10472_v27 = vadd.f32 %v10429_v23, %v10404_v11  ;;  %v16454_v11 = vld [vmem:[#allocation16 + $0xe40] ss:$44 sps:$4 sm:$0xff]  }
 0x71d   :  { %v10082_v58 = vrot.slane %v17778_v57, 4  ;;  %v10139_v62 = vmul.f32 %v17778_v57, %v17778_v57  ;;  %v17791_v29 = vadd.f32 %v9683_v42, %v9643_v5  ;;  %12362 = vmatpush1.bf16.msra.mxu0 %v16426_v31  ;;  %v16441_v5 = vld [vmem:[#allocation20 + $0x360] ss:$12 sps:$4 sm:$0xff]  }
 0x71e   :  { %v9685_v24 = vpop.f32.mrf.mxu1  ;;  %v17795_v54 = vpop.f32.mrf.mxu0  ;;  %12363 = vmatprep.subr.bf16.mxu0 %v16433_v12  ;;  %16814 = vtanh.f32 %v10472_v27 }
 0x71f   :  { %v10083_v8 = vadd.f32 %v10082_v58, %v17778_v57  ;;  %v10170_v45 = vrot.slane %v10139_v62, 4  ;;  %v10088_v33 = vrot.slane %v17791_v29, 4  ;;  %v10140_v25 = vmul.f32 %v17791_v29, %v17791_v29  ;;  %14363 = vmatpush3.bf16.msra.mxu1 %v16430_v14  ;;  %v16448_v14 = vld [vmem:[#allocation20 + $0x34c] ss:$12 sps:$4 sm:$0xff]  }
 0x720   :  { %v9686_v43 = vpop.f32.mrf.mxu1  ;;  %v9808_v39 = vpop.f32.mrf.mxu0  ;;  %14364 = vmatprep.subr.bf16.mxu1 %v16434_v20  ;;  %v16445_v58 = vld [vmem:[#allocation16 + $0xc30] ss:$44 sps:$4 sm:$0xff]  }
 0x721   :  { %v10084_v49 = vrot.slane %v10083_v8, 2  ;;  %v10171_v52 = vadd.f32 %v10170_v45, %v10139_v62  ;;  %v10089_v3 = vadd.f32 %v10088_v33, %v17791_v29  ;;  %v10176_v60 = vrot.slane %v10140_v25, 4  ;;  %12364 = vmatpush1.bf16.msra.mxu0 %v16431_v28  ;;  %v16446_v45 = vld [vmem:[#allocation20 + $0x348] ss:$12 sps:$4 sm:$0xff]  }
 0x722   :  { %v9809_v36 = vpop.f32.mrf.mxu0  ;;  %12365 = vmatprep.subr.bf16.mxu0 %v16438_v22  ;;  %v10073_v62 = vadd.f32 %v10072_v63, %v10071_v1  ;;  %v10160_v28 = vrot.slane %v10159_v4, 2  ;;  %v16453_v33 = vld [vmem:[#allocation20 + $0x334] ss:$12 sps:$4 sm:$0xff]  }
 0x723   :  { %v10085_v7 = vadd.f32 %v10084_v49, %v10083_v8  ;;  %v10172_v48 = vrot.slane %v10171_v52, 2  ;;  %v10090_v55 = vrot.slane %v10089_v3, 2  ;;  %v10177_v61 = vadd.f32 %v10176_v60, %v10140_v25  ;;  %14365 = vmatpush3.bf16.msra.mxu1 %v16435_v30  ;;  %v16450_v1 = vld [vmem:[#allocation16 + $0xbd8] ss:$44 sps:$4 sm:$0xff]   ;;  %v16458_v60 = vld [vmem:[#allocation20 + $0x31c] ss:$12 sps:$4 sm:$0xff]  }
 0x724   :  { %14366 = vmatprep.subr.bf16.mxu1 %v16439_v51  ;;  %v10074_v43 = vrot.slane %v10073_v62, 1  ;;  %v10161_v39 = vadd.f32 %v10160_v28, %v10159_v4  ;;  %v16455_v36 = vld [vmem:[#allocation16 + $0xb80] ss:$44 sps:$4 sm:$0xff]   ;;  %v16463_v4 = vld [vmem:[#allocation20 + $0x304] ss:$12 sps:$4 sm:$0xff]  }
 0x725   :  { %v10086_v6 = vrot.slane %v10085_v7, 1  ;;  %v10173_v31 = vadd.f32 %v10172_v48, %v10171_v52  ;;  %v10091_v32 = vadd.f32 %v10090_v55, %v10089_v3  ;;  %v10178_v12 = vrot.slane %v10177_v61, 2  ;;  %12366 = vmatpush1.bf16.msra.mxu0 %v16436_v19  ;;  %v16451_v52 = vld [vmem:[#allocation20 + $0x330] ss:$12 sps:$4 sm:$0xff]   ;;  %v16475_v28 = vld [vmem:[#allocation20 + $0x454] ss:$12 sps:$4 sm:$0xff]  }
 0x726   :  { %12367 = vmatprep.subr.bf16.mxu0 %v16443_v26  ;;  %v10075_v26 = vadd.f32 %v10074_v43, %v10073_v62  ;;  %v16459_v55 = vld [vmem:[#allocation16 + $0xde8] ss:$44 sps:$4 sm:$0xff]   ;;  %v16467_v62 = vld [vmem:[#allocation20 + $0x468] ss:$12 sps:$4 sm:$0xff]   ;;  %v10303_v43 = vrot.slane %v17719_v16, %v17369_v13 }
 0x727   :  { %v10087_v38 = vadd.f32 %v10086_v6, %v10085_v7  ;;  %v10174_v42 = vrot.slane %v10173_v31, 1  ;;  %v10092_v20 = vrot.slane %v10091_v32, 1  ;;  %v10179_v40 = vadd.f32 %v10178_v12, %v10177_v61  ;;  %14367 = vmatpush3.bf16.msra.mxu1 %v16440_v53  ;;  %v16456_v53 = vld [vmem:[#allocation20 + $0x318] ss:$12 sps:$4 sm:$0xff]  }
 0x728   :  { %14368 = vmatprep.subr.bf16.mxu1 %v16444_v59  ;;  %v10162_v7 = vrot.slane %v10161_v39, 1  ;;  %v16460_v59 = vld [vmem:[#allocation16 + $0xb28] ss:$44 sps:$4 sm:$0xff]   ;;  %v17813_v27 = vmul.f32 0.125, %v10075_v26 }
 0x729   :  { %v17805_v44 = vmul.f32 0.125, %v10087_v38  ;;  %v10175_v24 = vadd.f32 %v10174_v42, %v10173_v31  ;;  %v10093_v22 = vadd.f32 %v10092_v20, %v10091_v32  ;;  %v10180_v8 = vrot.slane %v10179_v40, 1  ;;  %12368 = vmatpush1.bf16.msra.mxu0 %v16441_v5  ;;  %v16466_v32 = vld [vmem:[#allocation20 + $0x22c] ss:$12 sps:$4 sm:$0xff]   ;;  %v16464_v38 = vld [vmem:[#allocation20 + $0x228] ss:$12 sps:$4 sm:$0xff]  }
 0x72a   :  { %12369 = vmatprep.subr.bf16.mxu0 %v16448_v14  ;;  %v10163_v6 = vadd.f32 %v10162_v7, %v10161_v39  ;;  %v16461_v5 = vld [vmem:[#allocation20 + $0x300] ss:$12 sps:$4 sm:$0xff]   ;;  %v10225_v20 = vmul.f32 %v17813_v27, %v17813_v27 }
 0x72b   :  { %v10216_v25 = vmul.f32 0.125, %v10175_v24  ;;  %v10227_v30 = vmul.f32 %v17805_v44, %v17805_v44  ;;  %v17809_v46 = vmul.f32 0.125, %v10093_v22  ;;  %14369 = vmatpush3.bf16.msra.mxu1 %v16445_v58  ;;  %v10181_v51 = vadd.f32 %v10180_v8, %v10179_v40  ;;  %v16815_v12 = vpop.eup %16814  ;;  %v16469_v14 = vld [vmem:[#allocation20 + $0x46c] ss:$12 sps:$4 sm:$0xff]   ;;  %v16472_v40 = vld [vmem:[#allocation20 + $0x214] ss:$12 sps:$4 sm:$0xff]  }
 0x72c   :  { %14370 = vmatprep.subr.bf16.mxu1 %v16449_v15  ;;  %v10214_v42 = vmul.f32 0.125, %v10163_v6  ;;  %v17817_v58 = vpack.c.bf16 %v16815_v12, %v16815_v12  ;;  %v16470_v15 = vld [vmem:[#allocation20 + $0x210] ss:$12 sps:$4 sm:$0xff]   ;;  %v10299_v8 = vrot.slane %v17719_v16, %v17366_v10  ;;  %v16499_v6 = vld [vmem:[#allocation20 + $0x3f4] ss:$12 sps:$4 sm:$0xff]  }
 0x72d   :  { %v10238_v23 = vsub.f32 %v10216_v25, %v10227_v30  ;;  %v10228_v49 = vmul.f32 %v17809_v46, %v17809_v46  ;;  %12370 = vmatpush1.bf16.msra.mxu0 %v16446_v45  ;;  %v10217_v3 = vmul.f32 0.125, %v10181_v51  ;;  %v16478_v22 = vld [vmem:[#allocation20 + $0x1fc] ss:$12 sps:$4 sm:$0xff]   ;;  %v16476_v25 = vld [vmem:[#allocation20 + $0x1f8] ss:$12 sps:$4 sm:$0xff]  }
 0x72e   :  { %12371 = vmatprep.subr.bf16.mxu0 %v16453_v33  ;;  %v10236_v24 = vsub.f32 %v10214_v42, %v10225_v20  ;;  %v16473_v45 = vld [vmem:[#allocation20 + $0x450] ss:$12 sps:$4 sm:$0xff]   ;;  %v16479_v51 = vld [vmem:[#allocation20 + $0x438] ss:$12 sps:$4 sm:$0xff]   ;;  %v16506_v42 = vld [vmem:[#allocation20 + $0x180] ss:$12 sps:$4 sm:$0xff]   ;;  %v10291_v20 = vrot.slane %v17719_v16, %v17345_v56 }
 0x72f   :  { %v10249_v19 = vmax.f32 %v10238_v23, 0.0  ;;  %14371 = vmatpush3.bf16.msra.mxu1 %v16450_v1  ;;  %v10239_v48 = vsub.f32 %v10217_v3, %v10228_v49  ;;  %v16481_v33 = vld [vmem:[#allocation20 + $0x43c] ss:$12 sps:$4 sm:$0xff]   ;;  %v16484_v1 = vld [vmem:[#allocation20 + $0x1e4] ss:$12 sps:$4 sm:$0xff]   ;;  %v10350_v49 = vsub.f32 %v17778_v57, %v17805_v44  ;;  %v10437_v44 = vrot.slane %v17732_v17, %v17369_v13 }
 0x730   :  { %14372 = vmatprep.subr.bf16.mxu1 %v16454_v11  ;;  %v16487_v11 = vld [vmem:[#allocation20 + $0x424] ss:$12 sps:$4 sm:$0xff]   ;;  %v16482_v3 = vld [vmem:[#allocation20 + $0x1e0] ss:$12 sps:$4 sm:$0xff]  }
 0x731   :  { %v10260_v61 = vadd.f32 1e-05, %v10249_v19  ;;  %12372 = vmatpush1.bf16.msra.mxu0 %v16451_v52  ;;  %v10250_v63 = vmax.f32 %v10239_v48, 0.0  ;;  %v16485_v48 = vld [vmem:[#allocation20 + $0x420] ss:$12 sps:$4 sm:$0xff]  }
 0x732   :  { %12373 = vmatprep.subr.bf16.mxu0 %v16458_v60  ;;  %v10433_v60 = vrot.slane %v17732_v17, %v17366_v10  ;;  %v16497_v13 = vld [vmem:[#allocation20 + $0x3f0] ss:$12 sps:$4 sm:$0xff]   ;;  %v16500_v12 = vld [vmem:[#allocation20 + $0x198] ss:$12 sps:$4 sm:$0xff]  }
 0x733   :  { %16816 = vrsqrt.f32 %v10260_v61  ;;  %14373 = vmatpush3.bf16.msra.mxu1 %v16455_v36  ;;  %v10261_v31 = vadd.f32 1e-05, %v10250_v63  ;;  %v16490_v36 = vld [vmem:[#allocation20 + $0x1cc] ss:$12 sps:$4 sm:$0xff]   ;;  %v16496_v63 = vld [vmem:[#allocation20 + $0x1b4] ss:$12 sps:$4 sm:$0xff]  }
 0x734   :  { %14374 = vmatprep.subr.bf16.mxu1 %v16459_v55  ;;  %v10351_v55 = vsub.f32 %v17791_v29, %v17809_v46  ;;  %v16493_v61 = vld [vmem:[#allocation20 + $0x40c] ss:$12 sps:$4 sm:$0xff]   ;;  %v16494_v29 = vld [vmem:[#allocation20 + $0x1b0] ss:$12 sps:$4 sm:$0xff]  }
 0x735   :  { %12374 = vmatpush1.bf16.msra.mxu0 %v16456_v53  ;;  %16818 = vrsqrt.f32 %v10261_v31  ;;  %v16488_v53 = vld [vmem:[#allocation20 + $0x1c8] ss:$12 sps:$4 sm:$0xff]  }
 0x736   :  { %12375 = vmatprep.subr.bf16.mxu0 %v16463_v4  ;;  %v16502_v46 = vld [vmem:[#allocation20 + $0x19c] ss:$12 sps:$4 sm:$0xff]  }
 0x737   :  { %14375 = vmatpush3.bf16.msra.mxu1 %v16460_v59  ;;  %v16491_v59 = vld [vmem:[#allocation20 + $0x408] ss:$12 sps:$4 sm:$0xff]  }
 0x738   :  { %12320 = vmatprep.subr.bf16.mxu1 %v16466_v32  ;;  %v16505_v32 = vld [vmem:[#allocation20 + $0x3dc] ss:$12 sps:$4 sm:$0xff]  }
 0x739   :  { %12376 = vmatpush1.bf16.msra.mxu0 %v16461_v5  ;;  %v16508_v5 = vld [vmem:[#allocation20 + $0x184] ss:$12 sps:$4 sm:$0xff]  }
 0x73a   :  { %10047 = vmatmul.mubr.bf16.vlgmr.msra.gmra.mxu1 %v17651_v2  ;;  %12377 = vmatprep.subr.bf16.mxu0 %v16469_v14  ;;  %v10247_v2 = vmax.f32 %v10236_v24, 0.0  ;;  %v16503_v14 = vld [vmem:[#allocation20 + $0x3d8] ss:$12 sps:$4 sm:$0xff]  }
 0x73b   :  { %12321 = vmatpush1.bf16.msra.mxu1 %v16464_v38  ;;  %12352 = vmatprep.mubr.bf16.mxu1 %v17817_v58  ;;  %v16511_v38 = vld [vmem:[#allocation20 + $0x3c4] ss:$12 sps:$4 sm:$0xff]  }
 0x73c   :  { %12322 = vmatprep.subr.bf16.mxu1 %v16472_v40  ;;  %v10258_v19 = vadd.f32 1e-05, %v10247_v2  ;;  %v16514_v40 = vld [vmem:[#allocation20 + $0x2ec] ss:$12 sps:$4 sm:$0xff]  }
 0x73d   :  { %12378 = vmatpush2.bf16.msra.mxu0 %v16467_v62 }
 0x73e   :  { %12379 = vmatprep.subr.bf16.mxu0 %v16475_v28  ;;  %16820 = vrsqrt.f32 %v10258_v19  ;;  %v16509_v28 = vld [vmem:[#allocation20 + $0x3c0] ss:$12 sps:$4 sm:$0xff]  }
 0x73f   :  { %12323 = vmatpush1.bf16.msra.mxu1 %v16470_v15  ;;  %v16512_v15 = vld [vmem:[#allocation20 + $0x2e8] ss:$12 sps:$4 sm:$0xff]  }
 0x740   :  { %v16817_v30 = vpop.eup %16816  ;;  %12324 = vmatprep.subr.bf16.mxu1 %v16478_v22  ;;  %v16589_v19 = vld [vmem:[#allocation20 + $0x694] ss:$12 sps:$4 sm:$0xff]  }
 0x741   :  { %v10339_v39 = vmul.f32 %v16817_v30, %v10299_v8  ;;  %12380 = vmatpush2.bf16.msra.mxu0 %v16473_v45  ;;  %v16517_v8 = vld [vmem:[#allocation20 + $0x2d4] ss:$12 sps:$4 sm:$0xff]   ;;  %v16586_v30 = vld [vmem:[#allocation20 + $0x6ac] ss:$12 sps:$4 sm:$0xff]  }
 0x742   :  { %12381 = vmatprep.subr.bf16.mxu0 %v16481_v33  ;;  %v16819_v23 = vpop.eup %16818 }
 0x743   :  { %v10376_v52 = vrot.slane %v10339_v39, %v17327_v35  ;;  %12325 = vmatpush1.bf16.msra.mxu1 %v16476_v25  ;;  %v10340_v26 = vmul.f32 %v16819_v23, %v10303_v43  ;;  %v16584_v43 = vld [vmem:[#allocation20 + $0x6a8] ss:$12 sps:$4 sm:$0xff]  }
 0x744   :  { %12326 = vmatprep.subr.bf16.mxu1 %v16484_v1  ;;  %v16515_v1 = vld [vmem:[#allocation20 + $0x2d0] ss:$12 sps:$4 sm:$0xff]  }
 0x745   :  { %v10405_v7 = vmul.f32 %v10376_v52, %v10350_v49  ;;  %12382 = vmatpush2.bf16.msra.mxu0 %v16479_v51  ;;  %v10380_v57 = vrot.slane %v10340_v26, %v17327_v35  ;;  %v16520_v23 = vld [vmem:[#allocation20 + $0x2bc] ss:$12 sps:$4 sm:$0xff]  }
 0x746   :  { %12383 = vmatprep.subr.bf16.mxu0 %v16487_v11 }
 0x747   :  { %12327 = vmatpush1.bf16.msra.mxu1 %v16482_v3  ;;  %v10473_v10 = vadd.f32 %v10433_v60, %v10405_v7  ;;  %v10406_v4 = vmul.f32 %v10380_v57, %v10351_v55  ;;  %v16587_v7 = vld [vmem:[#allocation20 + $0x690] ss:$12 sps:$4 sm:$0xff]  }
 0x748   :  { %12328 = vmatprep.subr.bf16.mxu1 %v16490_v36 }
 0x749   :  { %12384 = vmatpush2.bf16.msra.mxu0 %v16485_v48  ;;  %v10474_v31 = vadd.f32 %v10437_v44, %v10406_v4  ;;  %16822 = vtanh.f32 %v10473_v10 }
 0x74a   :  { %12385 = vmatprep.subr.bf16.mxu0 %v16493_v61 }
 0x74b   :  { %12329 = vmatpush1.bf16.msra.mxu1 %v16488_v53  ;;  %16824 = vtanh.f32 %v10474_v31  ;;  %v16821_v62 = vpop.eup %16820  ;;  %v16590_v31 = vld [vmem:[#allocation20 + $0x678] ss:$12 sps:$4 sm:$0xff]  }
 0x74c   :  { %12330 = vmatprep.subr.bf16.mxu1 %v16496_v63  ;;  %v10337_v22 = vmul.f32 %v16821_v62, %v10291_v20  ;;  %v16592_v63 = vld [vmem:[#allocation20 + $0x67c] ss:$12 sps:$4 sm:$0xff]   ;;  %v16593_v20 = vld [vmem:[#allocation20 + $0x660] ss:$12 sps:$4 sm:$0xff]  }
 0x74d   :  { %12386 = vmatpush2.bf16.msra.mxu0 %v16491_v59 }
 0x74e   :  { %12387 = vmatprep.subr.bf16.mxu0 %v16499_v6  ;;  %v10368_v39 = vrot.slane %v10337_v22, %v17327_v35  ;;  %v16521_v6 = vld [vmem:[#allocation20 + $0x2a0] ss:$12 sps:$4 sm:$0xff]  }
 0x74f   :  { %12331 = vmatpush1.bf16.msra.mxu1 %v16494_v29  ;;  %v16598_v22 = vld [vmem:[#allocation20 + $0x64c] ss:$12 sps:$4 sm:$0xff]  }
 0x750   :  { %12332 = vmatprep.subr.bf16.mxu1 %v16502_v46  ;;  %v16526_v46 = vld [vmem:[#allocation20 + $0x28c] ss:$12 sps:$4 sm:$0xff]  }
 0x751   :  { %12388 = vmatpush2.bf16.msra.mxu0 %v16497_v13 }
 0x752   :  { %12389 = vmatprep.subr.bf16.mxu0 %v16505_v32 }
 0x753   :  { %12333 = vmatpush1.bf16.msra.mxu1 %v16500_v12 }
 0x754   :  { %12334 = vmatprep.subr.bf16.mxu1 %v16508_v5  ;;  %v16595_v5 = vld [vmem:[#allocation20 + $0x664] ss:$12 sps:$4 sm:$0xff]  }
 0x755   :  { %12390 = vmatpush2.bf16.msra.mxu0 %v16503_v14 }
 0x756   :  { %12391 = vmatprep.subr.bf16.mxu0 %v16511_v38  ;;  %v16823_v24 = vpop.eup %16822 }
 0x757   :  { %12335 = vmatpush1.bf16.msra.mxu1 %v16506_v42  ;;  %v17840_v2 = vpack.c.bf16 %v16823_v24, %v16823_v24  ;;  %v16524_v42 = vld [vmem:[#allocation20 + $0x288] ss:$12 sps:$4 sm:$0xff]  }
 0x758   :  { %12336 = vmatprep.subr.bf16.mxu1 %v16514_v40  ;;  %v16825_v45 = vpop.eup %16824 }
 0x759   :  { %12392 = vmatpush2.bf16.msra.mxu0 %v16509_v28  ;;  %v17837_v25 = vpack.c.bf16 %v16825_v45, %v16825_v45  ;;  %v16529_v28 = vld [vmem:[#allocation20 + $0x274] ss:$12 sps:$4 sm:$0xff]  }
 0x75a   :  { %v9763_v33 = vpop.f32.mrf.mxu1  ;;  %12443 = vmatprep.subr.bf16.mxu0 %v16586_v30  ;;  %v16596_v30 = vld [vmem:[#allocation20 + $0x648] ss:$12 sps:$4 sm:$0xff]  }
 0x75b   :  { %v9764_v16 = vadd.f32 %v9763_v33, %v17752_v9  ;;  %12337 = vmatpush2.bf16.msra.mxu1 %v16512_v15  ;;  %12393 = vmatprep.mubr.bf16.mxu0 %v17837_v25  ;;  %v10348_v9 = vsub.f32 %v17710_v50, %v17813_v27  ;;  %v16523_v50 = vld [vmem:[#allocation20 + $0x2a4] ss:$12 sps:$4 sm:$0xff]   ;;  %v10425_v27 = vrot.slane %v17732_v17, %v17345_v56 }
 0x75c   :  { %v9765_v51 = vpop.f32.mrf.mxu1  ;;  %v17844_v11 = vpop.f32.mrf.mxu0  ;;  %12338 = vmatprep.subr.bf16.mxu1 %v16517_v8  ;;  %12394 = vmatmul.mubr.bf16.vlgmr.msra.gmra.mxu0 %v17840_v2  ;;  %v16527_v33 = vld [vmem:[#allocation20 + $0x270] ss:$12 sps:$4 sm:$0xff]  }
 0x75d   :  { %v17847_v49 = vadd.f32 %v17784_v18, %v9764_v16  ;;  %v9766_v52 = vadd.f32 %v9765_v51, %v17756_v47  ;;  %12444 = vmatpush1.bf16.msra.mxu0 %v16584_v43  ;;  %v16518_v47 = vld [vmem:[#allocation20 + $0x2b8] ss:$12 sps:$4 sm:$0xff]   ;;  %v10403_v48 = vmul.f32 %v10368_v39, %v10348_v9  ;;  %v16532_v43 = vld [vmem:[#allocation20 + $0x25c] ss:$12 sps:$4 sm:$0xff]  }
 0x75e   :  { %v9767_v3 = vpop.f32.mrf.mxu1  ;;  %v17853_v60 = vpop.f32.mrf.mxu0  ;;  %12445 = vmatprep.subr.bf16.mxu0 %v16589_v19  ;;  %v16530_v9 = vld [vmem:[#allocation20 + $0x258] ss:$12 sps:$4 sm:$0xff]  }
 0x75f   :  { %v10094_v36 = vrot.slane %v17847_v49, 4  ;;  %v10141_v26 = vmul.f32 %v17847_v49, %v17847_v49  ;;  %v17859_v18 = vadd.f32 %v17795_v54, %v9766_v52  ;;  %12339 = vmatpush2.bf16.msra.mxu1 %v16515_v1  ;;  %v10471_v13 = vadd.f32 %v10425_v27, %v10403_v48  ;;  %v16599_v3 = vld [vmem:[#allocation20 + $0x630] ss:$12 sps:$4 sm:$0xff]  }
 0x760   :  { %v9768_v55 = vpop.f32.mrf.mxu1  ;;  %v9890_v61 = vpop.f32.mrf.mxu0  ;;  %12340 = vmatprep.subr.bf16.mxu1 %v16520_v23  ;;  %v16601_v23 = vld [vmem:[#allocation20 + $0x634] ss:$12 sps:$4 sm:$0xff]   ;;  %v16604_v48 = vld [vmem:[#allocation20 + $0x61c] ss:$12 sps:$4 sm:$0xff]  }
 0x761   :  { %v10095_v57 = vadd.f32 %v10094_v36, %v17847_v49  ;;  %v10182_v44 = vrot.slane %v10141_v26, 4  ;;  %v10100_v53 = vrot.slane %v17859_v18, 4  ;;  %v10142_v54 = vmul.f32 %v17859_v18, %v17859_v18  ;;  %12446 = vmatpush1.bf16.msra.mxu0 %v16587_v7  ;;  %v16533_v55 = vld [vmem:[#allocation20 + $0x240] ss:$12 sps:$4 sm:$0xff]   ;;  %v16602_v61 = vld [vmem:[#allocation20 + $0x618] ss:$12 sps:$4 sm:$0xff]  }
 0x762   :  { %v9891_v10 = vpop.f32.mrf.mxu0  ;;  %12447 = vmatprep.subr.bf16.mxu0 %v16592_v63  ;;  %16826 = vtanh.f32 %v10471_v13  ;;  %v16536_v63 = vld [vmem:[#allocation20 + $0x528] ss:$12 sps:$4 sm:$0xff]  }
 0x763   :  { %v10101_v4 = vadd.f32 %v10100_v53, %v17859_v18  ;;  %v10188_v59 = vrot.slane %v10142_v54, 4  ;;  %12341 = vmatpush2.bf16.msra.mxu1 %v16518_v47  ;;  %v10096_v29 = vrot.slane %v10095_v57, 2  ;;  %v10183_v17 = vadd.f32 %v10182_v44, %v10141_v26  ;;  %v16535_v47 = vld [vmem:[#allocation20 + $0x244] ss:$12 sps:$4 sm:$0xff]   ;;  %v16538_v44 = vld [vmem:[#allocation20 + $0x52c] ss:$12 sps:$4 sm:$0xff]  }
 0x764   :  { %12342 = vmatprep.subr.bf16.mxu1 %v16523_v50  ;;  %v16607_v10 = vld [vmem:[#allocation20 + $0x604] ss:$12 sps:$4 sm:$0xff]   ;;  %v16608_v13 = vld [vmem:[#allocation20 + $0x768] ss:$12 sps:$4 sm:$0xff]  }
 0x765   :  { %v10102_v32 = vrot.slane %v10101_v4, 2  ;;  %v10189_v12 = vadd.f32 %v10188_v59, %v10142_v54  ;;  %12448 = vmatpush1.bf16.msra.mxu0 %v16590_v31  ;;  %v10097_v40 = vadd.f32 %v10096_v29, %v10095_v57  ;;  %v10184_v62 = vrot.slane %v10183_v17, 2  ;;  %v16541_v29 = vld [vmem:[#allocation20 + $0x514] ss:$12 sps:$4 sm:$0xff]  }
 0x766   :  { %12449 = vmatprep.subr.bf16.mxu0 %v16595_v5  ;;  %v16544_v5 = vld [vmem:[#allocation20 + $0x4fc] ss:$12 sps:$4 sm:$0xff]  }
 0x767   :  { %v10103_v14 = vadd.f32 %v10102_v32, %v10101_v4  ;;  %v10190_v38 = vrot.slane %v10189_v12, 2  ;;  %12343 = vmatpush2.bf16.msra.mxu1 %v16521_v6  ;;  %v10098_v16 = vrot.slane %v10097_v40, 1  ;;  %v10185_v1 = vadd.f32 %v10184_v62, %v10183_v17  ;;  %v16605_v4 = vld [vmem:[#allocation20 + $0x600] ss:$12 sps:$4 sm:$0xff]   ;;  %v16611_v62 = vld [vmem:[#allocation20 + $0x750] ss:$12 sps:$4 sm:$0xff]  }
 0x768   :  { %12344 = vmatprep.subr.bf16.mxu1 %v16526_v46  ;;  %v16610_v17 = vld [vmem:[#allocation20 + $0x76c] ss:$12 sps:$4 sm:$0xff]   ;;  %v16539_v46 = vld [vmem:[#allocation20 + $0x510] ss:$12 sps:$4 sm:$0xff]  }
 0x769   :  { %v10104_v15 = vrot.slane %v10103_v14, 1  ;;  %v10191_v24 = vadd.f32 %v10190_v38, %v10189_v12  ;;  %12450 = vmatpush1.bf16.msra.mxu0 %v16593_v20  ;;  %v10099_v19 = vadd.f32 %v10098_v16, %v10097_v40  ;;  %v10186_v36 = vrot.slane %v10185_v1, 1  ;;  %v16542_v40 = vld [vmem:[#allocation20 + $0x4f8] ss:$12 sps:$4 sm:$0xff]  }
 0x76a   :  { %12451 = vmatprep.subr.bf16.mxu0 %v16598_v22  ;;  %v10310_v38 = vsub.s32 7, %v17324_v34  ;;  %v16614_v16 = vld [vmem:[#allocation20 + $0x738] ss:$12 sps:$4 sm:$0xff]  }
 0x76b   :  { %v10105_v8 = vadd.f32 %v10104_v15, %v10103_v14  ;;  %v10192_v45 = vrot.slane %v10191_v24, 1  ;;  %12345 = vmatpush2.bf16.msra.mxu1 %v16524_v42  ;;  %v17872_v50 = vmul.f32 0.125, %v10099_v19  ;;  %v10187_v27 = vadd.f32 %v10186_v36, %v10185_v1  ;;  %v16613_v42 = vld [vmem:[#allocation20 + $0x754] ss:$12 sps:$4 sm:$0xff]  }
 0x76c   :  { %12346 = vmatprep.subr.bf16.mxu1 %v16529_v28  ;;  %v16553_v36 = vld [vmem:[#allocation20 + $0x4b4] ss:$12 sps:$4 sm:$0xff]  }
 0x76d   :  { %v17868_v39 = vmul.f32 0.125, %v10105_v8  ;;  %v10193_v51 = vadd.f32 %v10192_v45, %v10191_v24  ;;  %12452 = vmatpush1.bf16.msra.mxu0 %v16596_v30  ;;  %v10218_v59 = vmul.f32 0.125, %v10187_v27  ;;  %v10229_v6 = vmul.f32 %v17872_v50, %v17872_v50  ;;  %v16547_v24 = vld [vmem:[#allocation20 + $0x4e4] ss:$12 sps:$4 sm:$0xff]   ;;  %v16850_v8 = vld [vmem:[#allocation17] sm:$0xff] }
 0x76e   :  { %12453 = vmatprep.subr.bf16.mxu0 %v16601_v23  ;;  %v10311_v45 = vrot.slane %v16850_v8, %v10310_v38  ;;  %v16545_v30 = vld [vmem:[#allocation20 + $0x4e0] ss:$12 sps:$4 sm:$0xff]   ;;  %v16620_v27 = vld [vmem:[#allocation20 + $0x708] ss:$12 sps:$4 sm:$0xff]  }
 0x76f   :  { %v10230_v52 = vmul.f32 %v17868_v39, %v17868_v39  ;;  %12347 = vmatpush2.bf16.msra.mxu1 %v16527_v33  ;;  %v10219_v26 = vmul.f32 0.125, %v10193_v51  ;;  %v16827_v53 = vpop.eup %16826  ;;  %v10240_v32 = vsub.f32 %v10218_v59, %v10229_v6  ;;  %v16616_v33 = vld [vmem:[#allocation20 + $0x73c] ss:$12 sps:$4 sm:$0xff]   ;;  %v10353_v19 = vsub.f32 %v17859_v18, %v17868_v39  ;;  %v16625_v18 = vld [vmem:[#allocation20 + $0x6f4] ss:$12 sps:$4 sm:$0xff]  }
 0x770   :  { %12348 = vmatprep.subr.bf16.mxu1 %v16532_v43  ;;  %v17876_v31 = vpack.c.bf16 %v16827_v53, %v16827_v53  ;;  %v16550_v43 = vld [vmem:[#allocation20 + $0x4cc] ss:$12 sps:$4 sm:$0xff]   ;;  %v16623_v53 = vld [vmem:[#allocation20 + $0x6f0] ss:$12 sps:$4 sm:$0xff]  }
 0x771   :  { %v10241_v7 = vsub.f32 %v10219_v26, %v10230_v52  ;;  %12454 = vmatpush1.bf16.msra.mxu0 %v16599_v3  ;;  %v10251_v28 = vmax.f32 %v10240_v32, 0.0  ;;  %v16619_v52 = vld [vmem:[#allocation20 + $0x724] ss:$12 sps:$4 sm:$0xff]   ;;  %v16617_v3 = vld [vmem:[#allocation20 + $0x720] ss:$12 sps:$4 sm:$0xff]  }
 0x772   :  { %12455 = vmatprep.subr.bf16.mxu0 %v16604_v48  ;;  %v16554_v39 = vld [vmem:[#allocation20 + $0x498] ss:$12 sps:$4 sm:$0xff]   ;;  %v16629_v32 = vld [vmem:[#allocation20 + $0x6c0] ss:$12 sps:$4 sm:$0xff]  }
 0x773   :  { %12349 = vmatpush2.bf16.msra.mxu1 %v16530_v9  ;;  %v10252_v57 = vmax.f32 %v10241_v7, 0.0  ;;  %v10262_v1 = vadd.f32 1e-05, %v10251_v28  ;;  %v16548_v9 = vld [vmem:[#allocation20 + $0x4c8] ss:$12 sps:$4 sm:$0xff]  }
 0x774   :  { %12350 = vmatprep.subr.bf16.mxu1 %v16535_v47  ;;  %v17885_v47 = vld [vmem:[#allocation19] sm:$0xff] }
 0x775   :  { %v10263_v54 = vadd.f32 1e-05, %v10252_v57  ;;  %12456 = vmatpush1.bf16.msra.mxu0 %v16602_v61  ;;  %v10445_v7 = vrot.slane %v17885_v47, %v10310_v38  ;;  %v16551_v61 = vld [vmem:[#allocation20 + $0x4b0] ss:$12 sps:$4 sm:$0xff]   ;;  %v16626_v59 = vld [vmem:[#allocation20 + $0x6d8] ss:$12 sps:$4 sm:$0xff]  }
 0x776   :  { %12457 = vmatprep.subr.bf16.mxu0 %v16607_v10  ;;  %v16556_v57 = vld [vmem:[#allocation20 + $0x49c] ss:$12 sps:$4 sm:$0xff]   ;;  %v16559_v10 = vld [vmem:[#allocation20 + $0x484] ss:$12 sps:$4 sm:$0xff]  }
 0x777   :  { %12351 = vmatpush2.bf16.msra.mxu1 %v16533_v55  ;;  %16828 = vrsqrt.f32 %v10263_v54  ;;  %v16622_v55 = vld [vmem:[#allocation20 + $0x70c] ss:$12 sps:$4 sm:$0xff]   ;;  %v10306_v54 = vsub.s32 6, %v17324_v34  ;;  %v16565_v34 = vld [vmem:[#allocation20 + $0x5d4] ss:$12 sps:$4 sm:$0xff]  }
 0x778   :  { %12402 = vmatprep.subr.bf16.mxu1 %v16538_v44  ;;  %16830 = vrsqrt.f32 %v10262_v1 }
 0x779   :  { %12458 = vmatpush1.bf16.msra.mxu0 %v16605_v4  ;;  %v16557_v4 = vld [vmem:[#allocation20 + $0x480] ss:$12 sps:$4 sm:$0xff]   ;;  %v10307_v6 = vrot.slane %v16850_v8, %v10306_v54  ;;  %v10352_v8 = vsub.f32 %v17847_v49, %v17872_v50 }
 0x77a   :  { %12353 = vmatmul.mubr.bf16.vlgmr.msra.gmra.mxu1 %v17876_v31  ;;  %12459 = vmatprep.subr.bf16.mxu0 %v16610_v17  ;;  %v16569_v49 = vld [vmem:[#allocation20 + $0x5a0] ss:$12 sps:$4 sm:$0xff]  }
 0x77b   :  { %12403 = vmatpush1.bf16.msra.mxu1 %v16536_v63  ;;  %v16628_v63 = vld [vmem:[#allocation20 + $0x6dc] ss:$12 sps:$4 sm:$0xff]   ;;  %v16574_v50 = vld [vmem:[#allocation20 + $0x58c] ss:$12 sps:$4 sm:$0xff]  }
 0x77c   :  { %v14332_v12 = vpop.f32.mrf.mxu0  ;;  %12404 = vmatprep.subr.bf16.mxu1 %v16541_v29  ;;  %v16562_v29 = vld [vmem:[#allocation20 + $0x5ec] ss:$12 sps:$4 sm:$0xff]  }
 0x77d   :  { %12460 = vmatpush2.bf16.msra.mxu0 %v16608_v13  ;;  %v16560_v13 = vld [vmem:[#allocation20 + $0x5e8] ss:$12 sps:$4 sm:$0xff]  }
 0x77e   :  { %v14333_v14 = vpop.f32.mrf.mxu0  ;;  %12461 = vmatprep.subr.bf16.mxu0 %v16613_v42 }
 0x77f   :  { %v17880_v20 = vadd.f32 %v14333_v14, %v14332_v12  ;;  %12405 = vmatpush1.bf16.msra.mxu1 %v16539_v46  ;;  %v16631_v46 = vld [vmem:[#allocation20 + $0x6c4] ss:$12 sps:$4 sm:$0xff]  }
 0x780   :  { %v14335_v15 = vpop.f32.mrf.mxu0  ;;  %12406 = vmatprep.subr.bf16.mxu1 %v16544_v5  ;;  %v16632_v14 = vld [vmem:[#allocation20 + $0x2f0] ss:$12 sps:$4 sm:$0xff]  }
 0x781   :  { %12462 = vmatpush2.bf16.msra.mxu0 %v16611_v62 }
 0x782   :  { %v14336_v22 = vpop.f32.mrf.mxu0  ;;  %12463 = vmatprep.subr.bf16.mxu0 %v16616_v33 }
 0x783   :  { %12407 = vmatpush1.bf16.msra.mxu1 %v16542_v40  ;;  %v16563_v40 = vld [vmem:[#allocation20 + $0x5d0] ss:$12 sps:$4 sm:$0xff]  }
 0x784   :  { %12408 = vmatprep.subr.bf16.mxu1 %v16547_v24  ;;  %v16829_v51 = vpop.eup %16828  ;;  %v16568_v22 = vld [vmem:[#allocation20 + $0x5bc] ss:$12 sps:$4 sm:$0xff]  }
 0x785   :  { %v10342_v23 = vmul.f32 %v16829_v51, %v10311_v45  ;;  %12464 = vmatpush2.bf16.msra.mxu0 %v16614_v16  ;;  %v16831_v17 = vpop.eup %16830  ;;  %v16571_v51 = vld [vmem:[#allocation20 + $0x5a4] ss:$12 sps:$4 sm:$0xff]  }
 0x786   :  { %12465 = vmatprep.subr.bf16.mxu0 %v16619_v52  ;;  %v10341_v12 = vmul.f32 %v16831_v17, %v10307_v6  ;;  %v16658_v6 = vld [vmem:[#allocation20 + $0x7b0] ss:$12 sps:$4 sm:$0xff]  }
 0x787   :  { %12409 = vmatpush1.bf16.msra.mxu1 %v16545_v30  ;;  %v10388_v26 = vrot.slane %v10342_v23, %v17327_v35  ;;  %v16566_v30 = vld [vmem:[#allocation20 + $0x5b8] ss:$12 sps:$4 sm:$0xff]   ;;  %v10441_v23 = vrot.slane %v17885_v47, %v10306_v54 }
 0x788   :  { %12410 = vmatprep.subr.bf16.mxu1 %v16550_v43  ;;  %v10384_v62 = vrot.slane %v10341_v12, %v17327_v35  ;;  %v16578_v47 = vld [vmem:[#allocation20 + $0x558] ss:$12 sps:$4 sm:$0xff]  }
 0x789   :  { %v10408_v48 = vmul.f32 %v10388_v26, %v10353_v19  ;;  %12466 = vmatpush2.bf16.msra.mxu0 %v16617_v3  ;;  %v16572_v19 = vld [vmem:[#allocation20 + $0x588] ss:$12 sps:$4 sm:$0xff]   ;;  %v16575_v26 = vld [vmem:[#allocation20 + $0x570] ss:$12 sps:$4 sm:$0xff]  }
 0x78a   :  { %12467 = vmatprep.subr.bf16.mxu0 %v16622_v55  ;;  %v10407_v16 = vmul.f32 %v10384_v62, %v10352_v8  ;;  %v16635_v55 = vld [vmem:[#allocation20 + $0x82c] ss:$12 sps:$4 sm:$0xff]   ;;  %v16650_v54 = vld [vmem:[#allocation20 + $0x7e4] ss:$12 sps:$4 sm:$0xff]  }
 0x78b   :  { %12411 = vmatpush1.bf16.msra.mxu1 %v16548_v9  ;;  %v10476_v44 = vadd.f32 %v10445_v7, %v10408_v48  ;;  %v16580_v7 = vld [vmem:[#allocation20 + $0x55c] ss:$12 sps:$4 sm:$0xff]   ;;  %v16581_v48 = vld [vmem:[#allocation20 + $0x540] ss:$12 sps:$4 sm:$0xff]   ;;  %v16670_v17 = vld [vmem:[#allocation20 + $0x784] ss:$12 sps:$4 sm:$0xff]  }
 0x78c   :  { %12412 = vmatprep.subr.bf16.mxu1 %v16553_v36  ;;  %v10475_v3 = vadd.f32 %v10441_v23, %v10407_v16  ;;  %v16577_v36 = vld [vmem:[#allocation20 + $0x574] ss:$12 sps:$4 sm:$0xff]  }
 0x78d   :  { %16832 = vtanh.f32 %v10476_v44  ;;  %12468 = vmatpush2.bf16.msra.mxu0 %v16620_v27  ;;  %v16633_v27 = vld [vmem:[#allocation20 + $0x828] ss:$12 sps:$4 sm:$0xff]  }
 0x78e   :  { %12469 = vmatprep.subr.bf16.mxu0 %v16625_v18  ;;  %16834 = vtanh.f32 %v10475_v3  ;;  %v16640_v44 = vld [vmem:[#allocation20 + $0x814] ss:$12 sps:$4 sm:$0xff]   ;;  %v16638_v18 = vld [vmem:[#allocation20 + $0x810] ss:$12 sps:$4 sm:$0xff]  }
 0x78f   :  { %12413 = vmatpush1.bf16.msra.mxu1 %v16551_v61 }
 0x790   :  { %12414 = vmatprep.subr.bf16.mxu1 %v16556_v57 }
 0x791   :  { %12470 = vmatpush2.bf16.msra.mxu0 %v16623_v53  ;;  %v16643_v53 = vld [vmem:[#allocation20 + $0x7f8] ss:$12 sps:$4 sm:$0xff]  }
 0x792   :  { %12471 = vmatprep.subr.bf16.mxu0 %v16628_v63  ;;  %v16655_v63 = vld [vmem:[#allocation20 + $0x7cc] ss:$12 sps:$4 sm:$0xff]  }
 0x793   :  { %12415 = vmatpush1.bf16.msra.mxu1 %v16554_v39  ;;  %v16645_v39 = vld [vmem:[#allocation20 + $0x7fc] ss:$12 sps:$4 sm:$0xff]  }
 0x794   :  { %12416 = vmatprep.subr.bf16.mxu1 %v16559_v10  ;;  %v16648_v10 = vld [vmem:[#allocation20 + $0x7e0] ss:$12 sps:$4 sm:$0xff]  }
 0x795   :  { %12472 = vmatpush2.bf16.msra.mxu0 %v16626_v59  ;;  %v16660_v59 = vld [vmem:[#allocation20 + $0x7b4] ss:$12 sps:$4 sm:$0xff]  }
 0x796   :  { %12473 = vmatprep.subr.bf16.mxu0 %v16631_v46  ;;  %v16668_v46 = vld [vmem:[#allocation20 + $0x780] ss:$12 sps:$4 sm:$0xff]  }
 0x797   :  { %12417 = vmatpush1.bf16.msra.mxu1 %v16557_v4  ;;  %v16653_v4 = vld [vmem:[#allocation20 + $0x7c8] ss:$12 sps:$4 sm:$0xff]  }
 0x798   :  { %12418 = vmatprep.subr.bf16.mxu1 %v16562_v29  ;;  %v16665_v29 = vld [vmem:[#allocation20 + $0x79c] ss:$12 sps:$4 sm:$0xff]  }
 0x799   :  { %12474 = vmatpush2.bf16.msra.mxu0 %v16629_v32 }
 0x79a   :  { %v9845_v5 = vpop.f32.mrf.mxu1  ;;  %v16833_v38 = vpop.eup %16832  ;;  %14404 = vmatprep.subr.bf16.mxu0 %v16632_v14 }
 0x79b   :  { %v17890_v42 = vadd.f32 %v17844_v11, %v9845_v5  ;;  %12419 = vmatpush2.bf16.msra.mxu1 %v16560_v13  ;;  %v17895_v24 = vpack.c.bf16 %v16833_v38, %v16833_v38  ;;  %v16835_v61 = vpop.eup %16834  ;;  %v16673_v13 = vld [vmem:[#allocation20 + $0x170] ss:$12 sps:$4 sm:$0xff]  }
 0x79c   :  { %v17893_v28 = vpop.f32.mrf.mxu1  ;;  %v14354_v15 = vpop.f32.mrf.mxu0  ;;  %12420 = vmatprep.subr.bf16.mxu1 %v16565_v34  ;;  %v17904_v57 = vpack.c.bf16 %v16835_v61, %v16835_v61 }
 0x79d   :  { %12434 = vmatprep.mubr.bf16.mxu1 %v17895_v24  ;;  %v9889_v12 = vadd.f32 %v17853_v60, %v17893_v28 }
 0x79e   :  { %v9849_v45 = vpop.f32.mrf.mxu1  ;;  %v14355_v11 = vpop.f32.mrf.mxu0 }
 0x79f   :  { %v14356_v33 = vadd.f32 %v14355_v11, %v14354_v15  ;;  %12421 = vmatpush2.bf16.msra.mxu1 %v16563_v40 }
 0x7a0   :  { %v9850_v1 = vpop.f32.mrf.mxu1  ;;  %v14357_v43 = vpop.f32.mrf.mxu0  ;;  %12422 = vmatprep.subr.bf16.mxu1 %v16568_v22 }
 0x7a1   :  { %v17902_v52 = vadd.f32 %v14356_v33, %v17880_v20  ;;  %v16583_v20 = vld [vmem:[#allocation20 + $0x544] ss:$12 sps:$4 sm:$0xff]  }
 0x7a2   :  { %v14358_v9 = vpop.f32.mrf.mxu0 }
 0x7a3   :  { %12423 = vmatpush2.bf16.msra.mxu1 %v16566_v30 }
 0x7a4   :  { %12424 = vmatprep.subr.bf16.mxu1 %v16571_v51 }
 0x7a7   :  { %12425 = vmatpush2.bf16.msra.mxu1 %v16569_v49 }
 0x7a8   :  { %12426 = vmatprep.subr.bf16.mxu1 %v16574_v50 }
 0x7ab   :  { %12427 = vmatpush2.bf16.msra.mxu1 %v16572_v19 }
 0x7ac   :  { %12428 = vmatprep.subr.bf16.mxu1 %v16577_v36 }
 0x7af   :  { %12429 = vmatpush2.bf16.msra.mxu1 %v16575_v26 }
 0x7b0   :  { %12430 = vmatprep.subr.bf16.mxu1 %v16580_v7 }
 0x7b3   :  { %12431 = vmatpush2.bf16.msra.mxu1 %v16578_v47 }
 0x7b4   :  { %12432 = vmatprep.subr.bf16.mxu1 %v16583_v20 }
 0x7b7   :  { %12433 = vmatpush2.bf16.msra.mxu1 %v16581_v48 }
 0x7b8   :  { %12484 = vmatprep.subr.bf16.mxu1 %v16635_v55 }
 0x7ba   :  { %12435 = vmatmul.mubr.bf16.vlgmr.msra.gmra.mxu1 %v17904_v57 }
 0x7bb   :  { %12485 = vmatpush1.bf16.msra.mxu1 %v16633_v27  ;;  %12516 = vmatprep.mubr.bf16.mxu1 %v17170_v0  ;;  %v16663_v0 = vld [vmem:[#allocation20 + $0x798] ss:$12 sps:$4 sm:$0xff]  }
 0x7bc   :  { %12486 = vmatprep.subr.bf16.mxu1 %v16640_v44 }
 0x7bf   :  { %12487 = vmatpush1.bf16.msra.mxu1 %v16638_v18 }
 0x7c0   :  { %12488 = vmatprep.subr.bf16.mxu1 %v16645_v39 }
 0x7c3   :  { %12489 = vmatpush1.bf16.msra.mxu1 %v16643_v53 }
 0x7c4   :  { %12490 = vmatprep.subr.bf16.mxu1 %v16650_v54 }
 0x7c7   :  { %12491 = vmatpush1.bf16.msra.mxu1 %v16648_v10 }
 0x7c8   :  { %12492 = vmatprep.subr.bf16.mxu1 %v16655_v63 }
 0x7cb   :  { %12493 = vmatpush1.bf16.msra.mxu1 %v16653_v4 }
 0x7cc   :  { %12494 = vmatprep.subr.bf16.mxu1 %v16660_v59 }
 0x7cf   :  { %12495 = vmatpush1.bf16.msra.mxu1 %v16658_v6 }
 0x7d0   :  { %12496 = vmatprep.subr.bf16.mxu1 %v16665_v29 }
 0x7d3   :  { %12497 = vmatpush1.bf16.msra.mxu1 %v16663_v0 }
 0x7d4   :  { %12498 = vmatprep.subr.bf16.mxu1 %v16670_v17  ;;  %v17927_v17 = vld [vmem:[#allocation17 + $0x8] sm:$0x7] }
 0x7d7   :  { %12499 = vmatpush1.bf16.msra.mxu1 %v16668_v46 }
 0x7d8   :  { %14382 = vmatprep.subr.bf16.mxu1 %v16673_v13 }
 0x7da   :  { %v9927_v32 = vpop.f32.mrf.mxu1 }
 0x7db   :  { %v17911_v34 = vadd.f32 %v9927_v32, %v17890_v42  ;;  %v10315_v32 = vrot.slane %v17927_v17, %v17327_v35 }
 0x7dc   :  { %v9929_v5 = vpop.f32.mrf.mxu1  ;;  %v17913_v14 = vpop.f32.mrf.mxu0 }
 0x7dd   :  { %v10106_v38 = vrot.slane %v17911_v34, 4  ;;  %v10143_v40 = vmul.f32 %v17911_v34, %v17911_v34  ;;  %v17918_v62 = vadd.f32 %v9929_v5, %v9889_v12 }
 0x7de   :  { %v9931_v15 = vpop.f32.mrf.mxu1  ;;  %v17920_v22 = vpop.f32.mrf.mxu0 }
 0x7df   :  { %v10107_v8 = vadd.f32 %v10106_v38, %v17911_v34  ;;  %v10194_v45 = vrot.slane %v10143_v40, 4  ;;  %v10112_v60 = vrot.slane %v17918_v62, 4  ;;  %v10144_v42 = vmul.f32 %v17918_v62, %v17918_v62 }
 0x7e0   :  { %v9932_v28 = vpop.f32.mrf.mxu1  ;;  %v12317_v11 = vpop.f32.mrf.mxu0 }
 0x7e1   :  { %v10108_v33 = vrot.slane %v10107_v8, 2  ;;  %v10195_v30 = vadd.f32 %v10194_v45, %v10143_v40  ;;  %v10113_v16 = vadd.f32 %v10112_v60, %v17918_v62  ;;  %v10200_v1 = vrot.slane %v10144_v42, 4  ;;  %v17934_v40 = vld [vmem:[#allocation19 + $0x8] sm:$0x7] }
 0x7e2   :  { %v12318_v43 = vpop.f32.mrf.mxu0  ;;  %v10319_v45 = vrot.slane %v17927_v17, %v17332_v37  ;;  %v10449_v11 = vrot.slane %v17934_v40, %v17327_v35 }
 0x7e3   :  { %v10109_v51 = vadd.f32 %v10108_v33, %v10107_v8  ;;  %v10196_v23 = vrot.slane %v10195_v30, 2  ;;  %v10114_v9 = vrot.slane %v10113_v16, 2  ;;  %v10201_v49 = vadd.f32 %v10200_v1, %v10144_v42 }
 0x7e5   :  { %v10110_v50 = vrot.slane %v10109_v51, 1  ;;  %v10197_v3 = vadd.f32 %v10196_v23, %v10195_v30  ;;  %v10115_v19 = vadd.f32 %v10114_v9, %v10113_v16  ;;  %v10202_v36 = vrot.slane %v10201_v49, 2 }
 0x7e7   :  { %v10111_v26 = vadd.f32 %v10110_v50, %v10109_v51  ;;  %v10198_v7 = vrot.slane %v10197_v3, 1  ;;  %v10116_v47 = vrot.slane %v10115_v19, 1  ;;  %v10203_v20 = vadd.f32 %v10202_v36, %v10201_v49 }
 0x7e9   :  { %v10132_v48 = vmul.f32 0.125, %v10111_v26  ;;  %v10199_v55 = vadd.f32 %v10198_v7, %v10197_v3  ;;  %v10117_v61 = vadd.f32 %v10116_v47, %v10115_v19  ;;  %v10204_v27 = vrot.slane %v10203_v20, 1 }
 0x7ea   :  { %v10453_v3 = vrot.slane %v17934_v40, %v17332_v37 }
 0x7eb   :  { %v10220_v44 = vmul.f32 0.125, %v10199_v55  ;;  %v10231_v18 = vmul.f32 %v10132_v48, %v10132_v48  ;;  %v10133_v39 = vmul.f32 0.125, %v10117_v61  ;;  %v10205_v53 = vadd.f32 %v10204_v27, %v10203_v20 }
 0x7ed   :  { %v10242_v54 = vsub.f32 %v10220_v44, %v10231_v18  ;;  %v10232_v10 = vmul.f32 %v10133_v39, %v10133_v39  ;;  %v10221_v63 = vmul.f32 0.125, %v10205_v53  ;;  %v10355_v49 = vsub.f32 %v17918_v62, %v10133_v39 }
 0x7ef   :  { %v10253_v4 = vmax.f32 %v10242_v54, 0.0  ;;  %v10243_v59 = vsub.f32 %v10221_v63, %v10232_v10 }
 0x7f1   :  { %v10264_v6 = vadd.f32 1e-05, %v10253_v4  ;;  %v10254_v29 = vmax.f32 %v10243_v59, 0.0  ;;  %v16636_v4 = vld [vmem:[#allocation20 + $0x230] ss:$12 sps:$4 sm:$0xff]  }
 0x7f3   :  { %16836 = vrsqrt.f32 %v10264_v6  ;;  %v10265_v0 = vadd.f32 1e-05, %v10254_v29  ;;  %v16637_v6 = vld [vmem:[#allocation20 + $0x2d8] ss:$12 sps:$4 sm:$0xff]  }
 0x7f5   :  { %16838 = vrsqrt.f32 %v10265_v0  ;;  %v16641_v0 = vld [vmem:[#allocation20 + $0x218] ss:$12 sps:$4 sm:$0xff]  }
 0x7fa   :  { %v14376_v46 = vpop.f32.mrf.mxu1 }
 0x7fc   :  { %v14377_v13 = vpop.f32.mrf.mxu1 }
 0x7fd   :  { %v14378_v12 = vadd.f32 %v14377_v13, %v14376_v46  ;;  %v16642_v13 = vld [vmem:[#allocation20 + $0x2c0] ss:$12 sps:$4 sm:$0xff]  }
 0x7fe   :  { %v14379_v5 = vpop.f32.mrf.mxu1 }
 0x7ff   :  { %v17932_v38 = vadd.f32 %v14378_v12, %v17902_v52  ;;  %v10354_v52 = vsub.f32 %v17911_v34, %v10132_v48  ;;  %v16646_v5 = vld [vmem:[#allocation20 + $0x200] ss:$12 sps:$4 sm:$0xff]  }
 0x800   :  { %v16837_v15 = vpop.eup %16836  ;;  %v14380_v8 = vpop.f32.mrf.mxu1 }
 0x801   :  { %v10343_v60 = vmul.f32 %v16837_v15, %v10315_v32  ;;  %v10118_v42 = vrot.slane %v17932_v38, 4  ;;  %v10145_v28 = vmul.f32 %v17932_v38, %v17932_v38  ;;  %v10323_v32 = vrot.slane %v17927_v17, %v17345_v56  ;;  %v16647_v8 = vld [vmem:[#allocation20 + $0x2a8] ss:$12 sps:$4 sm:$0xff]  }
 0x802   :  { %v16839_v33 = vpop.eup %16838 }
 0x803   :  { %v10392_v30 = vrot.slane %v10343_v60, %v17327_v35  ;;  %v10119_v16 = vadd.f32 %v10118_v42, %v17932_v38  ;;  %v10206_v1 = vrot.slane %v10145_v28, 4  ;;  %v10344_v43 = vmul.f32 %v16839_v33, %v10319_v45  ;;  %v16651_v42 = vld [vmem:[#allocation20 + $0x1e8] ss:$12 sps:$4 sm:$0xff]  }
 0x804   :  { %v10457_v33 = vrot.slane %v17934_v40, %v17345_v56 }
 0x805   :  { %v10409_v51 = vmul.f32 %v10392_v30, %v10354_v52  ;;  %v10120_v23 = vrot.slane %v10119_v16, 2  ;;  %v10207_v9 = vadd.f32 %v10206_v1, %v10145_v28  ;;  %v10396_v50 = vrot.slane %v10344_v43, %v17327_v35  ;;  %v16656_v52 = vld [vmem:[#allocation20 + $0x1d0] ss:$12 sps:$4 sm:$0xff]   ;;  %v16657_v30 = vld [vmem:[#allocation20 + $0x278] ss:$12 sps:$4 sm:$0xff]  }
 0x806   :  { %v16661_v1 = vld [vmem:[#allocation20 + $0x1b8] ss:$12 sps:$4 sm:$0xff]   ;;  %v16662_v43 = vld [vmem:[#allocation20 + $0x260] ss:$12 sps:$4 sm:$0xff]  }
 0x807   :  { %v10121_v19 = vadd.f32 %v10120_v23, %v10119_v16  ;;  %v10208_v36 = vrot.slane %v10207_v9, 2  ;;  %v10477_v26 = vadd.f32 %v10449_v11, %v10409_v51  ;;  %v10410_v34 = vmul.f32 %v10396_v50, %v10355_v49  ;;  %v16652_v11 = vld [vmem:[#allocation20 + $0x290] ss:$12 sps:$4 sm:$0xff]   ;;  %v17965_v51 = vld [vmem:[#allocation22] sm:$0x7] }
 0x808   :  { %v16667_v23 = vld [vmem:[#allocation20 + $0x248] ss:$12 sps:$4 sm:$0xff]   ;;  %v10859_v40 = vrot.slane %v17965_v51, %v17327_v35  ;;  %v10863_v49 = vrot.slane %v17965_v51, %v17332_v37  ;;  %v16672_v50 = vld [vmem:[#allocation20 + $0x5f0] ss:$12 sps:$4 sm:$0xff]  }
 0x809   :  { %v10122_v7 = vrot.slane %v10121_v19, 1  ;;  %v10209_v47 = vadd.f32 %v10208_v36, %v10207_v9  ;;  %v10478_v20 = vadd.f32 %v10453_v3, %v10410_v34  ;;  %16840 = vtanh.f32 %v10477_v26  ;;  %v16671_v9 = vld [vmem:[#allocation20 + $0x188] ss:$12 sps:$4 sm:$0xff]   ;;  %v16674_v26 = vld [vmem:[#allocation20 + $0x530] ss:$12 sps:$4 sm:$0xff]  }
 0x80a   :  { %v12314_v3 = vadd.f32 %v17913_v14, %v10859_v40  ;;  %v12316_v34 = vadd.f32 %v17920_v22, %v10863_v49  ;;  %v16678_v22 = vld [vmem:[#allocation20 + $0x518] ss:$12 sps:$4 sm:$0xff]   ;;  %v16716_v40 = vld [vmem:[#allocation20 + $0x410] ss:$12 sps:$4 sm:$0xff]  }
 0x80b   :  { %v10123_v48 = vadd.f32 %v10122_v7, %v10121_v19  ;;  %v10210_v55 = vrot.slane %v10209_v47, 1  ;;  %16842 = vtanh.f32 %v10478_v20  ;;  %v16718_v49 = vld [vmem:[#allocation20 + $0x350] ss:$12 sps:$4 sm:$0xff]  }
 0x80d   :  { %v10134_v61 = vmul.f32 0.125, %v10123_v48  ;;  %v10211_v27 = vadd.f32 %v10210_v55, %v10209_v47  ;;  %v16676_v48 = vld [vmem:[#allocation20 + $0x5d8] ss:$12 sps:$4 sm:$0xff]  }
 0x80e   :  { %v16677_v55 = vld [vmem:[#allocation20 + $0x158] ss:$12 sps:$4 sm:$0xff]  }
 0x80f   :  { %v10222_v44 = vmul.f32 0.125, %v10211_v27  ;;  %v10233_v62 = vmul.f32 %v10134_v61, %v10134_v61  ;;  %v16679_v27 = vld [vmem:[#allocation20 + $0x98] ss:$12 sps:$4 sm:$0xff]  }
 0x811   :  { %v10244_v18 = vsub.f32 %v10222_v44, %v10233_v62  ;;  %v16680_v44 = vld [vmem:[#allocation20 + $0x5c0] ss:$12 sps:$4 sm:$0xff]  }
 0x813   :  { %v10255_v39 = vmax.f32 %v10244_v18, 0.0  ;;  %v16681_v18 = vld [vmem:[#allocation20 + $0x140] ss:$12 sps:$4 sm:$0xff]  }
 0x815   :  { %v10266_v53 = vadd.f32 1e-05, %v10255_v39  ;;  %v16682_v39 = vld [vmem:[#allocation20 + $0x500] ss:$12 sps:$4 sm:$0xff]  }
 0x816   :  { %v16841_v54 = vpop.eup %16840 }
 0x817   :  { %16844 = vrsqrt.f32 %v10266_v53  ;;  %v17952_v59 = vpack.c.bf16 %v16841_v54, %v16841_v54  ;;  %v16683_v53 = vld [vmem:[#allocation20 + $0x80] ss:$12 sps:$4 sm:$0xff]   ;;  %v16685_v54 = vld [vmem:[#allocation20 + $0x128] ss:$12 sps:$4 sm:$0xff]  }
 0x818   :  { %v16843_v10 = vpop.eup %16842 }
 0x819   :  { %v17950_v63 = vpack.c.bf16 %v16843_v10, %v16843_v10  ;;  %v16686_v10 = vld [vmem:[#allocation20 + $0x4e8] ss:$12 sps:$4 sm:$0xff]  }
 0x81b   :  { %12475 = vmatprep.mubr.bf16.mxu0 %v17950_v63 }
 0x81c   :  { %v12395_v29 = vpop.f32.mrf.mxu0  ;;  %12476 = vmatmul.mubr.bf16.vlgmr.msra.gmra.mxu0 %v17952_v59 }
 0x81d   :  { %14405 = vmatpush3.bf16.msra.mxu0 %v16636_v4  ;;  %12597 = vmatprep.mubr.bf16.mxu0 %v17817_v58  ;;  %v10356_v58 = vsub.f32 %v17932_v38, %v10134_v61  ;;  %v16666_v38 = vld [vmem:[#allocation20 + $0x1a0] ss:$12 sps:$4 sm:$0xff]   ;;  %v16688_v4 = vld [vmem:[#allocation20 + $0x590] ss:$12 sps:$4 sm:$0xff]  }
 0x81e   :  { %v17957_v46 = vpop.f32.mrf.mxu0  ;;  %14406 = vmatprep.subr.bf16.mxu0 %v16637_v6  ;;  %v16689_v6 = vld [vmem:[#allocation20 + $0x110] ss:$12 sps:$4 sm:$0xff]  }
 0x820   :  { %v12399_v12 = vpop.f32.mrf.mxu0 }
 0x821   :  { %14407 = vmatpush3.bf16.msra.mxu0 %v16641_v0  ;;  %v16691_v0 = vld [vmem:[#allocation20 + $0x50] ss:$12 sps:$4 sm:$0xff]   ;;  %v16695_v12 = vld [vmem:[#allocation20 + $0x38] ss:$12 sps:$4 sm:$0xff]  }
 0x822   :  { %v12400_v15 = vpop.f32.mrf.mxu0  ;;  %14408 = vmatprep.subr.bf16.mxu0 %v16642_v13  ;;  %v16693_v13 = vld [vmem:[#allocation20 + $0xf8] ss:$12 sps:$4 sm:$0xff]  }
 0x823   :  { %v16697_v15 = vld [vmem:[#allocation20 + $0xe0] ss:$12 sps:$4 sm:$0xff]  }
 0x824   :  { %v16845_v45 = vpop.eup %16844 }
 0x825   :  { %v10345_v60 = vmul.f32 %v16845_v45, %v10323_v32  ;;  %14409 = vmatpush3.bf16.msra.mxu0 %v16646_v5  ;;  %v16694_v32 = vld [vmem:[#allocation20 + $0x4b8] ss:$12 sps:$4 sm:$0xff]   ;;  %v16696_v5 = vld [vmem:[#allocation20 + $0x560] ss:$12 sps:$4 sm:$0xff]  }
 0x826   :  { %14410 = vmatprep.subr.bf16.mxu0 %v16647_v8  ;;  %v16698_v8 = vld [vmem:[#allocation20 + $0x4a0] ss:$12 sps:$4 sm:$0xff]  }
 0x827   :  { %v10400_v28 = vrot.slane %v10345_v60, %v17327_v35  ;;  %v16675_v35 = vld [vmem:[#allocation20 + $0xb0] ss:$12 sps:$4 sm:$0xff]   ;;  %v16699_v45 = vld [vmem:[#allocation20 + $0x20] ss:$12 sps:$4 sm:$0xff]   ;;  %v16700_v60 = vld [vmem:[#allocation20 + $0x548] ss:$12 sps:$4 sm:$0xff]  }
 0x829   :  { %v10411_v17 = vmul.f32 %v10400_v28, %v10356_v58  ;;  %14411 = vmatpush3.bf16.msra.mxu0 %v16651_v42  ;;  %v16701_v42 = vld [vmem:[#allocation20 + $0xc8] ss:$12 sps:$4 sm:$0xff]  }
 0x82a   :  { %14412 = vmatprep.subr.bf16.mxu0 %v16652_v11  ;;  %v16702_v58 = vld [vmem:[#allocation20 + $0x488] ss:$12 sps:$4 sm:$0xff]   ;;  %v16704_v11 = vld [vmem:[#allocation20 + $0x470] ss:$12 sps:$4 sm:$0xff]  }
 0x82b   :  { %v10479_v16 = vadd.f32 %v10457_v33, %v10411_v17  ;;  %v16703_v28 = vld [vmem:[#allocation20 + $0x8] ss:$12 sps:$4 sm:$0xff]   ;;  %v16705_v33 = vld [vmem:[#allocation20 + $0x830] ss:$12 sps:$4 sm:$0xff]   ;;  %v17171_v17 = vmov 0.0  }
 0x82d   :  { %16846 = vtanh.f32 %v10479_v16  ;;  %14413 = vmatpush3.bf16.msra.mxu0 %v16656_v52  ;;  %v16706_v52 = vld [vmem:[#allocation20 + $0x3b0] ss:$12 sps:$4 sm:$0xff]   ;;  %v16708_v16 = vld [vmem:[#allocation20 + $0x818] ss:$12 sps:$4 sm:$0xff]  }
 0x82e   :  { %14414 = vmatprep.subr.bf16.mxu0 %v16657_v30  ;;  %v16707_v30 = vld [vmem:[#allocation20 + $0x458] ss:$12 sps:$4 sm:$0xff]  }
 0x831   :  { %14415 = vmatpush3.bf16.msra.mxu0 %v16661_v1  ;;  %v16709_v1 = vld [vmem:[#allocation20 + $0x398] ss:$12 sps:$4 sm:$0xff]  }
 0x832   :  { %14416 = vmatprep.subr.bf16.mxu0 %v16662_v43  ;;  %v16710_v43 = vld [vmem:[#allocation20 + $0x440] ss:$12 sps:$4 sm:$0xff]  }
 0x835   :  { %14417 = vmatpush3.bf16.msra.mxu0 %v16666_v38  ;;  %v16711_v38 = vld [vmem:[#allocation20 + $0x800] ss:$12 sps:$4 sm:$0xff]  }
 0x836   :  { %14418 = vmatprep.subr.bf16.mxu0 %v16667_v23  ;;  %v16714_v23 = vld [vmem:[#allocation20 + $0x7e8] ss:$12 sps:$4 sm:$0xff]  }
 0x839   :  { %14419 = vmatpush3.bf16.msra.mxu0 %v16671_v9  ;;  %v16717_v9 = vld [vmem:[#allocation20 + $0x7d0] ss:$12 sps:$4 sm:$0xff]  }
 0x83a   :  { %v16847_v19 = vpop.eup %16846  ;;  %v12354_v36 = vpop.f32.mrf.mxu1  ;;  %14448 = vmatprep.subr.bf16.mxu0 %v16672_v50  ;;  %v16719_v50 = vld [vmem:[#allocation20 + $0x3f8] ss:$12 sps:$4 sm:$0xff]  }
 0x83b   :  { %v12355_v7 = vadd.f32 %v12354_v36, %v12314_v3  ;;  %v17973_v47 = vpack.c.bf16 %v16847_v19, %v16847_v19  ;;  %v16720_v3 = vld [vmem:[#allocation20 + $0x7b8] ss:$12 sps:$4 sm:$0xff]   ;;  %v16722_v36 = vld [vmem:[#allocation20 + $0x3e0] ss:$12 sps:$4 sm:$0xff]  }
 0x83c   :  { %v12356_v20 = vpop.f32.mrf.mxu1  ;;  %12598 = vmatmul.mubr.bf16.vlgmr.msra.gmra.mxu0 %v17876_v31  ;;  %v16721_v19 = vld [vmem:[#allocation20 + $0x338] ss:$12 sps:$4 sm:$0xff]  }
 0x83d   :  { %v12357_v37 = vadd.f32 %v12356_v20, %v12316_v34  ;;  %12517 = vmatmul.mubr.bf16.vlgmr.msra.gmra.mxu1 %v17973_v47  ;;  %v17977_v14 = vadd.f32 %v12395_v29, %v12355_v7  ;;  %14449 = vmatpush3.bf16.msra.mxu0 %v16674_v26  ;;  %v16690_v29 = vld [vmem:[#allocation20 + $0x4d0] ss:$12 sps:$4 sm:$0xff]   ;;  %v16723_v26 = vld [vmem:[#allocation20 + $0x7a0] ss:$12 sps:$4 sm:$0xff]   ;;  %v16725_v7 = vld [vmem:[#allocation20 + $0x3c8] ss:$12 sps:$4 sm:$0xff]  }
 0x83e   :  { %12677 = vmatprep.mubr.bf16.mxu0 %v17895_v24  ;;  %v12358_v61 = vpop.f32.mrf.mxu1  ;;  %14383 = vmatpush3.bf16.msra.mxu1 %v16675_v35  ;;  %v16684_v24 = vld [vmem:[#allocation20 + $0x5a8] ss:$12 sps:$4 sm:$0xff]   ;;  %v16724_v34 = vld [vmem:[#allocation20 + $0x320] ss:$12 sps:$4 sm:$0xff]  }
 0x83f   :  { %12557 = vmatprep.mubr.bf16.mxu1 %v17745_v21  ;;  %v17982_v62 = vadd.f32 %v17957_v46, %v12357_v37  ;;  %14450 = vmatprep.subr.bf16.mxu0 %v16676_v48  ;;  %v16687_v21 = vld [vmem:[#allocation20 + $0x68] ss:$12 sps:$4 sm:$0xff]   ;;  %v16692_v46 = vld [vmem:[#allocation20 + $0x578] ss:$12 sps:$4 sm:$0xff]   ;;  %v16728_v48 = vld [vmem:[#allocation20 + $0x770] ss:$12 sps:$4 sm:$0xff]  }
 0x840   :  { %v12359_v31 = vpop.f32.mrf.mxu1  ;;  %14384 = vmatprep.subr.bf16.mxu1 %v16677_v55  ;;  %v16726_v35 = vld [vmem:[#allocation20 + $0x788] ss:$12 sps:$4 sm:$0xff]   ;;  %v16729_v61 = vld [vmem:[#allocation20 + $0x6b0] ss:$12 sps:$4 sm:$0xff]  }
 0x841   :  { %14451 = vmatpush3.bf16.msra.mxu0 %v16678_v22  ;;  %v16727_v20 = vld [vmem:[#allocation20 + $0x308] ss:$12 sps:$4 sm:$0xff]  }
 0x842   :  { %14385 = vmatpush3.bf16.msra.mxu1 %v16679_v27  ;;  %14452 = vmatprep.subr.bf16.mxu0 %v16680_v44  ;;  %v16730_v27 = vld [vmem:[#allocation20 + $0x758] ss:$12 sps:$4 sm:$0xff]  }
 0x843   :  { %14386 = vmatprep.subr.bf16.mxu1 %v16681_v18  ;;  %v16731_v18 = vld [vmem:[#allocation20 + $0x698] ss:$12 sps:$4 sm:$0xff]  }
 0x845   :  { %14453 = vmatpush3.bf16.msra.mxu0 %v16682_v39 }
 0x846   :  { %14387 = vmatpush3.bf16.msra.mxu1 %v16683_v53  ;;  %14454 = vmatprep.subr.bf16.mxu0 %v16684_v24  ;;  %v16732_v53 = vld [vmem:[#allocation20 + $0x740] ss:$12 sps:$4 sm:$0xff]   ;;  %v16734_v24 = vld [vmem:[#allocation20 + $0x728] ss:$12 sps:$4 sm:$0xff]  }
 0x847   :  { %14388 = vmatprep.subr.bf16.mxu1 %v16685_v54  ;;  %v16735_v54 = vld [vmem:[#allocation20 + $0x668] ss:$12 sps:$4 sm:$0xff]  }
 0x849   :  { %14455 = vmatpush3.bf16.msra.mxu0 %v16686_v10  ;;  %v16739_v10 = vld [vmem:[#allocation20 + $0x638] ss:$12 sps:$4 sm:$0xff]  }
 0x84a   :  { %14389 = vmatpush3.bf16.msra.mxu1 %v16687_v21  ;;  %14456 = vmatprep.subr.bf16.mxu0 %v16688_v4  ;;  %v16741_v21 = vld [vmem:[#allocation20 + $0x620] ss:$12 sps:$4 sm:$0xff]   ;;  %v16742_v4 = vld [vmem:[#allocation20 + $0x6c8] ss:$12 sps:$4 sm:$0xff]  }
 0x84b   :  { %14390 = vmatprep.subr.bf16.mxu1 %v16689_v6  ;;  %v16743_v6 = vld [vmem:[#allocation20 + $0x608] ss:$12 sps:$4 sm:$0xff]  }
 0x84d   :  { %14457 = vmatpush3.bf16.msra.mxu0 %v16690_v29 }
 0x84e   :  { %14391 = vmatpush3.bf16.msra.mxu1 %v16691_v0  ;;  %14458 = vmatprep.subr.bf16.mxu0 %v16692_v46 }
 0x84f   :  { %14392 = vmatprep.subr.bf16.mxu1 %v16693_v13 }
 0x851   :  { %14459 = vmatpush3.bf16.msra.mxu0 %v16694_v32 }
 0x852   :  { %14393 = vmatpush3.bf16.msra.mxu1 %v16695_v12  ;;  %14460 = vmatprep.subr.bf16.mxu0 %v16696_v5 }
 0x853   :  { %14394 = vmatprep.subr.bf16.mxu1 %v16697_v15 }
 0x855   :  { %14461 = vmatpush3.bf16.msra.mxu0 %v16698_v8  ;;  %v16852_v8 = vld [vmem:[%s18019_s0] sm:$0xff] }
 0x856   :  { %14395 = vmatpush3.bf16.msra.mxu1 %v16699_v45  ;;  %14462 = vmatprep.subr.bf16.mxu0 %v16700_v60  ;;  %vm212_vm1 = vcmp.ne.f32.partialorder %v16852_v8, 0.0 }
 0x857   :  { %14396 = vmatprep.subr.bf16.mxu1 %v16701_v42 }
 0x859   :  { %14463 = vmatpush3.bf16.msra.mxu0 %v16702_v58 }
 0x85a   :  { %14397 = vmatpush3.bf16.msra.mxu1 %v16703_v28  ;;  %14501 = vmatprep.subr.bf16.mxu0 %v17171_v17 }
 0x85b   :  { %14426 = vmatprep.subr.bf16.mxu1 %v16704_v11 }
 0x85c   :  { %12678 = vmatmul.mubr.bf16.vlgmr.msra.gmra.mxu0 %v17904_v57  ;;  %v16712_v57 = vld [vmem:[#allocation20 + $0x380] ss:$12 sps:$4 sm:$0xff]  }
 0x85d   :  { %12558 = vmatmul.mubr.bf16.vlgmr.msra.gmra.mxu1 %v17773_v41  ;;  %14502 = vmatpush3.bf16.msra.mxu0 %v16705_v33  ;;  %v16713_v41 = vld [vmem:[#allocation20 + $0x428] ss:$12 sps:$4 sm:$0xff]  }
 0x85e   :  { %14427 = vmatpush3.bf16.msra.mxu1 %v16706_v52  ;;  %12637 = vmatprep.mubr.bf16.mxu1 %v17837_v25  ;;  %v16715_v25 = vld [vmem:[#allocation20 + $0x368] ss:$12 sps:$4 sm:$0xff]  }
 0x85f   :  { %14503 = vmatprep.subr.bf16.mxu0 %v17171_v17  ;;  %14428 = vmatprep.subr.bf16.mxu1 %v16707_v30 }
 0x860   :  { %14517 = vmatprep.mubr.msk.bf16.mxu0 %vm17172_vm0, %v17171_v17 }
 0x861   :  { %14504 = vmatpush3.bf16.msra.mxu0 %v16708_v16 }
 0x862   :  { %14429 = vmatpush3.bf16.msra.mxu1 %v16709_v1  ;;  %14505 = vmatprep.subr.bf16.mxu0 %v17171_v17 }
 0x863   :  { %14430 = vmatprep.subr.bf16.mxu1 %v16710_v43 }
 0x865   :  { %14506 = vmatpush3.bf16.msra.mxu0 %v16711_v38 }
 0x866   :  { %14431 = vmatpush3.bf16.msra.mxu1 %v16712_v57  ;;  %14507 = vmatprep.subr.bf16.mxu0 %v17171_v17 }
 0x867   :  { %14432 = vmatprep.subr.bf16.mxu1 %v16713_v41 }
 0x869   :  { %14508 = vmatpush3.bf16.msra.mxu0 %v16714_v23 }
 0x86a   :  { %14433 = vmatpush3.bf16.msra.mxu1 %v16715_v25  ;;  %14509 = vmatprep.subr.bf16.mxu0 %v17171_v17 }
 0x86b   :  { %14434 = vmatprep.subr.bf16.mxu1 %v16716_v40 }
 0x86d   :  { %14510 = vmatpush3.bf16.msra.mxu0 %v16717_v9 }
 0x86e   :  { %14435 = vmatpush3.bf16.msra.mxu1 %v16718_v49  ;;  %14511 = vmatprep.subr.bf16.mxu0 %v17171_v17  ;;  %v10867_v49 = vrot.slane %v17965_v51, %v17345_v56 }
 0x86f   :  { %14436 = vmatprep.subr.bf16.mxu1 %v16719_v50 }
 0x871   :  { %14512 = vmatpush3.bf16.msra.mxu0 %v16720_v3 }
 0x872   :  { %14437 = vmatpush3.bf16.msra.mxu1 %v16721_v19  ;;  %14513 = vmatprep.subr.bf16.mxu0 %v17171_v17 }
 0x873   :  { %14438 = vmatprep.subr.bf16.mxu1 %v16722_v36 }
 0x875   :  { %14514 = vmatpush3.bf16.msra.mxu0 %v16723_v26 }
 0x876   :  { %14439 = vmatpush3.bf16.msra.mxu1 %v16724_v34  ;;  %14515 = vmatprep.subr.bf16.mxu0 %v17171_v17 }
 0x877   :  { %14440 = vmatprep.subr.bf16.mxu1 %v16725_v7 }
 0x879   :  { %14516 = vmatpush3.bf16.msra.mxu0 %v16726_v35 }
 0x87a   :  { %v12436_v55 = vpop.f32.mrf.mxu1  ;;  %14441 = vmatpush3.bf16.msra.mxu1 %v16727_v20 }
 0x87b   :  { %v12437_v37 = vadd.f32 %v12436_v55, %v17977_v14  ;;  %14470 = vmatprep.subr.bf16.mxu1 %v16728_v48  ;;  %v16733_v14 = vld [vmem:[#allocation20 + $0x680] ss:$12 sps:$4 sm:$0xff]  }
 0x87c   :  { %v12438_v22 = vpop.f32.mrf.mxu1  ;;  %14518 = vmatmul.mubr.bf16.vlgmr.msra.gmra.mxu0 %v17973_v47  ;;  %v16736_v47 = vld [vmem:[#allocation20 + $0x710] ss:$12 sps:$4 sm:$0xff]  }
 0x87d   :  { %v12439_v44 = vadd.f32 %v12438_v22, %v17982_v62  ;;  %12638 = vmatmul.mubr.bf16.vlgmr.msra.gmra.mxu1 %v17840_v2  ;;  %v16737_v62 = vld [vmem:[#allocation20 + $0x650] ss:$12 sps:$4 sm:$0xff]   ;;  %v16738_v2 = vld [vmem:[#allocation20 + $0x6f8] ss:$12 sps:$4 sm:$0xff]  }
 0x87e   :  { %v12440_v31 = vpop.f32.mrf.mxu1  ;;  %14471 = vmatpush3.bf16.msra.mxu1 %v16729_v61  ;;  %12717 = vmatprep.mubr.bf16.mxu1 %v17950_v63  ;;  %v16740_v63 = vld [vmem:[#allocation20 + $0x6e0] ss:$12 sps:$4 sm:$0xff]  }
 0x87f   :  { %14472 = vmatprep.subr.bf16.mxu1 %v16730_v27 }
 0x880   :  { %v12441_v39 = vpop.f32.mrf.mxu1 }
 0x882   :  { %14473 = vmatpush3.bf16.msra.mxu1 %v16731_v18 }
 0x883   :  { %14474 = vmatprep.subr.bf16.mxu1 %v16732_v53  ;;  %v16854_v53 = vld [vmem:[%s18019_s0 + $0x10] sm:$0xff] }
 0x884   :  { %vm214_vm7 = vcmp.ne.f32.partialorder %v16854_v53, 0.0 }
 0x886   :  { %14475 = vmatpush3.bf16.msra.mxu1 %v16733_v14 }
 0x887   :  { %14476 = vmatprep.subr.bf16.mxu1 %v16734_v24 }
 0x88a   :  { %14477 = vmatpush3.bf16.msra.mxu1 %v16735_v54 }
 0x88b   :  { %14478 = vmatprep.subr.bf16.mxu1 %v16736_v47 }
 0x88e   :  { %14479 = vmatpush3.bf16.msra.mxu1 %v16737_v62 }
 0x88f   :  { %14480 = vmatprep.subr.bf16.mxu1 %v16738_v2 }
 0x892   :  { %14481 = vmatpush3.bf16.msra.mxu1 %v16739_v10 }
 0x893   :  { %14482 = vmatprep.subr.bf16.mxu1 %v16740_v63 }
 0x896   :  { %14483 = vmatpush3.bf16.msra.mxu1 %v16741_v21 }
 0x897   :  { %14484 = vmatprep.subr.bf16.mxu1 %v16742_v4 }
 0x89a   :  { %14485 = vmatpush3.bf16.msra.mxu1 %v16743_v6 }
 0x89d   :  { %12718 = vmatmul.mubr.bf16.vlgmr.msra.gmra.mxu1 %v17952_v59  ;;  %v16853_v59 = vld [vmem:[%s18019_s0 + $0x8] sm:$0xff] }
 0x89e   :  { %vm213_vm3 = vcmp.ne.f32.partialorder %v16853_v59, 0.0 }
 0x8dc   :  { %v12477_v29 = vpop.f32.mrf.mxu0 }
 0x8dd   :  { %v12478_v32 = vadd.f32 %v12477_v29, %v12437_v37 }
 0x8de   :  { %v12479_v0 = vpop.f32.mrf.mxu0 }
 0x8df   :  { %v12480_v15 = vadd.f32 %v12479_v0, %v12439_v44 }
 0x8e0   :  { %v12481_v46 = vpop.f32.mrf.mxu0 }
 0x8e2   :  { %v12482_v13 = vpop.f32.mrf.mxu0 }
 0x8fc   :  { %v14420_v12 = vpop.f32.mrf.mxu0 }
 0x8fd   :  { %v12518_v5 = vpop.f32.mrf.mxu1 }
 0x8fe   :  { %v12519_v45 = vadd.f32 %v12518_v5, %v12478_v32  ;;  %v14421_v60 = vpop.f32.mrf.mxu0 }
 0x8ff   :  { %v12520_v42 = vpop.f32.mrf.mxu1  ;;  %v14422_v58 = vadd.f32 %v14421_v60, %v14420_v12 }
 0x900   :  { %vm12765_vm2 = vcmp.gt.f32.partialorder %v12519_v45, 0.0  ;;  %v12521_v28 = vadd.f32 %v12520_v42, %v12480_v15  ;;  %v14423_v11 = vpop.f32.mrf.mxu0 }
 0x901   :  { %vm12768_vm4 = vmor %vm212_vm1, %vm12765_vm2  ;;  %v12522_v33 = vpop.f32.mrf.mxu1 }
 0x902   :  { %v14313_v52 = vsel %vm12768_vm4, 1.0, %v17171_v17  ;;  %vm12766_vm5 = vcmp.gt.f32.partialorder %v12521_v28, 0.0  ;;  %v14424_v30 = vpop.f32.mrf.mxu0 }
 0x903   :  { %12777 = vst [vmem:[#allocation23] sm:$0xff] %v14313_v52  ;;  %vm12769_vm6 = vmor %vm213_vm3, %vm12766_vm5  ;;  %v12523_v16 = vpop.f32.mrf.mxu1 }
 0x904   :  { %v14314_v1 = vsel %vm12769_vm6, 1.0, %v17171_v17 }
 0x905   :  { %12778 = vst [vmem:[#allocation23 + $0x8] sm:$0xff] %v14314_v1 }
 0x91c   :  { %v14464_v43 = vpop.f32.mrf.mxu0 }
 0x91d   :  { %v14398_v38 = vpop.f32.mrf.mxu1 }
 0x91e   :  { %v14465_v57 = vpop.f32.mrf.mxu0 }
 0x91f   :  { %v14399_v41 = vpop.f32.mrf.mxu1  ;;  %v14466_v55 = vadd.f32 %v14465_v57, %v14464_v43 }
 0x920   :  { %v14467_v23 = vpop.f32.mrf.mxu0  ;;  %v14400_v50 = vadd.f32 %v14399_v41, %v14398_v38 }
 0x921   :  { %v14401_v25 = vpop.f32.mrf.mxu1 }
 0x922   :  { %v14468_v40 = vpop.f32.mrf.mxu0  ;;  %v12560_v3 = vadd.f32 %v14400_v50, %v10867_v49 }
 0x923   :  { %v14402_v9 = vpop.f32.mrf.mxu1 }
 0x924   :  { %v12600_v7 = vadd.f32 %v14422_v58, %v12560_v3 }
 0x93c   :  { %v12759_v19 = vpop.f32.mrf.mxu0 }
 0x93d   :  { %v14442_v36 = vpop.f32.mrf.mxu1 }
 0x93e   :  { %v14519_v26 = vpop.f32.mrf.mxu0 }
 0x93f   :  { %v14443_v34 = vpop.f32.mrf.mxu1 }
 0x940   :  { %v14444_v35 = vadd.f32 %v14443_v34, %v14442_v36  ;;  %v12762_v20 = vpop.f32.mrf.mxu0 }
 0x941   :  { %v14445_v48 = vpop.f32.mrf.mxu1 }
 0x942   :  { %v12640_v37 = vadd.f32 %v14444_v35, %v12600_v7  ;;  %v14520_v61 = vpop.f32.mrf.mxu0 }
 0x943   :  { %v14446_v22 = vpop.f32.mrf.mxu1 }
 0x944   :  { %v12680_v27 = vadd.f32 %v14466_v55, %v12640_v37 }
 0x95d   :  { %v14486_v44 = vpop.f32.mrf.mxu1 }
 0x95f   :  { %v14487_v31 = vpop.f32.mrf.mxu1 }
 0x960   :  { %v14488_v18 = vadd.f32 %v14487_v31, %v14486_v44 }
 0x961   :  { %v14489_v39 = vpop.f32.mrf.mxu1 }
 0x962   :  { %v12720_v56 = vadd.f32 %v14488_v18, %v12680_v27 }
 0x963   :  { %v14490_v51 = vpop.f32.mrf.mxu1 }
 0x964   :  { %v12760_v14 = vadd.f32 %v12759_v19, %v12720_v56 }
 0x966   :  { %vm12767_vm8 = vcmp.gt.f32.partialorder %v12760_v14, 0.0 }
 0x967   :  { %vm12770_vm9 = vmor %vm214_vm7, %vm12767_vm8 }
 0x968   :  { %v14315_v24 = vsel %vm12770_vm9, 1.0, %v17171_v17 }
 0x969   :  { %12779 = vst [vmem:[#allocation23 + $0x10] sm:$0xff] %v14315_v24 }
 0x96a   :  { %17126 = shalt.err (!%p17123_p13)
}
 0x96b   :  { %12789 = dma.vmem_to_hbm [thread:$0]  %s12787_s5, 384, %s18033_s14, [#allocation4]  }
 0x96c   :  { %17149 = dma.done.wait [#allocation4], 384  }
 0x96d   :  { %17150 = vsyncadd [#allocation4], 4294966912 }
 0x96e   :  { %12793 = vsyncpa [#allocation3], 1 }
 0x96f   :  { %12794 = vsyncpa [#allocation6], 1 }
 0x970   :  { %12795 = vsyncpa [#allocation9], 1 }
 0x971   :  { %12796 = vsyncpa [#allocation12], 1 }
 0x972   :  { %12797 = vsyncpa [#allocation15], 1 }
 0x973   :  { %12798 = vsyncpa [#allocation18], 1 }
 0x974   :  { %12799 = vsyncpa [#allocation21], 1 }
 0x975   :  { %12800 = vsyncpa [#allocation4], 1 }

</bundles_post_ra>
